<compile_context>
chip_gen: v6e
topology: v6e:2x2x1
jax: 0.10.0
libtpu: 0.0.40
codegen_flags: <defaults>
</compile_context>

<pallas_src>
import functools

import jax
import jax.numpy as jnp
import numpy as np
from jax.experimental import pallas as pl
from jax.experimental.pallas import tpu as pltpu


# ------------------------------ fused kernel ------------------------------- #

def _autoencoder_kernel(x_ref, w1_ref, b1_ref, w2_ref, b2_ref,
                        wt1_ref, tb1_ref, wt2_ref, tb2_ref,
                        sel1_ref, sel2_ref, up1_ref, up2_ref,
                        o_ref, *, dims):
    # Static geometry of the batch-stacked, zero-padded flattened frames.
    Wp0, span0, psel0, Wp1, span1, psel1 = dims
    f32 = jnp.float32

    # (1, Btile*Hp0*Wp0): Btile pre-padded input frames stacked along lanes.
    frame0 = x_ref[0]

    # ---- conv1 (1->16, 3x3, pad=1) + ReLU: single matmul on 9-tap stack ---- #
    taps0 = jnp.concatenate(
        [frame0[:, (k // 3) * Wp0 + (k % 3):(k // 3) * Wp0 + (k % 3) + span0]
         for k in range(9)], axis=0)                                  # (9, span0)
    y1 = jnp.maximum(
        jnp.dot(w1_ref[...], taps0, preferred_element_type=f32) + b1_ref[...],
        0.0)                                                          # (16, span0)

    # ---- maxpool 2x2: 4 shifted maxima + select/re-pad matmul -------------- #
    m1 = jnp.maximum(
        jnp.maximum(y1[:, 0:psel0], y1[:, 1:1 + psel0]),
        jnp.maximum(y1[:, Wp0:Wp0 + psel0], y1[:, Wp0 + 1:Wp0 + 1 + psel0]))
    frame1 = jnp.dot(m1, sel1_ref[...], preferred_element_type=f32)   # (16, Bt*Hp1*Wp1)

    # ---- conv2 (16->4, 3x3, pad=1) + ReLU: single K=144 matmul ------------- #
    taps1 = jnp.concatenate(
        [frame1[:, (k // 3) * Wp1 + (k % 3):(k // 3) * Wp1 + (k % 3) + span1]
         for k in range(9)], axis=0)                                  # (144, span1)
    y2 = jnp.maximum(
        jnp.dot(w2_ref[...], taps1, preferred_element_type=f32) + b2_ref[...],
        0.0)                                                          # (4, span1)

    # ---- maxpool 2x2 -> dense bottleneck (4, Bt*H2*W2) --------------------- #
    m2 = jnp.maximum(
        jnp.maximum(y2[:, 0:psel1], y2[:, 1:1 + psel1]),
        jnp.maximum(y2[:, Wp1:Wp1 + psel1], y2[:, Wp1 + 1:Wp1 + 1 + psel1]))
    z = jnp.dot(m2, sel2_ref[...], preferred_element_type=f32)        # (4, Bt*16)

    # ---- tconv1 (4->16, 2x2, s=2) + ReLU: 1 channel matmul + 1 scatter ----- #
    cout1 = wt1_ref.shape[0] // 4
    proj1 = jnp.dot(wt1_ref[...], z, preferred_element_type=f32)      # (4*16, Bt*16)
    p1 = jnp.concatenate(
        [proj1[k * cout1:(k + 1) * cout1, :] for k in range(4)], axis=1)  # (16, 4*Bt*16)
    a1 = jnp.maximum(
        jnp.dot(p1, up1_ref[...], preferred_element_type=f32) + tb1_ref[...],
        0.0)                                                          # (16, Bt*64)

    # ---- tconv2 (16->1, 2x2, s=2) + sigmoid: 1 channel matmul + 1 scatter -- #
    cout2 = wt2_ref.shape[0] // 4
    proj2 = jnp.dot(wt2_ref[...], a1, preferred_element_type=f32)     # (4, Bt*64)
    p2 = jnp.concatenate(
        [proj2[k * cout2:(k + 1) * cout2, :] for k in range(4)], axis=1)  # (1, 4*Bt*64)
    out = jax.nn.sigmoid(
        jnp.dot(p2, up2_ref[...], preferred_element_type=f32) + tb2_ref[...])
    o_ref[0] = out.astype(o_ref.dtype)                                # (1, Bt*H*W), lane-dense


# -------------------- constant selection / scatter matrices ----------------- #

@functools.lru_cache(maxsize=None)
def _build_constants(H, W, BT):
    assert H % 4 == 0 and W % 4 == 0 and H >= 4 and W >= 4, (H, W)
    Hp0, Wp0 = H + 2, W + 2
    F0 = Hp0 * Wp0
    H1, W1 = H // 2, W // 2
    Hp1, Wp1 = H1 + 2, W1 + 2
    F1 = Hp1 * Wp1
    H2, W2 = H1 // 2, W1 // 2

    span0 = BT * F0 - (2 * Wp0 + 2)                       # conv1 wide-grid length
    psel0 = (BT - 1) * F0 + (H - 2) * Wp0 + (W - 2) + 1   # pool1 select length
    span1 = BT * F1 - (2 * Wp1 + 2)                       # conv2 wide-grid length
    psel1 = (BT - 1) * F1 + (H1 - 2) * Wp1 + (W1 - 2) + 1  # pool2 select length

    sel1 = np.zeros((psel0, BT * F1), np.float32)         # pool1: select + re-pad
    sel2 = np.zeros((psel1, BT * H2 * W2), np.float32)    # pool2: select (dense)
    for b in range(BT):
        for i in range(H1):
            for j in range(W1):
                sel1[b * F0 + (2 * i) * Wp0 + 2 * j,
                     b * F1 + (i + 1) * Wp1 + (j + 1)] = 1.0
        for i in range(H2):
            for j in range(W2):
                sel2[b * F1 + (2 * i) * Wp1 + 2 * j,
                     b * H2 * W2 + i * W2 + j] = 1.0

    up1 = np.zeros((4 * BT * H2 * W2, BT * H1 * W1), np.float32)  # tconv1 scatter (4 taps fused)
    up2 = np.zeros((4 * BT * H1 * W1, BT * H * W), np.float32)    # tconv2 scatter (4 taps fused)
    for kh in range(2):
        for kw in range(2):
            k = kh * 2 + kw
            for b in range(BT):
                for i in range(H2):
                    for j in range(W2):
                        up1[k * BT * H2 * W2 + b * H2 * W2 + i * W2 + j,
                            b * H1 * W1 + (2 * i + kh) * W1 + (2 * j + kw)] = 1.0
                for i in range(H1):
                    for j in range(W1):
                        up2[k * BT * H1 * W1 + b * H1 * W1 + i * W1 + j,
                            b * H * W + (2 * i + kh) * W + (2 * j + kw)] = 1.0

    dims = (Wp0, span0, psel0, Wp1, span1, psel1)
    return (sel1, sel2, up1, up2), dims


def _pick_btile(n):
    # Scatter/select constants scale with Btile^2, so keep Btile modest; prefer
    # >= 2 grid steps so both v7x TensorCores get work ("parallel" batch axis).
    for bt in (4, 2, 1):
        if n % bt == 0 and n // bt >= 2:
            return bt
    return 1


# --------------------------------- forward ---------------------------------- #

@jax.jit
def conv_autoencoder_forward(x_nchw, params):
    N, C, H, W = x_nchw.shape
    assert C == 1
    BT = _pick_btile(N)
    G = N // BT
    (sel1, sel2, up1, up2), dims = _build_constants(H, W, BT)
    F0 = (H + 2) * (W + 2)

    c1 = params["conv1_w"].shape[0]            # 16
    c2 = params["conv2_w"].shape[0]            # 4
    ci2 = params["conv2_w"].shape[1]           # 16
    t1i = params["tconv1_w"].shape[0]          # 4
    t1o = params["tconv1_w"].shape[1]          # 16
    t2i = params["tconv2_w"].shape[0]          # 16
    t2o = params["tconv2_w"].shape[1]          # 1

    # Wrapper-side layout plumbing (replaces the old in-kernel `emb` matmul):
    # zero-pad each image and stack Btile padded frames along the lane axis.
    xp = jnp.pad(x_nchw, ((0, 0), (0, 0), (1, 1), (1, 1)))
    x_blk = xp.reshape(N, F0).reshape(G, 1, BT * F0)

    # One-time weight re-layouts (tiny transposes / reshapes).
    w1 = params["conv1_w"].reshape(c1, 9)                                    # (16, 9)
    b1 = params["conv1_b"].reshape(c1, 1)
    w2 = jnp.transpose(params["conv2_w"], (0, 2, 3, 1)).reshape(c2, 9 * ci2)  # (4, 144)
    b2 = params["conv2_b"].reshape(c2, 1)
    wt1 = jnp.transpose(params["tconv1_w"], (2, 3, 1, 0)).reshape(4 * t1o, t1i)  # (64, 4)
    tb1 = params["tconv1_b"].reshape(t1o, 1)
    wt2 = jnp.transpose(params["tconv2_w"], (2, 3, 1, 0)).reshape(4 * t2o, t2i)  # (4, 16)
    tb2 = params["tconv2_b"].reshape(t2o, 1)

    operands = (x_blk, w1, b1, w2, b2, wt1, tb1, wt2, tb2,
                jnp.asarray(sel1), jnp.asarray(sel2),
                jnp.asarray(up1), jnp.asarray(up2))

    def rep_spec(a):   # full-array block, same index every step -> DMA'd once
        return pl.BlockSpec(a.shape, lambda g, _nd=a.ndim: (0,) * _nd)

    in_specs = [pl.BlockSpec((1, 1, BT * F0), lambda g: (g, 0, 0))]
    in_specs += [rep_spec(a) for a in operands[1:]]

    out = pl.pallas_call(
        functools.partial(_autoencoder_kernel, dims=dims),
        out_shape=jax.ShapeDtypeStruct((G, 1, BT * H * W), jnp.float32),
        grid=(G,),
        in_specs=in_specs,
        out_specs=pl.BlockSpec((1, 1, BT * H * W), lambda g: (g, 0, 0)),
        compiler_params=pltpu.CompilerParams(
            dimension_semantics=("parallel",),        # split batch groups across TCs
            vmem_limit_bytes=32 * 1024 * 1024),       # explicit (v5e default is 16 MiB)
    )(*operands)
    return out.reshape(N, 1, H, W)


# ------------------------- pure-JAX reference check ------------------------- #

def reference_forward(x_nchw, params):
    dn = ("NHWC", "HWIO", "NHWC")
    hi = jax.lax.Precision.HIGHEST

    def conv(x, w, b):
        w_hwio = jnp.transpose(w, (2, 3, 1, 0))
        y = jax.lax.conv_general_dilated(x, w_hwio, (1, 1), "SAME",
                                         dimension_numbers=dn, precision=hi)
        return jax.nn.relu(y + b)

    def pool(x):
        return jax.lax.reduce_window(x, -jnp.inf, jax.lax.max,
                                     (1, 2, 2, 1), (1, 2, 2, 1), "VALID")

    def tconv(x, w, b, act):
        N, H, W, _ = x.shape
        Cout = w.shape[1]
        y = jnp.einsum("nhwi,iokl->nhwokl", x, w, precision=hi)
        y = y + b[None, None, None, :, None, None]
        y = jnp.transpose(y, (0, 1, 4, 2, 5, 3)).reshape(N, 2 * H, 2 * W, Cout)
        return act(y)

    x = jnp.transpose(x_nchw, (0, 2, 3, 1))
    x = conv(x, params["conv1_w"], params["conv1_b"])
    x = pool(x)
    x = conv(x, params["conv2_w"], params["conv2_b"])
    x = pool(x)
    x = tconv(x, params["tconv1_w"], params["tconv1_b"], jax.nn.relu)
    x = tconv(x, params["tconv2_w"], params["tconv2_b"], jax.nn.sigmoid)
    return jnp.transpose(x, (0, 3, 1, 2))


# ----------------------------------- main ----------------------------------- #

if __name__ == "__main__":
    key = jax.random.PRNGKey(0)
    ks = jax.random.split(key, 9)

    def u(k, shape, fan_in):
        bound = 1.0 / float(np.sqrt(fan_in))
        return jax.random.uniform(k, shape, jnp.float32, -bound, bound)

    # Parameter shapes follow the PyTorch module's __init__.
    params = {
        "conv1_w": u(ks[0], (16, 1, 3, 3), 1 * 9),     # Conv2d(1, 16, 3, pad=1)
        "conv1_b": u(ks[1], (16,), 1 * 9),
        "conv2_w": u(ks[2], (4, 16, 3, 3), 16 * 9),    # Conv2d(16, 4, 3, pad=1)
        "conv2_b": u(ks[3], (4,), 16 * 9),
        "tconv1_w": u(ks[4], (4, 16, 2, 2), 16 * 4),   # ConvTranspose2d(4, 16, 2, s=2)
        "tconv1_b": u(ks[5], (16,), 16 * 4),
        "tconv2_w": u(ks[6], (16, 1, 2, 2), 1 * 4),    # ConvTranspose2d(16, 1, 2, s=2)
        "tconv2_b": u(ks[7], (1,), 1 * 4),
    }

    # Batch 8 -> Btile=4, grid=(2,): exercises batch-blocking + 2-TC split.
    x = jax.random.uniform(ks[8], (8, 1, 16, 16), jnp.float32)   # NCHW, like PyTorch

    out = jax.block_until_ready(conv_autoencoder_forward(x, params))
    assert out.shape == (8, 1, 16, 16), out.shape

    ref = jax.block_until_ready(reference_forward(x, params))
    np.testing.assert_allclose(np.asarray(out), np.asarray(ref), rtol=2e-3, atol=2e-3)

    print("KERNEL_OK")
</pallas_src>

<mosaic_0001>
module attributes {stable_mosaic.version = 11 : i64} {
  func.func @_autoencoder_kernel(%arg0: i32, %arg1: memref<1x1x1296xf32, #tpu.memory_space<vmem>>, %arg2: memref<16x9xf32, #tpu.memory_space<vmem>>, %arg3: memref<16x1xf32, #tpu.memory_space<vmem>>, %arg4: memref<4x144xf32, #tpu.memory_space<vmem>>, %arg5: memref<4x1xf32, #tpu.memory_space<vmem>>, %arg6: memref<64x4xf32, #tpu.memory_space<vmem>>, %arg7: memref<16x1xf32, #tpu.memory_space<vmem>>, %arg8: memref<4x16xf32, #tpu.memory_space<vmem>>, %arg9: memref<1x1xf32, #tpu.memory_space<vmem>>, %arg10: memref<1239x400xf32, #tpu.memory_space<vmem>>, %arg11: memref<367x64xf32, #tpu.memory_space<vmem>>, %arg12: memref<256x256xf32, #tpu.memory_space<vmem>>, %arg13: memref<1024x1024xf32, #tpu.memory_space<vmem>>, %arg14: memref<1x1x1024xf32, #tpu.memory_space<vmem>>) attributes {dimension_semantics = [#tpu.dimension_semantics<parallel>], iteration_bounds = array<i64: 2>, scalar_prefetch = 0 : i64, scratch_operands = 0 : i64, tpu.core_type = #tpu.core_type<tc>, window_params = [{transform_indices = @transform_0, window_bounds = array<i64: 1, 1, 1296>}, {pipeline_mode = #tpu.pipeline_mode<synchronous>, transform_indices = @transform_1, window_bounds = array<i64: 16, 9>}, {pipeline_mode = #tpu.pipeline_mode<synchronous>, transform_indices = @transform_2, window_bounds = array<i64: 16, 1>}, {pipeline_mode = #tpu.pipeline_mode<synchronous>, transform_indices = @transform_3, window_bounds = array<i64: 4, 144>}, {pipeline_mode = #tpu.pipeline_mode<synchronous>, transform_indices = @transform_4, window_bounds = array<i64: 4, 1>}, {pipeline_mode = #tpu.pipeline_mode<synchronous>, transform_indices = @transform_5, window_bounds = array<i64: 64, 4>}, {pipeline_mode = #tpu.pipeline_mode<synchronous>, transform_indices = @transform_6, window_bounds = array<i64: 16, 1>}, {pipeline_mode = #tpu.pipeline_mode<synchronous>, transform_indices = @transform_7, window_bounds = array<i64: 4, 16>}, {pipeline_mode = #tpu.pipeline_mode<synchronous>, transform_indices = @transform_8, window_bounds = array<i64: 1, 1>}, {pipeline_mode = #tpu.pipeline_mode<synchronous>, transform_indices = @transform_9, window_bounds = array<i64: 1239, 400>}, {pipeline_mode = #tpu.pipeline_mode<synchronous>, transform_indices = @transform_10, window_bounds = array<i64: 367, 64>}, {pipeline_mode = #tpu.pipeline_mode<synchronous>, transform_indices = @transform_11, window_bounds = array<i64: 256, 256>}, {pipeline_mode = #tpu.pipeline_mode<synchronous>, transform_indices = @transform_12, window_bounds = array<i64: 1024, 1024>}, {transform_indices = @transform_13, window_bounds = array<i64: 1, 1, 1024>}]} {
    %c0 = arith.constant 0 : index
    %c0_0 = arith.constant 0 : index
    %c0_1 = arith.constant 0 : index
    %0 = vector.load %arg1[%c0, %c0_0, %c0_1] : memref<1x1x1296xf32, #tpu.memory_space<vmem>>, vector<1x1x1296xf32>
    %1 = vector.shape_cast %0 : vector<1x1x1296xf32> to vector<1x1296xf32>
    %2 = vector.extract_strided_slice %1 {offsets = [0, 0], sizes = [1, 1258], strides = [1, 1]} : vector<1x1296xf32> to vector<1x1258xf32>
    %3 = vector.extract_strided_slice %1 {offsets = [0, 1], sizes = [1, 1258], strides = [1, 1]} : vector<1x1296xf32> to vector<1x1258xf32>
    %4 = vector.extract_strided_slice %1 {offsets = [0, 2], sizes = [1, 1258], strides = [1, 1]} : vector<1x1296xf32> to vector<1x1258xf32>
    %5 = vector.extract_strided_slice %1 {offsets = [0, 18], sizes = [1, 1258], strides = [1, 1]} : vector<1x1296xf32> to vector<1x1258xf32>
    %6 = vector.extract_strided_slice %1 {offsets = [0, 19], sizes = [1, 1258], strides = [1, 1]} : vector<1x1296xf32> to vector<1x1258xf32>
    %7 = vector.extract_strided_slice %1 {offsets = [0, 20], sizes = [1, 1258], strides = [1, 1]} : vector<1x1296xf32> to vector<1x1258xf32>
    %8 = vector.extract_strided_slice %1 {offsets = [0, 36], sizes = [1, 1258], strides = [1, 1]} : vector<1x1296xf32> to vector<1x1258xf32>
    %9 = vector.extract_strided_slice %1 {offsets = [0, 37], sizes = [1, 1258], strides = [1, 1]} : vector<1x1296xf32> to vector<1x1258xf32>
    %10 = vector.extract_strided_slice %1 {offsets = [0, 38], sizes = [1, 1258], strides = [1, 1]} : vector<1x1296xf32> to vector<1x1258xf32>
    %11 = tpu.concatenate %2, %3, %4, %5, %6, %7, %8, %9, %10 in 0 : vector<1x1258xf32>, vector<1x1258xf32>, vector<1x1258xf32>, vector<1x1258xf32>, vector<1x1258xf32>, vector<1x1258xf32>, vector<1x1258xf32>, vector<1x1258xf32>, vector<1x1258xf32> -> vector<9x1258xf32>
    %c0_2 = arith.constant 0 : index
    %c0_3 = arith.constant 0 : index
    %12 = vector.load %arg2[%c0_2, %c0_3] : memref<16x9xf32, #tpu.memory_space<vmem>>, vector<16x9xf32>
    %cst = arith.constant dense<0.000000e+00> : vector<16x1258xf32>
    %13 = tpu.matmul %12, %11, %cst {dimension_numbers = #tpu.dot_dimension_numbers<[1], [0], [0], [1], [0, 0, 1, 1], [], []>} : vector<16x9xf32>, vector<9x1258xf32>, vector<16x1258xf32> -> vector<16x1258xf32>
    %c0_4 = arith.constant 0 : index
    %c0_5 = arith.constant 0 : index
    %14 = vector.load %arg3[%c0_4, %c0_5] : memref<16x1xf32, #tpu.memory_space<vmem>>, vector<16x1xf32>
    %15 = vector.broadcast %14 : vector<16x1xf32> to vector<16x1258xf32>
    %16 = arith.addf %13, %15 : vector<16x1258xf32>
    %cst_6 = arith.constant 0.000000e+00 : f32
    %17 = vector.broadcast %cst_6 : f32 to vector<16x1258xf32>
    %18 = arith.maximumf %16, %17 : vector<16x1258xf32>
    %19 = vector.extract_strided_slice %18 {offsets = [0, 0], sizes = [16, 1239], strides = [1, 1]} : vector<16x1258xf32> to vector<16x1239xf32>
    %20 = vector.extract_strided_slice %18 {offsets = [0, 1], sizes = [16, 1239], strides = [1, 1]} : vector<16x1258xf32> to vector<16x1239xf32>
    %21 = arith.maximumf %19, %20 : vector<16x1239xf32>
    %22 = vector.extract_strided_slice %18 {offsets = [0, 18], sizes = [16, 1239], strides = [1, 1]} : vector<16x1258xf32> to vector<16x1239xf32>
    %23 = vector.extract_strided_slice %18 {offsets = [0, 19], sizes = [16, 1239], strides = [1, 1]} : vector<16x1258xf32> to vector<16x1239xf32>
    %24 = arith.maximumf %22, %23 : vector<16x1239xf32>
    %25 = arith.maximumf %21, %24 : vector<16x1239xf32>
    %c0_7 = arith.constant 0 : index
    %c0_8 = arith.constant 0 : index
    %26 = vector.load %arg10[%c0_7, %c0_8] : memref<1239x400xf32, #tpu.memory_space<vmem>>, vector<1239x400xf32>
    %cst_9 = arith.constant dense<0.000000e+00> : vector<16x400xf32>
    %27 = tpu.matmul %25, %26, %cst_9 {dimension_numbers = #tpu.dot_dimension_numbers<[1], [0], [0], [1], [0, 0, 1, 1], [], []>} : vector<16x1239xf32>, vector<1239x400xf32>, vector<16x400xf32> -> vector<16x400xf32>
    %28 = vector.extract_strided_slice %27 {offsets = [0, 0], sizes = [16, 378], strides = [1, 1]} : vector<16x400xf32> to vector<16x378xf32>
    %29 = vector.extract_strided_slice %27 {offsets = [0, 1], sizes = [16, 378], strides = [1, 1]} : vector<16x400xf32> to vector<16x378xf32>
    %30 = vector.extract_strided_slice %27 {offsets = [0, 2], sizes = [16, 378], strides = [1, 1]} : vector<16x400xf32> to vector<16x378xf32>
    %31 = vector.extract_strided_slice %27 {offsets = [0, 10], sizes = [16, 378], strides = [1, 1]} : vector<16x400xf32> to vector<16x378xf32>
    %32 = vector.extract_strided_slice %27 {offsets = [0, 11], sizes = [16, 378], strides = [1, 1]} : vector<16x400xf32> to vector<16x378xf32>
    %33 = vector.extract_strided_slice %27 {offsets = [0, 12], sizes = [16, 378], strides = [1, 1]} : vector<16x400xf32> to vector<16x378xf32>
    %34 = vector.extract_strided_slice %27 {offsets = [0, 20], sizes = [16, 378], strides = [1, 1]} : vector<16x400xf32> to vector<16x378xf32>
    %35 = vector.extract_strided_slice %27 {offsets = [0, 21], sizes = [16, 378], strides = [1, 1]} : vector<16x400xf32> to vector<16x378xf32>
    %36 = vector.extract_strided_slice %27 {offsets = [0, 22], sizes = [16, 378], strides = [1, 1]} : vector<16x400xf32> to vector<16x378xf32>
    %37 = tpu.concatenate %28, %29, %30, %31, %32, %33, %34, %35, %36 in 0 : vector<16x378xf32>, vector<16x378xf32>, vector<16x378xf32>, vector<16x378xf32>, vector<16x378xf32>, vector<16x378xf32>, vector<16x378xf32>, vector<16x378xf32>, vector<16x378xf32> -> vector<144x378xf32>
    %c0_10 = arith.constant 0 : index
    %c0_11 = arith.constant 0 : index
    %38 = vector.load %arg4[%c0_10, %c0_11] : memref<4x144xf32, #tpu.memory_space<vmem>>, vector<4x144xf32>
    %cst_12 = arith.constant dense<0.000000e+00> : vector<4x378xf32>
    %39 = tpu.matmul %38, %37, %cst_12 {dimension_numbers = #tpu.dot_dimension_numbers<[1], [0], [0], [1], [0, 0, 1, 1], [], []>} : vector<4x144xf32>, vector<144x378xf32>, vector<4x378xf32> -> vector<4x378xf32>
    %c0_13 = arith.constant 0 : index
    %c0_14 = arith.constant 0 : index
    %40 = vector.load %arg5[%c0_13, %c0_14] : memref<4x1xf32, #tpu.memory_space<vmem>>, vector<4x1xf32>
    %41 = vector.broadcast %40 : vector<4x1xf32> to vector<4x378xf32>
    %42 = arith.addf %39, %41 : vector<4x378xf32>
    %cst_15 = arith.constant 0.000000e+00 : f32
    %43 = vector.broadcast %cst_15 : f32 to vector<4x378xf32>
    %44 = arith.maximumf %42, %43 : vector<4x378xf32>
    %45 = vector.extract_strided_slice %44 {offsets = [0, 0], sizes = [4, 367], strides = [1, 1]} : vector<4x378xf32> to vector<4x367xf32>
    %46 = vector.extract_strided_slice %44 {offsets = [0, 1], sizes = [4, 367], strides = [1, 1]} : vector<4x378xf32> to vector<4x367xf32>
    %47 = arith.maximumf %45, %46 : vector<4x367xf32>
    %48 = vector.extract_strided_slice %44 {offsets = [0, 10], sizes = [4, 367], strides = [1, 1]} : vector<4x378xf32> to vector<4x367xf32>
    %49 = vector.extract_strided_slice %44 {offsets = [0, 11], sizes = [4, 367], strides = [1, 1]} : vector<4x378xf32> to vector<4x367xf32>
    %50 = arith.maximumf %48, %49 : vector<4x367xf32>
    %51 = arith.maximumf %47, %50 : vector<4x367xf32>
    %c0_16 = arith.constant 0 : index
    %c0_17 = arith.constant 0 : index
    %52 = vector.load %arg11[%c0_16, %c0_17] : memref<367x64xf32, #tpu.memory_space<vmem>>, vector<367x64xf32>
    %cst_18 = arith.constant dense<0.000000e+00> : vector<4x64xf32>
    %53 = tpu.matmul %51, %52, %cst_18 {dimension_numbers = #tpu.dot_dimension_numbers<[1], [0], [0], [1], [0, 0, 1, 1], [], []>} : vector<4x367xf32>, vector<367x64xf32>, vector<4x64xf32> -> vector<4x64xf32>
    %c0_19 = arith.constant 0 : index
    %c0_20 = arith.constant 0 : index
    %54 = vector.load %arg6[%c0_19, %c0_20] : memref<64x4xf32, #tpu.memory_space<vmem>>, vector<64x4xf32>
    %cst_21 = arith.constant dense<0.000000e+00> : vector<64x64xf32>
    %55 = tpu.matmul %54, %53, %cst_21 {dimension_numbers = #tpu.dot_dimension_numbers<[1], [0], [0], [1], [0, 0, 1, 1], [], []>} : vector<64x4xf32>, vector<4x64xf32>, vector<64x64xf32> -> vector<64x64xf32>
    %56 = vector.extract_strided_slice %55 {offsets = [0, 0], sizes = [16, 64], strides = [1, 1]} : vector<64x64xf32> to vector<16x64xf32>
    %57 = vector.extract_strided_slice %55 {offsets = [16, 0], sizes = [16, 64], strides = [1, 1]} : vector<64x64xf32> to vector<16x64xf32>
    %58 = vector.extract_strided_slice %55 {offsets = [32, 0], sizes = [16, 64], strides = [1, 1]} : vector<64x64xf32> to vector<16x64xf32>
    %59 = vector.extract_strided_slice %55 {offsets = [48, 0], sizes = [16, 64], strides = [1, 1]} : vector<64x64xf32> to vector<16x64xf32>
    %60 = tpu.concatenate %56, %57, %58, %59 in 1 : vector<16x64xf32>, vector<16x64xf32>, vector<16x64xf32>, vector<16x64xf32> -> vector<16x256xf32>
    %c0_22 = arith.constant 0 : index
    %c0_23 = arith.constant 0 : index
    %61 = vector.load %arg12[%c0_22, %c0_23] : memref<256x256xf32, #tpu.memory_space<vmem>>, vector<256x256xf32>
    %cst_24 = arith.constant dense<0.000000e+00> : vector<16x256xf32>
    %62 = tpu.matmul %60, %61, %cst_24 {dimension_numbers = #tpu.dot_dimension_numbers<[1], [0], [0], [1], [0, 0, 1, 1], [], []>} : vector<16x256xf32>, vector<256x256xf32>, vector<16x256xf32> -> vector<16x256xf32>
    %c0_25 = arith.constant 0 : index
    %c0_26 = arith.constant 0 : index
    %63 = vector.load %arg7[%c0_25, %c0_26] : memref<16x1xf32, #tpu.memory_space<vmem>>, vector<16x1xf32>
    %64 = vector.broadcast %63 : vector<16x1xf32> to vector<16x256xf32>
    %65 = arith.addf %62, %64 : vector<16x256xf32>
    %cst_27 = arith.constant 0.000000e+00 : f32
    %66 = vector.broadcast %cst_27 : f32 to vector<16x256xf32>
    %67 = arith.maximumf %65, %66 : vector<16x256xf32>
    %c0_28 = arith.constant 0 : index
    %c0_29 = arith.constant 0 : index
    %68 = vector.load %arg8[%c0_28, %c0_29] : memref<4x16xf32, #tpu.memory_space<vmem>>, vector<4x16xf32>
    %cst_30 = arith.constant dense<0.000000e+00> : vector<4x256xf32>
    %69 = tpu.matmul %68, %67, %cst_30 {dimension_numbers = #tpu.dot_dimension_numbers<[1], [0], [0], [1], [0, 0, 1, 1], [], []>} : vector<4x16xf32>, vector<16x256xf32>, vector<4x256xf32> -> vector<4x256xf32>
    %70 = vector.extract_strided_slice %69 {offsets = [0, 0], sizes = [1, 256], strides = [1, 1]} : vector<4x256xf32> to vector<1x256xf32>
    %71 = vector.extract_strided_slice %69 {offsets = [1, 0], sizes = [1, 256], strides = [1, 1]} : vector<4x256xf32> to vector<1x256xf32>
    %72 = vector.extract_strided_slice %69 {offsets = [2, 0], sizes = [1, 256], strides = [1, 1]} : vector<4x256xf32> to vector<1x256xf32>
    %73 = vector.extract_strided_slice %69 {offsets = [3, 0], sizes = [1, 256], strides = [1, 1]} : vector<4x256xf32> to vector<1x256xf32>
    %74 = tpu.concatenate %70, %71, %72, %73 in 1 : vector<1x256xf32>, vector<1x256xf32>, vector<1x256xf32>, vector<1x256xf32> -> vector<1x1024xf32>
    %c0_31 = arith.constant 0 : index
    %c0_32 = arith.constant 0 : index
    %75 = vector.load %arg13[%c0_31, %c0_32] : memref<1024x1024xf32, #tpu.memory_space<vmem>>, vector<1024x1024xf32>
    %cst_33 = arith.constant dense<0.000000e+00> : vector<1x1024xf32>
    %76 = tpu.matmul %74, %75, %cst_33 {dimension_numbers = #tpu.dot_dimension_numbers<[1], [0], [0], [1], [0, 0, 1, 1], [], []>} : vector<1x1024xf32>, vector<1024x1024xf32>, vector<1x1024xf32> -> vector<1x1024xf32>
    %c0_34 = arith.constant 0 : index
    %c0_35 = arith.constant 0 : index
    %77 = vector.load %arg9[%c0_34, %c0_35] : memref<1x1xf32, #tpu.memory_space<vmem>>, vector<1x1xf32>
    %78 = vector.broadcast %77 : vector<1x1xf32> to vector<1x1024xf32>
    %79 = arith.addf %76, %78 : vector<1x1024xf32>
    %80 = arith.negf %79 : vector<1x1024xf32>
    %81 = math.exp %80 : vector<1x1024xf32>
    %cst_36 = arith.constant 1.000000e+00 : f32
    %82 = vector.broadcast %cst_36 : f32 to vector<1x1024xf32>
    %83 = arith.addf %82, %81 : vector<1x1024xf32>
    %84 = arith.divf %82, %83 : vector<1x1024xf32>
    %c0_37 = arith.constant 0 : index
    %c0_38 = arith.constant 0 : index
    %c0_39 = arith.constant 0 : index
    %85 = vector.load %arg14[%c0_37, %c0_38, %c0_39] : memref<1x1x1024xf32, #tpu.memory_space<vmem>>, vector<1x1x1024xf32>
    %86 = vector.shape_cast %85 : vector<1x1x1024xf32> to vector<1x1024xf32>
    %87 = vector.shape_cast %84 : vector<1x1024xf32> to vector<1x1x1024xf32>
    tpu.vector_store %arg14[%c0_37, %c0_38, %c0_39], %87 {strides = array<i32>} : memref<1x1x1024xf32, #tpu.memory_space<vmem>>, vector<1x1x1024xf32>,
    return
  }
  func.func @transform_0(%arg0: i32) -> (i32, i32, i32) {
    %c0_i32 = arith.constant 0 : i32
    %c0_i32_0 = arith.constant 0 : i32
    %c0_i32_1 = arith.constant 0 : i32
    return %arg0, %c0_i32, %c0_i32_0 : i32, i32, i32
  }
  func.func @transform_1(%arg0: i32) -> (i32, i32) {
    %c0_i32 = arith.constant 0 : i32
    %c0_i32_0 = arith.constant 0 : i32
    %c0_i32_1 = arith.constant 0 : i32
    return %c0_i32, %c0_i32_0 : i32, i32
  }
  func.func @transform_2(%arg0: i32) -> (i32, i32) {
    %c0_i32 = arith.constant 0 : i32
    %c0_i32_0 = arith.constant 0 : i32
    %c0_i32_1 = arith.constant 0 : i32
    return %c0_i32, %c0_i32_0 : i32, i32
  }
  func.func @transform_3(%arg0: i32) -> (i32, i32) {
    %c0_i32 = arith.constant 0 : i32
    %c0_i32_0 = arith.constant 0 : i32
    %c0_i32_1 = arith.constant 0 : i32
    return %c0_i32, %c0_i32_0 : i32, i32
  }
  func.func @transform_4(%arg0: i32) -> (i32, i32) {
    %c0_i32 = arith.constant 0 : i32
    %c0_i32_0 = arith.constant 0 : i32
    %c0_i32_1 = arith.constant 0 : i32
    return %c0_i32, %c0_i32_0 : i32, i32
  }
  func.func @transform_5(%arg0: i32) -> (i32, i32) {
    %c0_i32 = arith.constant 0 : i32
    %c0_i32_0 = arith.constant 0 : i32
    %c0_i32_1 = arith.constant 0 : i32
    return %c0_i32, %c0_i32_0 : i32, i32
  }
  func.func @transform_6(%arg0: i32) -> (i32, i32) {
    %c0_i32 = arith.constant 0 : i32
    %c0_i32_0 = arith.constant 0 : i32
    %c0_i32_1 = arith.constant 0 : i32
    return %c0_i32, %c0_i32_0 : i32, i32
  }
  func.func @transform_7(%arg0: i32) -> (i32, i32) {
    %c0_i32 = arith.constant 0 : i32
    %c0_i32_0 = arith.constant 0 : i32
    %c0_i32_1 = arith.constant 0 : i32
    return %c0_i32, %c0_i32_0 : i32, i32
  }
  func.func @transform_8(%arg0: i32) -> (i32, i32) {
    %c0_i32 = arith.constant 0 : i32
    %c0_i32_0 = arith.constant 0 : i32
    %c0_i32_1 = arith.constant 0 : i32
    return %c0_i32, %c0_i32_0 : i32, i32
  }
  func.func @transform_9(%arg0: i32) -> (i32, i32) {
    %c0_i32 = arith.constant 0 : i32
    %c0_i32_0 = arith.constant 0 : i32
    %c0_i32_1 = arith.constant 0 : i32
    return %c0_i32, %c0_i32_0 : i32, i32
  }
  func.func @transform_10(%arg0: i32) -> (i32, i32) {
    %c0_i32 = arith.constant 0 : i32
    %c0_i32_0 = arith.constant 0 : i32
    %c0_i32_1 = arith.constant 0 : i32
    return %c0_i32, %c0_i32_0 : i32, i32
  }
  func.func @transform_11(%arg0: i32) -> (i32, i32) {
    %c0_i32 = arith.constant 0 : i32
    %c0_i32_0 = arith.constant 0 : i32
    %c0_i32_1 = arith.constant 0 : i32
    return %c0_i32, %c0_i32_0 : i32, i32
  }
  func.func @transform_12(%arg0: i32) -> (i32, i32) {
    %c0_i32 = arith.constant 0 : i32
    %c0_i32_0 = arith.constant 0 : i32
    %c0_i32_1 = arith.constant 0 : i32
    return %c0_i32, %c0_i32_0 : i32, i32
  }
  func.func @transform_13(%arg0: i32) -> (i32, i32, i32) {
    %c0_i32 = arith.constant 0 : i32
    %c0_i32_0 = arith.constant 0 : i32
    %c0_i32_1 = arith.constant 0 : i32
    return %arg0, %c0_i32, %c0_i32_0 : i32, i32, i32
  }
}

</mosaic_0001>

<bundles_post_ra>
// kernel: conv_autoencoder_forward.1
= control target key start
LH: loop header
LB: loop body
LE: loop exit
PB: predicated region body
PF: predicated region fallthrough
CT: control target
= control target key end

     0   :  { %s8680_s0 = inlined_call_operand.vmem [shape: f32[2,1,1296], index: 0, kind: input, shape index: {}]   ;;  %s8681_s1 = inlined_call_operand.vmem [shape: f32[16,9], index: 1, kind: input, shape index: {}]   ;;  %s8682_s2 = inlined_call_operand.vmem [shape: f32[16,1], index: 2, kind: input, shape index: {}]   ;;  %s8683_s3 = inlined_call_operand.vmem [shape: f32[4,144], index: 3, kind: input, shape index: {}]   ;;  %s8684_s4 = inlined_call_operand.vmem [shape: f32[4,1], index: 4, kind: input, shape index: {}]   ;;  %s8685_s5 = inlined_call_operand.vmem [shape: f32[64,4], index: 5, kind: input, shape index: {}]   ;;  %s8686_s6 = inlined_call_operand.vmem [shape: f32[16,1], index: 6, kind: input, shape index: {}]   ;;  %s8687_s7 = inlined_call_operand.hbm [shape: f32[4,16], index: 7, kind: input, shape index: {}]   ;;  %s8688_s8 = inlined_call_operand.<no memory space> [shape: f32[1,1], index: 8, kind: input, shape index: {}]   ;;  %s8689_s9 = inlined_call_operand.hbm [shape: f32[1239,400], index: 9, kind: input, shape index: {}]   ;;  %s8690_s10 = inlined_call_operand.hbm [shape: f32[367,64], index: 10, kind: input, shape index: {}]   ;;  %s8691_s11 = inlined_call_operand.hbm [shape: f32[256,256], index: 11, kind: input, shape index: {}]   ;;  %s8692_s12 = inlined_call_operand.hbm [shape: f32[1024,1024], index: 12, kind: input, shape index: {}]   ;;  %s8693_s13 = inlined_call_operand.vmem [shape: f32[2,1,1024], index: 13, kind: output, shape index: {}]  }
   0x1   :  { %v18_v0 = vstv %s8688_s8 }
   0x2   :  { %19 = vst [vmem:[#allocation2] sm:$0x1] %v18_v0 }
   0x3   :  { %20 = vsyncpa [#allocation4], 0 }
   0x4   :  { %21 = vsyncpa [#allocation6], 0 }
   0x5   :  { %22 = vsyncpa [#allocation9], 0  ;;  %s7101_s27 = smov 0  }
   0x6 LB: > { %s6997_s28 = smov [#allocation5]   ;;  %s7107_s30 = sadd.s32 4294967295, %s6995_s27   ;;  %s6995_s27 = sphi %s7101_s27, %s28_s27  }
   0x7   : > { %s381_s29 = sshll.u32 %s6997_s28, 4  ;;  %p6452_p0 = scmp.ge.s32.totalorder %s6995_s27, 1  ;;  %s382_s29 = int_to_ptr.vmem [resolvable:$true] %s381_s29 }
   0x8   : > { %p337_p1 = scmp.lt.s32.totalorder %s6995_s27, 3  ;;  %p8694_p2 = scmp.eq.s32.totalorder %s7107_s30, 0 }
   0x9   : > { %s6998_s14 = smov [#allocation8]   ;;  %s6999_s17 = smov [#allocation3]  }
   0xa   : > { %p7112_p3 = pnand %p6452_p0, %p337_p1  ;;  %s407_s15 = sshll.u32 %s6998_s14, 4  ;;  %s7118_s15 = int_to_ptr.vmem [resolvable:$true] %s407_s15 }
   0xb   : > { %s7126_s18 = sshll.u32 %s6999_s17, 4  ;;  %s6858_s20 = scalar_lea.vmem %s382_s29, 79360  ;;  %s369_s18 = int_to_ptr.vmem [resolvable:$true] %s7126_s18 }
   0xc   : > { %s8696_s8 = scalar_select %p7112_p3, 1, 0 }
   0xd   : > { %p6647_p4 = pneg %p7112_p3  ;;  %p6859_p7 = scmp.ne.s32.totalorder %s382_s29, %s6858_s20 }
   0xe   : > { %p6866_p10 = scmp.lt.s32.totalorder %s382_s29, %s382_s29  ;;  %p6867_p11 = scmp.lt.s32.totalorder %s6858_s20, %s6858_s20 }
   0xf   : > { %p7122_p5 = pnand %p8694_p2, %p6647_p4 }
  0x10   : > { %p6868_p12 = por %p6867_p11, %p6866_p10 }
  0x11   : > { %p7130_p6 = pneg %p7122_p5 }
  0x13   : > { %p6861_p8 = pnand %p6859_p7, %p7130_p6 }
  0x15   : > { %p6862_p9 = pneg %p6861_p8 }
  0x17   : > { %p6869_p13 = pnand %p6868_p12, %p6862_p9 }
  0x19   : > { %6872 = shalt.err (!%p6869_p13)
}
  0x1a   : > { %s7000_s21 = smov 512   ;;  %s7001_s22 = smov 32  }
  0x1b   : > { %6653 = dma.hbm_to_vmem [thread:$0]  (!%p7122_p5), %s8689_s9, 79360, %s382_s29, [#allocation6], %s7000_s21, %s7000_s21, %s7001_s22  }
  0x1c   : > { %s6884_s25 = scalar_lea.vmem %s7118_s15, 8192  ;;  %p6892_p7 = scmp.lt.s32.totalorder %s7118_s15, %s7118_s15 }
  0x1d   : > { %p6885_p0 = scmp.ne.s32.totalorder %s7118_s15, %s6884_s25  ;;  %p6893_p8 = scmp.lt.s32.totalorder %s6884_s25, %s6884_s25 }
  0x1f   : > { %p6887_p1 = pnand %p6885_p0, %p7130_p6  ;;  %p6894_p9 = por %p6893_p8, %p6892_p7 }
  0x21   : > { %p6888_p4 = pneg %p6887_p1 }
  0x23   : > { %p6895_p10 = pnand %p6894_p9, %p6888_p4 }
  0x25   : > { %6898 = shalt.err (!%p6895_p10)
}
  0x26   : > { %s7002_s26 = smov 256   ;;  %s7003_s28 = smov 16  }
  0x27   : > { %6659 = dma.hbm_to_vmem [thread:$0]  (!%p7122_p5), %s8691_s11, 8192, %s7118_s15, [#allocation9], %s7002_s26, %s7002_s26, %s7003_s28  }
  0x28   : > { %s7004_s17 = smov [#allocation7]   ;;  %s6910_s21 = scalar_lea.vmem %s369_s18, 64 }
  0x29   : > { %s394_s20 = sshll.u32 %s7004_s17, 4  ;;  %p6911_p11 = scmp.ne.s32.totalorder %s369_s18, %s6910_s21  ;;  %s395_s20 = int_to_ptr.vmem [resolvable:$true] %s394_s20 }
  0x2a   : > { %p6918_p0 = scmp.lt.s32.totalorder %s369_s18, %s369_s18  ;;  %p6919_p1 = scmp.lt.s32.totalorder %s6910_s21, %s6910_s21 }
  0x2b   : > { %p6913_p12 = pnand %p6911_p11, %p7130_p6 }
  0x2c   : > { %p6920_p4 = por %p6919_p1, %p6918_p0 }
  0x2d   : > { %p6914_p13 = pneg %p6913_p12 }
  0x2f   : > { %p6921_p7 = pnand %p6920_p4, %p6914_p13 }
  0x31   : > { %6924 = shalt.err (!%p6921_p7)
}
  0x32   : > { %6650 = dma.hbm_to_vmem [thread:$0]  (!%p7122_p5), %s8687_s7, 64, %s369_s18, [#allocation4]  }
  0x33   : > { %s6936_s15 = scalar_lea.vmem %s395_s20, 5888  ;;  %p6944_p11 = scmp.lt.s32.totalorder %s395_s20, %s395_s20 }
  0x34   : > { %p6937_p8 = scmp.ne.s32.totalorder %s395_s20, %s6936_s15  ;;  %p6945_p12 = scmp.lt.s32.totalorder %s6936_s15, %s6936_s15 }
  0x36   : > { %p6939_p9 = pnand %p6937_p8, %p7130_p6  ;;  %p6946_p2 = por %p6945_p12, %p6944_p11 }
  0x38   : > { %p6940_p10 = pneg %p6939_p9 }
  0x3a   : > { %p6947_p3 = pnand %p6946_p2, %p6940_p10 }
  0x3c   : > { %6950 = shalt.err (!%p6947_p3)
}
  0x3d   : > { %s7005_s24 = smov 128   ;;  %s7006_s25 = smov 8  }
  0x3e   : > { %6656 = dma.hbm_to_vmem [thread:$0]  (!%p7122_p5), %s8690_s10, 5888, %s395_s20, [#allocation6], %s7005_s24, %s7005_s24, %s7006_s25  }
  0x3f   : > { %s7007_s18 = smov [#allocation10]  }
  0x40   : > { %s420_s14 = sshll.u32 %s7007_s18, 4  ;;  %s421_s14 = int_to_ptr.vmem [resolvable:$true] %s420_s14 }
  0x41   : > { %s6962_s29 = scalar_lea.vmem %s421_s14, 131072  ;;  %p6970_p4 = scmp.lt.s32.totalorder %s421_s14, %s421_s14 }
  0x42   : > { %p6963_p13 = scmp.ne.s32.totalorder %s421_s14, %s6962_s29  ;;  %p6971_p2 = scmp.lt.s32.totalorder %s6962_s29, %s6962_s29 }
  0x44   : > { %p6965_p0 = pnand %p6963_p13, %p7130_p6  ;;  %p6972_p3 = por %p6971_p2, %p6970_p4 }
  0x46   : > { %p6966_p1 = pneg %p6965_p0 }
  0x48   : > { %p6973_p7 = pnand %p6972_p3, %p6966_p1 }
  0x4a   : > { %6976 = shalt.err (!%p6973_p7)
}
  0x4b   : > { %s7008_s17 = smov 1024   ;;  %s7009_s21 = smov 64  }
  0x4c   : > { %6662 = dma.hbm_to_vmem [thread:$0]  (!%p7122_p5), %s8692_s12, 131072, %s421_s14, [#allocation9], %s7008_s17, %s7008_s17, %s7009_s21  }
  0x4d   : > { %p8699_p8 = scmp.ne.s32.totalorder %s8696_s8, 0 }
  0x4e   : > { %p8700_p9 = scmp.eq.s32.totalorder (!%p8699_p8), %s7107_s30, 0 }
  0x4f   : > { %443 = sbr.rel (%p8699_p8) target bundleno = 3664 (0xe50), region = 72 }
  0x54   : > { %6982 = dma.done.wait (%p8700_p9), [#allocation4], 64   ;;  %p8701_p6 = pmov %p8700_p9 }
  0x56   : > { %6984 = vsyncadd (%p8701_p6), [#allocation4], 4294967232  ;;  %p8702_p10 = pmov %p8701_p6 }
  0x57   : > { %p8703_p11 = pmov %p8701_p6 }
  0x58   : > { %6986 = dma.done.wait (%p8702_p10), [#allocation6], 85248  }
  0x59   : > { %6988 = vsyncadd (%p8703_p11), [#allocation6], 4294882048  ;;  %p8704_p12 = pmov %p8701_p6 }
  0x5a   : > { %p8705_p5 = pmov %p8701_p6 }
  0x5b   : > { %6990 = dma.done.wait (%p8704_p12), [#allocation9], 139264  }
  0x5c   : > { %6992 = vsyncadd (%p8705_p5), [#allocation9], 4294828032  ;;  %p501_p13 = scmp.lt.s32.totalorder %s7107_s30, 1  ;;  %v513_v1 = vlaneseq  ;;  %s7010_s15 = smov 127   ;;  %v7018_v21 = vmov 0.0   ;;  %v7019_v43 = vmov 0  }
  0x5d   : > { %s7011_s24 = smov 126   ;;  %s7012_s25 = smov 110   ;;  %1068 = vmatprep.mubr.f32.mxu0 %v7018_v21  ;;  %1151 = vmatprep.mubr.f32.mxu1 %v7018_v21  ;;  %vm583_vm0 = vcmask 1039360   ;;  %vm875_vm1 = vcmask 736256   ;;  %vm886_vm2 = vcmask 1040384   ;;  %vm623_vm3 = vcmask 1031168  }
  0x5e   : > { %s8707_s30 = smov (!%p501_p13, %s7107_s30), 1  ;;  %v7193_v2 = vshrl.u32 %v513_v1, 7  ;;  %s7013_s26 = smov 109   ;;  %6712 = vset.pattern.permute.xlu1 %v7019_v43  ;;  %6713 = vset.pattern.permute.xlu0 %v7019_v43  ;;  %vm897_vm4 = vcmask 1041408   ;;  %vm663_vm5 = vcmask 900096   ;;  %vm908_vm6 = vcmask 1042432  }
  0x5f   : > { %s6626_s8 = smul.u32 11, %s8707_s30  ;;  %s7014_s28 = smov 108   ;;  %vm703_vm7 = vcmask 891904   ;;  %vm919_vm8 = vcmask 1043456   ;;  %vm743_vm9 = vcmask 883712   ;;  %vm930_vm10 = vcmask 1044480  }
  0x60   : > { %v519_v3 = vsub.s32 1, %v7193_v2  ;;  %v7198_v4 = vsub.s32 0, %v7193_v2  ;;  %v523_v5 = vsub.s32 2, %v7193_v2  ;;  %s7015_s18 = smov 92   ;;  %s7016_s14 = smov 90   ;;  %v527_v13 = vsub.s32 3, %v7193_v2 }
  0x61   : > { %s504_s20 = scalar_lea.vmem %s8680_s0, %s6626_s8  ;;  %s7017_s29 = smov 91   ;;  %v531_v14 = vsub.s32 4, %v7193_v2  ;;  %v535_v17 = vsub.s32 5, %v7193_v2  ;;  %v539_v18 = vsub.s32 6, %v7193_v2  ;;  %v543_v22 = vsub.s32 7, %v7193_v2 }
  0x62   : > { %v7204_v6 = vld [vmem:[%s504_s20] sm:$0xff]  ;;  %v7213_v9 = vld [vmem:[%s504_s20 + $0x8] sm:$0x7]  ;;  %vm789_vm11 = vcmask 752640   ;;  %vm832_vm12 = vcmask 744448   ;;  %vm941_vm13 = vcmask 1045504  }
  0x63   : > { %v7207_v7 = vrot.slane %v7204_v6, %v519_v3  ;;  %v7211_v8 = vrot.slane %v7204_v6, %v7198_v4  ;;  %v7220_v10 = vrot.slane %v7204_v6, %v523_v5  ;;  %v7223_v11 = vrot.slane %v7213_v9, %v519_v3  ;;  %s6465_s19 = sshll.u32 %s8707_s30, 3 }
  0x64   : > { %v7250_v12 = vrot.slane %v7213_v9, %v523_v5  ;;  %v7275_v15 = vrot.slane %v7204_v6, %v527_v13  ;;  %v7278_v16 = vrot.slane %v7204_v6, %v531_v14  ;;  %v7299_v19 = vrot.slane %v7204_v6, %v535_v17 }
  0x65   : > { %565 = vrot.lane.b32.xlu0 %v7207_v7, %s7010_s15  ;;  %563 = vrot.lane.b32.xlu1 %v7211_v8, %s7010_s15  ;;  %v7302_v20 = vrot.slane %v7204_v6, %v539_v18  ;;  %v7356_v23 = vrot.slane %v7204_v6, %v543_v22  ;;  %v7360_v24 = vrot.slane %v7213_v9, %v7198_v4  ;;  %vm952_vm14 = vcmask 1046528  }
  0x66   : > { %vm977_vm15 = vcmask 72704  }
  0x69   : > { %567 = vrot.lane.b32.xlu0 %v7220_v10, %s7010_s15  ;;  %605 = vrot.lane.b32.xlu1 %v7207_v7, %s7011_s24 }
  0x6d   : > { %607 = vrot.lane.b32.xlu0 %v7220_v10, %s7011_s24  ;;  %603 = vrot.lane.b32.xlu1 %v7211_v8, %s7011_s24 }
  0x71   : > { %645 = vrot.lane.b32.xlu0 %v7207_v7, %s7012_s25  ;;  %647 = vrot.lane.b32.xlu1 %v7220_v10, %s7012_s25 }
  0x75   : > { %643 = vrot.lane.b32.xlu0 %v7211_v8, %s7012_s25  ;;  %685 = vrot.lane.b32.xlu1 %v7207_v7, %s7013_s26 }
  0x79   : > { %687 = vrot.lane.b32.xlu0 %v7220_v10, %s7013_s26  ;;  %683 = vrot.lane.b32.xlu1 %v7211_v8, %s7013_s26 }
  0x7d   : > { %725 = vrot.lane.b32.xlu0 %v7207_v7, %s7014_s28  ;;  %727 = vrot.lane.b32.xlu1 %v7220_v10, %s7014_s28 }
  0x81   : > { %723 = vrot.lane.b32.xlu0 %v7211_v8, %s7014_s28  ;;  %769 = vrot.lane.b32.xlu1 %v7207_v7, %s7015_s18 }
  0x85   : > { %771 = vrot.lane.b32.xlu0 %v7220_v10, %s7015_s18  ;;  %855 = vrot.lane.b32.xlu1 %v7207_v7, %s7016_s14 }
  0x89   : > { %857 = vrot.lane.b32.xlu0 %v7220_v10, %s7016_s14  ;;  %767 = vrot.lane.b32.xlu1 %v7211_v8, %s7015_s18 }
  0x8d   : > { %812 = vrot.lane.b32.xlu0 %v7207_v7, %s7017_s29  ;;  %814 = vrot.lane.b32.xlu1 %v7220_v10, %s7017_s29 }
  0x91   : > { %853 = vrot.lane.b32.xlu0 %v7211_v8, %s7016_s14  ;;  %810 = vrot.lane.b32.xlu1 %v7211_v8, %s7017_s29 }
  0x95   : > { %569 = vrot.lane.b32.xlu0 %v7275_v15, %s7010_s15  ;;  %571 = vrot.lane.b32.xlu1 %v7278_v16, %s7010_s15 }
  0x99   : > { %609 = vrot.lane.b32.xlu0 %v7275_v15, %s7011_s24  ;;  %611 = vrot.lane.b32.xlu1 %v7278_v16, %s7011_s24 }
  0x9d   : > { %649 = vrot.lane.b32.xlu0 %v7275_v15, %s7012_s25  ;;  %651 = vrot.lane.b32.xlu1 %v7278_v16, %s7012_s25 }
  0xa1   : > { %689 = vrot.lane.b32.xlu0 %v7275_v15, %s7013_s26  ;;  %691 = vrot.lane.b32.xlu1 %v7278_v16, %s7013_s26 }
  0xa5   : > { %573 = vrot.lane.b32.xlu0 %v7299_v19, %s7010_s15  ;;  %575 = vrot.lane.b32.xlu1 %v7302_v20, %s7010_s15 }
  0xa9   : > { %729 = vrot.lane.b32.xlu0 %v7275_v15, %s7014_s28  ;;  %731 = vrot.lane.b32.xlu1 %v7278_v16, %s7014_s28 }
  0xad   : > { %613 = vrot.lane.b32.xlu0 %v7299_v19, %s7011_s24  ;;  %615 = vrot.lane.b32.xlu1 %v7302_v20, %s7011_s24 }
  0xb1   : > { %773 = vrot.lane.b32.xlu0 %v7275_v15, %s7015_s18  ;;  %775 = vrot.lane.b32.xlu1 %v7278_v16, %s7015_s18 }
  0xb5   : > { %859 = vrot.lane.b32.xlu0 %v7275_v15, %s7016_s14  ;;  %861 = vrot.lane.b32.xlu1 %v7278_v16, %s7016_s14 }
  0xb9   : > { %653 = vrot.lane.b32.xlu0 %v7299_v19, %s7012_s25  ;;  %655 = vrot.lane.b32.xlu1 %v7302_v20, %s7012_s25 }
  0xbd   : > { %816 = vrot.lane.b32.xlu0 %v7275_v15, %s7017_s29  ;;  %818 = vrot.lane.b32.xlu1 %v7278_v16, %s7017_s29 }
  0xc1   : > { %693 = vrot.lane.b32.xlu0 %v7299_v19, %s7013_s26  ;;  %695 = vrot.lane.b32.xlu1 %v7302_v20, %s7013_s26 }
  0xc5   : > { %733 = vrot.lane.b32.xlu0 %v7299_v19, %s7014_s28  ;;  %735 = vrot.lane.b32.xlu1 %v7302_v20, %s7014_s28 }
  0xc9   : > { %777 = vrot.lane.b32.xlu0 %v7299_v19, %s7015_s18  ;;  %779 = vrot.lane.b32.xlu1 %v7302_v20, %s7015_s18 }
  0xcd   : > { %863 = vrot.lane.b32.xlu0 %v7299_v19, %s7016_s14  ;;  %865 = vrot.lane.b32.xlu1 %v7302_v20, %s7016_s14 }
  0xd1   : > { %820 = vrot.lane.b32.xlu0 %v7299_v19, %s7017_s29  ;;  %822 = vrot.lane.b32.xlu1 %v7302_v20, %s7017_s29 }
  0xd5   : > { %577 = vrot.lane.b32.xlu0 %v7356_v23, %s7010_s15  ;;  %579 = vrot.lane.b32.xlu1 %v7360_v24, %s7010_s15 }
  0xd7   : > { %v566_v25 = vpop.permute.xlu0 %565  ;;  %v564_v26 = vpop.permute.xlu1 %563 }
  0xd8   : > { %v584_v46 = vsel %vm583_vm0, %v564_v26, %v566_v25 }
  0xd9   : > { %617 = vrot.lane.b32.xlu0 %v7356_v23, %s7011_s24  ;;  %619 = vrot.lane.b32.xlu1 %v7360_v24, %s7011_s24  ;;  %v887_v53 = vsel %vm886_vm2, %v7211_v8, %v584_v46 }
  0xdb   : > { %v7370_v27 = vpop.permute.xlu0 %567  ;;  %v606_v28 = vpop.permute.xlu1 %605 }
  0xdc   : > { %v585_v47 = vsel %vm583_vm0, %v566_v25, %v7370_v27 }
  0xdd   : > { %657 = vrot.lane.b32.xlu0 %v7356_v23, %s7012_s25  ;;  %659 = vrot.lane.b32.xlu1 %v7360_v24, %s7012_s25  ;;  %v888_v54 = vsel %vm886_vm2, %v7207_v7, %v585_v47 }
  0xdf   : > { %v7376_v29 = vpop.permute.xlu0 %607  ;;  %v604_v30 = vpop.permute.xlu1 %603 }
  0xe0   : > { %v625_v49 = vsel %vm623_vm3, %v606_v28, %v7376_v29  ;;  %v624_v50 = vsel %vm623_vm3, %v604_v30, %v606_v28  ;;  %v7473_v30 = vld [vmem:[%s8681_s1] sm:$0xff] }
  0xe1   : > { %581 = vrot.lane.b32.xlu0 %v7223_v11, %s7010_s15  ;;  %697 = vrot.lane.b32.xlu1 %v7356_v23, %s7013_s26  ;;  %v899_v59 = vsel %vm897_vm4, %v888_v54, %v625_v49  ;;  %v898_v60 = vsel %vm897_vm4, %v887_v53, %v624_v50 }
  0xe3   : > { %v646_v31 = vpop.permute.xlu0 %645  ;;  %v7382_v32 = vpop.permute.xlu1 %647 }
  0xe4   : > { %v665_v51 = vsel %vm663_vm5, %v646_v31, %v7382_v32 }
  0xe5   : > { %699 = vrot.lane.b32.xlu0 %v7360_v24, %s7013_s26  ;;  %621 = vrot.lane.b32.xlu1 %v7223_v11, %s7011_s24  ;;  %v910_v63 = vsel %vm908_vm6, %v899_v59, %v665_v51 }
  0xe7   : > { %v644_v33 = vpop.permute.xlu0 %643  ;;  %v686_v34 = vpop.permute.xlu1 %685 }
  0xe8   : > { %v664_v52 = vsel %vm663_vm5, %v644_v33, %v646_v31 }
  0xe9   : > { %737 = vrot.lane.b32.xlu0 %v7356_v23, %s7014_s28  ;;  %739 = vrot.lane.b32.xlu1 %v7360_v24, %s7014_s28  ;;  %v909_v0 = vsel %vm908_vm6, %v898_v60, %v664_v52 }
  0xeb   : > { %v7392_v35 = vpop.permute.xlu0 %687  ;;  %v684_v36 = vpop.permute.xlu1 %683 }
  0xec   : > { %v705_v55 = vsel %vm703_vm7, %v686_v34, %v7392_v35  ;;  %v704_v56 = vsel %vm703_vm7, %v684_v36, %v686_v34  ;;  %v965_v34 = vld [vmem:[%s8682_s2] sm:$0xff]  ;;  %v7490_v36 = vld [vmem:[%s8681_s1 + $0x8] sm:$0xff] }
  0xed   : > { %661 = vrot.lane.b32.xlu0 %v7223_v11, %s7012_s25  ;;  %781 = vrot.lane.b32.xlu1 %v7356_v23, %s7015_s18  ;;  %v921_v5 = vsel %vm919_vm8, %v910_v63, %v705_v55  ;;  %v920_v6 = vsel %vm919_vm8, %v909_v0, %v704_v56 }
  0xef   : > { %v726_v37 = vpop.permute.xlu0 %725  ;;  %v7398_v38 = vpop.permute.xlu1 %727 }
  0xf0   : > { %v745_v61 = vsel %vm743_vm9, %v726_v37, %v7398_v38 }
  0xf1   : > { %783 = vrot.lane.b32.xlu0 %v7360_v24, %s7015_s18  ;;  %867 = vrot.lane.b32.xlu1 %v7356_v23, %s7016_s14  ;;  %v932_v8 = vsel %vm930_vm10, %v921_v5, %v745_v61 }
  0xf3   : > { %v724_v39 = vpop.permute.xlu0 %723  ;;  %v770_v40 = vpop.permute.xlu1 %769 }
  0xf4   : > { %v744_v62 = vsel %vm743_vm9, %v724_v39, %v726_v37  ;;  %v966_v37 = vld [vmem:[%s8682_s2 + $0x8] sm:$0xff] }
  0xf5   : > { %869 = vrot.lane.b32.xlu0 %v7360_v24, %s7016_s14  ;;  %701 = vrot.lane.b32.xlu1 %v7223_v11, %s7013_s26  ;;  %v931_v9 = vsel %vm930_vm10, %v920_v6, %v744_v62  ;;  %s7021_s26 = smov 116  }
  0xf7   : > { %v7408_v41 = vpop.permute.xlu0 %771  ;;  %v856_v42 = vpop.permute.xlu1 %855 }
  0xf8   : > { %v791_v1 = vsel %vm789_vm11, %v770_v40, %v7408_v41 }
  0xf9   : > { %824 = vrot.lane.b32.xlu0 %v7356_v23, %s7017_s29  ;;  %826 = vrot.lane.b32.xlu1 %v7360_v24, %s7017_s29  ;;  %v943_v22 = vsel %vm941_vm13, %v932_v8, %v791_v1 }
  0xfb   : > { %v7414_v44 = vpop.permute.xlu0 %857  ;;  %v768_v45 = vpop.permute.xlu1 %767 }
  0xfc   : > { %v877_v48 = vsel %vm875_vm1, %v856_v42, %v7414_v44  ;;  %v790_v3 = vsel %vm789_vm11, %v768_v45, %v770_v40 }
  0xfd   : > { %741 = vrot.lane.b32.xlu0 %v7223_v11, %s7014_s28  ;;  %6466 = vmatprep.subr.msk.mxu0 %vm886_vm2, %v877_v48  ;;  %v942_v25 = vsel %vm941_vm13, %v931_v9, %v790_v3 }
  0xfe   : > { %785 = vrot.lane.b32.xlu1 %v7223_v11, %s7015_s18 }
  0xff   : > { %v813_v57 = vpop.permute.xlu0 %812  ;;  %v7439_v58 = vpop.permute.xlu1 %814 }
 0x100   : > { %v834_v7 = vsel %vm832_vm12, %v813_v57, %v7439_v58 }
 0x101   : > { %787 = vrot.lane.b32.xlu0 %v7250_v12, %s7015_s18  ;;  %v954_v26 = vsel %vm952_vm14, %v943_v22, %v834_v7  ;;  %s7022_s18 = smov 117  }
 0x102   : > { %871 = vrot.lane.b32.xlu1 %v7223_v11, %s7016_s14 }
 0x103   : > { %v854_v13 = vpop.permute.xlu0 %853  ;;  %v811_v14 = vpop.permute.xlu1 %810 }
 0x104   : > { %v833_v17 = vsel %vm832_vm12, %v811_v14, %v813_v57  ;;  %v876_v18 = vsel %vm875_vm1, %v854_v13, %v856_v42 }
 0x105   : > { %873 = vrot.lane.b32.xlu0 %v7250_v12, %s7016_s14  ;;  %6467 = vmatpush1.msk.msra.mxu0 %vm886_vm2, %v876_v18  ;;  %v953_v28 = vsel %vm952_vm14, %v942_v25, %v833_v17  ;;  %s7023_s14 = smov 118  }
 0x106   : > { %1034 = vmatprep.subr.mxu0 %v954_v26  ;;  %828 = vrot.lane.b32.xlu1 %v7223_v11, %s7017_s29 }
 0x107   : > { %v570_v31 = vpop.permute.xlu0 %569  ;;  %1035 = vmatpush1.msra.mxu0 %v953_v28  ;;  %v7477_v33 = vpop.permute.xlu1 %571 }
 0x108   : > { %6468 = vmatmul.mubr.msk.f32.vlgmr.msra.gmra.mxu0 %vm977_vm15, %v7473_v30  ;;  %v586_v56 = vsel %vm583_vm0, %v7370_v27, %v570_v31  ;;  %v587_v57 = vsel %vm583_vm0, %v570_v31, %v7477_v33 }
 0x109   : > { %830 = vrot.lane.b32.xlu0 %v7250_v12, %s7017_s29  ;;  %1074 = vmatprep.mubr.f32.mxu0 %v7018_v21  ;;  %s7024_s29 = smov 106  }
 0x10a   : > { %969 = vperm.xlu1 %6712, %v965_v34  }
 0x10b   : > { %v610_v39 = vpop.permute.xlu0 %609  ;;  %v7495_v40 = vpop.permute.xlu1 %611 }
 0x10c   : > { %6469 = vmatmul.mubr.msk.f32.gmra.mxu0 %vm977_vm15, %v7490_v36  ;;  %v626_v61 = vsel %vm623_vm3, %v7376_v29, %v610_v39  ;;  %v627_v62 = vsel %vm623_vm3, %v610_v39, %v7495_v40  ;;  %v889_v29 = vsel %vm886_vm2, %v7220_v10, %v586_v56 }
 0x10d   : > { %1145 = vmatprep.mubr.f32.mxu0 %v7018_v21  ;;  %974 = vperm.xlu0 %6713, %v966_v37   ;;  %v900_v5 = vsel %vm897_vm4, %v889_v29, %v626_v61 }
 0x10f   : > { %v650_v12 = vpop.permute.xlu0 %649  ;;  %v7500_v42 = vpop.permute.xlu1 %651 }
 0x110   : > { %v666_v27 = vsel %vm663_vm5, %v7382_v32, %v650_v12  ;;  %v667_v63 = vsel %vm663_vm5, %v650_v12, %v7500_v42 }
 0x113   : > { %v690_v43 = vpop.permute.xlu0 %689  ;;  %v7502_v45 = vpop.permute.xlu1 %691 }
 0x114   : > { %v706_v0 = vsel %vm703_vm7, %v7392_v35, %v690_v43  ;;  %v707_v1 = vsel %vm703_vm7, %v690_v43, %v7502_v45 }
 0x117   : > { %v574_v46 = vpop.permute.xlu0 %573  ;;  %v7504_v47 = vpop.permute.xlu1 %575 }
 0x118   : > { %v588_v43 = vsel %vm583_vm0, %v7477_v33, %v574_v46 }
 0x11b   : > { %v730_v48 = vpop.permute.xlu0 %729  ;;  %v7506_v49 = vpop.permute.xlu1 %731 }
 0x11c   : > { %v746_v7 = vsel %vm743_vm9, %v7398_v38, %v730_v48  ;;  %v747_v10 = vsel %vm743_vm9, %v730_v48, %v7506_v49  ;;  %v589_v48 = vsel %vm583_vm0, %v574_v46, %v7504_v47 }
 0x11f   : > { %v614_v50 = vpop.permute.xlu0 %613  ;;  %v7508_v51 = vpop.permute.xlu1 %615 }
 0x120   : > { %v628_v56 = vsel %vm623_vm3, %v7495_v40, %v614_v50 }
 0x123   : > { %v774_v52 = vpop.permute.xlu0 %773  ;;  %v7510_v53 = vpop.permute.xlu1 %775 }
 0x124   : > { %v792_v8 = vsel %vm789_vm11, %v7408_v41, %v774_v52  ;;  %v793_v9 = vsel %vm789_vm11, %v774_v52, %v7510_v53 }
 0x127   : > { %v860_v54 = vpop.permute.xlu0 %859  ;;  %v7512_v55 = vpop.permute.xlu1 %861 }
 0x128   : > { %v878_v59 = vsel %vm875_vm1, %v7414_v44, %v860_v54  ;;  %v879_v60 = vsel %vm875_vm1, %v860_v54, %v7512_v55  ;;  %v890_v44 = vsel %vm886_vm2, %v7275_v15, %v587_v57  ;;  %v911_v15 = vsel %vm908_vm6, %v900_v5, %v666_v27 }
 0x129   : > { %6470 = vmatprep.subr.msk.mxu0 %vm886_vm2, %v879_v60  ;;  %6622 = vmatprep.subr.msk.mxu1 %vm886_vm2, %v879_v60  ;;  %v901_v6 = vsel %vm897_vm4, %v890_v44, %v627_v62  ;;  %v922_v13 = vsel %vm919_vm8, %v911_v15, %v706_v0  ;;  %v629_v57 = vsel %vm623_vm3, %v614_v50, %v7508_v51 }
 0x12a   : > { %6471 = vmatpush1.msk.msra.mxu0 %vm886_vm2, %v878_v59  ;;  %6624 = vmatpush1.msk.msra.mxu1 %vm886_vm2, %v878_v59  ;;  %v912_v35 = vsel %vm908_vm6, %v901_v6, %v667_v63  ;;  %v933_v17 = vsel %vm930_vm10, %v922_v13, %v746_v7  ;;  %v891_v59 = vsel %vm886_vm2, %v7278_v16, %v588_v43 }
 0x12b   : > { %v654_v32 = vpop.permute.xlu0 %653  ;;  %v7542_v3 = vpop.permute.xlu1 %655  ;;  %v923_v14 = vsel %vm919_vm8, %v912_v35, %v707_v1  ;;  %v944_v28 = vsel %vm941_vm13, %v933_v17, %v792_v8  ;;  %v892_v60 = vsel %vm886_vm2, %v7299_v19, %v589_v48  ;;  %v902_v61 = vsel %vm897_vm4, %v891_v59, %v628_v56 }
 0x12c   : > { %v934_v38 = vsel %vm930_vm10, %v923_v14, %v747_v10  ;;  %v668_v33 = vsel %vm663_vm5, %v7500_v42, %v654_v32  ;;  %v669_v46 = vsel %vm663_vm5, %v654_v32, %v7542_v3  ;;  %v903_v62 = vsel %vm897_vm4, %v892_v60, %v629_v57 }
 0x12d   : > { %v945_v41 = vsel %vm941_vm13, %v934_v38, %v793_v9  ;;  %v914_v44 = vsel %vm908_vm6, %v903_v62, %v669_v46 }
 0x12f   : > { %v817_v18 = vpop.permute.xlu0 %816  ;;  %v819_v22 = vpop.permute.xlu1 %818 }
 0x130   : > { %v835_v25 = vsel %vm832_vm12, %v7439_v58, %v817_v18  ;;  %v836_v26 = vsel %vm832_vm12, %v817_v18, %v819_v22 }
 0x131   : > { %v956_v31 = vsel %vm952_vm14, %v945_v41, %v836_v26  ;;  %v955_v34 = vsel %vm952_vm14, %v944_v28, %v835_v25 }
 0x132   : > { %1111 = vmatprep.subr.mxu0 %v956_v31  ;;  %6623 = vmatprep.subr.mxu1 %v956_v31 }
 0x133   : > { %v694_v37 = vpop.permute.xlu0 %693  ;;  %1112 = vmatpush1.msra.mxu0 %v955_v34  ;;  %6625 = vmatpush1.msra.mxu1 %v955_v34  ;;  %v7567_v39 = vpop.permute.xlu1 %695 }
 0x134   : > { %6472 = vmatmul.mubr.msk.f32.vlgmr.msra.gmra.mxu0 %vm977_vm15, %v7473_v30  ;;  %6473 = vmatmul.mubr.msk.f32.vlgmr.msra.gmra.mxu1 %vm977_vm15, %v7490_v36  ;;  %v708_v40 = vsel %vm703_vm7, %v7502_v45, %v694_v37  ;;  %v709_v50 = vsel %vm703_vm7, %v694_v37, %v7567_v39  ;;  %v913_v45 = vsel %vm908_vm6, %v902_v61, %v668_v33 }
 0x135   : > { %1222 = vmatprep.mubr.f32.mxu0 %v7018_v21  ;;  %1299 = vmatprep.mubr.f32.mxu1 %v7018_v21  ;;  %v925_v32 = vsel %vm919_vm8, %v914_v44, %v709_v50 }
 0x137   : > { %v734_v58 = vpop.permute.xlu0 %733  ;;  %v7575_v12 = vpop.permute.xlu1 %735 }
 0x138   : > { %v748_v19 = vsel %vm743_vm9, %v7506_v49, %v734_v58  ;;  %v749_v42 = vsel %vm743_vm9, %v734_v58, %v7575_v12  ;;  %v924_v49 = vsel %vm919_vm8, %v913_v45, %v708_v40 }
 0x139   : > { %v936_v5 = vsel %vm930_vm10, %v925_v32, %v749_v42 }
 0x13b   : > { %v778_v52 = vpop.permute.xlu0 %777  ;;  %v7581_v54 = vpop.permute.xlu1 %779 }
 0x13c   : > { %v794_v0 = vsel %vm789_vm11, %v7510_v53, %v778_v52  ;;  %v795_v1 = vsel %vm789_vm11, %v778_v52, %v7581_v54 }
 0x13d   : > { %v947_v15 = vsel %vm941_vm13, %v936_v5, %v795_v1 }
 0x13f   : > { %v864_v16 = vpop.permute.xlu0 %863  ;;  %v7601_v27 = vpop.permute.xlu1 %865 }
 0x140   : > { %v880_v63 = vsel %vm875_vm1, %v7512_v55, %v864_v16  ;;  %v881_v29 = vsel %vm875_vm1, %v864_v16, %v7601_v27  ;;  %v935_v55 = vsel %vm930_vm10, %v924_v49, %v748_v19 }
 0x141   : > { %6474 = vmatprep.subr.msk.mxu0 %vm886_vm2, %v881_v29  ;;  %v946_v35 = vsel %vm941_vm13, %v935_v55, %v794_v0 }
 0x142   : > { %6475 = vmatpush1.msk.msra.mxu0 %vm886_vm2, %v880_v63 }
 0x143   : > { %v821_v6 = vpop.permute.xlu0 %820  ;;  %v7623_v7 = vpop.permute.xlu1 %822 }
 0x144   : > { %v837_v53 = vsel %vm832_vm12, %v819_v22, %v821_v6  ;;  %v838_v10 = vsel %vm832_vm12, %v821_v6, %v7623_v7 }
 0x145   : > { %v958_v8 = vsel %vm952_vm14, %v947_v15, %v838_v10  ;;  %v957_v9 = vsel %vm952_vm14, %v946_v35, %v837_v53 }
 0x146   : > { %1188 = vmatprep.subr.mxu0 %v958_v8 }
 0x147   : > { %v578_v13 = vpop.permute.xlu0 %577  ;;  %1189 = vmatpush1.msra.mxu0 %v957_v9  ;;  %v580_v14 = vpop.permute.xlu1 %579 }
 0x148   : > { %6476 = vmatmul.mubr.msk.f32.vlgmr.msra.gmra.mxu0 %vm977_vm15, %v7473_v30  ;;  %v591_v31 = vsel %vm583_vm0, %v578_v13, %v580_v14  ;;  %v590_v33 = vsel %vm583_vm0, %v7504_v47, %v578_v13 }
 0x149   : > { %1228 = vmatprep.mubr.f32.mxu0 %v7018_v21  ;;  %v894_v34 = vsel %vm886_vm2, %v7356_v23, %v591_v31  ;;  %v893_v50 = vsel %vm886_vm2, %v7302_v20, %v590_v33 }
 0x14b   : > { %v618_v17 = vpop.permute.xlu0 %617  ;;  %v620_v38 = vpop.permute.xlu1 %619 }
 0x14c   : > { %6477 = vmatmul.mubr.msk.f32.gmra.mxu0 %vm977_vm15, %v7490_v36  ;;  %v631_v37 = vsel %vm623_vm3, %v618_v17, %v620_v38  ;;  %v630_v40 = vsel %vm623_vm3, %v7508_v51, %v618_v17 }
 0x14d   : > { %1376 = vmatprep.mubr.f32.mxu0 %v7018_v21  ;;  %v905_v48 = vsel %vm897_vm4, %v894_v34, %v631_v37  ;;  %v904_v44 = vsel %vm897_vm4, %v893_v50, %v630_v40 }
 0x14f   : > { %v658_v18 = vpop.permute.xlu0 %657  ;;  %v660_v22 = vpop.permute.xlu1 %659 }
 0x150   : > { %v671_v52 = vsel %vm663_vm5, %v658_v18, %v660_v22  ;;  %v670_v16 = vsel %vm663_vm5, %v7542_v3, %v658_v18 }
 0x151   : > { %v916_v59 = vsel %vm908_vm6, %v905_v48, %v671_v52  ;;  %v915_v3 = vsel %vm908_vm6, %v904_v44, %v670_v16 }
 0x153   : > { %v582_v25 = vpop.permute.xlu0 %581  ;;  %v698_v26 = vpop.permute.xlu1 %697 }
 0x154   : > { %v592_v19 = vsel %vm583_vm0, %v580_v14, %v582_v25  ;;  %v710_v47 = vsel %vm703_vm7, %v7567_v39, %v698_v26  ;;  %v896_v55 = vsel %vm886_vm2, %v7223_v11, %v582_v25 }
 0x155   : > { %v895_v1 = vsel %vm886_vm2, %v7360_v24, %v592_v19  ;;  %v926_v49 = vsel %vm919_vm8, %v915_v3, %v710_v47 }
 0x157   : > { %v700_v41 = vpop.permute.xlu0 %699  ;;  %v622_v28 = vpop.permute.xlu1 %621 }
 0x158   : > { %v711_v60 = vsel %vm703_vm7, %v698_v26, %v700_v41  ;;  %v632_v32 = vsel %vm623_vm3, %v620_v38, %v622_v28  ;;  %v907_v11 = vsel %vm897_vm4, %v896_v55, %v622_v28 }
 0x159   : > { %v927_v23 = vsel %vm919_vm8, %v916_v59, %v711_v60  ;;  %v906_v10 = vsel %vm897_vm4, %v895_v1, %v632_v32  ;;  %vm3237_vm4 = vcmask 875520  }
 0x15b   : > { %v738_v58 = vpop.permute.xlu0 %737  ;;  %v740_v43 = vpop.permute.xlu1 %739 }
 0x15c   : > { %v751_v62 = vsel %vm743_vm9, %v738_v58, %v740_v43  ;;  %v750_v51 = vsel %vm743_vm9, %v7575_v12, %v738_v58 }
 0x15d   : > { %v938_v42 = vsel %vm930_vm10, %v927_v23, %v751_v62 }
 0x15f   : > { %v662_v56 = vpop.permute.xlu0 %661  ;;  %v782_v57 = vpop.permute.xlu1 %781 }
 0x160   : > { %v796_v0 = vsel %vm789_vm11, %v7581_v54, %v782_v57  ;;  %v937_v54 = vsel %vm930_vm10, %v926_v49, %v750_v51  ;;  %v672_v15 = vsel %vm663_vm5, %v660_v22, %v662_v56  ;;  %v918_v17 = vsel %vm908_vm6, %v907_v11, %v662_v56 }
 0x161   : > { %v948_v53 = vsel %vm941_vm13, %v937_v54, %v796_v0  ;;  %v917_v13 = vsel %vm908_vm6, %v906_v10, %v672_v15  ;;  %vm3151_vm6 = vcmask 957440  }
 0x163   : > { %v784_v46 = vpop.permute.xlu0 %783  ;;  %v868_v61 = vpop.permute.xlu1 %867 }
 0x164   : > { %v797_v63 = vsel %vm789_vm11, %v782_v57, %v784_v46  ;;  %v882_v39 = vsel %vm875_vm1, %v7601_v27, %v868_v61 }
 0x165   : > { %v949_v12 = vsel %vm941_vm13, %v938_v42, %v797_v63 }
 0x167   : > { %v870_v29 = vpop.permute.xlu0 %869  ;;  %v702_v45 = vpop.permute.xlu1 %701 }
 0x168   : > { %v883_v20 = vsel %vm875_vm1, %v868_v61, %v870_v29  ;;  %v929_v25 = vsel %vm919_vm8, %v918_v17, %v702_v45 }
 0x169   : > { %6478 = vmatprep.subr.msk.mxu1 %vm886_vm2, %v883_v20 }
 0x16a   : > { %6479 = vmatpush1.msk.msra.mxu1 %vm886_vm2, %v882_v39 }
 0x16b   : > { %v825_v5 = vpop.permute.xlu0 %824  ;;  %v827_v27 = vpop.permute.xlu1 %826 }
 0x16c   : > { %v839_v6 = vsel %vm832_vm12, %v7623_v7, %v825_v5  ;;  %v840_v24 = vsel %vm832_vm12, %v825_v5, %v827_v27  ;;  %v712_v7 = vsel %vm703_vm7, %v700_v41, %v702_v45  ;;  %vm3122_vm7 = vcmask 965632  }
 0x16d   : > { %v960_v35 = vsel %vm952_vm14, %v949_v12, %v840_v24  ;;  %v959_v8 = vsel %vm952_vm14, %v948_v53, %v839_v6  ;;  %v928_v38 = vsel %vm919_vm8, %v917_v13, %v712_v7 }
 0x16e   : > { %1265 = vmatprep.subr.mxu1 %v960_v35 }
 0x16f   : > { %v742_v9 = vpop.permute.xlu0 %741  ;;  %1266 = vmatpush1.msra.mxu1 %v959_v8 }
 0x170   : > { %6480 = vmatmul.mubr.msk.f32.vlgmr.msra.gmra.mxu1 %vm977_vm15, %v7473_v30  ;;  %v786_v14 = vpop.permute.xlu1 %785  ;;  %v752_v18 = vsel %vm743_vm9, %v740_v43, %v742_v9  ;;  %v940_v31 = vsel %vm930_vm10, %v929_v25, %v742_v9 }
 0x171   : > { %1305 = vmatprep.mubr.f32.mxu1 %v7018_v21  ;;  %v939_v41 = vsel %vm930_vm10, %v928_v38, %v752_v18  ;;  %v798_v28 = vsel %vm789_vm11, %v784_v46, %v786_v14  ;;  %vm3670_vm10 = vcmask 31744  }
 0x172   : > { %v950_v56 = vsel %vm941_vm13, %v939_v41, %v798_v28 }
 0x173   : > { %v788_v22 = vpop.permute.xlu0 %787 }
 0x174   : > { %v872_v26 = vpop.permute.xlu1 %871  ;;  %6481 = vmatmul.mubr.msk.f32.gmra.mxu1 %vm977_vm15, %v7490_v36  ;;  %v799_v34 = vsel %vm789_vm11, %v786_v14, %v788_v22 }
 0x175   : > { %v884_v58 = vsel %vm875_vm1, %v870_v29, %v872_v26  ;;  %v951_v57 = vsel %vm941_vm13, %v940_v31, %v799_v34  ;;  %v1706_v31 = vld [vmem:[#allocation5 + $0x1e8] sm:$0xff]  ;;  %v1705_v34 = vld [vmem:[#allocation5 + $0x1e0] sm:$0xff] }
 0x176   : > { %2284 = vmatprep.subr.mxu1 %v1706_v31  ;;  %v1806_v31 = vld [vmem:[#allocation5 + $0x508] sm:$0xff] }
 0x177   : > { %v874_v37 = vpop.permute.xlu0 %873  ;;  %2285 = vmatpush1.msra.mxu1 %v1705_v34  ;;  %v1674_v34 = vld [vmem:[#allocation5 + $0xe8] sm:$0xff] }
 0x178   : > { %v829_v48 = vpop.permute.xlu1 %828  ;;  %v885_v43 = vsel %vm875_vm1, %v872_v26, %v874_v37  ;;  %v1834_v37 = vld [vmem:[#allocation5 + $0x5e8] sm:$0xff]  ;;  %vm2265_vm1 = vcmask 711680  }
 0x179   : > { %v841_v52 = vsel %vm832_vm12, %v827_v27, %v829_v48  ;;  %6482 = vmatprep.subr.msk.mxu0 %vm886_vm2, %v885_v43  ;;  %v1701_v43 = vld [vmem:[#allocation5 + $0x1c0] sm:$0xff] }
 0x17a   : > { %6483 = vmatpush1.msk.msra.mxu0 %vm886_vm2, %v884_v58  ;;  %v961_v33 = vsel %vm952_vm14, %v950_v56, %v841_v52  ;;  %v1702_v58 = vld [vmem:[#allocation5 + $0x1c8] sm:$0xff]  ;;  %vm3288_vm2 = vcmask 130048  }
 0x17b   : > { %v831_v59 = vpop.permute.xlu0 %830  ;;  %2286 = vmatprep.subr.mxu1 %v1702_v58  ;;  %v1673_v58 = vld [vmem:[#allocation5 + $0xe0] sm:$0xff] }
 0x17c   : > { %v842_v60 = vsel %vm832_vm12, %v829_v48, %v831_v59  ;;  %v1833_v48 = vld [vmem:[#allocation5 + $0x5e0] sm:$0xff]  ;;  %v1698_v59 = vld [vmem:[#allocation5 + $0x1a8] sm:$0xff]  ;;  %2287 = vmatpush1.msra.mxu1 %v1701_v43 }
 0x17d   : > { %v962_v46 = vsel %vm952_vm14, %v951_v57, %v842_v60  ;;  %v1830_v57 = vld [vmem:[#allocation5 + $0x5c8] sm:$0xff]  ;;  %v1829_v60 = vld [vmem:[#allocation5 + $0x5c0] sm:$0xff]  ;;  %2288 = vmatprep.subr.mxu1 %v1698_v59 }
 0x17e   : > { %1342 = vmatprep.subr.mxu0 %v962_v46  ;;  %v1826_v46 = vld [vmem:[#allocation5 + $0x5a8] sm:$0xff]  ;;  %v1669_v59 = vld [vmem:[#allocation5 + $0xc0] sm:$0xff] }
 0x17f   : > { %1343 = vmatpush1.msra.mxu0 %v961_v33  ;;  %v1697_v33 = vld [vmem:[#allocation5 + $0x1a0] sm:$0xff]  ;;  %v1670_v43 = vld [vmem:[#allocation5 + $0xc8] sm:$0xff] }
 0x180   : > { %6484 = vmatmul.mubr.msk.f32.vlgmr.msra.gmra.mxu0 %vm977_vm15, %v7473_v30  ;;  %2361 = vmatprep.subr.mxu0 %v1834_v37  ;;  %v1805_v37 = vld [vmem:[#allocation5 + $0x500] sm:$0xff] }
 0x181   : > { %1382 = vmatprep.mubr.f32.mxu0 %v7018_v21  ;;  %2362 = vmatpush1.msra.mxu0 %v1833_v48  ;;  %v1802_v48 = vld [vmem:[#allocation5 + $0x4e8] sm:$0xff] }
 0x182   : > { %2363 = vmatprep.subr.mxu0 %v1830_v57  ;;  %2289 = vmatpush1.msra.mxu1 %v1697_v33  ;;  %v1801_v57 = vld [vmem:[#allocation5 + $0x4e0] sm:$0xff]  ;;  %v1666_v33 = vld [vmem:[#allocation5 + $0xa8] sm:$0xff] }
 0x183   : > { %2364 = vmatpush1.msra.mxu0 %v1829_v60  ;;  %v1798_v60 = vld [vmem:[#allocation5 + $0x4c8] sm:$0xff] }
 0x184   : > { %6485 = vmatmul.mubr.msk.f32.gmra.mxu0 %vm977_vm15, %v7490_v36  ;;  %2365 = vmatprep.subr.mxu0 %v1826_v46  ;;  %v1797_v46 = vld [vmem:[#allocation5 + $0x4c0] sm:$0xff] }
 0x185   : > { %v7719_v40 = vpop.permute.xlu1 %969 }
 0x188   : > { %v7727_v47 = vpop.permute.xlu0 %974 }
 0x1c8   : > { %v1070_v61 = vpop.f32.mrf.mxu0 }
 0x1c9   : > { %v7725_v19 = vadd.f32 %v1070_v61, %v7719_v40 }
 0x1ca   : > { %v1072_v23 = vpop.f32.mrf.mxu0 }
 0x1cb   : > { %v7722_v16 = vadd.f32 %v1072_v23, %v7719_v40  ;;  %v1389_v45 = vmax.f32 %v7725_v19, 0.0  ;;  %v1694_v23 = vld [vmem:[#allocation5 + $0x188] sm:$0xff] }
 0x1cc   : > { %v1076_v62 = vpop.f32.mrf.mxu0  ;;  %2290 = vmatprep.subr.mxu1 %v1694_v23  ;;  %v1794_v23 = vld [vmem:[#allocation5 + $0x4a8] sm:$0xff] }
 0x1cd   : > { %v1390_v36 = vmax.f32 %v7722_v16, 0.0  ;;  %v7766_v6 = vadd.f32 %v1076_v62, %v7727_v47  ;;  %v1825_v62 = vld [vmem:[#allocation5 + $0x5a0] sm:$0xff] }
 0x1ce   : > { %v1078_v50 = vpop.f32.mrf.mxu0  ;;  %2366 = vmatpush1.msra.mxu0 %v1825_v62  ;;  %v1662_v62 = vld [vmem:[#allocation5 + $0x88] sm:$0xff]  ;;  %v1725_v16 = vld [vmem:[#allocation5 + $0x280] sm:$0xff] }
 0x1cf   : > { %v7739_v20 = vadd.f32 %v1078_v50, %v7727_v47  ;;  %v1399_v9 = vmax.f32 %v7766_v6, 0.0  ;;  %v1693_v50 = vld [vmem:[#allocation5 + $0x180] sm:$0xff] }
 0x1d0   : > { %2291 = vmatpush1.msra.mxu1 %v1693_v50  ;;  %v1793_v50 = vld [vmem:[#allocation5 + $0x4a0] sm:$0xff] }
 0x1d1   : > { %v1400_v49 = vmax.f32 %v7739_v20, 0.0 }
 0x1f4   : > { %v1147_v30 = vpop.f32.mrf.mxu0  ;;  %v1153_v42 = vpop.f32.mrf.mxu1 }
 0x1f5   : > { %v7730_v63 = vadd.f32 %v1147_v30, %v7719_v40  ;;  %v7742_v3 = vadd.f32 %v1153_v42, %v7727_v47  ;;  %v1822_v30 = vld [vmem:[#allocation5 + $0x588] sm:$0xff] }
 0x1f6   : > { %v1149_v29 = vpop.f32.mrf.mxu0  ;;  %v1155_v55 = vpop.f32.mrf.mxu1  ;;  %v1690_v42 = vld [vmem:[#allocation5 + $0x168] sm:$0xff]  ;;  %2367 = vmatprep.subr.mxu0 %v1822_v30  ;;  %v1661_v30 = vld [vmem:[#allocation5 + $0x80] sm:$0xff] }
 0x1f7   : > { %v7735_v44 = vadd.f32 %v1149_v29, %v7719_v40  ;;  %v1391_v51 = vmax.f32 %v7730_v63, 0.0  ;;  %v1401_v32 = vmax.f32 %v7742_v3, 0.0  ;;  %v7769_v24 = vadd.f32 %v1155_v55, %v7727_v47  ;;  %v1821_v29 = vld [vmem:[#allocation5 + $0x580] sm:$0xff]  ;;  %2292 = vmatprep.subr.mxu1 %v1690_v42  ;;  %v1790_v42 = vld [vmem:[#allocation5 + $0x488] sm:$0xff] }
 0x1f8   : > { %v1817_v55 = vld [vmem:[#allocation5 + $0x560] sm:$0xff]  ;;  %2368 = vmatpush1.msra.mxu0 %v1821_v29  ;;  %v1658_v29 = vld [vmem:[#allocation5 + $0x68] sm:$0xff] }
 0x1f9   : > { %v1392_v0 = vmax.f32 %v7735_v44, 0.0  ;;  %v6714_v39 = vpack.i.bf16 %v1391_v51, %v1390_v36  ;;  %v6729_v12 = vpack.i.bf16 %v1401_v32, %v1400_v49  ;;  %v1402_v13 = vmax.f32 %v7769_v24, 0.0  ;;  %v1722_v63 = vld [vmem:[#allocation5 + $0x268] sm:$0xff] }
 0x1fb   : > { %v6719_v1 = vpack.i.bf16 %v1389_v45, %v1392_v0  ;;  %6715 = vrot.lane.b32.xlu1 %v6714_v39, %s7010_s15  ;;  %v6734_v18 = vpack.i.bf16 %v1399_v9, %v1402_v13  ;;  %v1689_v39 = vld [vmem:[#allocation5 + $0x160] sm:$0xff] }
 0x1fc   : > { %2293 = vmatpush1.msra.mxu1 %v1689_v39  ;;  %v1789_v39 = vld [vmem:[#allocation5 + $0x480] sm:$0xff] }
 0x1ff   : > { %6720 = vrot.lane.b32.xlu1 %v6719_v1, %s7010_s15  ;;  %v1818_v1 = vld [vmem:[#allocation5 + $0x568] sm:$0xff] }
 0x200   : > { %2369 = vmatprep.subr.mxu0 %v1818_v1  ;;  %v1657_v1 = vld [vmem:[#allocation5 + $0x60] sm:$0xff] }
 0x201   : > { %2370 = vmatpush1.msra.mxu0 %v1817_v55  ;;  %v1654_v55 = vld [vmem:[#allocation5 + $0x48] sm:$0xff] }
 0x203   : > { %6730 = vrot.lane.b32.xlu1 %v6729_v12, %s7010_s15  ;;  %v1686_v12 = vld [vmem:[#allocation5 + $0x148] sm:$0xff] }
 0x204   : > { %2294 = vmatprep.subr.mxu1 %v1686_v12  ;;  %v1786_v12 = vld [vmem:[#allocation5 + $0x468] sm:$0xff] }
 0x208   : > { %v1224_v54 = vpop.f32.mrf.mxu0 }
 0x209   : > { %v7763_v5 = vadd.f32 %v1224_v54, %v7719_v40  ;;  %v1685_v54 = vld [vmem:[#allocation5 + $0x140] sm:$0xff] }
 0x20a   : > { %v1226_v27 = vpop.f32.mrf.mxu0  ;;  %2295 = vmatpush1.msra.mxu1 %v1685_v54  ;;  %v1785_v54 = vld [vmem:[#allocation5 + $0x460] sm:$0xff] }
 0x20b   : > { %v7772_v53 = vadd.f32 %v1226_v27, %v7719_v40  ;;  %v1393_v15 = vmax.f32 %v7763_v5, 0.0  ;;  %v1814_v27 = vld [vmem:[#allocation5 + $0x548] sm:$0xff] }
 0x20c   : > { %v1230_v10 = vpop.f32.mrf.mxu0  ;;  %2371 = vmatprep.subr.mxu0 %v1814_v27  ;;  %v1653_v27 = vld [vmem:[#allocation5 + $0x40] sm:$0xff] }
 0x20d   : > { %v1394_v35 = vmax.f32 %v7772_v53, 0.0  ;;  %v7777_v8 = vadd.f32 %v1230_v10, %v7727_v47  ;;  %v1682_v10 = vld [vmem:[#allocation5 + $0x128] sm:$0xff] }
 0x20e   : > { %v1232_v11 = vpop.f32.mrf.mxu0  ;;  %2296 = vmatprep.subr.mxu1 %v1682_v10  ;;  %v1782_v10 = vld [vmem:[#allocation5 + $0x448] sm:$0xff] }
 0x20f   : > { %v6724_v7 = vpack.i.bf16 %v1394_v35, %v1393_v15  ;;  %v7786_v14 = vadd.f32 %v1232_v11, %v7727_v47  ;;  %v1403_v17 = vmax.f32 %v7777_v8, 0.0  ;;  %v1813_v11 = vld [vmem:[#allocation5 + $0x540] sm:$0xff] }
 0x210   : > { %2372 = vmatpush1.msra.mxu0 %v1813_v11  ;;  %v1650_v11 = vld [vmem:[#allocation5 + $0x28] sm:$0xff] }
 0x211   : > { %6725 = vrot.lane.b32.xlu0 %v6724_v7, %s7010_s15  ;;  %v1404_v38 = vmax.f32 %v7786_v14, 0.0  ;;  %v1681_v7 = vld [vmem:[#allocation5 + $0x120] sm:$0xff]  ;;  %v1950_v14 = vld [vmem:[#allocation5 + $0x988] sm:$0xff] }
 0x212   : > { %2297 = vmatpush1.msra.mxu1 %v1681_v7  ;;  %v1781_v7 = vld [vmem:[#allocation5 + $0x440] sm:$0xff] }
 0x213   : > { %v6744_v22 = vpack.i.bf16 %v1404_v38, %v1403_v17 }
 0x215   : > { %6735 = vrot.lane.b32.xlu0 %v6734_v18, %s7010_s15  ;;  %v1810_v18 = vld [vmem:[#allocation5 + $0x528] sm:$0xff] }
 0x216   : > { %2373 = vmatprep.subr.mxu0 %v1810_v18  ;;  %v1649_v18 = vld [vmem:[#allocation5 + $0x20] sm:$0xff] }
 0x219   : > { %6745 = vrot.lane.b32.xlu0 %v6744_v22, %s7010_s15  ;;  %v1678_v22 = vld [vmem:[#allocation5 + $0x108] sm:$0xff] }
 0x21a   : > { %2298 = vmatprep.subr.mxu1 %v1678_v22  ;;  %v1778_v22 = vld [vmem:[#allocation5 + $0x428] sm:$0xff] }
 0x230   : > { %v1301_v25 = vpop.f32.mrf.mxu1 }
 0x231   : > { %v7802_v26 = vadd.f32 %v1301_v25, %v7719_v40  ;;  %v1809_v25 = vld [vmem:[#allocation5 + $0x520] sm:$0xff] }
 0x232   : > { %v1303_v41 = vpop.f32.mrf.mxu1  ;;  %2374 = vmatpush1.msra.mxu0 %v1809_v25  ;;  %v1646_v25 = vld [vmem:[#allocation5 + $0x8] sm:$0xff] }
 0x233   : > { %v7805_v28 = vadd.f32 %v1303_v41, %v7719_v40  ;;  %v1395_v52 = vmax.f32 %v7802_v26, 0.0  ;;  %v1677_v41 = vld [vmem:[#allocation5 + $0x100] sm:$0xff]  ;;  %2375 = vmatprep.subr.mxu0 %v1806_v31 }
 0x234   : > { %2299 = vmatpush1.msra.mxu1 %v1677_v41  ;;  %2376 = vmatpush1.msra.mxu0 %v1805_v37  ;;  %v1777_v41 = vld [vmem:[#allocation5 + $0x420] sm:$0xff]  ;;  %v1770_v37 = vld [vmem:[#allocation5 + $0x3e8] sm:$0xff] }
 0x235   : > { %v1396_v56 = vmax.f32 %v7805_v28, 0.0  ;;  %2300 = vmatprep.subr.mxu1 %v1674_v34  ;;  %2377 = vmatprep.subr.mxu0 %v1802_v48  ;;  %v1645_v31 = vld [vmem:[#allocation5] sm:$0xff]  ;;  %v1774_v34 = vld [vmem:[#allocation5 + $0x408] sm:$0xff] }
 0x236   : > { %2301 = vmatpush1.msra.mxu1 %v1673_v58  ;;  %2378 = vmatpush1.msra.mxu0 %v1801_v57  ;;  %v1773_v58 = vld [vmem:[#allocation5 + $0x400] sm:$0xff]  ;;  %v1766_v57 = vld [vmem:[#allocation5 + $0x3c8] sm:$0xff] }
 0x237   : > { %v6739_v61 = vpack.i.bf16 %v1396_v56, %v1395_v52  ;;  %2302 = vmatprep.subr.mxu1 %v1670_v43  ;;  %2379 = vmatprep.subr.mxu0 %v1798_v60  ;;  %v1769_v48 = vld [vmem:[#allocation5 + $0x3e0] sm:$0xff]  ;;  %v1898_v43 = vld [vmem:[#allocation5 + $0x7e8] sm:$0xff] }
 0x238   : > { %2303 = vmatpush1.msra.mxu1 %v1669_v59  ;;  %2380 = vmatpush1.msra.mxu0 %v1797_v46  ;;  %v1897_v59 = vld [vmem:[#allocation5 + $0x7e0] sm:$0xff]  ;;  %v1762_v46 = vld [vmem:[#allocation5 + $0x3a8] sm:$0xff] }
 0x239   : > { %6740 = vrot.lane.b32.xlu1 %v6739_v61, %s7010_s15  ;;  %v1665_v61 = vld [vmem:[#allocation5 + $0xa0] sm:$0xff]  ;;  %2304 = vmatprep.subr.mxu1 %v1666_v33  ;;  %v1894_v33 = vld [vmem:[#allocation5 + $0x7c8] sm:$0xff] }
 0x23a   : > { %2305 = vmatpush1.msra.mxu1 %v1665_v61  ;;  %2381 = vmatprep.subr.mxu0 %v1794_v23  ;;  %v1765_v60 = vld [vmem:[#allocation5 + $0x3c0] sm:$0xff] }
 0x23b   : > { %2306 = vmatprep.subr.mxu1 %v1662_v62  ;;  %2382 = vmatpush1.msra.mxu0 %v1793_v50  ;;  %v1893_v61 = vld [vmem:[#allocation5 + $0x7c0] sm:$0xff]  ;;  %v1890_v62 = vld [vmem:[#allocation5 + $0x7a8] sm:$0xff] }
 0x23c   : > { %2307 = vmatpush1.msra.mxu1 %v1661_v30  ;;  %2383 = vmatprep.subr.mxu0 %v1790_v42  ;;  %v1761_v23 = vld [vmem:[#allocation5 + $0x3a0] sm:$0xff]  ;;  %v1758_v50 = vld [vmem:[#allocation5 + $0x388] sm:$0xff] }
 0x23d   : > { %2308 = vmatprep.subr.mxu1 %v1658_v29  ;;  %2384 = vmatpush1.msra.mxu0 %v1789_v39  ;;  %v1889_v30 = vld [vmem:[#allocation5 + $0x7a0] sm:$0xff]  ;;  %v1886_v29 = vld [vmem:[#allocation5 + $0x788] sm:$0xff] }
 0x23e   : > { %2309 = vmatpush1.msra.mxu1 %v1657_v1  ;;  %2385 = vmatprep.subr.mxu0 %v1786_v12  ;;  %v1757_v42 = vld [vmem:[#allocation5 + $0x380] sm:$0xff]  ;;  %v1754_v39 = vld [vmem:[#allocation5 + $0x368] sm:$0xff] }
 0x23f   : > { %2310 = vmatprep.subr.mxu1 %v1654_v55  ;;  %2386 = vmatpush1.msra.mxu0 %v1785_v54  ;;  %v1885_v1 = vld [vmem:[#allocation5 + $0x780] sm:$0xff]  ;;  %v1882_v55 = vld [vmem:[#allocation5 + $0x768] sm:$0xff] }
 0x240   : > { %2311 = vmatpush1.msra.mxu1 %v1653_v27  ;;  %2387 = vmatprep.subr.mxu0 %v1782_v10  ;;  %v1753_v12 = vld [vmem:[#allocation5 + $0x360] sm:$0xff]  ;;  %v1750_v54 = vld [vmem:[#allocation5 + $0x348] sm:$0xff] }
 0x241   : > { %2312 = vmatprep.subr.mxu1 %v1650_v11  ;;  %2388 = vmatpush1.msra.mxu0 %v1781_v7  ;;  %v1881_v27 = vld [vmem:[#allocation5 + $0x760] sm:$0xff]  ;;  %v1878_v7 = vld [vmem:[#allocation5 + $0x748] sm:$0xff] }
 0x242   : > { %2313 = vmatpush1.msra.mxu1 %v1649_v18  ;;  %2389 = vmatprep.subr.mxu0 %v1778_v22  ;;  %v1749_v10 = vld [vmem:[#allocation5 + $0x340] sm:$0xff]  ;;  %v1746_v18 = vld [vmem:[#allocation5 + $0x328] sm:$0xff] }
 0x243   : > { %2314 = vmatprep.subr.mxu1 %v1646_v25  ;;  %2390 = vmatpush1.msra.mxu0 %v1777_v41  ;;  %v1877_v22 = vld [vmem:[#allocation5 + $0x740] sm:$0xff] }
 0x244   : > { %2315 = vmatpush1.msra.mxu1 %v1645_v31  ;;  %2391 = vmatprep.subr.mxu0 %v1774_v34  ;;  %v1745_v31 = vld [vmem:[#allocation5 + $0x320] sm:$0xff]  ;;  %v1874_v34 = vld [vmem:[#allocation5 + $0x728] sm:$0xff] }
 0x245   : > { %2316 = vmatprep.subr.mxu1 %v1770_v37  ;;  %2392 = vmatpush1.msra.mxu0 %v1773_v58  ;;  %v1742_v37 = vld [vmem:[#allocation5 + $0x308] sm:$0xff]  ;;  %v1873_v58 = vld [vmem:[#allocation5 + $0x720] sm:$0xff] }
 0x246   : > { %2317 = vmatpush2.msra.mxu1 %v1769_v48  ;;  %2393 = vmatprep.subr.mxu0 %v1898_v43  ;;  %v1741_v43 = vld [vmem:[#allocation5 + $0x300] sm:$0xff] }
 0x247   : > { %2318 = vmatprep.subr.mxu1 %v1766_v57  ;;  %2394 = vmatpush2.msra.mxu0 %v1897_v59  ;;  %v1870_v57 = vld [vmem:[#allocation5 + $0x708] sm:$0xff] }
 0x248   : > { %2319 = vmatpush2.msra.mxu1 %v1765_v60  ;;  %2395 = vmatprep.subr.mxu0 %v1894_v33  ;;  %v1738_v59 = vld [vmem:[#allocation5 + $0x2e8] sm:$0xff] }
 0x249   : > { %2320 = vmatprep.subr.mxu1 %v1762_v46  ;;  %2396 = vmatpush2.msra.mxu0 %v1893_v61  ;;  %v1869_v46 = vld [vmem:[#allocation5 + $0x700] sm:$0xff] }
 0x24a   : > { %2321 = vmatpush2.msra.mxu1 %v1761_v23  ;;  %2397 = vmatprep.subr.mxu0 %v1890_v62  ;;  %v1737_v61 = vld [vmem:[#allocation5 + $0x2e0] sm:$0xff]  ;;  %v1866_v23 = vld [vmem:[#allocation5 + $0x6e8] sm:$0xff] }
 0x24b   : > { %2322 = vmatprep.subr.mxu1 %v1758_v50  ;;  %2398 = vmatpush2.msra.mxu0 %v1889_v30  ;;  %v1734_v62 = vld [vmem:[#allocation5 + $0x2c8] sm:$0xff]  ;;  %v1865_v50 = vld [vmem:[#allocation5 + $0x6e0] sm:$0xff] }
 0x24c   : > { %2323 = vmatpush2.msra.mxu1 %v1757_v42  ;;  %2399 = vmatprep.subr.mxu0 %v1886_v29  ;;  %v1733_v30 = vld [vmem:[#allocation5 + $0x2c0] sm:$0xff]  ;;  %v1862_v29 = vld [vmem:[#allocation5 + $0x6c8] sm:$0xff] }
 0x24d   : > { %2324 = vmatprep.subr.mxu1 %v1754_v39  ;;  %2400 = vmatpush2.msra.mxu0 %v1885_v1  ;;  %v1730_v39 = vld [vmem:[#allocation5 + $0x2a8] sm:$0xff]  ;;  %v1861_v1 = vld [vmem:[#allocation5 + $0x6c0] sm:$0xff] }
 0x24e   : > { %2325 = vmatpush2.msra.mxu1 %v1753_v12  ;;  %2401 = vmatprep.subr.mxu0 %v1882_v55 }
 0x24f   : > { %2326 = vmatprep.subr.mxu1 %v1750_v54  ;;  %2402 = vmatpush2.msra.mxu0 %v1881_v27  ;;  %v1729_v54 = vld [vmem:[#allocation5 + $0x2a0] sm:$0xff]  ;;  %v1858_v27 = vld [vmem:[#allocation5 + $0x6a8] sm:$0xff] }
 0x250   : > { %2327 = vmatpush2.msra.mxu1 %v1749_v10  ;;  %2403 = vmatprep.subr.mxu0 %v1878_v7  ;;  %v1726_v10 = vld [vmem:[#allocation5 + $0x288] sm:$0xff] }
 0x251   : > { %2328 = vmatprep.subr.mxu1 %v1746_v18  ;;  %2404 = vmatpush2.msra.mxu0 %v1877_v22  ;;  %v1857_v18 = vld [vmem:[#allocation5 + $0x6a0] sm:$0xff] }
 0x252   : > { %2329 = vmatpush2.msra.mxu1 %v1745_v31  ;;  %2405 = vmatprep.subr.mxu0 %v1874_v34  ;;  %v1721_v22 = vld [vmem:[#allocation5 + $0x260] sm:$0xff]  ;;  %v1718_v31 = vld [vmem:[#allocation5 + $0x248] sm:$0xff] }
 0x253   : > { %2330 = vmatprep.subr.mxu1 %v1742_v37  ;;  %2406 = vmatpush2.msra.mxu0 %v1873_v58  ;;  %v1849_v34 = vld [vmem:[#allocation5 + $0x660] sm:$0xff]  ;;  %v1846_v58 = vld [vmem:[#allocation5 + $0x648] sm:$0xff] }
 0x254   : > { %2331 = vmatpush2.msra.mxu1 %v1741_v43  ;;  %2407 = vmatprep.subr.mxu0 %v1870_v57  ;;  %v1717_v37 = vld [vmem:[#allocation5 + $0x240] sm:$0xff]  ;;  %v1714_v43 = vld [vmem:[#allocation5 + $0x228] sm:$0xff] }
 0x255   : > { %2332 = vmatprep.subr.mxu1 %v1738_v59  ;;  %2408 = vmatpush2.msra.mxu0 %v1869_v46  ;;  %v1845_v57 = vld [vmem:[#allocation5 + $0x640] sm:$0xff]  ;;  %v1307_v59 = vpop.f32.mrf.mxu1  ;;  %v1842_v46 = vld [vmem:[#allocation5 + $0x628] sm:$0xff] }
 0x256   : > { %2333 = vmatpush2.msra.mxu1 %v1737_v61  ;;  %2409 = vmatprep.subr.mxu0 %v1866_v23  ;;  %v1710_v23 = vld [vmem:[#allocation5 + $0x208] sm:$0xff] }
 0x257   : > { %2334 = vmatprep.subr.mxu1 %v1734_v62  ;;  %2410 = vmatpush2.msra.mxu0 %v1865_v50  ;;  %v1841_v62 = vld [vmem:[#allocation5 + $0x620] sm:$0xff] }
 0x258   : > { %2335 = vmatpush2.msra.mxu1 %v1733_v30  ;;  %2411 = vmatprep.subr.mxu0 %v1862_v29  ;;  %v1709_v50 = vld [vmem:[#allocation5 + $0x200] sm:$0xff]  ;;  %v1838_v30 = vld [vmem:[#allocation5 + $0x608] sm:$0xff] }
 0x259   : > { %2336 = vmatprep.subr.mxu1 %v1730_v39  ;;  %2412 = vmatpush2.msra.mxu0 %v1861_v1  ;;  %v1837_v29 = vld [vmem:[#allocation5 + $0x600] sm:$0xff]  ;;  %v1309_v39 = vpop.f32.mrf.mxu1 }
 0x25a   : > { %2337 = vmatpush2.msra.mxu1 %v1729_v54  ;;  %2413 = vmatprep.subr.mxu0 %v1858_v27 }
 0x25b   : > { %2338 = vmatprep.subr.mxu1 %v1726_v10  ;;  %2414 = vmatpush2.msra.mxu0 %v1857_v18 }
 0x25c   : > { %2339 = vmatpush2.msra.mxu1 %v1725_v16  ;;  %v7843_v16 = vadd.f32 %v1307_v59, %v7727_v47 }
 0x25d   : > { %2340 = vmatprep.subr.mxu1 %v1722_v63 }
 0x25e   : > { %2341 = vmatpush2.msra.mxu1 %v1721_v22  ;;  %v1405_v44 = vmax.f32 %v7843_v16, 0.0  ;;  %v2081_v16 = vld [vmem:[#allocation5 + $0xda0] sm:$0xff] }
 0x25f   : > { %2342 = vmatprep.subr.mxu1 %v1718_v31 }
 0x260   : > { %2343 = vmatpush2.msra.mxu1 %v1717_v37 }
 0x261   : > { %2344 = vmatprep.subr.mxu1 %v1714_v43 }
 0x26d   : > { %v7814_v11 = vpop.permute.xlu1 %6715 }
 0x26e   : > { %v6718_v25 = vunpack.i.h.bf16 %v7814_v11  ;;  %v6717_v41 = vunpack.i.l.bf16 %v7814_v11 }
 0x270   : > { %v1470_v60 = vsel %vm583_vm0, %v6717_v41, %v6718_v25 }
 0x271   : > { %v7818_v48 = vpop.permute.xlu1 %6720  ;;  %v7829_v12 = vmax.f32 %v1390_v36, %v1470_v60  ;;  %v1854_v36 = vld [vmem:[#allocation5 + $0x688] sm:$0xff]  ;;  %v1713_v60 = vld [vmem:[#allocation5 + $0x220] sm:$0xff] }
 0x272   : > { %v6722_v33 = vunpack.i.l.bf16 %v7818_v48  ;;  %2415 = vmatprep.subr.mxu0 %v1854_v36  ;;  %v6723_v61 = vunpack.i.h.bf16 %v7818_v48  ;;  %2345 = vmatpush2.msra.mxu1 %v1713_v60  ;;  %v7846_v36 = vadd.f32 %v1309_v39, %v7727_v47  ;;  %v2090_v39 = vld [vmem:[#allocation5 + $0xde8] sm:$0xff] }
 0x273   : > { %2346 = vmatprep.subr.mxu1 %v1710_v23 }
 0x274   : > { %v1471_v42 = vsel %vm583_vm0, %v6718_v25, %v6722_v33  ;;  %v1850_v25 = vld [vmem:[#allocation5 + $0x668] sm:$0xff]  ;;  %2347 = vmatpush2.msra.mxu1 %v1709_v50  ;;  %v1469_v54 = vsel %vm583_vm0, %v6723_v61, %v6717_v41 }
 0x275   : > { %v7833_v55 = vmax.f32 %v1391_v51, %v1471_v42  ;;  %v1853_v51 = vld [vmem:[#allocation5 + $0x680] sm:$0xff]  ;;  %v1378_v42 = vpop.f32.mrf.mxu0 }
 0x276   : > { %2416 = vmatpush2.msra.mxu0 %v1853_v51  ;;  %v7853_v11 = vadd.f32 %v1378_v42, %v7719_v40 }
 0x277   : > { %v6749_v7 = vpack.i.bf16 %v7833_v55, %v7829_v12  ;;  %2417 = vmatprep.subr.mxu0 %v1850_v25  ;;  %v1380_v18 = vpop.f32.mrf.mxu0  ;;  %v7861_v25 = vmax.f32 %v1389_v45, %v1469_v54 }
 0x278   : > { %2418 = vmatpush2.msra.mxu0 %v1849_v34  ;;  %v7868_v37 = vadd.f32 %v1380_v18, %v7719_v40  ;;  %v1397_v45 = vmax.f32 %v7853_v11, 0.0 }
 0x279   : > { %6750 = vrot.lane.b32.xlu1 %v6749_v7, %s7012_s25  ;;  %2419 = vmatprep.subr.mxu0 %v1846_v58  ;;  %v6731_v7 = vpop.permute.xlu1 %6730 }
 0x27a   : > { %2420 = vmatpush2.msra.mxu0 %v1845_v57  ;;  %v6733_v48 = vunpack.i.h.bf16 %v6731_v7  ;;  %v1398_v57 = vmax.f32 %v7868_v37, 0.0 }
 0x27b   : > { %2421 = vmatprep.subr.mxu0 %v1842_v46 }
 0x27c   : > { %2422 = vmatpush2.msra.mxu0 %v1841_v62 }
 0x27d   : > { %2423 = vmatprep.subr.mxu0 %v1838_v30 }
 0x27e   : > { %2424 = vmatpush2.msra.mxu0 %v1837_v29  ;;  %v1962_v29 = vld [vmem:[#allocation5 + $0x9e8] sm:$0xff] }
 0x27f   : > { %2438 = vmatprep.subr.mxu1 %v1962_v29  ;;  %2515 = vmatprep.subr.mxu0 %v2090_v39 }
 0x283   : > { %v6726_v1 = vpop.permute.xlu0 %6725 }
 0x284   : > { %v6728_v27 = vunpack.i.h.bf16 %v6726_v1  ;;  %v6727_v10 = vunpack.i.l.bf16 %v6726_v1 }
 0x286   : > { %v1472_v63 = vsel %vm583_vm0, %v6722_v33, %v6727_v10  ;;  %v1473_v51 = vsel %vm583_vm0, %v6727_v10, %v6728_v27  ;;  %v6732_v33 = vunpack.i.l.bf16 %v6731_v7 }
 0x287   : > { %v6736_v41 = vpop.permute.xlu0 %6735  ;;  %v7857_v22 = vmax.f32 %v1393_v15, %v1473_v51  ;;  %v7865_v31 = vmax.f32 %v1392_v0, %v1472_v63  ;;  %v1406_v0 = vmax.f32 %v7846_v36, 0.0 }
 0x288   : > { %v6737_v34 = vunpack.i.l.bf16 %v6736_v41  ;;  %v6738_v15 = vunpack.i.h.bf16 %v6736_v41  ;;  %v1479_v40 = vsel %vm583_vm0, %v6732_v33, %v6733_v48 }
 0x289   : > { %1555 = vrot.lane.b32.xlu0 %v7857_v22, %s7012_s25  ;;  %v6754_v5 = vpack.i.bf16 %v7865_v31, %v7861_v25  ;;  %v7895_v61 = vmax.f32 %v1400_v49, %v1479_v40  ;;  %v6759_v23 = vpack.i.bf16 %v1406_v0, %v1405_v44 }
 0x28a   : > { %v1480_v19 = vsel %vm583_vm0, %v6733_v48, %v6737_v34  ;;  %v1478_v60 = vsel %vm583_vm0, %v6738_v15, %v6732_v33 }
 0x28b   : > { %v7878_v58 = vpop.permute.xlu0 %6745  ;;  %6755 = vrot.lane.b32.xlu1 %v6754_v5, %s7012_s25  ;;  %v7886_v59 = vmax.f32 %v1401_v32, %v1480_v19  ;;  %v1384_v32 = vpop.f32.mrf.mxu0  ;;  %v7913_v20 = vmax.f32 %v1399_v9, %v1478_v60 }
 0x28c   : > { %v6747_v43 = vunpack.i.l.bf16 %v7878_v58  ;;  %v7909_v62 = vadd.f32 %v1384_v32, %v7727_v47  ;;  %v6748_v6 = vunpack.i.h.bf16 %v7878_v58 }
 0x28d   : > { %1445 = vrot.lane.b32.xlu0 %v1397_v45, %s7010_s15  ;;  %v6764_v49 = vpack.i.bf16 %v7886_v59, %v7895_v61  ;;  %v1386_v5 = vpop.f32.mrf.mxu0 }
 0x28e   : > { %v1481_v46 = vsel %vm583_vm0, %v6737_v34, %v6747_v43  ;;  %v1482_v50 = vsel %vm583_vm0, %v6747_v43, %v6748_v6  ;;  %v7972_v32 = vadd.f32 %v1386_v5, %v7727_v47  ;;  %v1945_v5 = vld [vmem:[#allocation5 + $0x960] sm:$0xff] }
 0x28f   : > { %v7903_v3 = vmax.f32 %v1402_v13, %v1481_v46  ;;  %1447 = vrot.lane.b32.xlu1 %v1398_v57, %s7010_s15  ;;  %v1407_v13 = vmax.f32 %v7909_v62, 0.0  ;;  %v7932_v10 = vmax.f32 %v1403_v17, %v1482_v50  ;;  %v1961_v46 = vld [vmem:[#allocation5 + $0x9e0] sm:$0xff]  ;;  %v2210_v62 = vld [vmem:[#allocation5 + $0x11a8] sm:$0xff] }
 0x290   : > { %v2085_v50 = vld [vmem:[#allocation5 + $0xdc0] sm:$0xff] }
 0x291   : > { %6760 = vrot.lane.b32.xlu0 %v6759_v23, %s7010_s15  ;;  %v6769_v24 = vpack.i.bf16 %v7903_v3, %v7913_v20 }
 0x293   : > { %6765 = vrot.lane.b32.xlu1 %v6764_v49, %s7012_s25 }
 0x295   : > { %6770 = vrot.lane.b32.xlu0 %v6769_v24, %s7012_s25  ;;  %v1957_v24 = vld [vmem:[#allocation5 + $0x9c0] sm:$0xff] }
 0x297   : > { %1465 = vrot.lane.b32.xlu1 %v1407_v13, %s7010_s15 }
 0x2ab   : > { %v6741_v9 = vpop.permute.xlu1 %6740 }
 0x2ac   : > { %v6743_v30 = vunpack.i.h.bf16 %v6741_v9  ;;  %v6742_v42 = vunpack.i.l.bf16 %v6741_v9  ;;  %v2086_v9 = vld [vmem:[#allocation5 + $0xdc8] sm:$0xff] }
 0x2ae   : > { %v1474_v1 = vsel %vm583_vm0, %v6728_v27, %v6742_v42  ;;  %v1475_v54 = vsel %vm583_vm0, %v6742_v42, %v6743_v30 }
 0x2af   : > { %v7936_v7 = vmax.f32 %v1394_v35, %v1474_v1  ;;  %v7950_v34 = vmax.f32 %v1395_v52, %v1475_v54  ;;  %v1408_v1 = vmax.f32 %v7972_v32, 0.0  ;;  %v2213_v32 = vld [vmem:[#allocation5 + $0x11c0] sm:$0xff] }
 0x2b1   : > { %v6774_v18 = vpack.i.bf16 %v7936_v7, %v7932_v10 }
 0x2b3   : > { %6775 = vrot.lane.b32.xlu1 %v6774_v18, %s7012_s25 }
 0x2eb   : > { %v6751_v63 = vpop.permute.xlu1 %6750 }
 0x2ec   : > { %v6753_v51 = vunpack.i.h.bf16 %v6751_v63  ;;  %v6752_v41 = vunpack.i.l.bf16 %v6751_v63 }
 0x2ee   : > { %v1588_v27 = vsel %vm663_vm5, %v6752_v41, %v6753_v51 }
 0x2ef   : > { %v7943_v48 = vmax.f32 %v7829_v12, %v1588_v27 }
 0x2f1   : > { %2348 = vmatprep.mubr.f32.mxu1 %v7943_v48 }
 0x2fb   : > { %v7946_v8 = vpop.permute.xlu0 %1555 }
 0x2fd   : > { %v6756_v53 = vpop.permute.xlu1 %6755 }
 0x2fe   : > { %v6758_v35 = vunpack.i.h.bf16 %v6756_v53  ;;  %v6757_v17 = vunpack.i.l.bf16 %v6756_v53 }
 0x2ff   : > { %v1446_v33 = vpop.permute.xlu0 %1445 }
 0x300   : > { %v1587_v15 = vsel %vm663_vm5, %v6757_v17, %v6752_v41  ;;  %v1589_v19 = vsel %vm663_vm5, %v6753_v51, %v6758_v35  ;;  %v1476_v12 = vsel %vm583_vm0, %v6743_v30, %v1446_v33  ;;  %v1590_v58 = vsel %vm663_vm5, %v6758_v35, %v7946_v8  ;;  %v1953_v51 = vld [vmem:[#allocation5 + $0x9a0] sm:$0xff]  ;;  %v2082_v41 = vld [vmem:[#allocation5 + $0xda8] sm:$0xff] }
 0x301   : > { %v7958_v40 = vmax.f32 %v7861_v25, %v1587_v15  ;;  %v7961_v43 = vmax.f32 %v7833_v55, %v1589_v19  ;;  %v7965_v26 = vmax.f32 %v1396_v56, %v1476_v12  ;;  %v1448_v52 = vpop.permute.xlu1 %1447  ;;  %v7968_v60 = vmax.f32 %v7865_v31, %v1590_v58  ;;  %v1958_v56 = vld [vmem:[#allocation5 + $0x9c8] sm:$0xff]  ;;  %v2089_v31 = vld [vmem:[#allocation5 + $0xde0] sm:$0xff] }
 0x302   : > { %v1477_v23 = vsel %vm583_vm0, %v1446_v33, %v1448_v52  ;;  %v8001_v54 = vmax.f32 %v1398_v57, %v1448_v52  ;;  %v2078_v17 = vld [vmem:[#allocation5 + $0xd88] sm:$0xff]  ;;  %v2073_v12 = vld [vmem:[#allocation5 + $0xd60] sm:$0xff] }
 0x303   : > { %v6779_v25 = vpack.i.bf16 %v7965_v26, %v7950_v34  ;;  %v7978_v55 = vmax.f32 %v1397_v45, %v1477_v23  ;;  %v7980_v28 = vpop.permute.xlu0 %6760  ;;  %2349 = vmatmul.mubr.f32.vlgmr.msra.gmra.mxu1 %v7958_v40  ;;  %2425 = vmatprep.mubr.f32.mxu0 %v7968_v60  ;;  %v1954_v45 = vld [vmem:[#allocation5 + $0x9a8] sm:$0xff]  ;;  %v1941_v58 = vld [vmem:[#allocation5 + $0x940] sm:$0xff] }
 0x304   : > { %v6763_v49 = vunpack.i.h.bf16 %v7980_v28  ;;  %v6762_v47 = vunpack.i.l.bf16 %v7980_v28  ;;  %2426 = vmatmul.mubr.f32.vlgmr.msra.gmra.mxu0 %v7961_v43  ;;  %2439 = vmatpush1.msra.mxu1 %v1961_v46  ;;  %v1946_v33 = vld [vmem:[#allocation5 + $0x968] sm:$0xff]  ;;  %v2069_v46 = vld [vmem:[#allocation5 + $0xd40] sm:$0xff] }
 0x305   : > { %6780 = vrot.lane.b32.xlu0 %v6779_v25, %s7012_s25  ;;  %1563 = vrot.lane.b32.xlu1 %v7978_v55, %s7012_s25  ;;  %v7990_v11 = vpop.permute.xlu1 %6765  ;;  %v2074_v15 = vld [vmem:[#allocation5 + $0xd68] sm:$0xff]  ;;  %v1937_v23 = vld [vmem:[#allocation5 + $0x920] sm:$0xff] }
 0x306   : > { %v1483_v30 = vsel %vm583_vm0, %v6748_v6, %v6762_v47  ;;  %v1484_v42 = vsel %vm583_vm0, %v6762_v47, %v6763_v49  ;;  %v6768_v29 = vunpack.i.h.bf16 %v7990_v11  ;;  %v6767_v39 = vunpack.i.l.bf16 %v7990_v11  ;;  %2440 = vmatprep.subr.mxu1 %v1958_v56  ;;  %2516 = vmatpush1.msra.mxu0 %v2089_v31  ;;  %v1942_v19 = vld [vmem:[#allocation5 + $0x948] sm:$0xff]  ;;  %v2065_v31 = vld [vmem:[#allocation5 + $0xd20] sm:$0xff] }
 0x307   : > { %v8005_v18 = vmax.f32 %v1404_v38, %v1483_v30  ;;  %v8009_v6 = vmax.f32 %v1405_v44, %v1484_v42  ;;  %v8011_v63 = vpop.permute.xlu0 %6770  ;;  %2441 = vmatpush1.msra.mxu1 %v1957_v24  ;;  %2517 = vmatprep.subr.mxu0 %v2086_v9  ;;  %v1949_v44 = vld [vmem:[#allocation5 + $0x980] sm:$0xff]  ;;  %v1938_v52 = vld [vmem:[#allocation5 + $0x928] sm:$0xff] }
 0x308   : > { %v6772_v27 = vunpack.i.l.bf16 %v8011_v63  ;;  %v1597_v37 = vsel %vm663_vm5, %v6767_v39, %v6768_v29  ;;  %2442 = vmatprep.subr.mxu1 %v1954_v45  ;;  %2518 = vmatpush1.msra.mxu0 %v2085_v50  ;;  %v2066_v25 = vld [vmem:[#allocation5 + $0xd28] sm:$0xff]  ;;  %v1933_v47 = vld [vmem:[#allocation5 + $0x900] sm:$0xff] }
 0x309   : > { %1467 = vrot.lane.b32.xlu0 %v1408_v1, %s7010_s15  ;;  %1565 = vrot.lane.b32.xlu1 %v8001_v54, %s7012_s25  ;;  %v8023_v38 = vmax.f32 %v7895_v61, %v1597_v37  ;;  %v6784_v53 = vpack.i.bf16 %v8009_v6, %v8005_v18  ;;  %v2077_v61 = vld [vmem:[#allocation5 + $0xd80] sm:$0xff]  ;;  %v1934_v56 = vld [vmem:[#allocation5 + $0x908] sm:$0xff] }
 0x30a   : > { %v1596_v57 = vsel %vm663_vm5, %v6772_v27, %v6767_v39  ;;  %2443 = vmatpush1.msra.mxu1 %v1953_v51  ;;  %2519 = vmatprep.subr.mxu0 %v2082_v41  ;;  %v2062_v24 = vld [vmem:[#allocation5 + $0xd08] sm:$0xff]  ;;  %v2061_v45 = vld [vmem:[#allocation5 + $0xd00] sm:$0xff] }
 0x30b   : > { %2354 = vmatprep.mubr.f32.mxu1 %v8023_v38  ;;  %v8030_v35 = vmax.f32 %v7913_v20, %v1596_v57  ;;  %2444 = vmatprep.subr.mxu1 %v1950_v14  ;;  %v2070_v20 = vld [vmem:[#allocation5 + $0xd48] sm:$0xff]  ;;  %v1929_v50 = vld [vmem:[#allocation5 + $0x8e0] sm:$0xff] }
 0x30c   : > { %2520 = vmatpush1.msra.mxu0 %v2081_v16  ;;  %2445 = vmatpush1.msra.mxu1 %v1949_v44  ;;  %v1930_v9 = vld [vmem:[#allocation5 + $0x8e8] sm:$0xff]  ;;  %v2057_v39 = vld [vmem:[#allocation5 + $0xce0] sm:$0xff] }
 0x30d   : > { %6785 = vrot.lane.b32.xlu0 %v6784_v53, %s7012_s25  ;;  %2355 = vmatmul.mubr.f32.gmra.mxu1 %v8030_v35  ;;  %v2058_v30 = vld [vmem:[#allocation5 + $0xce8] sm:$0xff]  ;;  %v1925_v51 = vld [vmem:[#allocation5 + $0x8c0] sm:$0xff] }
 0x30e   : > { %2521 = vmatprep.subr.mxu0 %v2078_v17  ;;  %2446 = vmatprep.subr.mxu1 %v1946_v33  ;;  %v1926_v42 = vld [vmem:[#allocation5 + $0x8c8] sm:$0xff]  ;;  %v2053_v37 = vld [vmem:[#allocation5 + $0xcc0] sm:$0xff] }
 0x30f   : > { %2522 = vmatpush1.msra.mxu0 %v2077_v61  ;;  %2447 = vmatpush1.msra.mxu1 %v1945_v5  ;;  %v2054_v41 = vld [vmem:[#allocation5 + $0xcc8] sm:$0xff]  ;;  %v1921_v14 = vld [vmem:[#allocation5 + $0x8a0] sm:$0xff] }
 0x310   : > { %2523 = vmatprep.subr.mxu0 %v2074_v15  ;;  %2448 = vmatprep.subr.mxu1 %v1942_v19  ;;  %v1922_v27 = vld [vmem:[#allocation5 + $0x8a8] sm:$0xff]  ;;  %v2049_v57 = vld [vmem:[#allocation5 + $0xca0] sm:$0xff] }
 0x311   : > { %2524 = vmatpush1.msra.mxu0 %v2073_v12  ;;  %2449 = vmatpush1.msra.mxu1 %v1941_v58  ;;  %v2050_v16 = vld [vmem:[#allocation5 + $0xca8] sm:$0xff]  ;;  %v1917_v53 = vld [vmem:[#allocation5 + $0x880] sm:$0xff] }
 0x312   : > { %2525 = vmatprep.subr.mxu0 %v2070_v20  ;;  %2450 = vmatprep.subr.mxu1 %v1938_v52  ;;  %v1918_v44 = vld [vmem:[#allocation5 + $0x888] sm:$0xff]  ;;  %v2045_v61 = vld [vmem:[#allocation5 + $0xc80] sm:$0xff] }
 0x313   : > { %2526 = vmatpush1.msra.mxu0 %v2069_v46  ;;  %2451 = vmatpush1.msra.mxu1 %v1937_v23  ;;  %v2046_v17 = vld [vmem:[#allocation5 + $0xc88] sm:$0xff]  ;;  %v1913_v5 = vld [vmem:[#allocation5 + $0x860] sm:$0xff] }
 0x314   : > { %2527 = vmatprep.subr.mxu0 %v2066_v25  ;;  %2452 = vmatprep.subr.mxu1 %v1934_v56  ;;  %v1914_v33 = vld [vmem:[#allocation5 + $0x868] sm:$0xff]  ;;  %v2041_v12 = vld [vmem:[#allocation5 + $0xc60] sm:$0xff]  ;;  %v8034_v25 = vpop.permute.xlu1 %1465 }
 0x315   : > { %2528 = vmatpush1.msra.mxu0 %v2065_v31  ;;  %2453 = vmatpush1.msra.mxu1 %v1933_v47  ;;  %v2042_v15 = vld [vmem:[#allocation5 + $0xc68] sm:$0xff]  ;;  %v1909_v58 = vld [vmem:[#allocation5 + $0x840] sm:$0xff] }
 0x316   : > { %2529 = vmatprep.subr.mxu0 %v2062_v24  ;;  %2454 = vmatprep.subr.mxu1 %v1930_v9  ;;  %v1910_v19 = vld [vmem:[#allocation5 + $0x848] sm:$0xff]  ;;  %v2037_v46 = vld [vmem:[#allocation5 + $0xc40] sm:$0xff]  ;;  %v6773_v9 = vunpack.i.h.bf16 %v8011_v63 }
 0x317   : > { %2530 = vmatpush1.msra.mxu0 %v2061_v45  ;;  %2455 = vmatpush1.msra.mxu1 %v1929_v50  ;;  %v2038_v20 = vld [vmem:[#allocation5 + $0xc48] sm:$0xff]  ;;  %v1905_v23 = vld [vmem:[#allocation5 + $0x820] sm:$0xff] }
 0x318   : > { %2531 = vmatprep.subr.mxu0 %v2058_v30  ;;  %2456 = vmatprep.subr.mxu1 %v1926_v42  ;;  %v1906_v52 = vld [vmem:[#allocation5 + $0x828] sm:$0xff]  ;;  %v2033_v47 = vld [vmem:[#allocation5 + $0xc20] sm:$0xff] }
 0x319   : > { %2532 = vmatpush1.msra.mxu0 %v2057_v39  ;;  %2457 = vmatpush1.msra.mxu1 %v1925_v51  ;;  %v2034_v56 = vld [vmem:[#allocation5 + $0xc28] sm:$0xff]  ;;  %v1901_v24 = vld [vmem:[#allocation5 + $0x800] sm:$0xff] }
 0x31a   : > { %2533 = vmatprep.subr.mxu0 %v2054_v41  ;;  %2458 = vmatprep.subr.mxu1 %v1922_v27  ;;  %v1902_v31 = vld [vmem:[#allocation5 + $0x808] sm:$0xff]  ;;  %v2029_v30 = vld [vmem:[#allocation5 + $0xc00] sm:$0xff] }
 0x31b   : > { %2534 = vmatpush1.msra.mxu0 %v2053_v37  ;;  %2459 = vmatpush1.msra.mxu1 %v1921_v14  ;;  %v2030_v45 = vld [vmem:[#allocation5 + $0xc08] sm:$0xff]  ;;  %v2025_v42 = vld [vmem:[#allocation5 + $0xbe0] sm:$0xff]  ;;  %v1598_v14 = vsel %vm663_vm5, %v6768_v29, %v6773_v9 }
 0x31c   : > { %2535 = vmatprep.subr.mxu0 %v2050_v16  ;;  %2460 = vmatprep.subr.mxu1 %v1918_v44  ;;  %v2026_v50 = vld [vmem:[#allocation5 + $0xbe8] sm:$0xff]  ;;  %v2153_v37 = vld [vmem:[#allocation5 + $0xfe0] sm:$0xff]  ;;  %v8050_v11 = vmax.f32 %v7886_v59, %v1598_v14 }
 0x31d   : > { %2536 = vmatpush1.msra.mxu0 %v2049_v57  ;;  %2461 = vmatpush1.msra.mxu1 %v1917_v53  ;;  %v2154_v51 = vld [vmem:[#allocation5 + $0xfe8] sm:$0xff]  ;;  %v2021_v63 = vld [vmem:[#allocation5 + $0xbc0] sm:$0xff] }
 0x31e   : > { %2537 = vmatprep.subr.mxu0 %v2046_v17  ;;  %2462 = vmatprep.subr.mxu1 %v1914_v33  ;;  %v2022_v41 = vld [vmem:[#allocation5 + $0xbc8] sm:$0xff]  ;;  %v2149_v53 = vld [vmem:[#allocation5 + $0xfc0] sm:$0xff] }
 0x31f   : > { %2538 = vmatpush1.msra.mxu0 %v2045_v61  ;;  %2463 = vmatpush1.msra.mxu1 %v1913_v5  ;;  %v2150_v16 = vld [vmem:[#allocation5 + $0xfc8] sm:$0xff]  ;;  %v2017_v33 = vld [vmem:[#allocation5 + $0xba0] sm:$0xff] }
 0x320   : > { %2539 = vmatprep.subr.mxu0 %v2042_v15  ;;  %2464 = vmatprep.subr.mxu1 %v1910_v19  ;;  %v2018_v44 = vld [vmem:[#allocation5 + $0xba8] sm:$0xff]  ;;  %v2145_v5 = vld [vmem:[#allocation5 + $0xfa0] sm:$0xff] }
 0x321   : > { %2540 = vmatpush1.msra.mxu0 %v2041_v12  ;;  %2465 = vmatpush1.msra.mxu1 %v1909_v58  ;;  %v2146_v29 = vld [vmem:[#allocation5 + $0xfa8] sm:$0xff]  ;;  %v2013_v15 = vld [vmem:[#allocation5 + $0xb80] sm:$0xff] }
 0x322   : > { %2541 = vmatprep.subr.mxu0 %v2038_v20  ;;  %2466 = vmatprep.subr.mxu1 %v1906_v52  ;;  %v2014_v61 = vld [vmem:[#allocation5 + $0xb88] sm:$0xff]  ;;  %v2141_v12 = vld [vmem:[#allocation5 + $0xf80] sm:$0xff] }
 0x323   : > { %2542 = vmatpush1.msra.mxu0 %v2037_v46  ;;  %2467 = vmatpush1.msra.mxu1 %v1905_v23  ;;  %v2010_v19 = vld [vmem:[#allocation5 + $0xb68] sm:$0xff]  ;;  %v2009_v58 = vld [vmem:[#allocation5 + $0xb60] sm:$0xff] }
 0x324   : > { %2543 = vmatprep.subr.mxu0 %v2034_v56  ;;  %2468 = vmatprep.subr.mxu1 %v1902_v31  ;;  %v2138_v59 = vld [vmem:[#allocation5 + $0xf68] sm:$0xff]  ;;  %v2137_v52 = vld [vmem:[#allocation5 + $0xf60] sm:$0xff] }
 0x325   : > { %v8037_v39 = vpop.permute.xlu1 %6775  ;;  %2544 = vmatpush1.msra.mxu0 %v2033_v47  ;;  %2469 = vmatpush1.msra.mxu1 %v1901_v24  ;;  %v2006_v20 = vld [vmem:[#allocation5 + $0xb48] sm:$0xff]  ;;  %v2005_v46 = vld [vmem:[#allocation5 + $0xb40] sm:$0xff] }
 0x326   : > { %v6777_v27 = vunpack.i.l.bf16 %v8037_v39  ;;  %2545 = vmatprep.subr.mxu0 %v2030_v45  ;;  %2470 = vmatprep.subr.mxu1 %v2026_v50  ;;  %v2134_v23 = vld [vmem:[#allocation5 + $0xf48] sm:$0xff]  ;;  %v2133_v31 = vld [vmem:[#allocation5 + $0xf40] sm:$0xff] }
 0x327   : > { %2546 = vmatpush1.msra.mxu0 %v2029_v30  ;;  %2471 = vmatpush2.msra.mxu1 %v2025_v42  ;;  %v2002_v56 = vld [vmem:[#allocation5 + $0xb28] sm:$0xff]  ;;  %v2001_v47 = vld [vmem:[#allocation5 + $0xb20] sm:$0xff] }
 0x328   : > { %v1599_v57 = vsel %vm663_vm5, %v6773_v9, %v6777_v27  ;;  %2547 = vmatprep.subr.mxu0 %v2154_v51  ;;  %2472 = vmatprep.subr.mxu1 %v2022_v41  ;;  %v2130_v24 = vld [vmem:[#allocation5 + $0xf28] sm:$0xff]  ;;  %v2129_v45 = vld [vmem:[#allocation5 + $0xf20] sm:$0xff] }
 0x329   : > { %v8047_v17 = vmax.f32 %v7903_v3, %v1599_v57  ;;  %2548 = vmatpush2.msra.mxu0 %v2153_v37  ;;  %2473 = vmatpush2.msra.mxu1 %v2021_v63  ;;  %v2142_v3 = vld [vmem:[#allocation5 + $0xf88] sm:$0xff]  ;;  %v1997_v50 = vld [vmem:[#allocation5 + $0xb00] sm:$0xff] }
 0x32a   : > { %2549 = vmatprep.subr.mxu0 %v2150_v16  ;;  %2474 = vmatprep.subr.mxu1 %v2018_v44  ;;  %v1998_v9 = vld [vmem:[#allocation5 + $0xb08] sm:$0xff]  ;;  %v2125_v51 = vld [vmem:[#allocation5 + $0xf00] sm:$0xff] }
 0x32b   : > { %2431 = vmatprep.mubr.f32.mxu0 %v8047_v17  ;;  %2550 = vmatpush2.msra.mxu0 %v2149_v53  ;;  %v2126_v30 = vld [vmem:[#allocation5 + $0xf08] sm:$0xff]  ;;  %v1993_v41 = vld [vmem:[#allocation5 + $0xae0] sm:$0xff] }
 0x32c   : > { %2432 = vmatmul.mubr.f32.gmra.mxu0 %v8050_v11  ;;  %2475 = vmatpush2.msra.mxu1 %v2017_v33  ;;  %v1994_v42 = vld [vmem:[#allocation5 + $0xae8] sm:$0xff]  ;;  %v2121_v14 = vld [vmem:[#allocation5 + $0xee0] sm:$0xff] }
 0x32d   : > { %2551 = vmatprep.subr.mxu0 %v2146_v29  ;;  %2476 = vmatprep.subr.mxu1 %v2014_v61  ;;  %v2122_v37 = vld [vmem:[#allocation5 + $0xee8] sm:$0xff]  ;;  %v1989_v16 = vld [vmem:[#allocation5 + $0xac0] sm:$0xff] }
 0x32e   : > { %2552 = vmatpush2.msra.mxu0 %v2145_v5  ;;  %2477 = vmatpush2.msra.mxu1 %v2013_v15  ;;  %v1990_v63 = vld [vmem:[#allocation5 + $0xac8] sm:$0xff]  ;;  %v2117_v53 = vld [vmem:[#allocation5 + $0xec0] sm:$0xff] }
 0x32f   : > { %2553 = vmatprep.subr.mxu0 %v2142_v3  ;;  %2478 = vmatprep.subr.mxu1 %v2010_v19  ;;  %v2118_v44 = vld [vmem:[#allocation5 + $0xec8] sm:$0xff]  ;;  %v1985_v33 = vld [vmem:[#allocation5 + $0xaa0] sm:$0xff] }
 0x330   : > { %2554 = vmatpush2.msra.mxu0 %v2141_v12  ;;  %2479 = vmatpush2.msra.mxu1 %v2009_v58  ;;  %v1986_v57 = vld [vmem:[#allocation5 + $0xaa8] sm:$0xff]  ;;  %v2113_v5 = vld [vmem:[#allocation5 + $0xea0] sm:$0xff] }
 0x331   : > { %2555 = vmatprep.subr.mxu0 %v2138_v59  ;;  %2480 = vmatprep.subr.mxu1 %v2006_v20  ;;  %v2114_v29 = vld [vmem:[#allocation5 + $0xea8] sm:$0xff]  ;;  %v1981_v15 = vld [vmem:[#allocation5 + $0xa80] sm:$0xff] }
 0x332   : > { %2556 = vmatpush2.msra.mxu0 %v2137_v52  ;;  %2481 = vmatpush2.msra.mxu1 %v2005_v46  ;;  %v1982_v61 = vld [vmem:[#allocation5 + $0xa88] sm:$0xff]  ;;  %v2109_v12 = vld [vmem:[#allocation5 + $0xe80] sm:$0xff] }
 0x333   : > { %2557 = vmatprep.subr.mxu0 %v2134_v23  ;;  %2482 = vmatprep.subr.mxu1 %v2002_v56  ;;  %v2110_v3 = vld [vmem:[#allocation5 + $0xe88] sm:$0xff]  ;;  %v1977_v58 = vld [vmem:[#allocation5 + $0xa60] sm:$0xff] }
 0x334   : > { %2558 = vmatpush2.msra.mxu0 %v2133_v31  ;;  %2483 = vmatpush2.msra.mxu1 %v2001_v47  ;;  %v1978_v19 = vld [vmem:[#allocation5 + $0xa68] sm:$0xff]  ;;  %v2105_v52 = vld [vmem:[#allocation5 + $0xe60] sm:$0xff] }
 0x335   : > { %2559 = vmatprep.subr.mxu0 %v2130_v24  ;;  %2484 = vmatprep.subr.mxu1 %v1998_v9  ;;  %v2106_v59 = vld [vmem:[#allocation5 + $0xe68] sm:$0xff]  ;;  %v1973_v46 = vld [vmem:[#allocation5 + $0xa40] sm:$0xff] }
 0x336   : > { %2560 = vmatpush2.msra.mxu0 %v2129_v45  ;;  %2485 = vmatpush2.msra.mxu1 %v1997_v50  ;;  %v1974_v20 = vld [vmem:[#allocation5 + $0xa48] sm:$0xff]  ;;  %v2101_v31 = vld [vmem:[#allocation5 + $0xe40] sm:$0xff] }
 0x337   : > { %2561 = vmatprep.subr.mxu0 %v2126_v30  ;;  %2486 = vmatprep.subr.mxu1 %v1994_v42  ;;  %v2102_v23 = vld [vmem:[#allocation5 + $0xe48] sm:$0xff]  ;;  %v1969_v47 = vld [vmem:[#allocation5 + $0xa20] sm:$0xff] }
 0x338   : > { %2562 = vmatpush2.msra.mxu0 %v2125_v51  ;;  %2487 = vmatpush2.msra.mxu1 %v1993_v41  ;;  %v1970_v56 = vld [vmem:[#allocation5 + $0xa28] sm:$0xff]  ;;  %v2097_v45 = vld [vmem:[#allocation5 + $0xe20] sm:$0xff]  ;;  %v1708_v41 = vld [vmem:[#allocation5 + $0x1f8] sm:$0xff] }
 0x339   : > { %2563 = vmatprep.subr.mxu0 %v2122_v37  ;;  %2488 = vmatprep.subr.mxu1 %v1990_v63  ;;  %v2098_v24 = vld [vmem:[#allocation5 + $0xe28] sm:$0xff]  ;;  %v1965_v50 = vld [vmem:[#allocation5 + $0xa00] sm:$0xff]  ;;  %v6778_v37 = vunpack.i.h.bf16 %v8037_v39 }
 0x33a   : > { %2564 = vmatpush2.msra.mxu0 %v2121_v14  ;;  %2489 = vmatpush2.msra.mxu1 %v1989_v16  ;;  %v1966_v9 = vld [vmem:[#allocation5 + $0xa08] sm:$0xff]  ;;  %v2093_v51 = vld [vmem:[#allocation5 + $0xe00] sm:$0xff] }
 0x33b   : > { %2565 = vmatprep.subr.mxu0 %v2118_v44  ;;  %2490 = vmatprep.subr.mxu1 %v1986_v57  ;;  %v2094_v30 = vld [vmem:[#allocation5 + $0xe08] sm:$0xff]  ;;  %v1591_v44 = vsel %vm663_vm5, %v7946_v8, %v6778_v37 }
 0x33c   : > { %2566 = vmatpush2.msra.mxu0 %v2117_v53  ;;  %2491 = vmatpush2.msra.mxu1 %v1985_v33  ;;  %v2218_v42 = vld [vmem:[#allocation5 + $0x11e8] sm:$0xff]  ;;  %v1485_v53 = vsel %vm583_vm0, %v6763_v49, %v8034_v25  ;;  %v8077_v28 = vmax.f32 %v7857_v22, %v1591_v44  ;;  %v1687_v44 = vld [vmem:[#allocation5 + $0x150] sm:$0xff] }
 0x33d   : > { %2567 = vmatprep.subr.mxu0 %v2114_v29  ;;  %2492 = vmatprep.subr.mxu1 %v1982_v61  ;;  %v2214_v22 = vld [vmem:[#allocation5 + $0x11c8] sm:$0xff] }
 0x33e   : > { %2568 = vmatpush2.msra.mxu0 %v2113_v5  ;;  %2493 = vmatpush2.msra.mxu1 %v1981_v15  ;;  %v2198_v39 = vld [vmem:[#allocation5 + $0x1148] sm:$0xff] }
 0x33f   : > { %2569 = vmatprep.subr.mxu0 %v2110_v3  ;;  %2494 = vmatprep.subr.mxu1 %v1978_v19 }
 0x340   : > { %2570 = vmatpush2.msra.mxu0 %v2109_v12  ;;  %2495 = vmatpush2.msra.mxu1 %v1977_v58  ;;  %v2217_v12 = vld [vmem:[#allocation5 + $0x11e0] sm:$0xff] }
 0x341   : > { %2571 = vmatprep.subr.mxu0 %v2106_v59  ;;  %2496 = vmatprep.subr.mxu1 %v1974_v20  ;;  %v2209_v58 = vld [vmem:[#allocation5 + $0x11a0] sm:$0xff]  ;;  %v1703_v59 = vld [vmem:[#allocation5 + $0x1d0] sm:$0xff]  ;;  %v2206_v20 = vld [vmem:[#allocation5 + $0x1188] sm:$0xff] }
 0x342   : > { %2572 = vmatpush2.msra.mxu0 %v2105_v52  ;;  %2497 = vmatpush2.msra.mxu1 %v1973_v46  ;;  %v1700_v52 = vld [vmem:[#allocation5 + $0x1b8] sm:$0xff] }
 0x343   : > { %2573 = vmatprep.subr.mxu0 %v2102_v23  ;;  %2498 = vmatprep.subr.mxu1 %v1970_v56  ;;  %v2205_v23 = vld [vmem:[#allocation5 + $0x1180] sm:$0xff] }
 0x344   : > { %2574 = vmatpush2.msra.mxu0 %v2101_v31  ;;  %2499 = vmatpush2.msra.mxu1 %v1969_v47 }
 0x345   : > { %2575 = vmatprep.subr.mxu0 %v2098_v24  ;;  %2500 = vmatprep.subr.mxu1 %v1966_v9  ;;  %v2202_v24 = vld [vmem:[#allocation5 + $0x1168] sm:$0xff] }
 0x346   : > { %2576 = vmatpush2.msra.mxu0 %v2097_v45  ;;  %2501 = vmatpush2.msra.mxu1 %v1965_v50  ;;  %v2201_v45 = vld [vmem:[#allocation5 + $0x1160] sm:$0xff] }
 0x347   : > { %2577 = vmatprep.subr.mxu0 %v2094_v30  ;;  %2592 = vmatprep.subr.mxu1 %v2218_v42  ;;  %v2194_v30 = vld [vmem:[#allocation5 + $0x1128] sm:$0xff]  ;;  %v1695_v42 = vld [vmem:[#allocation5 + $0x190] sm:$0xff] }
 0x348   : > { %2578 = vmatpush2.msra.mxu0 %v2093_v51  ;;  %v2193_v51 = vld [vmem:[#allocation5 + $0x1120] sm:$0xff] }
 0x349   : > { %2669 = vmatprep.subr.mxu0 %v1708_v41  ;;  %v2190_v41 = vld [vmem:[#allocation5 + $0x1108] sm:$0xff] }
 0x377   : > { %v6781_v63 = vpop.permute.xlu0 %6780  ;;  %v8057_v57 = vpop.permute.xlu1 %1563 }
 0x378   : > { %v6783_v14 = vunpack.i.h.bf16 %v6781_v63  ;;  %v6782_v16 = vunpack.i.l.bf16 %v6781_v63  ;;  %v2189_v63 = vld [vmem:[#allocation5 + $0x1100] sm:$0xff] }
 0x37a   : > { %v1593_v33 = vsel %vm663_vm5, %v6782_v16, %v6783_v14  ;;  %v1594_v29 = vsel %vm663_vm5, %v6783_v14, %v8057_v57  ;;  %v1592_v61 = vsel %vm663_vm5, %v6778_v37, %v6782_v16  ;;  %v1691_v37 = vld [vmem:[#allocation5 + $0x170] sm:$0xff]  ;;  %v1688_v14 = vld [vmem:[#allocation5 + $0x158] sm:$0xff]  ;;  %v2186_v16 = vld [vmem:[#allocation5 + $0x10e8] sm:$0xff] }
 0x37b   : > { %v8068_v5 = vmax.f32 %v7950_v34, %v1593_v33  ;;  %v8071_v15 = vmax.f32 %v7965_v26, %v1594_v29  ;;  %v1468_v8 = vpop.permute.xlu0 %1467  ;;  %v8074_v3 = vmax.f32 %v7936_v7, %v1592_v61  ;;  %v8087_v34 = vmax.f32 %v1406_v0, %v1485_v53  ;;  %v1707_v7 = vld [vmem:[#allocation5 + $0x1f0] sm:$0xff]  ;;  %v8106_v46 = vpop.permute.xlu1 %1565  ;;  %v2185_v53 = vld [vmem:[#allocation5 + $0x10e0] sm:$0xff]  ;;  %v1684_v33 = vld [vmem:[#allocation5 + $0x138] sm:$0xff] }
 0x37c   : > { %v1486_v49 = vsel %vm583_vm0, %v8034_v25, %v1468_v8  ;;  %v8083_v19 = vmax.f32 %v1408_v1, %v1468_v8  ;;  %v8122_v50 = vmax.f32 %v8001_v54, %v8106_v46  ;;  %v1692_v54 = vld [vmem:[#allocation5 + $0x178] sm:$0xff]  ;;  %v2182_v29 = vld [vmem:[#allocation5 + $0x10c8] sm:$0xff]  ;;  %v1683_v61 = vld [vmem:[#allocation5 + $0x130] sm:$0xff] }
 0x37d   : > { %v8091_v26 = vmax.f32 %v1407_v13, %v1486_v49  ;;  %2502 = vmatprep.mubr.f32.mxu1 %v8074_v3  ;;  %2579 = vmatprep.mubr.f32.mxu0 %v8071_v15  ;;  %v1704_v13 = vld [vmem:[#allocation5 + $0x1d8] sm:$0xff]  ;;  %v2181_v8 = vld [vmem:[#allocation5 + $0x10c0] sm:$0xff] }
 0x37e   : > { %1585 = vrot.lane.b32.xlu1 %v8083_v19, %s7012_s25  ;;  %2503 = vmatmul.mubr.f32.vlgmr.msra.gmra.mxu1 %v8077_v28  ;;  %v1680_v49 = vld [vmem:[#allocation5 + $0x118] sm:$0xff] }
 0x37f   : > { %v6789_v36 = vpack.i.bf16 %v8091_v26, %v8087_v34  ;;  %2580 = vmatmul.mubr.f32.vlgmr.msra.gmra.mxu0 %v8068_v5  ;;  %2593 = vmatpush1.msra.mxu1 %v2217_v12  ;;  %v8101_v0 = vpop.permute.xlu0 %6785  ;;  %v2178_v12 = vld [vmem:[#allocation5 + $0x10a8] sm:$0xff] }
 0x380   : > { %v6788_v1 = vunpack.i.h.bf16 %v8101_v0  ;;  %v6787_v25 = vunpack.i.l.bf16 %v8101_v0  ;;  %2594 = vmatprep.subr.mxu1 %v2214_v22  ;;  %2670 = vmatpush1.msra.mxu0 %v1707_v7  ;;  %v1679_v22 = vld [vmem:[#allocation5 + $0x110] sm:$0xff]  ;;  %v2177_v7 = vld [vmem:[#allocation5 + $0x10a0] sm:$0xff] }
 0x381   : > { %2595 = vmatpush1.msra.mxu1 %v2213_v32  ;;  %6790 = vrot.lane.b32.xlu0 %v6789_v36, %s7012_s25  ;;  %v1676_v32 = vld [vmem:[#allocation5 + $0xf8] sm:$0xff]  ;;  %v2174_v36 = vld [vmem:[#allocation5 + $0x1088] sm:$0xff]  ;;  %v2091_v0 = vld [vmem:[#allocation5 + $0xdf0] sm:$0xff]  ;;  %s7020_s25 = smov 107  }
 0x382   : > { %2596 = vmatprep.subr.mxu1 %v2210_v62  ;;  %v1601_v56 = vsel %vm663_vm5, %v6787_v25, %v6788_v1  ;;  %v1600_v31 = vsel %vm663_vm5, %v6777_v27, %v6787_v25  ;;  %2671 = vmatprep.subr.mxu0 %v1704_v13  ;;  %v1699_v27 = vld [vmem:[#allocation5 + $0x1b0] sm:$0xff]  ;;  %v2173_v13 = vld [vmem:[#allocation5 + $0x1080] sm:$0xff]  ;;  %v1672_v25 = vld [vmem:[#allocation5 + $0xd8] sm:$0xff] }
 0x383   : > { %2597 = vmatpush1.msra.mxu1 %v2209_v58  ;;  %v8115_v47 = vmax.f32 %v8005_v18, %v1601_v56  ;;  %v8118_v9 = vmax.f32 %v7932_v10, %v1600_v31  ;;  %2672 = vmatpush1.msra.mxu0 %v1703_v59  ;;  %v2197_v18 = vld [vmem:[#allocation5 + $0x1140] sm:$0xff]  ;;  %v1696_v10 = vld [vmem:[#allocation5 + $0x198] sm:$0xff]  ;;  %v1675_v62 = vld [vmem:[#allocation5 + $0xf0] sm:$0xff] }
 0x384   : > { %2598 = vmatprep.subr.mxu1 %v2206_v20  ;;  %2673 = vmatprep.subr.mxu0 %v1700_v52  ;;  %v2170_v58 = vld [vmem:[#allocation5 + $0x1068] sm:$0xff]  ;;  %v1671_v59 = vld [vmem:[#allocation5 + $0xd0] sm:$0xff]  ;;  %v2169_v20 = vld [vmem:[#allocation5 + $0x1060] sm:$0xff] }
 0x385   : > { %2599 = vmatpush1.msra.mxu1 %v2205_v23  ;;  %2508 = vmatprep.mubr.f32.mxu1 %v8115_v47  ;;  %v1668_v52 = vld [vmem:[#allocation5 + $0xb8] sm:$0xff]  ;;  %v2166_v23 = vld [vmem:[#allocation5 + $0x1048] sm:$0xff]  ;;  %v1667_v56 = vld [vmem:[#allocation5 + $0xb0] sm:$0xff] }
 0x386   : > { %2600 = vmatprep.subr.mxu1 %v2202_v24  ;;  %2509 = vmatmul.mubr.f32.gmra.mxu1 %v8118_v9  ;;  %v2165_v31 = vld [vmem:[#allocation5 + $0x1040] sm:$0xff]  ;;  %v1664_v24 = vld [vmem:[#allocation5 + $0x98] sm:$0xff] }
 0x387   : > { %2601 = vmatpush1.msra.mxu1 %v2201_v45  ;;  %6488 = vmatprep.mubr.msk.f32.mxu1 %vm2265_vm1, %v8122_v50  ;;  %v2162_v45 = vld [vmem:[#allocation5 + $0x1028] sm:$0xff] }
 0x388   : > { %2602 = vmatprep.subr.mxu1 %v2198_v39  ;;  %2674 = vmatpush1.msra.mxu0 %v1699_v27  ;;  %v1663_v39 = vld [vmem:[#allocation5 + $0x90] sm:$0xff]  ;;  %v2161_v27 = vld [vmem:[#allocation5 + $0x1020] sm:$0xff] }
 0x389   : > { %2603 = vmatpush1.msra.mxu1 %v2197_v18  ;;  %2675 = vmatprep.subr.mxu0 %v1696_v10  ;;  %v1660_v18 = vld [vmem:[#allocation5 + $0x78] sm:$0xff]  ;;  %v2158_v10 = vld [vmem:[#allocation5 + $0x1008] sm:$0xff] }
 0x38a   : > { %2604 = vmatprep.subr.mxu1 %v2194_v30  ;;  %2676 = vmatpush1.msra.mxu0 %v1695_v42  ;;  %v1659_v30 = vld [vmem:[#allocation5 + $0x70] sm:$0xff]  ;;  %v2157_v42 = vld [vmem:[#allocation5 + $0x1000] sm:$0xff] }
 0x38b   : > { %2605 = vmatpush1.msra.mxu1 %v2193_v51  ;;  %2677 = vmatprep.subr.mxu0 %v1692_v54  ;;  %v1656_v51 = vld [vmem:[#allocation5 + $0x58] sm:$0xff]  ;;  %v2262_v54 = vld [vmem:[#allocation5 + $0x1348] sm:$0x7f] }
 0x38c   : > { %2606 = vmatprep.subr.mxu1 %v2190_v41  ;;  %2678 = vmatpush1.msra.mxu0 %v1691_v37  ;;  %v1655_v41 = vld [vmem:[#allocation5 + $0x50] sm:$0xff]  ;;  %v2261_v37 = vld [vmem:[#allocation5 + $0x1340] sm:$0x7f] }
 0x38d   : > { %2607 = vmatpush1.msra.mxu1 %v2189_v63  ;;  %2679 = vmatprep.subr.mxu0 %v1688_v14  ;;  %v1652_v63 = vld [vmem:[#allocation5 + $0x38] sm:$0xff]  ;;  %v2258_v14 = vld [vmem:[#allocation5 + $0x1328] sm:$0xff] }
 0x38e   : > { %2608 = vmatprep.subr.mxu1 %v2186_v16  ;;  %2680 = vmatpush1.msra.mxu0 %v1687_v44  ;;  %v1651_v16 = vld [vmem:[#allocation5 + $0x30] sm:$0xff]  ;;  %v2257_v44 = vld [vmem:[#allocation5 + $0x1320] sm:$0xff] }
 0x38f   : > { %2609 = vmatpush1.msra.mxu1 %v2185_v53  ;;  %2681 = vmatprep.subr.mxu0 %v1684_v33  ;;  %v1648_v53 = vld [vmem:[#allocation5 + $0x18] sm:$0xff]  ;;  %v2254_v33 = vld [vmem:[#allocation5 + $0x1308] sm:$0xff] }
 0x390   : > { %2610 = vmatprep.subr.mxu1 %v2182_v29  ;;  %2682 = vmatpush1.msra.mxu0 %v1683_v61  ;;  %v1647_v29 = vld [vmem:[#allocation5 + $0x10] sm:$0xff]  ;;  %v2253_v61 = vld [vmem:[#allocation5 + $0x1300] sm:$0xff] }
 0x391   : > { %2611 = vmatpush1.msra.mxu1 %v2181_v8  ;;  %2683 = vmatprep.subr.mxu0 %v1680_v49  ;;  %v1772_v8 = vld [vmem:[#allocation5 + $0x3f8] sm:$0xff]  ;;  %v2250_v49 = vld [vmem:[#allocation5 + $0x12e8] sm:$0xff] }
 0x392   : > { %2612 = vmatprep.subr.mxu1 %v2178_v12  ;;  %2684 = vmatpush1.msra.mxu0 %v1679_v22  ;;  %v1771_v12 = vld [vmem:[#allocation5 + $0x3f0] sm:$0xff]  ;;  %v2249_v22 = vld [vmem:[#allocation5 + $0x12e0] sm:$0xff] }
 0x393   : > { %2613 = vmatpush1.msra.mxu1 %v2177_v7  ;;  %2685 = vmatprep.subr.mxu0 %v1676_v32  ;;  %v1768_v7 = vld [vmem:[#allocation5 + $0x3d8] sm:$0xff]  ;;  %v2246_v32 = vld [vmem:[#allocation5 + $0x12c8] sm:$0xff] }
 0x394   : > { %2614 = vmatprep.subr.mxu1 %v2174_v36  ;;  %2686 = vmatpush1.msra.mxu0 %v1675_v62  ;;  %v1767_v36 = vld [vmem:[#allocation5 + $0x3d0] sm:$0xff]  ;;  %v2245_v62 = vld [vmem:[#allocation5 + $0x12c0] sm:$0xff] }
 0x395   : > { %2615 = vmatpush1.msra.mxu1 %v2173_v13  ;;  %2687 = vmatprep.subr.mxu0 %v1672_v25  ;;  %v1764_v13 = vld [vmem:[#allocation5 + $0x3b8] sm:$0xff]  ;;  %v2242_v25 = vld [vmem:[#allocation5 + $0x12a8] sm:$0xff] }
 0x396   : > { %2616 = vmatprep.subr.mxu1 %v2170_v58  ;;  %2688 = vmatpush1.msra.mxu0 %v1671_v59  ;;  %v1763_v58 = vld [vmem:[#allocation5 + $0x3b0] sm:$0xff]  ;;  %v2241_v59 = vld [vmem:[#allocation5 + $0x12a0] sm:$0xff] }
 0x397   : > { %2617 = vmatpush1.msra.mxu1 %v2169_v20  ;;  %2689 = vmatprep.subr.mxu0 %v1668_v52  ;;  %v1760_v20 = vld [vmem:[#allocation5 + $0x398] sm:$0xff]  ;;  %v2238_v52 = vld [vmem:[#allocation5 + $0x1288] sm:$0xff] }
 0x398   : > { %2618 = vmatprep.subr.mxu1 %v2166_v23  ;;  %2690 = vmatpush1.msra.mxu0 %v1667_v56  ;;  %v1759_v23 = vld [vmem:[#allocation5 + $0x390] sm:$0xff]  ;;  %v2237_v56 = vld [vmem:[#allocation5 + $0x1280] sm:$0xff] }
 0x399   : > { %2619 = vmatpush1.msra.mxu1 %v2165_v31  ;;  %2691 = vmatprep.subr.mxu0 %v1664_v24  ;;  %v1756_v31 = vld [vmem:[#allocation5 + $0x378] sm:$0xff]  ;;  %v2234_v24 = vld [vmem:[#allocation5 + $0x1268] sm:$0xff] }
 0x39a   : > { %2620 = vmatprep.subr.mxu1 %v2162_v45  ;;  %2692 = vmatpush1.msra.mxu0 %v1663_v39  ;;  %v1755_v45 = vld [vmem:[#allocation5 + $0x370] sm:$0xff]  ;;  %v2233_v39 = vld [vmem:[#allocation5 + $0x1260] sm:$0xff] }
 0x39b   : > { %2621 = vmatpush1.msra.mxu1 %v2161_v27  ;;  %2693 = vmatprep.subr.mxu0 %v1660_v18  ;;  %v1752_v27 = vld [vmem:[#allocation5 + $0x358] sm:$0xff]  ;;  %v2230_v18 = vld [vmem:[#allocation5 + $0x1248] sm:$0xff] }
 0x39c   : > { %2622 = vmatprep.subr.mxu1 %v2158_v10  ;;  %2694 = vmatpush1.msra.mxu0 %v1659_v30  ;;  %v1751_v10 = vld [vmem:[#allocation5 + $0x350] sm:$0xff]  ;;  %v2229_v30 = vld [vmem:[#allocation5 + $0x1240] sm:$0xff] }
 0x39d   : > { %2623 = vmatpush1.msra.mxu1 %v2157_v42  ;;  %2695 = vmatprep.subr.mxu0 %v1656_v51  ;;  %v1748_v42 = vld [vmem:[#allocation5 + $0x338] sm:$0xff]  ;;  %v2226_v51 = vld [vmem:[#allocation5 + $0x1228] sm:$0xff] }
 0x39e   : > { %6486 = vmatprep.subr.msk.mxu1 %vm952_vm14, %v2262_v54  ;;  %2696 = vmatpush1.msra.mxu0 %v1655_v41  ;;  %v1747_v54 = vld [vmem:[#allocation5 + $0x330] sm:$0xff]  ;;  %v2225_v41 = vld [vmem:[#allocation5 + $0x1220] sm:$0xff] }
 0x39f   : > { %6487 = vmatpush2.msk.msra.mxu1 %vm952_vm14, %v2261_v37  ;;  %2697 = vmatprep.subr.mxu0 %v1652_v63  ;;  %v1744_v37 = vld [vmem:[#allocation5 + $0x318] sm:$0xff]  ;;  %v1595_v63 = vsel %vm663_vm5, %v8057_v57, %v8106_v46 }
 0x3a0   : > { %2636 = vmatprep.subr.mxu1 %v2258_v14  ;;  %2698 = vmatpush1.msra.mxu0 %v1651_v16  ;;  %v2222_v14 = vld [vmem:[#allocation5 + $0x1208] sm:$0xff]  ;;  %v1743_v16 = vld [vmem:[#allocation5 + $0x310] sm:$0xff]  ;;  %v1832_v57 = vld [vmem:[#allocation5 + $0x5d8] sm:$0xff] }
 0x3a1   : > { %2637 = vmatpush2.msra.mxu1 %v2257_v44  ;;  %2699 = vmatprep.subr.mxu0 %v1648_v53  ;;  %v2221_v44 = vld [vmem:[#allocation5 + $0x1200] sm:$0xff]  ;;  %v1740_v53 = vld [vmem:[#allocation5 + $0x2f8] sm:$0xff] }
 0x3a2   : > { %2638 = vmatprep.subr.mxu1 %v2254_v33  ;;  %2700 = vmatpush1.msra.mxu0 %v1647_v29  ;;  %v1836_v33 = vld [vmem:[#allocation5 + $0x5f8] sm:$0xff]  ;;  %v8134_v29 = vmax.f32 %v7978_v55, %v1595_v63  ;;  %v1827_v55 = vld [vmem:[#allocation5 + $0x5b0] sm:$0xff] }
 0x3a3   : > { %2639 = vmatpush2.msra.mxu1 %v2253_v61  ;;  %2701 = vmatprep.subr.mxu0 %v1772_v8  ;;  %v1835_v61 = vld [vmem:[#allocation5 + $0x5f0] sm:$0xff]  ;;  %v1736_v46 = vld [vmem:[#allocation5 + $0x2d8] sm:$0xff] }
 0x3a4   : > { %2640 = vmatprep.subr.mxu1 %v2250_v49  ;;  %2702 = vmatpush2.msra.mxu0 %v1771_v12  ;;  %v1739_v8 = vld [vmem:[#allocation5 + $0x2f0] sm:$0xff]  ;;  %v1800_v63 = vld [vmem:[#allocation5 + $0x4d8] sm:$0xff] }
 0x3a5   : > { %2641 = vmatpush2.msra.mxu1 %v2249_v22  ;;  %2703 = vmatprep.subr.mxu0 %v1768_v7  ;;  %v1831_v49 = vld [vmem:[#allocation5 + $0x5d0] sm:$0xff]  ;;  %v1828_v22 = vld [vmem:[#allocation5 + $0x5b8] sm:$0xff] }
 0x3a6   : > { %2642 = vmatprep.subr.mxu1 %v2246_v32  ;;  %2704 = vmatpush2.msra.mxu0 %v1767_v36  ;;  %v1735_v12 = vld [vmem:[#allocation5 + $0x2d0] sm:$0xff]  ;;  %v1732_v7 = vld [vmem:[#allocation5 + $0x2b8] sm:$0xff] }
 0x3a7   : > { %2643 = vmatpush2.msra.mxu1 %v2245_v62  ;;  %2705 = vmatprep.subr.mxu0 %v1764_v13  ;;  %v1731_v32 = vld [vmem:[#allocation5 + $0x2b0] sm:$0xff]  ;;  %v1824_v36 = vld [vmem:[#allocation5 + $0x598] sm:$0xff] }
 0x3a8   : > { %2644 = vmatprep.subr.mxu1 %v2242_v25  ;;  %2706 = vmatpush2.msra.mxu0 %v1763_v58  ;;  %v1728_v62 = vld [vmem:[#allocation5 + $0x298] sm:$0xff]  ;;  %v1823_v13 = vld [vmem:[#allocation5 + $0x590] sm:$0xff] }
 0x3a9   : > { %2645 = vmatpush2.msra.mxu1 %v2241_v59  ;;  %2707 = vmatprep.subr.mxu0 %v1760_v20  ;;  %v1727_v25 = vld [vmem:[#allocation5 + $0x290] sm:$0xff]  ;;  %v1820_v58 = vld [vmem:[#allocation5 + $0x578] sm:$0xff] }
 0x3aa   : > { %2646 = vmatprep.subr.mxu1 %v2238_v52  ;;  %2708 = vmatpush2.msra.mxu0 %v1759_v23  ;;  %v1724_v59 = vld [vmem:[#allocation5 + $0x278] sm:$0xff]  ;;  %v1819_v20 = vld [vmem:[#allocation5 + $0x570] sm:$0xff] }
 0x3ab   : > { %2647 = vmatpush2.msra.mxu1 %v2237_v56  ;;  %2709 = vmatprep.subr.mxu0 %v1756_v31  ;;  %v1723_v52 = vld [vmem:[#allocation5 + $0x270] sm:$0xff]  ;;  %v1816_v23 = vld [vmem:[#allocation5 + $0x558] sm:$0xff] }
 0x3ac   : > { %2648 = vmatprep.subr.mxu1 %v2234_v24  ;;  %2710 = vmatpush2.msra.mxu0 %v1755_v45  ;;  %v1720_v56 = vld [vmem:[#allocation5 + $0x258] sm:$0xff]  ;;  %v1815_v31 = vld [vmem:[#allocation5 + $0x550] sm:$0xff] }
 0x3ad   : > { %2649 = vmatpush2.msra.mxu1 %v2233_v39  ;;  %2711 = vmatprep.subr.mxu0 %v1752_v27  ;;  %v1719_v24 = vld [vmem:[#allocation5 + $0x250] sm:$0xff]  ;;  %v1812_v45 = vld [vmem:[#allocation5 + $0x538] sm:$0xff] }
 0x3ae   : > { %2650 = vmatprep.subr.mxu1 %v2230_v18  ;;  %2712 = vmatpush2.msra.mxu0 %v1751_v10  ;;  %v1716_v39 = vld [vmem:[#allocation5 + $0x238] sm:$0xff]  ;;  %v1811_v27 = vld [vmem:[#allocation5 + $0x530] sm:$0xff] }
 0x3af   : > { %2651 = vmatpush2.msra.mxu1 %v2229_v30  ;;  %2713 = vmatprep.subr.mxu0 %v1748_v42  ;;  %v1715_v18 = vld [vmem:[#allocation5 + $0x230] sm:$0xff]  ;;  %v1808_v10 = vld [vmem:[#allocation5 + $0x518] sm:$0xff] }
 0x3b0   : > { %2652 = vmatprep.subr.mxu1 %v2226_v51  ;;  %2714 = vmatpush2.msra.mxu0 %v1747_v54  ;;  %v1712_v30 = vld [vmem:[#allocation5 + $0x218] sm:$0xff]  ;;  %v1807_v42 = vld [vmem:[#allocation5 + $0x510] sm:$0xff] }
 0x3b1   : > { %2653 = vmatpush2.msra.mxu1 %v2225_v41  ;;  %2715 = vmatprep.subr.mxu0 %v1744_v37  ;;  %v1711_v51 = vld [vmem:[#allocation5 + $0x210] sm:$0xff]  ;;  %v1804_v54 = vld [vmem:[#allocation5 + $0x4f8] sm:$0xff] }
 0x3b2   : > { %2654 = vmatprep.subr.mxu1 %v2222_v14  ;;  %2716 = vmatpush2.msra.mxu0 %v1743_v16  ;;  %v1964_v41 = vld [vmem:[#allocation5 + $0x9f8] sm:$0xff]  ;;  %v1803_v37 = vld [vmem:[#allocation5 + $0x4f0] sm:$0xff] }
 0x3b3   : > { %2655 = vmatpush2.msra.mxu1 %v2221_v44  ;;  %2717 = vmatprep.subr.mxu0 %v1740_v53  ;;  %v1799_v14 = vld [vmem:[#allocation5 + $0x4d0] sm:$0xff]  ;;  %v1796_v16 = vld [vmem:[#allocation5 + $0x4b8] sm:$0xff] }
 0x3b4   : > { %2657 = vmatmul.mubr.f32.vlgmr.msra.gmra.mxu1 %v8134_v29  ;;  %2746 = vmatprep.subr.mxu1 %v1836_v33  ;;  %v1795_v44 = vld [vmem:[#allocation5 + $0x4b0] sm:$0xff]  ;;  %v1792_v53 = vld [vmem:[#allocation5 + $0x498] sm:$0xff] }
 0x3b5   : > { %2747 = vmatpush1.msra.mxu1 %v1835_v61  ;;  %2718 = vmatpush2.msra.mxu0 %v1739_v8  ;;  %v1791_v33 = vld [vmem:[#allocation5 + $0x490] sm:$0xff]  ;;  %v1788_v61 = vld [vmem:[#allocation5 + $0x478] sm:$0xff] }
 0x3b6   : > { %2748 = vmatprep.subr.mxu1 %v1832_v57  ;;  %2719 = vmatprep.subr.mxu0 %v1736_v46  ;;  %v1787_v8 = vld [vmem:[#allocation5 + $0x470] sm:$0xff]  ;;  %v1784_v57 = vld [vmem:[#allocation5 + $0x458] sm:$0xff] }
 0x3b7   : > { %2749 = vmatpush1.msra.mxu1 %v1831_v49  ;;  %2720 = vmatpush2.msra.mxu0 %v1735_v12  ;;  %v1783_v46 = vld [vmem:[#allocation5 + $0x450] sm:$0xff]  ;;  %v1780_v49 = vld [vmem:[#allocation5 + $0x438] sm:$0xff] }
 0x3b8   : > { %2750 = vmatprep.subr.mxu1 %v1828_v22  ;;  %2721 = vmatprep.subr.mxu0 %v1732_v7  ;;  %v1779_v12 = vld [vmem:[#allocation5 + $0x430] sm:$0xff]  ;;  %v1776_v22 = vld [vmem:[#allocation5 + $0x418] sm:$0xff] }
 0x3b9   : > { %2751 = vmatpush1.msra.mxu1 %v1827_v55  ;;  %2722 = vmatpush2.msra.mxu0 %v1731_v32  ;;  %v1775_v7 = vld [vmem:[#allocation5 + $0x410] sm:$0xff]  ;;  %v1900_v55 = vld [vmem:[#allocation5 + $0x7f8] sm:$0xff] }
 0x3ba   : > { %2752 = vmatprep.subr.mxu1 %v1824_v36  ;;  %2723 = vmatprep.subr.mxu0 %v1728_v62  ;;  %v1899_v32 = vld [vmem:[#allocation5 + $0x7f0] sm:$0xff]  ;;  %v1896_v36 = vld [vmem:[#allocation5 + $0x7d8] sm:$0xff] }
 0x3bb   : > { %2753 = vmatpush1.msra.mxu1 %v1823_v13  ;;  %2724 = vmatpush2.msra.mxu0 %v1727_v25  ;;  %v1895_v62 = vld [vmem:[#allocation5 + $0x7d0] sm:$0xff]  ;;  %v1892_v13 = vld [vmem:[#allocation5 + $0x7b8] sm:$0xff] }
 0x3bc   : > { %2754 = vmatprep.subr.mxu1 %v1820_v58  ;;  %2725 = vmatprep.subr.mxu0 %v1724_v59  ;;  %v1891_v25 = vld [vmem:[#allocation5 + $0x7b0] sm:$0xff]  ;;  %v1888_v58 = vld [vmem:[#allocation5 + $0x798] sm:$0xff] }
 0x3bd   : > { %2755 = vmatpush1.msra.mxu1 %v1819_v20  ;;  %2726 = vmatpush2.msra.mxu0 %v1723_v52  ;;  %v1887_v59 = vld [vmem:[#allocation5 + $0x790] sm:$0xff]  ;;  %v1884_v20 = vld [vmem:[#allocation5 + $0x778] sm:$0xff] }
 0x3be   : > { %2756 = vmatprep.subr.mxu1 %v1816_v23  ;;  %2727 = vmatprep.subr.mxu0 %v1720_v56  ;;  %v1883_v52 = vld [vmem:[#allocation5 + $0x770] sm:$0xff]  ;;  %v1880_v23 = vld [vmem:[#allocation5 + $0x758] sm:$0xff] }
 0x3bf   : > { %2757 = vmatpush1.msra.mxu1 %v1815_v31  ;;  %2728 = vmatpush2.msra.mxu0 %v1719_v24  ;;  %v1879_v56 = vld [vmem:[#allocation5 + $0x750] sm:$0xff]  ;;  %v1876_v31 = vld [vmem:[#allocation5 + $0x738] sm:$0xff] }
 0x3c0   : > { %2758 = vmatprep.subr.mxu1 %v1812_v45  ;;  %2729 = vmatprep.subr.mxu0 %v1716_v39  ;;  %v1875_v24 = vld [vmem:[#allocation5 + $0x730] sm:$0xff]  ;;  %v1872_v45 = vld [vmem:[#allocation5 + $0x718] sm:$0xff] }
 0x3c1   : > { %2759 = vmatpush1.msra.mxu1 %v1811_v27  ;;  %2730 = vmatpush2.msra.mxu0 %v1715_v18  ;;  %v1871_v39 = vld [vmem:[#allocation5 + $0x710] sm:$0xff]  ;;  %v1868_v27 = vld [vmem:[#allocation5 + $0x6f8] sm:$0xff] }
 0x3c2   : > { %2760 = vmatprep.subr.mxu1 %v1808_v10  ;;  %2731 = vmatprep.subr.mxu0 %v1712_v30  ;;  %v1867_v18 = vld [vmem:[#allocation5 + $0x6f0] sm:$0xff]  ;;  %v1864_v10 = vld [vmem:[#allocation5 + $0x6d8] sm:$0xff] }
 0x3c3   : > { %2761 = vmatpush1.msra.mxu1 %v1807_v42  ;;  %2732 = vmatpush2.msra.mxu0 %v1711_v51  ;;  %v1863_v30 = vld [vmem:[#allocation5 + $0x6d0] sm:$0xff]  ;;  %v1860_v42 = vld [vmem:[#allocation5 + $0x6b8] sm:$0xff]  ;;  %v8137_v51 = vpop.f32.mrf.mxu1 }
 0x3c4   : > { %2762 = vmatprep.subr.mxu1 %v1804_v54  ;;  %2823 = vmatprep.subr.mxu0 %v1964_v41  ;;  %v8139_v54 = vpop.f32.mrf.mxu0  ;;  %v1859_v41 = vld [vmem:[#allocation5 + $0x6b0] sm:$0xff] }
 0x3c5   : > { %2763 = vmatpush1.msra.mxu1 %v1803_v37  ;;  %v1856_v37 = vld [vmem:[#allocation5 + $0x698] sm:$0xff] }
 0x3c6   : > { %2764 = vmatprep.subr.mxu1 %v1800_v63  ;;  %v1855_v63 = vld [vmem:[#allocation5 + $0x690] sm:$0xff] }
 0x3c7   : > { %2765 = vmatpush1.msra.mxu1 %v1799_v14  ;;  %v1852_v14 = vld [vmem:[#allocation5 + $0x678] sm:$0xff] }
 0x3c8   : > { %2766 = vmatprep.subr.mxu1 %v1796_v16  ;;  %v8141_v16 = vpop.f32.mrf.mxu1 }
 0x3c9   : > { %2767 = vmatpush1.msra.mxu1 %v1795_v44  ;;  %v8143_v44 = vpop.f32.mrf.mxu0 }
 0x3ca   : > { %2768 = vmatprep.subr.mxu1 %v1792_v53  ;;  %v1851_v53 = vld [vmem:[#allocation5 + $0x670] sm:$0xff] }
 0x3cb   : > { %2769 = vmatpush1.msra.mxu1 %v1791_v33  ;;  %v1848_v33 = vld [vmem:[#allocation5 + $0x658] sm:$0xff] }
 0x3cc   : > { %2770 = vmatprep.subr.mxu1 %v1788_v61 }
 0x3cd   : > { %2771 = vmatpush1.msra.mxu1 %v1787_v8  ;;  %v2356_v61 = vpop.f32.mrf.mxu1 }
 0x3ce   : > { %2772 = vmatprep.subr.mxu1 %v1784_v57  ;;  %v1847_v57 = vld [vmem:[#allocation5 + $0x650] sm:$0xff] }
 0x3cf   : > { %2773 = vmatpush1.msra.mxu1 %v1783_v46 }
 0x3d0   : > { %2774 = vmatprep.subr.mxu1 %v1780_v49  ;;  %v1844_v49 = vld [vmem:[#allocation5 + $0x638] sm:$0xff] }
 0x3d1   : > { %2775 = vmatpush1.msra.mxu1 %v1779_v12  ;;  %v1843_v12 = vld [vmem:[#allocation5 + $0x630] sm:$0xff] }
 0x3d2   : > { %2776 = vmatprep.subr.mxu1 %v1776_v22  ;;  %v1840_v22 = vld [vmem:[#allocation5 + $0x618] sm:$0xff] }
 0x3d3   : > { %2777 = vmatpush1.msra.mxu1 %v1775_v7 }
 0x3d4   : > { %2778 = vmatprep.subr.mxu1 %v1900_v55  ;;  %v1839_v55 = vld [vmem:[#allocation5 + $0x610] sm:$0xff] }
 0x3d5   : > { %2779 = vmatpush2.msra.mxu1 %v1899_v32 }
 0x3d6   : > { %2780 = vmatprep.subr.mxu1 %v1896_v36  ;;  %v2092_v36 = vld [vmem:[#allocation5 + $0xdf8] sm:$0xff] }
 0x3d7   : > { %2781 = vmatpush2.msra.mxu1 %v1895_v62 }
 0x3d8   : > { %2782 = vmatprep.subr.mxu1 %v1892_v13 }
 0x3d9   : > { %2783 = vmatpush2.msra.mxu1 %v1891_v25 }
 0x3da   : > { %2784 = vmatprep.subr.mxu1 %v1888_v58 }
 0x3db   : > { %2785 = vmatpush2.msra.mxu1 %v1887_v59 }
 0x3dc   : > { %2786 = vmatprep.subr.mxu1 %v1884_v20 }
 0x3dd   : > { %2787 = vmatpush2.msra.mxu1 %v1883_v52 }
 0x3de   : > { %2788 = vmatprep.subr.mxu1 %v1880_v23 }
 0x3df   : > { %2789 = vmatpush2.msra.mxu1 %v1879_v56  ;;  %v1959_v56 = vld [vmem:[#allocation5 + $0x9d0] sm:$0xff] }
 0x3e0   : > { %2790 = vmatprep.subr.mxu1 %v1876_v31  ;;  %v2084_v31 = vld [vmem:[#allocation5 + $0xdb8] sm:$0xff] }
 0x3e1   : > { %2791 = vmatpush2.msra.mxu1 %v1875_v24  ;;  %v2080_v24 = vld [vmem:[#allocation5 + $0xd98] sm:$0xff] }
 0x3e2   : > { %2792 = vmatprep.subr.mxu1 %v1872_v45  ;;  %v1951_v45 = vld [vmem:[#allocation5 + $0x990] sm:$0xff] }
 0x3e3   : > { %2793 = vmatpush2.msra.mxu1 %v1871_v39  ;;  %v1948_v39 = vld [vmem:[#allocation5 + $0x978] sm:$0xff] }
 0x3e4   : > { %2794 = vmatprep.subr.mxu1 %v1868_v27  ;;  %v2075_v27 = vld [vmem:[#allocation5 + $0xd70] sm:$0xff] }
 0x3e5   : > { %2795 = vmatpush2.msra.mxu1 %v1867_v18  ;;  %v1947_v18 = vld [vmem:[#allocation5 + $0x970] sm:$0xff] }
 0x3e6   : > { %2796 = vmatprep.subr.mxu1 %v1864_v10  ;;  %v1944_v10 = vld [vmem:[#allocation5 + $0x958] sm:$0xff] }
 0x3e7   : > { %2797 = vmatpush2.msra.mxu1 %v1863_v30  ;;  %v2071_v30 = vld [vmem:[#allocation5 + $0xd50] sm:$0xff] }
 0x3e8   : > { %2798 = vmatprep.subr.mxu1 %v1860_v42  ;;  %v2068_v42 = vld [vmem:[#allocation5 + $0xd38] sm:$0xff] }
 0x3e9   : > { %2799 = vmatpush2.msra.mxu1 %v1859_v41  ;;  %v1940_v41 = vld [vmem:[#allocation5 + $0x938] sm:$0xff] }
 0x3ea   : > { %2800 = vmatprep.subr.mxu1 %v1856_v37  ;;  %v1939_v37 = vld [vmem:[#allocation5 + $0x930] sm:$0xff] }
 0x3eb   : > { %2801 = vmatpush2.msra.mxu1 %v1855_v63  ;;  %v2064_v63 = vld [vmem:[#allocation5 + $0xd18] sm:$0xff] }
 0x3ec   : > { %v2433_v8 = vpop.f32.mrf.mxu0  ;;  %2802 = vmatprep.subr.mxu1 %v1852_v14  ;;  %v2063_v14 = vld [vmem:[#allocation5 + $0xd10] sm:$0xff] }
 0x3ed   : > { %v8145_v46 = vadd.f32 %v2433_v8, %v2356_v61  ;;  %2803 = vmatpush2.msra.mxu1 %v1851_v53  ;;  %v1935_v53 = vld [vmem:[#allocation5 + $0x910] sm:$0xff]  ;;  %v1932_v61 = vld [vmem:[#allocation5 + $0x8f8] sm:$0xff] }
 0x3ee   : > { %2804 = vmatprep.subr.mxu1 %v1848_v33  ;;  %v2060_v33 = vld [vmem:[#allocation5 + $0xcf8] sm:$0xff]  ;;  %v2059_v8 = vld [vmem:[#allocation5 + $0xcf0] sm:$0xff] }
 0x3ef   : > { %2805 = vmatpush2.msra.mxu1 %v1847_v57  ;;  %v1931_v57 = vld [vmem:[#allocation5 + $0x8f0] sm:$0xff] }
 0x3f0   : > { %v1586_v7 = vpop.permute.xlu1 %1585  ;;  %2806 = vmatprep.subr.mxu1 %v1844_v49  ;;  %v2056_v49 = vld [vmem:[#allocation5 + $0xcd8] sm:$0xff] }
 0x3f1   : > { %v8148_v32 = vmax.f32 %v8083_v19, %v1586_v7  ;;  %2807 = vmatpush2.msra.mxu1 %v1843_v12  ;;  %v1928_v12 = vld [vmem:[#allocation5 + $0x8d8] sm:$0xff] }
 0x3f2   : > { %2808 = vmatprep.subr.mxu1 %v1840_v22  ;;  %v2055_v22 = vld [vmem:[#allocation5 + $0xcd0] sm:$0xff] }
 0x3f3   : > { %v6791_v62 = vpop.permute.xlu0 %6790  ;;  %6489 = vmatprep.mubr.msk.f32.mxu1 %vm2265_vm1, %v8148_v32  ;;  %2809 = vmatpush2.msra.mxu1 %v1839_v55  ;;  %v2052_v55 = vld [vmem:[#allocation5 + $0xcb8] sm:$0xff] }
 0x3f4   : > { %v6793_v13 = vunpack.i.h.bf16 %v6791_v62  ;;  %v6792_v25 = vunpack.i.l.bf16 %v6791_v62  ;;  %2900 = vmatprep.subr.mxu1 %v2092_v36  ;;  %v1924_v36 = vld [vmem:[#allocation5 + $0x8b8] sm:$0xff]  ;;  %v2051_v62 = vld [vmem:[#allocation5 + $0xcb0] sm:$0xff] }
 0x3f6   : > { %v1603_v58 = vsel %vm663_vm5, %v6792_v25, %v6793_v13  ;;  %v1604_v59 = vsel %vm663_vm5, %v6793_v13, %v1586_v7  ;;  %v1602_v19 = vsel %vm663_vm5, %v6788_v1, %v6792_v25  ;;  %v1963_v1 = vld [vmem:[#allocation5 + $0x9f0] sm:$0xff]  ;;  %v2048_v25 = vld [vmem:[#allocation5 + $0xc98] sm:$0xff]  ;;  %vm3180_vm5 = vcmask 949248  }
 0x3f7   : > { %v8158_v20 = vmax.f32 %v8087_v34, %v1603_v58  ;;  %v8161_v52 = vmax.f32 %v8091_v26, %v1604_v59  ;;  %v8164_v23 = vmax.f32 %v8009_v6, %v1602_v19  ;;  %v2088_v34 = vld [vmem:[#allocation5 + $0xdd8] sm:$0xff]  ;;  %v2087_v26 = vld [vmem:[#allocation5 + $0xdd0] sm:$0xff] }
 0x3f8   : > { %v1960_v6 = vld [vmem:[#allocation5 + $0x9d8] sm:$0xff]  ;;  %v1927_v7 = vld [vmem:[#allocation5 + $0x8d0] sm:$0xff] }
 0x3f9   : > { %2585 = vmatprep.mubr.f32.mxu0 %v8158_v20  ;;  %2663 = vmatmul.mubr.f32.gmra.mxu1 %v8161_v52  ;;  %v1923_v13 = vld [vmem:[#allocation5 + $0x8b0] sm:$0xff]  ;;  %v1920_v58 = vld [vmem:[#allocation5 + $0x898] sm:$0xff] }
 0x3fa   : > { %2586 = vmatmul.mubr.f32.gmra.mxu0 %v8164_v23  ;;  %2810 = vmatprep.mubr.f32.mxu1 %v7968_v60  ;;  %v1956_v60 = vld [vmem:[#allocation5 + $0x9b8] sm:$0xff]  ;;  %v2047_v59 = vld [vmem:[#allocation5 + $0xc90] sm:$0xff] }
 0x3fb   : > { %2733 = vmatprep.mubr.f32.mxu0 %v7943_v48  ;;  %v2083_v48 = vld [vmem:[#allocation5 + $0xdb0] sm:$0xff] }
 0x3fc   : > { %v1919_v19 = vld [vmem:[#allocation5 + $0x890] sm:$0xff] }
 0x3fd   : > { %2811 = vmatmul.mubr.f32.vlgmr.msra.gmra.mxu1 %v7961_v43  ;;  %v1955_v43 = vld [vmem:[#allocation5 + $0x9b0] sm:$0xff] }
 0x3fe   : > { %2901 = vmatpush1.msra.mxu1 %v2091_v0  ;;  %2734 = vmatmul.mubr.f32.vlgmr.msra.gmra.mxu0 %v7958_v40  ;;  %v1952_v40 = vld [vmem:[#allocation5 + $0x998] sm:$0xff] }
 0x3ff   : > { %2816 = vmatprep.mubr.f32.mxu1 %v8047_v17  ;;  %2824 = vmatpush1.msra.mxu0 %v1963_v1  ;;  %v2079_v17 = vld [vmem:[#allocation5 + $0xd90] sm:$0xff]  ;;  %v2044_v0 = vld [vmem:[#allocation5 + $0xc78] sm:$0xff] }
 0x400   : > { %2902 = vmatprep.subr.mxu1 %v2088_v34  ;;  %2739 = vmatprep.mubr.f32.mxu0 %v8023_v38  ;;  %v2076_v38 = vld [vmem:[#allocation5 + $0xd78] sm:$0xff]  ;;  %v2043_v34 = vld [vmem:[#allocation5 + $0xc70] sm:$0xff] }
 0x401   : > { %2825 = vmatprep.subr.mxu0 %v1960_v6  ;;  %2903 = vmatpush1.msra.mxu1 %v2087_v26  ;;  %v1916_v1 = vld [vmem:[#allocation5 + $0x878] sm:$0xff]  ;;  %v1915_v6 = vld [vmem:[#allocation5 + $0x870] sm:$0xff] }
 0x402   : > { %2826 = vmatpush1.msra.mxu0 %v1959_v56  ;;  %2904 = vmatprep.subr.mxu1 %v2084_v31  ;;  %v2040_v26 = vld [vmem:[#allocation5 + $0xc58] sm:$0xff]  ;;  %v2039_v31 = vld [vmem:[#allocation5 + $0xc50] sm:$0xff] }
 0x403   : > { %2817 = vmatmul.mubr.f32.gmra.mxu1 %v8050_v11  ;;  %2827 = vmatprep.subr.mxu0 %v1956_v60  ;;  %v2072_v11 = vld [vmem:[#allocation5 + $0xd58] sm:$0xff]  ;;  %v1911_v60 = vld [vmem:[#allocation5 + $0x850] sm:$0xff] }
 0x404   : > { %2905 = vmatpush1.msra.mxu1 %v2083_v48  ;;  %2740 = vmatmul.mubr.f32.gmra.mxu0 %v8030_v35  ;;  %v1943_v35 = vld [vmem:[#allocation5 + $0x950] sm:$0xff]  ;;  %v1912_v56 = vld [vmem:[#allocation5 + $0x858] sm:$0xff] }
 0x405   : > { %2828 = vmatpush1.msra.mxu0 %v1955_v43  ;;  %2906 = vmatprep.subr.mxu1 %v2080_v24  ;;  %v2036_v48 = vld [vmem:[#allocation5 + $0xc38] sm:$0xff]  ;;  %v2035_v24 = vld [vmem:[#allocation5 + $0xc30] sm:$0xff] }
 0x406   : > { %2964 = vmatprep.mubr.f32.mxu1 %v8071_v15  ;;  %2829 = vmatprep.subr.mxu0 %v1952_v40  ;;  %v2067_v15 = vld [vmem:[#allocation5 + $0xd30] sm:$0xff]  ;;  %v1908_v43 = vld [vmem:[#allocation5 + $0x838] sm:$0xff] }
 0x407   : > { %2887 = vmatprep.mubr.f32.mxu0 %v8074_v3  ;;  %2907 = vmatpush1.msra.mxu1 %v2079_v17  ;;  %v1936_v3 = vld [vmem:[#allocation5 + $0x918] sm:$0xff]  ;;  %v1907_v40 = vld [vmem:[#allocation5 + $0x830] sm:$0xff] }
 0x408   : > { %2830 = vmatpush1.msra.mxu0 %v1951_v45  ;;  %2908 = vmatprep.subr.mxu1 %v2076_v38  ;;  %v2032_v17 = vld [vmem:[#allocation5 + $0xc18] sm:$0xff]  ;;  %v2031_v38 = vld [vmem:[#allocation5 + $0xc10] sm:$0xff] }
 0x409   : > { %2831 = vmatprep.subr.mxu0 %v1948_v39  ;;  %2909 = vmatpush1.msra.mxu1 %v2075_v27  ;;  %v1904_v45 = vld [vmem:[#allocation5 + $0x818] sm:$0xff]  ;;  %v1903_v39 = vld [vmem:[#allocation5 + $0x810] sm:$0xff] }
 0x40a   : > { %2832 = vmatpush1.msra.mxu0 %v1947_v18  ;;  %2910 = vmatprep.subr.mxu1 %v2072_v11  ;;  %v2156_v27 = vld [vmem:[#allocation5 + $0xff8] sm:$0xff]  ;;  %v2155_v11 = vld [vmem:[#allocation5 + $0xff0] sm:$0xff] }
 0x40b   : > { %2833 = vmatprep.subr.mxu0 %v1944_v10  ;;  %2911 = vmatpush1.msra.mxu1 %v2071_v30  ;;  %v2028_v18 = vld [vmem:[#allocation5 + $0xbf8] sm:$0xff]  ;;  %v2027_v10 = vld [vmem:[#allocation5 + $0xbf0] sm:$0xff] }
 0x40c   : > { %2834 = vmatpush1.msra.mxu0 %v1943_v35  ;;  %2912 = vmatprep.subr.mxu1 %v2068_v42  ;;  %v2152_v30 = vld [vmem:[#allocation5 + $0xfd8] sm:$0xff]  ;;  %v2151_v42 = vld [vmem:[#allocation5 + $0xfd0] sm:$0xff] }
 0x40d   : > { %2835 = vmatprep.subr.mxu0 %v1940_v41  ;;  %2913 = vmatpush1.msra.mxu1 %v2067_v15  ;;  %v2024_v35 = vld [vmem:[#allocation5 + $0xbd8] sm:$0xff]  ;;  %v2023_v41 = vld [vmem:[#allocation5 + $0xbd0] sm:$0xff] }
 0x40e   : > { %2836 = vmatpush1.msra.mxu0 %v1939_v37  ;;  %2914 = vmatprep.subr.mxu1 %v2064_v63  ;;  %v2148_v15 = vld [vmem:[#allocation5 + $0xfb8] sm:$0xff]  ;;  %v2147_v63 = vld [vmem:[#allocation5 + $0xfb0] sm:$0xff] }
 0x40f   : > { %2837 = vmatprep.subr.mxu0 %v1936_v3  ;;  %2915 = vmatpush1.msra.mxu1 %v2063_v14  ;;  %v2020_v37 = vld [vmem:[#allocation5 + $0xbb8] sm:$0xff]  ;;  %v2019_v3 = vld [vmem:[#allocation5 + $0xbb0] sm:$0xff] }
 0x410   : > { %2838 = vmatpush1.msra.mxu0 %v1935_v53  ;;  %2916 = vmatprep.subr.mxu1 %v2060_v33  ;;  %v2144_v14 = vld [vmem:[#allocation5 + $0xf98] sm:$0xff]  ;;  %v2143_v33 = vld [vmem:[#allocation5 + $0xf90] sm:$0xff] }
 0x411   : > { %2839 = vmatprep.subr.mxu0 %v1932_v61  ;;  %2917 = vmatpush1.msra.mxu1 %v2059_v8  ;;  %v2016_v53 = vld [vmem:[#allocation5 + $0xb98] sm:$0xff]  ;;  %v2015_v61 = vld [vmem:[#allocation5 + $0xb90] sm:$0xff] }
 0x412   : > { %2840 = vmatpush1.msra.mxu0 %v1931_v57  ;;  %2918 = vmatprep.subr.mxu1 %v2056_v49  ;;  %v2140_v8 = vld [vmem:[#allocation5 + $0xf78] sm:$0xff]  ;;  %v2139_v49 = vld [vmem:[#allocation5 + $0xf70] sm:$0xff] }
 0x413   : > { %2841 = vmatprep.subr.mxu0 %v1928_v12  ;;  %2919 = vmatpush1.msra.mxu1 %v2055_v22  ;;  %v2012_v57 = vld [vmem:[#allocation5 + $0xb78] sm:$0xff]  ;;  %v2011_v12 = vld [vmem:[#allocation5 + $0xb70] sm:$0xff] }
 0x414   : > { %2842 = vmatpush1.msra.mxu0 %v1927_v7  ;;  %2920 = vmatprep.subr.mxu1 %v2052_v55  ;;  %v2136_v22 = vld [vmem:[#allocation5 + $0xf58] sm:$0xff]  ;;  %v2135_v55 = vld [vmem:[#allocation5 + $0xf50] sm:$0xff] }
 0x415   : > { %2843 = vmatprep.subr.mxu0 %v1924_v36  ;;  %2921 = vmatpush1.msra.mxu1 %v2051_v62  ;;  %v2008_v7 = vld [vmem:[#allocation5 + $0xb58] sm:$0xff]  ;;  %v2007_v36 = vld [vmem:[#allocation5 + $0xb50] sm:$0xff] }
 0x416   : > { %2844 = vmatpush1.msra.mxu0 %v1923_v13  ;;  %2922 = vmatprep.subr.mxu1 %v2048_v25  ;;  %v2132_v62 = vld [vmem:[#allocation5 + $0xf38] sm:$0xff]  ;;  %v2131_v25 = vld [vmem:[#allocation5 + $0xf30] sm:$0xff] }
 0x417   : > { %2845 = vmatprep.subr.mxu0 %v1920_v58  ;;  %2923 = vmatpush1.msra.mxu1 %v2047_v59  ;;  %v2004_v13 = vld [vmem:[#allocation5 + $0xb38] sm:$0xff]  ;;  %v2003_v58 = vld [vmem:[#allocation5 + $0xb30] sm:$0xff] }
 0x418   : > { %2846 = vmatpush1.msra.mxu0 %v1919_v19  ;;  %2924 = vmatprep.subr.mxu1 %v2044_v0  ;;  %v2128_v59 = vld [vmem:[#allocation5 + $0xf18] sm:$0xff]  ;;  %v2127_v0 = vld [vmem:[#allocation5 + $0xf10] sm:$0xff] }
 0x419   : > { %2847 = vmatprep.subr.mxu0 %v1916_v1  ;;  %2925 = vmatpush1.msra.mxu1 %v2043_v34  ;;  %v2000_v19 = vld [vmem:[#allocation5 + $0xb18] sm:$0xff]  ;;  %v1999_v1 = vld [vmem:[#allocation5 + $0xb10] sm:$0xff] }
 0x41a   : > { %2848 = vmatpush1.msra.mxu0 %v1915_v6  ;;  %2926 = vmatprep.subr.mxu1 %v2040_v26  ;;  %v2124_v34 = vld [vmem:[#allocation5 + $0xef8] sm:$0xff]  ;;  %v2123_v26 = vld [vmem:[#allocation5 + $0xef0] sm:$0xff] }
 0x41b   : > { %2849 = vmatprep.subr.mxu0 %v1912_v56  ;;  %2927 = vmatpush1.msra.mxu1 %v2039_v31  ;;  %v1996_v6 = vld [vmem:[#allocation5 + $0xaf8] sm:$0xff]  ;;  %v1995_v56 = vld [vmem:[#allocation5 + $0xaf0] sm:$0xff] }
 0x41c   : > { %2850 = vmatpush1.msra.mxu0 %v1911_v60  ;;  %2928 = vmatprep.subr.mxu1 %v2036_v48  ;;  %v2120_v31 = vld [vmem:[#allocation5 + $0xed8] sm:$0xff]  ;;  %v2119_v48 = vld [vmem:[#allocation5 + $0xed0] sm:$0xff] }
 0x41d   : > { %2851 = vmatprep.subr.mxu0 %v1908_v43  ;;  %2929 = vmatpush1.msra.mxu1 %v2035_v24  ;;  %v1992_v60 = vld [vmem:[#allocation5 + $0xad8] sm:$0xff]  ;;  %v1991_v43 = vld [vmem:[#allocation5 + $0xad0] sm:$0xff] }
 0x41e   : > { %2852 = vmatpush1.msra.mxu0 %v1907_v40  ;;  %2930 = vmatprep.subr.mxu1 %v2032_v17  ;;  %v2116_v24 = vld [vmem:[#allocation5 + $0xeb8] sm:$0xff]  ;;  %v2115_v17 = vld [vmem:[#allocation5 + $0xeb0] sm:$0xff] }
 0x41f   : > { %2853 = vmatprep.subr.mxu0 %v1904_v45  ;;  %2931 = vmatpush1.msra.mxu1 %v2031_v38  ;;  %v1988_v40 = vld [vmem:[#allocation5 + $0xab8] sm:$0xff]  ;;  %v1987_v45 = vld [vmem:[#allocation5 + $0xab0] sm:$0xff] }
 0x420   : > { %2854 = vmatpush1.msra.mxu0 %v1903_v39  ;;  %2932 = vmatprep.subr.mxu1 %v2156_v27  ;;  %v2112_v38 = vld [vmem:[#allocation5 + $0xe98] sm:$0xff]  ;;  %v2111_v27 = vld [vmem:[#allocation5 + $0xe90] sm:$0xff] }
 0x421   : > { %2855 = vmatprep.subr.mxu0 %v2028_v18  ;;  %2933 = vmatpush2.msra.mxu1 %v2155_v11  ;;  %v1984_v39 = vld [vmem:[#allocation5 + $0xa98] sm:$0xff]  ;;  %v1983_v18 = vld [vmem:[#allocation5 + $0xa90] sm:$0xff] }
 0x422   : > { %2856 = vmatpush2.msra.mxu0 %v2027_v10  ;;  %2934 = vmatprep.subr.mxu1 %v2152_v30  ;;  %v2108_v11 = vld [vmem:[#allocation5 + $0xe78] sm:$0xff]  ;;  %v2107_v30 = vld [vmem:[#allocation5 + $0xe70] sm:$0xff] }
 0x423   : > { %2857 = vmatprep.subr.mxu0 %v2024_v35  ;;  %2935 = vmatpush2.msra.mxu1 %v2151_v42  ;;  %v1980_v10 = vld [vmem:[#allocation5 + $0xa78] sm:$0xff]  ;;  %v1979_v35 = vld [vmem:[#allocation5 + $0xa70] sm:$0xff] }
 0x424   : > { %2858 = vmatpush2.msra.mxu0 %v2023_v41  ;;  %2936 = vmatprep.subr.mxu1 %v2148_v15  ;;  %v2104_v42 = vld [vmem:[#allocation5 + $0xe58] sm:$0xff]  ;;  %v2103_v15 = vld [vmem:[#allocation5 + $0xe50] sm:$0xff] }
 0x425   : > { %2859 = vmatprep.subr.mxu0 %v2020_v37  ;;  %2937 = vmatpush2.msra.mxu1 %v2147_v63  ;;  %v1976_v41 = vld [vmem:[#allocation5 + $0xa58] sm:$0xff]  ;;  %v1975_v37 = vld [vmem:[#allocation5 + $0xa50] sm:$0xff] }
 0x426   : > { %2860 = vmatpush2.msra.mxu0 %v2019_v3  ;;  %2938 = vmatprep.subr.mxu1 %v2144_v14  ;;  %v2100_v63 = vld [vmem:[#allocation5 + $0xe38] sm:$0xff]  ;;  %v2099_v14 = vld [vmem:[#allocation5 + $0xe30] sm:$0xff] }
 0x427   : > { %2861 = vmatprep.subr.mxu0 %v2016_v53  ;;  %2939 = vmatpush2.msra.mxu1 %v2143_v33  ;;  %v1972_v3 = vld [vmem:[#allocation5 + $0xa38] sm:$0xff]  ;;  %v1971_v53 = vld [vmem:[#allocation5 + $0xa30] sm:$0xff] }
 0x428   : > { %2862 = vmatpush2.msra.mxu0 %v2015_v61  ;;  %2940 = vmatprep.subr.mxu1 %v2140_v8  ;;  %v2096_v33 = vld [vmem:[#allocation5 + $0xe18] sm:$0xff]  ;;  %v2095_v8 = vld [vmem:[#allocation5 + $0xe10] sm:$0xff] }
 0x429   : > { %2863 = vmatprep.subr.mxu0 %v2012_v57  ;;  %2941 = vmatpush2.msra.mxu1 %v2139_v49  ;;  %v1968_v61 = vld [vmem:[#allocation5 + $0xa18] sm:$0xff]  ;;  %v1967_v57 = vld [vmem:[#allocation5 + $0xa10] sm:$0xff]  ;;  %v8179_v49 = vpop.f32.mrf.mxu1 }
 0x42a   : > { %2864 = vmatpush2.msra.mxu0 %v2011_v12  ;;  %2942 = vmatprep.subr.mxu1 %v2136_v22  ;;  %v2220_v12 = vld [vmem:[#allocation5 + $0x11f8] sm:$0xff] }
 0x42b   : > { %2865 = vmatprep.subr.mxu0 %v2008_v7  ;;  %2943 = vmatpush2.msra.mxu1 %v2135_v55  ;;  %v2219_v7 = vld [vmem:[#allocation5 + $0x11f0] sm:$0xff]  ;;  %v2216_v55 = vld [vmem:[#allocation5 + $0x11d8] sm:$0xff] }
 0x42c   : > { %2866 = vmatpush2.msra.mxu0 %v2007_v36  ;;  %2944 = vmatprep.subr.mxu1 %v2132_v62  ;;  %v2215_v36 = vld [vmem:[#allocation5 + $0x11d0] sm:$0xff]  ;;  %v2212_v62 = vld [vmem:[#allocation5 + $0x11b8] sm:$0xff] }
 0x42d   : > { %2867 = vmatprep.subr.mxu0 %v2004_v13  ;;  %2945 = vmatpush2.msra.mxu1 %v2131_v25  ;;  %v2208_v25 = vld [vmem:[#allocation5 + $0x1198] sm:$0xff] }
 0x42e   : > { %2868 = vmatpush2.msra.mxu0 %v2003_v58  ;;  %2946 = vmatprep.subr.mxu1 %v2128_v59  ;;  %v2203_v59 = vld [vmem:[#allocation5 + $0x1170] sm:$0xff] }
 0x42f   : > { %2869 = vmatprep.subr.mxu0 %v2000_v19  ;;  %2947 = vmatpush2.msra.mxu1 %v2127_v0  ;;  %v2199_v19 = vld [vmem:[#allocation5 + $0x1150] sm:$0xff]  ;;  %v2196_v0 = vld [vmem:[#allocation5 + $0x1138] sm:$0xff] }
 0x430   : > { %2870 = vmatpush2.msra.mxu0 %v1999_v1  ;;  %2948 = vmatprep.subr.mxu1 %v2124_v34  ;;  %v2192_v1 = vld [vmem:[#allocation5 + $0x1118] sm:$0xff]  ;;  %v2191_v34 = vld [vmem:[#allocation5 + $0x1110] sm:$0xff] }
 0x431   : > { %2871 = vmatprep.subr.mxu0 %v1996_v6  ;;  %2949 = vmatpush2.msra.mxu1 %v2123_v26  ;;  %v2187_v6 = vld [vmem:[#allocation5 + $0x10f0] sm:$0xff] }
 0x432   : > { %2872 = vmatpush2.msra.mxu0 %v1995_v56  ;;  %2950 = vmatprep.subr.mxu1 %v2120_v31  ;;  %v2183_v26 = vld [vmem:[#allocation5 + $0x10d0] sm:$0xff]  ;;  %v2180_v56 = vld [vmem:[#allocation5 + $0x10b8] sm:$0xff] }
 0x433   : > { %2873 = vmatprep.subr.mxu0 %v1992_v60  ;;  %2951 = vmatpush2.msra.mxu1 %v2119_v48  ;;  %v2179_v31 = vld [vmem:[#allocation5 + $0x10b0] sm:$0xff]  ;;  %v2176_v60 = vld [vmem:[#allocation5 + $0x1098] sm:$0xff] }
 0x434   : > { %2874 = vmatpush2.msra.mxu0 %v1991_v43  ;;  %2952 = vmatprep.subr.mxu1 %v2116_v24  ;;  %v2175_v48 = vld [vmem:[#allocation5 + $0x1090] sm:$0xff]  ;;  %v2172_v43 = vld [vmem:[#allocation5 + $0x1078] sm:$0xff] }
 0x435   : > { %2875 = vmatprep.subr.mxu0 %v1988_v40  ;;  %2953 = vmatpush2.msra.mxu1 %v2115_v17  ;;  %v2171_v24 = vld [vmem:[#allocation5 + $0x1070] sm:$0xff]  ;;  %v2168_v40 = vld [vmem:[#allocation5 + $0x1058] sm:$0xff] }
 0x436   : > { %2876 = vmatpush2.msra.mxu0 %v1987_v45  ;;  %2954 = vmatprep.subr.mxu1 %v2112_v38  ;;  %v2167_v17 = vld [vmem:[#allocation5 + $0x1050] sm:$0xff]  ;;  %v2164_v45 = vld [vmem:[#allocation5 + $0x1038] sm:$0xff] }
 0x437   : > { %2877 = vmatprep.subr.mxu0 %v1984_v39  ;;  %2955 = vmatpush2.msra.mxu1 %v2111_v27  ;;  %v2163_v38 = vld [vmem:[#allocation5 + $0x1030] sm:$0xff]  ;;  %v2160_v39 = vld [vmem:[#allocation5 + $0x1018] sm:$0xff] }
 0x438   : > { %2878 = vmatpush2.msra.mxu0 %v1983_v18  ;;  %2956 = vmatprep.subr.mxu1 %v2108_v11  ;;  %v2159_v27 = vld [vmem:[#allocation5 + $0x1010] sm:$0xff]  ;;  %v2264_v18 = vld [vmem:[#allocation5 + $0x1358] sm:$0x7f] }
 0x439   : > { %2879 = vmatprep.subr.mxu0 %v1980_v10  ;;  %2957 = vmatpush2.msra.mxu1 %v2107_v30  ;;  %v2263_v11 = vld [vmem:[#allocation5 + $0x1350] sm:$0x7f]  ;;  %v2260_v10 = vld [vmem:[#allocation5 + $0x1338] sm:$0xff] }
 0x43a   : > { %2880 = vmatpush2.msra.mxu0 %v1979_v35  ;;  %2958 = vmatprep.subr.mxu1 %v2104_v42  ;;  %v2259_v30 = vld [vmem:[#allocation5 + $0x1330] sm:$0xff]  ;;  %v2256_v35 = vld [vmem:[#allocation5 + $0x1318] sm:$0xff] }
 0x43b   : > { %2881 = vmatprep.subr.mxu0 %v1976_v41  ;;  %2959 = vmatpush2.msra.mxu1 %v2103_v15  ;;  %v2255_v42 = vld [vmem:[#allocation5 + $0x1310] sm:$0xff]  ;;  %v2252_v41 = vld [vmem:[#allocation5 + $0x12f8] sm:$0xff] }
 0x43c   : > { %2882 = vmatpush2.msra.mxu0 %v1975_v37  ;;  %2960 = vmatprep.subr.mxu1 %v2100_v63  ;;  %v2251_v15 = vld [vmem:[#allocation5 + $0x12f0] sm:$0xff]  ;;  %v2248_v37 = vld [vmem:[#allocation5 + $0x12d8] sm:$0xff] }
 0x43d   : > { %2883 = vmatprep.subr.mxu0 %v1972_v3  ;;  %2961 = vmatpush2.msra.mxu1 %v2099_v14  ;;  %v2247_v63 = vld [vmem:[#allocation5 + $0x12d0] sm:$0xff]  ;;  %v2244_v3 = vld [vmem:[#allocation5 + $0x12b8] sm:$0xff] }
 0x43e   : > { %2884 = vmatpush2.msra.mxu0 %v1971_v53  ;;  %2962 = vmatprep.subr.mxu1 %v2096_v33  ;;  %v8182_v22 = vpop.f32.mrf.mxu1  ;;  %v2243_v14 = vld [vmem:[#allocation5 + $0x12b0] sm:$0xff]  ;;  %v2240_v53 = vld [vmem:[#allocation5 + $0x1298] sm:$0xff] }
 0x43f   : > { %2885 = vmatprep.subr.mxu0 %v1968_v61  ;;  %2963 = vmatpush2.msra.mxu1 %v2095_v8  ;;  %v2239_v33 = vld [vmem:[#allocation5 + $0x1290] sm:$0xff]  ;;  %v2428_v61 = vadd.f32 %v8139_v54, %v8137_v51  ;;  %v2236_v8 = vld [vmem:[#allocation5 + $0x1278] sm:$0xff] }
 0x440   : > { %2886 = vmatpush2.msra.mxu0 %v1967_v57  ;;  %2965 = vmatmul.mubr.f32.vlgmr.msra.gmra.mxu1 %v8068_v5  ;;  %v8187_v13 = vpop.f32.mrf.mxu1  ;;  %v2211_v5 = vld [vmem:[#allocation5 + $0x11b0] sm:$0xff]  ;;  %v2224_v51 = vld [vmem:[#allocation5 + $0x1218] sm:$0xff] }
 0x441   : > { %2888 = vmatmul.mubr.f32.vlgmr.msra.gmra.mxu0 %v8077_v28  ;;  %2970 = vmatprep.mubr.f32.mxu1 %v8158_v20  ;;  %v2207_v28 = vld [vmem:[#allocation5 + $0x1190] sm:$0xff] }
 0x442   : > { %2977 = vmatprep.subr.mxu0 %v2220_v12  ;;  %2893 = vmatprep.mubr.f32.mxu0 %v8115_v47  ;;  %v2204_v47 = vld [vmem:[#allocation5 + $0x1178] sm:$0xff]  ;;  %v2235_v57 = vld [vmem:[#allocation5 + $0x1270] sm:$0xff]  ;;  %v2505_v12 = vadd.f32 %v8182_v22, %v2428_v61  ;;  %v2430_v22 = vadd.f32 %v8143_v44, %v8141_v16 }
 0x443   : > { %2978 = vmatpush1.msra.mxu0 %v2219_v7  ;;  %v2232_v7 = vld [vmem:[#allocation5 + $0x1258] sm:$0xff]  ;;  %v2223_v54 = vld [vmem:[#allocation5 + $0x1210] sm:$0xff] }
 0x444   : > { %2979 = vmatprep.subr.mxu0 %v2216_v55  ;;  %2971 = vmatmul.mubr.f32.gmra.mxu1 %v8164_v23  ;;  %v2200_v23 = vld [vmem:[#allocation5 + $0x1158] sm:$0xff]  ;;  %v2435_v55 = vpop.f32.mrf.mxu0 }
 0x445   : > { %2980 = vmatpush1.msra.mxu0 %v2215_v36  ;;  %v2231_v36 = vld [vmem:[#allocation5 + $0x1250] sm:$0xff]  ;;  %v2436_v16 = vadd.f32 %v2435_v55, %v8179_v49 }
 0x446   : > { %2894 = vmatmul.mubr.f32.gmra.mxu0 %v8118_v9  ;;  %2981 = vmatprep.subr.mxu0 %v2212_v62  ;;  %v2510_v20 = vpop.f32.mrf.mxu1  ;;  %v2195_v9 = vld [vmem:[#allocation5 + $0x1130] sm:$0xff]  ;;  %v2228_v62 = vld [vmem:[#allocation5 + $0x1238] sm:$0xff] }
 0x447   : > { %2982 = vmatpush1.msra.mxu0 %v2211_v5  ;;  %6492 = vmatprep.mubr.msk.f32.mxu0 %vm2265_vm1, %v8122_v50  ;;  %v8194_v58 = vadd.f32 %v2510_v20, %v8145_v46  ;;  %v2188_v50 = vld [vmem:[#allocation5 + $0x10f8] sm:$0xff]  ;;  %v2581_v5 = vpop.f32.mrf.mxu0 }
 0x448   : > { %2983 = vmatprep.subr.mxu0 %v2208_v25  ;;  %v2184_v46 = vld [vmem:[#allocation5 + $0x10d8] sm:$0xff]  ;;  %v2512_v25 = vpop.f32.mrf.mxu1  ;;  %v2582_v20 = vadd.f32 %v2581_v5, %v2505_v12 }
 0x449   : > { %2984 = vmatpush1.msra.mxu0 %v2207_v28  ;;  %v2227_v28 = vld [vmem:[#allocation5 + $0x1230] sm:$0xff] }
 0x44a   : > { %2985 = vmatprep.subr.mxu0 %v2204_v47 }
 0x44b   : > { %2986 = vmatpush1.msra.mxu0 %v2203_v59 }
 0x44c   : > { %2987 = vmatprep.subr.mxu0 %v2200_v23  ;;  %v2507_v23 = vadd.f32 %v8187_v13, %v2430_v22 }
 0x44d   : > { %2988 = vmatpush1.msra.mxu0 %v2199_v19 }
 0x44e   : > { %2989 = vmatprep.subr.mxu0 %v2196_v0  ;;  %v2513_v0 = vadd.f32 %v2512_v25, %v2436_v16 }
 0x44f   : > { %2990 = vmatpush1.msra.mxu0 %v2195_v9 }
 0x450   : > { %2991 = vmatprep.subr.mxu0 %v2192_v1 }
 0x451   : > { %2992 = vmatpush1.msra.mxu0 %v2191_v34 }
 0x452   : > { %2993 = vmatprep.subr.mxu0 %v2188_v50 }
 0x453   : > { %2994 = vmatpush1.msra.mxu0 %v2187_v6 }
 0x454   : > { %2995 = vmatprep.subr.mxu0 %v2184_v46 }
 0x455   : > { %2996 = vmatpush1.msra.mxu0 %v2183_v26 }
 0x456   : > { %2997 = vmatprep.subr.mxu0 %v2180_v56 }
 0x457   : > { %2998 = vmatpush1.msra.mxu0 %v2179_v31 }
 0x458   : > { %2999 = vmatprep.subr.mxu0 %v2176_v60 }
 0x459   : > { %3000 = vmatpush1.msra.mxu0 %v2175_v48 }
 0x45a   : > { %3001 = vmatprep.subr.mxu0 %v2172_v43 }
 0x45b   : > { %3002 = vmatpush1.msra.mxu0 %v2171_v24 }
 0x45c   : > { %3003 = vmatprep.subr.mxu0 %v2168_v40 }
 0x45d   : > { %3004 = vmatpush1.msra.mxu0 %v2167_v17 }
 0x45e   : > { %3005 = vmatprep.subr.mxu0 %v2164_v45 }
 0x45f   : > { %3006 = vmatpush1.msra.mxu0 %v2163_v38 }
 0x460   : > { %3007 = vmatprep.subr.mxu0 %v2160_v39 }
 0x461   : > { %3008 = vmatpush1.msra.mxu0 %v2159_v27 }
 0x462   : > { %6490 = vmatprep.subr.msk.mxu0 %vm952_vm14, %v2264_v18 }
 0x463   : > { %6491 = vmatpush2.msk.msra.mxu0 %vm952_vm14, %v2263_v11 }
 0x464   : > { %3021 = vmatprep.subr.mxu0 %v2260_v10 }
 0x465   : > { %3022 = vmatpush2.msra.mxu0 %v2259_v30 }
 0x466   : > { %3023 = vmatprep.subr.mxu0 %v2256_v35 }
 0x467   : > { %3024 = vmatpush2.msra.mxu0 %v2255_v42 }
 0x468   : > { %3025 = vmatprep.subr.mxu0 %v2252_v41 }
 0x469   : > { %3026 = vmatpush2.msra.mxu0 %v2251_v15 }
 0x46a   : > { %3027 = vmatprep.subr.mxu0 %v2248_v37 }
 0x46b   : > { %3028 = vmatpush2.msra.mxu0 %v2247_v63 }
 0x46c   : > { %3029 = vmatprep.subr.mxu0 %v2244_v3 }
 0x46d   : > { %3030 = vmatpush2.msra.mxu0 %v2243_v14 }
 0x46e   : > { %3031 = vmatprep.subr.mxu0 %v2240_v53 }
 0x46f   : > { %3032 = vmatpush2.msra.mxu0 %v2239_v33 }
 0x470   : > { %3033 = vmatprep.subr.mxu0 %v2236_v8 }
 0x471   : > { %3034 = vmatpush2.msra.mxu0 %v2235_v57 }
 0x472   : > { %3035 = vmatprep.subr.mxu0 %v2232_v7 }
 0x473   : > { %3036 = vmatpush2.msra.mxu0 %v2231_v36 }
 0x474   : > { %3037 = vmatprep.subr.mxu0 %v2228_v62  ;;  %v2658_v47 = vpop.f32.mrf.mxu1 }
 0x475   : > { %3038 = vmatpush2.msra.mxu0 %v2227_v28  ;;  %v8201_v59 = vadd.f32 %v2658_v47, %v2582_v20 }
 0x476   : > { %3039 = vmatprep.subr.mxu0 %v2224_v51 }
 0x477   : > { %3040 = vmatpush2.msra.mxu0 %v2223_v54  ;;  %3221 = vrot.lane.b32.xlu1 %v8201_v59, %s7020_s25 }
 0x478   : > { %3042 = vmatmul.mubr.f32.vlgmr.msra.gmra.mxu0 %v8134_v29  ;;  %3362 = vmatprep.subr.mxu0 %v7018_v21  ;;  %v2583_v29 = vpop.f32.mrf.mxu0 }
 0x479   : > { %6493 = vmatprep.mubr.msk.f32.mxu0 %vm2265_vm1, %v8148_v32  ;;  %v2660_v32 = vpop.f32.mrf.mxu1  ;;  %v2584_v19 = vadd.f32 %v2583_v29, %v2507_v23 }
 0x47b   : > { %3193 = vrot.lane.b32.xlu1 %v8201_v59, %s7014_s28 }
 0x47c   : > { %3048 = vmatmul.mubr.f32.gmra.mxu0 %v8161_v52  ;;  %v8221_v52 = vadd.f32 %v2660_v32, %v2584_v19 }
 0x47f   : > { %3164 = vrot.lane.b32.xlu1 %v8201_v59, %s7021_s26 }
 0x483   : > { %3135 = vrot.lane.b32.xlu1 %v8201_v59, %s7022_s18 }
 0x487   : > { %3106 = vrot.lane.b32.xlu1 %v8201_v59, %s7023_s14 }
 0x48b   : > { %3223 = vrot.lane.b32.xlu1 %v8221_v52, %s7020_s25 }
 0x48f   : > { %3195 = vrot.lane.b32.xlu1 %v8221_v52, %s7014_s28 }
 0x493   : > { %3166 = vrot.lane.b32.xlu1 %v8221_v52, %s7021_s26 }
 0x497   : > { %3137 = vrot.lane.b32.xlu1 %v8221_v52, %s7022_s18 }
 0x49b   : > { %3108 = vrot.lane.b32.xlu1 %v8221_v52, %s7023_s14 }
 0x4b9   : > { %v2664_v44 = vpop.f32.mrf.mxu1 }
 0x4ba   : > { %v2587_v13 = vpop.f32.mrf.mxu0 }
 0x4bb   : > { %v2588_v9 = vadd.f32 %v2587_v13, %v8194_v58  ;;  %v2666_v1 = vpop.f32.mrf.mxu1  ;;  %v8353_v13 = vld [vmem:[%s8683_s3] sm:$0xff] }
 0x4bc   : > { %v2589_v34 = vpop.f32.mrf.mxu0 }
 0x4bd   : > { %v8235_v50 = vadd.f32 %v2664_v44, %v2588_v9  ;;  %v2590_v6 = vadd.f32 %v2589_v34, %v2513_v0  ;;  %v2812_v46 = vpop.f32.mrf.mxu1  ;;  %v3287_v0 = vcombine.high %v8353_v13, %v8353_v13 }
 0x4be   : > { %v2735_v26 = vpop.f32.mrf.mxu0 }
 0x4bf   : > { %v2814_v56 = vpop.f32.mrf.mxu1  ;;  %3229 = vrot.lane.b32.xlu0 %v8235_v50, %s7020_s25  ;;  %3201 = vrot.lane.b32.xlu1 %v8235_v50, %s7014_s28  ;;  %v8241_v31 = vadd.f32 %v2666_v1, %v2590_v6  ;;  %v2813_v27 = vadd.f32 %v2812_v46, %v2735_v26  ;;  %v3280_v46 = vld [vmem:[%s8684_s4] sm:$0xf] }
 0x4c0   : > { %v2737_v49 = vpop.f32.mrf.mxu0  ;;  %6494 = vmatprep.mubr.msk.f32.mxu1 %vm3288_vm2, %v3287_v0  ;;  %6495 = vmatprep.mubr.msk.f32.mxu0 %vm3288_vm2, %v3287_v0 }
 0x4c1   : > { %v2815_v61 = vadd.f32 %v2814_v56, %v2737_v49 }
 0x4c3   : > { %v2818_v60 = vpop.f32.mrf.mxu1  ;;  %3172 = vrot.lane.b32.xlu1 %v8235_v50, %s7021_s26  ;;  %3231 = vrot.lane.b32.xlu0 %v8241_v31, %s7020_s25 }
 0x4c4   : > { %v2741_v58 = vpop.f32.mrf.mxu0 }
 0x4c5   : > { %v2820_v48 = vpop.f32.mrf.mxu1  ;;  %v2819_v10 = vadd.f32 %v2818_v60, %v2741_v58 }
 0x4c6   : > { %v2743_v43 = vpop.f32.mrf.mxu0 }
 0x4c7   : > { %v2821_v24 = vadd.f32 %v2820_v48, %v2743_v43  ;;  %3143 = vrot.lane.b32.xlu1 %v8235_v50, %s7022_s18 }
 0x4cb   : > { %3114 = vrot.lane.b32.xlu1 %v8235_v50, %s7023_s14 }
 0x4cf   : > { %3203 = vrot.lane.b32.xlu1 %v8241_v31, %s7014_s28 }
 0x4d3   : > { %3174 = vrot.lane.b32.xlu1 %v8241_v31, %s7021_s26 }
 0x4d7   : > { %3145 = vrot.lane.b32.xlu1 %v8241_v31, %s7022_s18 }
 0x4db   : > { %3116 = vrot.lane.b32.xlu1 %v8241_v31, %s7023_s14 }
 0x4df   : > { %3090 = vrot.lane.b32.xlu1 %v8241_v31, %s7011_s24 }
 0x4e9   : > { %v8273_v33 = vpop.permute.xlu1 %3221 }
 0x4ed   : > { %v8283_v57 = vpop.permute.xlu1 %3193 }
 0x4f1   : > { %v8289_v55 = vpop.permute.xlu1 %3164 }
 0x4f5   : > { %v8297_v36 = vpop.permute.xlu1 %3135 }
 0x4f9   : > { %v8302_v62 = vpop.permute.xlu1 %3106 }
 0x4fd   : > { %v3224_v5 = vpop.permute.xlu1 %3223 }
 0x500   : > { %v2966_v18 = vpop.f32.mrf.mxu1 }
 0x501   : > { %v2889_v40 = vpop.f32.mrf.mxu0  ;;  %v8314_v25 = vpop.permute.xlu1 %3195 }
 0x502   : > { %v2890_v11 = vadd.f32 %v2889_v40, %v2813_v27  ;;  %v2968_v30 = vpop.f32.mrf.mxu1  ;;  %v3238_v40 = vsel %vm3237_vm4, %v8273_v33, %v3224_v5 }
 0x503   : > { %v2891_v17 = vpop.f32.mrf.mxu0 }
 0x504   : > { %v2967_v42 = vadd.f32 %v2966_v18, %v2890_v11  ;;  %v2972_v37 = vpop.f32.mrf.mxu1  ;;  %v2892_v8 = vadd.f32 %v2891_v17, %v2815_v61 }
 0x505   : > { %v8321_v28 = vpop.permute.xlu1 %3166 }
 0x506   : > { %v2895_v45 = vpop.f32.mrf.mxu0  ;;  %v2969_v12 = vadd.f32 %v2968_v30, %v2892_v8  ;;  %v2974_v47 = vpop.f32.mrf.mxu1 }
 0x507   : > { %v2896_v35 = vadd.f32 %v2895_v45, %v2819_v10 }
 0x508   : > { %v2897_v38 = vpop.f32.mrf.mxu0 }
 0x509   : > { %v8261_v39 = vadd.f32 %v2897_v38, %v2821_v24  ;;  %v2973_v3 = vadd.f32 %v2972_v37, %v2896_v35  ;;  %v8325_v20 = vpop.permute.xlu1 %3137 }
 0x50b   : > { %v2975_v29 = vadd.f32 %v2974_v47, %v8261_v39 }
 0x50d   : > { %v8331_v51 = vpop.permute.xlu1 %3108 }
 0x531   : > { %v3202_v54 = vpop.permute.xlu1 %3201  ;;  %v3230_v34 = vpop.permute.xlu0 %3229 }
 0x535   : > { %v8337_v23 = vpop.permute.xlu1 %3172  ;;  %v3232_v26 = vpop.permute.xlu0 %3231 }
 0x536   : > { %v3241_v43 = vsel %vm3237_vm4, %v3230_v34, %v3232_v26 }
 0x538   : > { %v3043_v41 = vpop.f32.mrf.mxu0 }
 0x539   : > { %v8263_v15 = vadd.f32 %v3043_v41, %v2967_v42  ;;  %v8343_v19 = vpop.permute.xlu1 %3143 }
 0x53a   : > { %v3045_v63 = vpop.f32.mrf.mxu0 }
 0x53b   : > { %3225 = vrot.lane.b32.xlu0 %v8263_v15, %s7020_s25  ;;  %v3046_v7 = vadd.f32 %v3045_v63, %v2969_v12  ;;  %v3209_v12 = vsel %vm743_vm9, %v8283_v57, %v8314_v25  ;;  %v3181_v57 = vsel %vm3180_vm5, %v8289_v55, %v8321_v28  ;;  %v3152_v55 = vsel %vm3151_vm6, %v8297_v36, %v8325_v20 }
 0x53c   : > { %v3049_v14 = vpop.f32.mrf.mxu0 }
 0x53d   : > { %v8267_v53 = vadd.f32 %v3049_v14, %v2973_v3  ;;  %v8346_v16 = vpop.permute.xlu1 %3114 }
 0x53e   : > { %v3051_v22 = vpop.f32.mrf.mxu0 }
 0x53f   : > { %3233 = vrot.lane.b32.xlu1 %v8267_v53, %s7020_s25  ;;  %3197 = vrot.lane.b32.xlu0 %v8263_v15, %s7014_s28  ;;  %v3052_v32 = vadd.f32 %v3051_v22, %v2975_v29 }
 0x541   : > { %v3204_v44 = vpop.permute.xlu1 %3203 }
 0x542   : > { %v3212_v33 = vsel %vm743_vm9, %v3202_v54, %v3204_v44 }
 0x543   : > { %3088 = vrot.lane.b32.xlu1 %v8235_v50, %s7011_s24  ;;  %3168 = vrot.lane.b32.xlu0 %v8263_v15, %s7021_s26 }
 0x545   : > { %v3175_v9 = vpop.permute.xlu1 %3174 }
 0x546   : > { %v3184_v54 = vsel %vm3180_vm5, %v8337_v23, %v3175_v9 }
 0x547   : > { %3084 = vrot.lane.b32.xlu1 %v8221_v52, %s7011_s24  ;;  %3139 = vrot.lane.b32.xlu0 %v8263_v15, %s7022_s18 }
 0x549   : > { %v3146_v1 = vpop.permute.xlu1 %3145 }
 0x54a   : > { %v3155_v23 = vsel %vm3151_vm6, %v8343_v19, %v3146_v1 }
 0x54b   : > { %3082 = vrot.lane.b32.xlu1 %v8201_v59, %s7011_s24  ;;  %3110 = vrot.lane.b32.xlu0 %v8263_v15, %s7023_s14 }
 0x54d   : > { %v8366_v6 = vpop.permute.xlu1 %3116 }
 0x54e   : > { %v3126_v19 = vsel %vm3122_vm7, %v8346_v16, %v8366_v6 }
 0x54f   : > { %3062 = vrot.lane.b32.xlu1 %v8221_v52, %s7010_s15  ;;  %3227 = vrot.lane.b32.xlu0 %v3046_v7, %s7020_s25 }
 0x551   : > { %v8372_v56 = vpop.permute.xlu1 %3090 }
 0x553   : > { %3060 = vrot.lane.b32.xlu1 %v8201_v59, %s7010_s15  ;;  %3199 = vrot.lane.b32.xlu0 %v3046_v7, %s7014_s28 }
 0x557   : > { %3070 = vrot.lane.b32.xlu1 %v8267_v53, %s7010_s15  ;;  %3170 = vrot.lane.b32.xlu0 %v3046_v7, %s7021_s26 }
 0x55b   : > { %3262 = vrot.lane.b32.xlu1 %v8267_v53, %s7024_s29  ;;  %3141 = vrot.lane.b32.xlu0 %v3046_v7, %s7022_s18 }
 0x55f   : > { %3252 = vrot.lane.b32.xlu1 %v8221_v52, %s7024_s29  ;;  %3112 = vrot.lane.b32.xlu0 %v3046_v7, %s7023_s14 }
 0x563   : > { %3250 = vrot.lane.b32.xlu1 %v8201_v59, %s7024_s29  ;;  %3086 = vrot.lane.b32.xlu0 %v8263_v15, %s7011_s24 }
 0x567   : > { %3256 = vrot.lane.b32.xlu1 %v3046_v7, %s7024_s29  ;;  %3068 = vrot.lane.b32.xlu0 %v8241_v31, %s7010_s15 }
 0x56b   : > { %3066 = vrot.lane.b32.xlu0 %v8235_v50, %s7010_s15 }
 0x56f   : > { %3064 = vrot.lane.b32.xlu0 %v8263_v15, %s7010_s15 }
 0x573   : > { %3205 = vrot.lane.b32.xlu0 %v8267_v53, %s7014_s28 }
 0x577   : > { %3176 = vrot.lane.b32.xlu0 %v8267_v53, %s7021_s26 }
 0x57b   : > { %3147 = vrot.lane.b32.xlu0 %v8267_v53, %s7022_s18 }
 0x57f   : > { %3118 = vrot.lane.b32.xlu0 %v8267_v53, %s7023_s14 }
 0x583   : > { %3092 = vrot.lane.b32.xlu0 %v8267_v53, %s7011_s24 }
 0x587   : > { %3235 = vrot.lane.b32.xlu0 %v3052_v32, %s7020_s25 }
 0x58b   : > { %3207 = vrot.lane.b32.xlu0 %v3052_v32, %s7014_s28 }
 0x58f   : > { %3178 = vrot.lane.b32.xlu0 %v3052_v32, %s7021_s26  ;;  %s508_s26 = scalar_lea.vmem %s8693_s13, %s6465_s19 }
 0x593   : > { %3149 = vrot.lane.b32.xlu0 %v3052_v32, %s7022_s18 }
 0x597   : > { %3120 = vrot.lane.b32.xlu0 %v3052_v32, %s7023_s14 }
 0x59b   : > { %3260 = vrot.lane.b32.xlu0 %v8241_v31, %s7024_s29 }
 0x59f   : > { %3258 = vrot.lane.b32.xlu0 %v8235_v50, %s7024_s29 }
 0x5a3   : > { %3254 = vrot.lane.b32.xlu0 %v8263_v15, %s7024_s29 }
 0x5a7   : > { %3264 = vrot.lane.b32.xlu0 %v3052_v32, %s7024_s29 }
 0x5ab   : > { %3283 = vperm.xlu0 %6713, %v3280_v46  }
 0x5ad   : > { %v8374_v49 = vpop.permute.xlu0 %3225 }
 0x5ae   : > { %v3239_v24 = vsel %vm3237_vm4, %v3224_v5, %v8374_v49 }
 0x5b1   : > { %v8376_v60 = vpop.permute.xlu1 %3233  ;;  %v8378_v58 = vpop.permute.xlu0 %3197 }
 0x5b2   : > { %v3242_v48 = vsel %vm3237_vm4, %v3232_v26, %v8376_v60  ;;  %v3210_v8 = vsel %vm743_vm9, %v8314_v25, %v8378_v58 }
 0x5b3   : > { %3291 = vmatprep.subr.mxu1 %v3242_v48 }
 0x5b4   : > { %3292 = vmatpush1.msra.mxu1 %v3241_v43 }
 0x5b5   : > { %3293 = vmatprep.subr.mxu1 %v3239_v24  ;;  %v8387_v17 = vpop.permute.xlu0 %3168  ;;  %v3089_v42 = vpop.permute.xlu1 %3088 }
 0x5b6   : > { %3294 = vmatpush1.msra.mxu1 %v3238_v40  ;;  %v3182_v47 = vsel %vm3180_vm5, %v8321_v28, %v8387_v17  ;;  %v3096_v16 = vsel %vm623_vm3, %v3089_v42, %v8372_v56 }
 0x5b9   : > { %v8389_v45 = vpop.permute.xlu0 %3139  ;;  %v3085_v37 = vpop.permute.xlu1 %3084 }
 0x5ba   : > { %v3153_v32 = vsel %vm3151_vm6, %v8325_v20, %v8389_v45  ;;  %v3123_v20 = vsel %vm3122_vm7, %v8302_v62, %v8331_v51 }
 0x5bd   : > { %v8391_v38 = vpop.permute.xlu0 %3110  ;;  %v3083_v61 = vpop.permute.xlu1 %3082 }
 0x5be   : > { %v3124_v36 = vsel %vm3122_vm7, %v8331_v51, %v8391_v38 }
 0x5c1   : > { %v8393_v39 = vpop.permute.xlu0 %3227  ;;  %v3063_v25 = vpop.permute.xlu1 %3062 }
 0x5c5   : > { %v8395_v27 = vpop.permute.xlu0 %3199  ;;  %v3061_v0 = vpop.permute.xlu1 %3060 }
 0x5c6   : > { %v3072_v24 = vsel %vm583_vm0, %v3061_v0, %v3063_v25  ;;  %v3481_v0 = vld [vmem:[#allocation7 + $0x60] sm:$0xff] }
 0x5c9   : > { %v8397_v18 = vpop.permute.xlu0 %3170  ;;  %v3071_v46 = vpop.permute.xlu1 %3070 }
 0x5cd   : > { %v8399_v11 = vpop.permute.xlu0 %3141 }
 0x5d1   : > { %v8401_v10 = vpop.permute.xlu0 %3112 }
 0x5d5   : > { %v8403_v30 = vpop.permute.xlu0 %3086 }
 0x5d6   : > { %v3095_v34 = vsel %vm623_vm3, %v3085_v37, %v8403_v30 }
 0x5d9   : > { %v3069_v35 = vpop.permute.xlu0 %3068 }
 0x5da   : > { %v3075_v26 = vsel %vm583_vm0, %v3069_v35, %v3071_v46 }
 0x5dd   : > { %v3067_v41 = vpop.permute.xlu0 %3066 }
 0x5de   : > { %v3074_v48 = vsel %vm583_vm0, %v3067_v41, %v3069_v35 }
 0x5e1   : > { %v8405_v63 = vpop.permute.xlu0 %3064 }
 0x5e2   : > { %v3073_v43 = vsel %vm583_vm0, %v3063_v25, %v8405_v63 }
 0x5e5   : > { %v8407_v3 = vpop.permute.xlu0 %3205 }
 0x5e6   : > { %v3213_v14 = vsel %vm743_vm9, %v3204_v44, %v8407_v3 }
 0x5e7   : > { %3295 = vmatprep.subr.mxu1 %v3213_v14 }
 0x5e8   : > { %3296 = vmatpush1.msra.mxu1 %v3212_v33 }
 0x5e9   : > { %3297 = vmatprep.subr.mxu1 %v3210_v8  ;;  %v8418_v7 = vpop.permute.xlu0 %3176 }
 0x5ea   : > { %3298 = vmatpush1.msra.mxu1 %v3209_v12  ;;  %v3185_v5 = vsel %vm3180_vm5, %v3175_v9, %v8418_v7 }
 0x5eb   : > { %3299 = vmatprep.subr.mxu1 %v3185_v5  ;;  %v3500_v5 = vld [vmem:[#allocation7 + $0xf8] sm:$0xff] }
 0x5ec   : > { %3300 = vmatpush1.msra.mxu1 %v3184_v54  ;;  %v3484_v54 = vld [vmem:[#allocation7 + $0x78] sm:$0xff] }
 0x5ed   : > { %3301 = vmatprep.subr.mxu1 %v3182_v47  ;;  %v8430_v22 = vpop.permute.xlu0 %3147  ;;  %v3499_v47 = vld [vmem:[#allocation7 + $0xf0] sm:$0xff] }
 0x5ee   : > { %3302 = vmatpush1.msra.mxu1 %v3181_v57  ;;  %v3156_v29 = vsel %vm3151_vm6, %v3146_v1, %v8430_v22  ;;  %v3483_v57 = vld [vmem:[#allocation7 + $0x70] sm:$0xff] }
 0x5ef   : > { %3303 = vmatprep.subr.mxu1 %v3156_v29 }
 0x5f0   : > { %3304 = vmatpush1.msra.mxu1 %v3155_v23  ;;  %v3498_v23 = vld [vmem:[#allocation7 + $0xe8] sm:$0xff] }
 0x5f1   : > { %3305 = vmatprep.subr.mxu1 %v3153_v32  ;;  %v8442_v28 = vpop.permute.xlu0 %3118  ;;  %v3482_v32 = vld [vmem:[#allocation7 + $0x68] sm:$0xff] }
 0x5f2   : > { %3306 = vmatpush1.msra.mxu1 %v3152_v55  ;;  %v3127_v44 = vsel %vm3122_vm7, %v8366_v6, %v8442_v28  ;;  %v3094_v6 = vsel %vm623_vm3, %v3083_v61, %v3085_v37 }
 0x5f3   : > { %3307 = vmatprep.subr.mxu1 %v3127_v44  ;;  %v3497_v44 = vld [vmem:[#allocation7 + $0xe0] sm:$0xff] }
 0x5f4   : > { %3308 = vmatpush1.msra.mxu1 %v3126_v19 }
 0x5f5   : > { %3309 = vmatprep.subr.mxu1 %v3124_v36  ;;  %v8456_v9 = vpop.permute.xlu0 %3092  ;;  %v3496_v36 = vld [vmem:[#allocation7 + $0xd8] sm:$0xff] }
 0x5f6   : > { %3310 = vmatpush1.msra.mxu1 %v3123_v20  ;;  %v3097_v1 = vsel %vm623_vm3, %v8372_v56, %v8456_v9  ;;  %v3240_v56 = vsel %vm3237_vm4, %v8374_v49, %v8393_v39  ;;  %v3211_v49 = vsel %vm743_vm9, %v8378_v58, %v8395_v27  ;;  %v3263_v58 = vpop.permute.xlu1 %3262  ;;  %vm3266_vm3 = vcmask 867328   ;;  %v3480_v20 = vld [vmem:[#allocation7 + $0x58] sm:$0xff] }
 0x5f7   : > { %3311 = vmatprep.subr.mxu1 %v3097_v1  ;;  %v3479_v1 = vld [vmem:[#allocation7 + $0x50] sm:$0xff] }
 0x5f8   : > { %3312 = vmatpush1.msra.mxu1 %v3096_v16  ;;  %v3494_v16 = vld [vmem:[#allocation7 + $0xc8] sm:$0xff] }
 0x5f9   : > { %3313 = vmatprep.subr.mxu1 %v3095_v34  ;;  %v3236_v62 = vpop.permute.xlu0 %3235  ;;  %v3478_v34 = vld [vmem:[#allocation7 + $0x48] sm:$0xff] }
 0x5fa   : > { %v3243_v51 = vsel %vm3237_vm4, %v8376_v60, %v3236_v62  ;;  %3314 = vmatpush1.msra.mxu1 %v3094_v6  ;;  %v3493_v6 = vld [vmem:[#allocation7 + $0xc0] sm:$0xff]  ;;  %v3492_v62 = vld [vmem:[#allocation7 + $0xb8] sm:$0xff] }
 0x5fb   : > { %3315 = vmatprep.subr.mxu1 %v3075_v26  ;;  %3363 = vmatpush1.msra.mxu0 %v3243_v51  ;;  %v3476_v51 = vld [vmem:[#allocation7 + $0x38] sm:$0xff]  ;;  %v3491_v26 = vld [vmem:[#allocation7 + $0xb0] sm:$0xff] }
 0x5fc   : > { %3316 = vmatpush1.msra.mxu1 %v3074_v48  ;;  %3364 = vmatprep.subr.mxu0 %v7018_v21  ;;  %v3475_v48 = vld [vmem:[#allocation7 + $0x30] sm:$0xff] }
 0x5fd   : > { %3317 = vmatprep.subr.mxu1 %v3073_v43  ;;  %3365 = vmatpush1.msra.mxu0 %v3240_v56  ;;  %v3208_v60 = vpop.permute.xlu0 %3207  ;;  %v3490_v56 = vld [vmem:[#allocation7 + $0xa8] sm:$0xff] }
 0x5fe   : > { %v3214_v40 = vsel %vm743_vm9, %v8407_v3, %v3208_v60  ;;  %3318 = vmatpush1.msra.mxu1 %v3072_v24  ;;  %3366 = vmatprep.subr.mxu0 %v7018_v21  ;;  %v3474_v43 = vld [vmem:[#allocation7 + $0x28] sm:$0xff]  ;;  %v3489_v24 = vld [vmem:[#allocation7 + $0xa0] sm:$0xff]  ;;  %vm3515_vm9 = vcmask 908288  }
 0x5ff   : > { %3319 = vmatprep.subr.mxu1 %v8241_v31  ;;  %3367 = vmatpush1.msra.mxu0 %v3214_v40  ;;  %v3183_v31 = vsel %vm3180_vm5, %v8387_v17, %v8397_v18  ;;  %v3125_v18 = vsel %vm3122_vm7, %v8391_v38, %v8401_v10  ;;  %v3473_v60 = vld [vmem:[#allocation7 + $0x20] sm:$0xff]  ;;  %v3488_v40 = vld [vmem:[#allocation7 + $0x98] sm:$0xff] }
 0x600   : > { %3320 = vmatpush1.msra.mxu1 %v8235_v50  ;;  %3368 = vmatprep.subr.mxu0 %v7018_v21 }
 0x601   : > { %3321 = vmatprep.subr.mxu1 %v8221_v52  ;;  %3369 = vmatpush1.msra.mxu0 %v3211_v49  ;;  %v3179_v39 = vpop.permute.xlu0 %3178  ;;  %v3472_v49 = vld [vmem:[#allocation7 + $0x18] sm:$0xff] }
 0x602   : > { %v3186_v35 = vsel %vm3180_vm5, %v8418_v7, %v3179_v39  ;;  %3322 = vmatpush1.msra.mxu1 %v8201_v59  ;;  %3370 = vmatprep.subr.mxu0 %v7018_v21  ;;  %v3154_v59 = vsel %vm3151_vm6, %v8389_v45, %v8399_v11  ;;  %v3253_v45 = vpop.permute.xlu1 %3252  ;;  %v3487_v39 = vld [vmem:[#allocation7 + $0x90] sm:$0xff] }
 0x603   : > { %3371 = vmatpush1.msra.mxu0 %v3186_v35  ;;  %v3471_v35 = vld [vmem:[#allocation7 + $0x10] sm:$0xff] }
 0x604   : > { %3372 = vmatprep.subr.mxu0 %v7018_v21 }
 0x605   : > { %3373 = vmatpush1.msra.mxu0 %v3183_v31  ;;  %v3150_v50 = vpop.permute.xlu0 %3149  ;;  %v3486_v31 = vld [vmem:[#allocation7 + $0x88] sm:$0xff] }
 0x606   : > { %v3157_v52 = vsel %vm3151_vm6, %v8430_v22, %v3150_v50  ;;  %3374 = vmatprep.subr.mxu0 %v7018_v21  ;;  %v3251_v10 = vpop.permute.xlu1 %3250  ;;  %v3470_v50 = vld [vmem:[#allocation7 + $0x8] sm:$0xff] }
 0x607   : > { %3375 = vmatpush1.msra.mxu0 %v3157_v52  ;;  %v3267_v14 = vsel %vm3266_vm3, %v3251_v10, %v3253_v45  ;;  %v3485_v52 = vld [vmem:[#allocation7 + $0x80] sm:$0xff] }
 0x608   : > { %3376 = vmatprep.subr.mxu0 %v7018_v21 }
 0x609   : > { %3377 = vmatpush1.msra.mxu0 %v3154_v59  ;;  %v3121_v27 = vpop.permute.xlu0 %3120 }
 0x60a   : > { %v3128_v17 = vsel %vm3122_vm7, %v8442_v28, %v3121_v27  ;;  %3378 = vmatprep.subr.mxu0 %v7018_v21  ;;  %v3257_v33 = vpop.permute.xlu1 %3256 }
 0x60b   : > { %3379 = vmatpush1.msra.mxu0 %v3128_v17 }
 0x60c   : > { %3380 = vmatprep.subr.mxu0 %v7018_v21 }
 0x60d   : > { %3381 = vmatpush1.msra.mxu0 %v3125_v18  ;;  %v3261_v42 = vpop.permute.xlu0 %3260 }
 0x60e   : > { %3382 = vmatprep.subr.mxu0 %v7018_v21  ;;  %v3271_v11 = vsel %vm3266_vm3, %v3261_v42, %v3263_v58 }
 0x60f   : > { %3351 = vmatprep.subr.mxu1 %v3271_v11  ;;  %3383 = vmatpush1.msra.mxu0 %v8456_v9  ;;  %v3495_v9 = vld [vmem:[#allocation7 + $0xd0] sm:$0xff] }
 0x610   : > { %3384 = vmatprep.subr.mxu0 %v7018_v21 }
 0x611   : > { %3385 = vmatpush1.msra.mxu0 %v8403_v30  ;;  %v3259_v41 = vpop.permute.xlu0 %3258 }
 0x612   : > { %v3270_v38 = vsel %vm3266_vm3, %v3259_v41, %v3261_v42  ;;  %3386 = vmatprep.subr.mxu0 %v7018_v21 }
 0x613   : > { %3352 = vmatpush2.msra.mxu1 %v3270_v38  ;;  %3387 = vmatpush1.msra.mxu0 %v3071_v46  ;;  %v3477_v46 = vld [vmem:[#allocation7 + $0x40] sm:$0xff] }
 0x614   : > { %3388 = vmatprep.subr.mxu0 %v7018_v21 }
 0x615   : > { %3389 = vmatpush1.msra.mxu0 %v8405_v63  ;;  %v3255_v37 = vpop.permute.xlu0 %3254 }
 0x616   : > { %3390 = vmatprep.subr.mxu0 %v7018_v21  ;;  %v3268_v3 = vsel %vm3266_vm3, %v3253_v45, %v3255_v37  ;;  %v3269_v61 = vsel %vm3266_vm3, %v3255_v37, %v3257_v33 }
 0x617   : > { %3353 = vmatprep.subr.mxu1 %v3268_v3  ;;  %3391 = vmatpush1.msra.mxu0 %v8267_v53 }
 0x618   : > { %3354 = vmatpush2.msra.mxu1 %v3267_v14  ;;  %3392 = vmatprep.subr.mxu0 %v7018_v21 }
 0x619   : > { %3356 = vmatmul.mubr.f32.vlgmr.msra.gmra.mxu1 %v8353_v13  ;;  %3393 = vmatpush1.msra.mxu0 %v8263_v15  ;;  %v3265_v30 = vpop.permute.xlu0 %3264 }
 0x61a   : > { %v3272_v63 = vsel %vm3266_vm3, %v3263_v58, %v3265_v30  ;;  %3422 = vmatprep.subr.mxu0 %v7018_v21  ;;  %6518 = vmatprep.subr.mxu1 %v3500_v5  ;;  %v3469_v58 = vld [vmem:[#allocation7] sm:$0xff]  ;;  %v3510_v5 = vld [vmem:[#allocation7 + $0x148] sm:$0xff] }
 0x61b   : > { %3423 = vmatpush2.msra.mxu0 %v3272_v63  ;;  %6519 = vmatpush3.msra.mxu1 %v3484_v54  ;;  %v3509_v54 = vld [vmem:[#allocation7 + $0x140] sm:$0xff] }
 0x61c   : > { %3424 = vmatprep.subr.mxu0 %v7018_v21  ;;  %6520 = vmatprep.subr.mxu1 %v3499_v47  ;;  %v3508_v47 = vld [vmem:[#allocation7 + $0x138] sm:$0xff] }
 0x61d   : > { %3425 = vmatpush2.msra.mxu0 %v3269_v61  ;;  %6521 = vmatpush3.msra.mxu1 %v3483_v57  ;;  %v3507_v57 = vld [vmem:[#allocation7 + $0x130] sm:$0xff] }
 0x61e   : > { %3427 = vmatmul.mubr.f32.vlgmr.msra.gmra.mxu0 %v8353_v13  ;;  %6522 = vmatprep.subr.mxu1 %v3498_v23  ;;  %v3503_v23 = vld [vmem:[#allocation7 + $0x110] sm:$0xff] }
 0x61f   : > { %6523 = vmatpush3.msra.mxu1 %v3482_v32  ;;  %v3501_v32 = vld [vmem:[#allocation7 + $0x100] sm:$0xff] }
 0x620   : > { %6524 = vmatprep.subr.mxu1 %v3497_v44 }
 0x621   : > { %6525 = vmatpush3.msra.mxu1 %v3481_v0 }
 0x622   : > { %6526 = vmatprep.subr.mxu1 %v3496_v36 }
 0x623   : > { %6527 = vmatpush3.msra.mxu1 %v3480_v20 }
 0x624   : > { %6528 = vmatprep.subr.mxu1 %v3495_v9 }
 0x625   : > { %6529 = vmatpush3.msra.mxu1 %v3479_v1  ;;  %v3663_v1 = vld [vmem:[%s8685_s5 + $0x8] sm:$0xff] }
 0x626   : > { %v3284_v53 = vpop.permute.xlu0 %3283  ;;  %6530 = vmatprep.subr.mxu1 %v3494_v16  ;;  %v3664_v16 = vld [vmem:[%s8685_s5 + $0x10] sm:$0xff] }
 0x627   : > { %6531 = vmatpush3.msra.mxu1 %v3478_v34  ;;  %v3665_v34 = vld [vmem:[%s8685_s5 + $0x18] sm:$0xff] }
 0x628   : > { %6532 = vmatprep.subr.mxu1 %v3493_v6  ;;  %v3666_v6 = vld [vmem:[%s8685_s5 + $0x20] sm:$0xff] }
 0x629   : > { %6533 = vmatpush3.msra.mxu1 %v3477_v46  ;;  %v3667_v46 = vld [vmem:[%s8685_s5 + $0x28] sm:$0xff] }
 0x62a   : > { %6534 = vmatprep.subr.mxu1 %v3492_v62  ;;  %v3668_v62 = vld [vmem:[%s8685_s5 + $0x30] sm:$0xff] }
 0x62b   : > { %6535 = vmatpush3.msra.mxu1 %v3476_v51  ;;  %v3669_v51 = vld [vmem:[%s8685_s5 + $0x38] sm:$0xff] }
 0x62c   : > { %6536 = vmatprep.subr.mxu1 %v3491_v26  ;;  %v3855_v26 = vld [vmem:[#allocation8 + $0xf8] sm:$0xff] }
 0x62d   : > { %6537 = vmatpush3.msra.mxu1 %v3475_v48  ;;  %v3854_v48 = vld [vmem:[#allocation8 + $0xf0] sm:$0xff]  ;;  %3900 = vmatprep.subr.mxu0 %v3855_v26  ;;  %v3859_v26 = vld [vmem:[#allocation8 + $0x118] sm:$0xff] }
 0x62e   : > { %6538 = vmatprep.subr.mxu1 %v3490_v56  ;;  %v3853_v56 = vld [vmem:[#allocation8 + $0xe8] sm:$0xff]  ;;  %3901 = vmatpush1.msra.mxu0 %v3854_v48 }
 0x62f   : > { %6539 = vmatpush3.msra.mxu1 %v3474_v43  ;;  %v3852_v43 = vld [vmem:[#allocation8 + $0xe0] sm:$0xff]  ;;  %3902 = vmatprep.subr.mxu0 %v3853_v56  ;;  %v3858_v56 = vld [vmem:[#allocation8 + $0x110] sm:$0xff] }
 0x630   : > { %6540 = vmatprep.subr.mxu1 %v3489_v24  ;;  %v3851_v24 = vld [vmem:[#allocation8 + $0xd8] sm:$0xff]  ;;  %3903 = vmatpush1.msra.mxu0 %v3852_v43  ;;  %v3857_v43 = vld [vmem:[#allocation8 + $0x108] sm:$0xff] }
 0x631   : > { %6541 = vmatpush3.msra.mxu1 %v3473_v60  ;;  %v3850_v60 = vld [vmem:[#allocation8 + $0xd0] sm:$0xff]  ;;  %3904 = vmatprep.subr.mxu0 %v3851_v24  ;;  %v3856_v24 = vld [vmem:[#allocation8 + $0x100] sm:$0xff] }
 0x632   : > { %6542 = vmatprep.subr.mxu1 %v3488_v40  ;;  %v3849_v40 = vld [vmem:[#allocation8 + $0xc8] sm:$0xff]  ;;  %3905 = vmatpush1.msra.mxu0 %v3850_v60 }
 0x633   : > { %6543 = vmatpush3.msra.mxu1 %v3472_v49  ;;  %v3848_v49 = vld [vmem:[#allocation8 + $0xc0] sm:$0xff]  ;;  %3906 = vmatprep.subr.mxu0 %v3849_v40 }
 0x634   : > { %6544 = vmatprep.subr.mxu1 %v3487_v39  ;;  %v3847_v39 = vld [vmem:[#allocation8 + $0xb8] sm:$0xff]  ;;  %3907 = vmatpush1.msra.mxu0 %v3848_v49 }
 0x635   : > { %6545 = vmatpush3.msra.mxu1 %v3471_v35  ;;  %v3846_v35 = vld [vmem:[#allocation8 + $0xb0] sm:$0xff]  ;;  %3908 = vmatprep.subr.mxu0 %v3847_v39 }
 0x636   : > { %6546 = vmatprep.subr.mxu1 %v3486_v31  ;;  %v3845_v31 = vld [vmem:[#allocation8 + $0xa8] sm:$0xff]  ;;  %3909 = vmatpush1.msra.mxu0 %v3846_v35 }
 0x637   : > { %6547 = vmatpush3.msra.mxu1 %v3470_v50  ;;  %v3843_v50 = vld [vmem:[#allocation8 + $0x98] sm:$0xff]  ;;  %3910 = vmatprep.subr.mxu0 %v3845_v31 }
 0x638   : > { %6548 = vmatprep.subr.mxu1 %v3485_v52  ;;  %v3842_v52 = vld [vmem:[#allocation8 + $0x90] sm:$0xff] }
 0x639   : > { %6549 = vmatpush3.msra.mxu1 %v3469_v58  ;;  %v3841_v58 = vld [vmem:[#allocation8 + $0x88] sm:$0xff] }
 0x63a   : > { %6577 = vmatprep.subr.mxu1 %v7018_v21 }
 0x6d9   : > { %v3357_v8 = vpop.f32.mrf.mxu1 }
 0x6da   : > { %v8530_v12 = vadd.f32 %v3357_v8, %v3284_v53  ;;  %v3514_v8 = vld [vmem:[#allocation7 + $0x168] sm:$0x7f] }
 0x6db   : > { %v3359_v7 = vpop.f32.mrf.mxu1 }
 0x6dc   : > { %v8532_v15 = vadd.f32 %v3359_v7, %v3284_v53  ;;  %v3432_v25 = vmax.f32 %v8530_v12, 0.0  ;;  %v3513_v12 = vld [vmem:[#allocation7 + $0x160] sm:$0xff]  ;;  %v3512_v7 = vld [vmem:[#allocation7 + $0x158] sm:$0xff] }
 0x6de   : > { %v3433_v22 = vmax.f32 %v8532_v15, 0.0  ;;  %v3428_v29 = vpop.f32.mrf.mxu0  ;;  %v3511_v15 = vld [vmem:[#allocation7 + $0x150] sm:$0xff] }
 0x6df   : > { %v8536_v13 = vadd.f32 %v3428_v29, %v3284_v53  ;;  %v3504_v29 = vld [vmem:[#allocation7 + $0x118] sm:$0xff] }
 0x6e0   : > { %v6794_v55 = vpack.i.bf16 %v3432_v25, %v3433_v22  ;;  %v3430_v28 = vpop.f32.mrf.mxu0 }
 0x6e1   : > { %v3434_v19 = vmax.f32 %v8536_v13, 0.0  ;;  %v3502_v13 = vld [vmem:[#allocation7 + $0x108] sm:$0xff]  ;;  %v3662_v28 = vld [vmem:[%s8685_s5] sm:$0xff] }
 0x6e2   : > { %6795 = vrot.lane.b32.xlu1 %v6794_v55, %s7010_s15 }
 0x6e3   : > { %3442 = vrot.lane.b32.xlu0 %v3434_v19, %s7010_s15  ;;  %s7026_s15 = smov 64  }
 0x754   : > { %v6796_v59 = vpop.permute.xlu1 %6795 }
 0x755   : > { %v6798_v27 = vunpack.i.h.bf16 %v6796_v59  ;;  %v6797_v17 = vunpack.i.l.bf16 %v6796_v59  ;;  %v3443_v18 = vpop.permute.xlu0 %3442  ;;  %v3840_v59 = vld [vmem:[#allocation8 + $0x80] sm:$0xff] }
 0x756   : > { %v8546_v42 = vmax.f32 %v3434_v19, %v3443_v18 }
 0x757   : > { %v3444_v45 = vsel %vm583_vm0, %v6798_v27, %v6797_v17  ;;  %v3445_v11 = vsel %vm583_vm0, %v6797_v17, %v3443_v18  ;;  %vm7025_vm0 = vmmov 0   ;;  %v3839_v27 = vld [vmem:[#allocation8 + $0x78] sm:$0xff]  ;;  %v3838_v17 = vld [vmem:[#allocation8 + $0x70] sm:$0xff]  ;;  %v3837_v18 = vld [vmem:[#allocation8 + $0x68] sm:$0xff] }
 0x758   : > { %v3449_v41 = vmax.f32 %v3432_v25, %v3444_v45  ;;  %v3450_v38 = vmax.f32 %v3433_v22, %v3445_v11  ;;  %3459 = vrot.lane.b32.xlu0 %v8546_v42, %s7023_s14  ;;  %v3506_v25 = vld [vmem:[#allocation7 + $0x128] sm:$0xff]  ;;  %v3505_v22 = vld [vmem:[#allocation7 + $0x120] sm:$0xff] }
 0x759   : > { %v3835_v45 = vld [vmem:[#allocation8 + $0x58] sm:$0xff]  ;;  %v3834_v11 = vld [vmem:[#allocation8 + $0x50] sm:$0xff] }
 0x75a   : > { %v6799_v10 = vpack.i.bf16 %v3449_v41, %v3450_v38 }
 0x75c   : > { %6800 = vrot.lane.b32.xlu1 %v6799_v10, %s7023_s14  ;;  %v3831_v10 = vld [vmem:[#allocation8 + $0x38] sm:$0xff] }
 0x7ca   : > { %v3460_v30 = vpop.permute.xlu0 %3459 }
 0x7cb   : > { %v3468_v55 = vmax.f32 %v8546_v42, %v3460_v30  ;;  %v3836_v42 = vld [vmem:[#allocation8 + $0x60] sm:$0xff] }
 0x7ce   : > { %v6801_v37 = vpop.permute.xlu1 %6800 }
 0x7cf   : > { %v6803_v3 = vunpack.i.h.bf16 %v6801_v37  ;;  %v6802_v14 = vunpack.i.l.bf16 %v6801_v37  ;;  %v3830_v37 = vld [vmem:[#allocation8 + $0x30] sm:$0xff] }
 0x7d1   : > { %v3461_v63 = vsel %vm3122_vm7, %v6803_v3, %v6802_v14  ;;  %v3462_v33 = vsel %vm3122_vm7, %v6802_v14, %v3460_v30  ;;  %v3829_v3 = vld [vmem:[#allocation8 + $0x28] sm:$0xff]  ;;  %v3828_v14 = vld [vmem:[#allocation8 + $0x20] sm:$0xff]  ;;  %v3827_v30 = vld [vmem:[#allocation8 + $0x18] sm:$0xff] }
 0x7d2   : > { %v3466_v61 = vmax.f32 %v3449_v41, %v3461_v63  ;;  %v3467_v53 = vmax.f32 %v3450_v38, %v3462_v33  ;;  %v3833_v41 = vld [vmem:[#allocation8 + $0x48] sm:$0xff]  ;;  %v3832_v38 = vld [vmem:[#allocation8 + $0x40] sm:$0xff]  ;;  %v3826_v63 = vld [vmem:[#allocation8 + $0x10] sm:$0xff] }
 0x7d3   : > { %v3825_v33 = vld [vmem:[#allocation8 + $0x8] sm:$0xff] }
 0x7d4   : > { %3586 = vmatprep.mubr.f32.mxu1 %v3467_v53  ;;  %v3887_v53 = vld [vmem:[#allocation8 + $0x1f8] sm:$0xff] }
 0x7d5   : > { %3587 = vmatmul.mubr.f32.vlgmr.msra.gmra.mxu1 %v3466_v61  ;;  %v3824_v61 = vld [vmem:[#allocation8] sm:$0xff] }
 0x7d6   : > { %6578 = vmatpush3.msk.msra.mxu1 %vm952_vm14, %v3514_v8  ;;  %6605 = vmatprep.mubr.msk.f32.mxu1 %vm7025_vm0, %v7018_v21  ;;  %v3886_v8 = vld [vmem:[#allocation8 + $0x1f0] sm:$0xff] }
 0x7d7   : > { %6579 = vmatprep.subr.mxu1 %v7018_v21 }
 0x7d8   : > { %6580 = vmatpush3.msra.mxu1 %v3513_v12  ;;  %v3885_v12 = vld [vmem:[#allocation8 + $0x1e8] sm:$0xff] }
 0x7d9   : > { %6581 = vmatprep.subr.mxu1 %v7018_v21 }
 0x7da   : > { %6582 = vmatpush3.msra.mxu1 %v3512_v7  ;;  %v3884_v7 = vld [vmem:[#allocation8 + $0x1e0] sm:$0xff] }
 0x7db   : > { %6583 = vmatprep.subr.mxu1 %v7018_v21 }
 0x7dc   : > { %6584 = vmatpush3.msra.mxu1 %v3511_v15  ;;  %v3883_v15 = vld [vmem:[#allocation8 + $0x1d8] sm:$0xff] }
 0x7dd   : > { %6585 = vmatprep.subr.mxu1 %v7018_v21 }
 0x7de   : > { %6586 = vmatpush3.msra.mxu1 %v3510_v5  ;;  %v3882_v5 = vld [vmem:[#allocation8 + $0x1d0] sm:$0xff] }
 0x7df   : > { %6587 = vmatprep.subr.mxu1 %v7018_v21 }
 0x7e0   : > { %6588 = vmatpush3.msra.mxu1 %v3509_v54  ;;  %v3881_v54 = vld [vmem:[#allocation8 + $0x1c8] sm:$0xff] }
 0x7e1   : > { %6589 = vmatprep.subr.mxu1 %v7018_v21 }
 0x7e2   : > { %6590 = vmatpush3.msra.mxu1 %v3508_v47  ;;  %v3880_v47 = vld [vmem:[#allocation8 + $0x1c0] sm:$0xff] }
 0x7e3   : > { %6591 = vmatprep.subr.mxu1 %v7018_v21 }
 0x7e4   : > { %6592 = vmatpush3.msra.mxu1 %v3507_v57  ;;  %v3879_v57 = vld [vmem:[#allocation8 + $0x1b8] sm:$0xff] }
 0x7e5   : > { %6593 = vmatprep.subr.mxu1 %v7018_v21 }
 0x7e6   : > { %6594 = vmatpush3.msra.mxu1 %v3506_v25  ;;  %v3878_v25 = vld [vmem:[#allocation8 + $0x1b0] sm:$0xff] }
 0x7e7   : > { %6595 = vmatprep.subr.mxu1 %v7018_v21 }
 0x7e8   : > { %6596 = vmatpush3.msra.mxu1 %v3505_v22  ;;  %v3877_v22 = vld [vmem:[#allocation8 + $0x1a8] sm:$0xff] }
 0x7e9   : > { %6597 = vmatprep.subr.mxu1 %v7018_v21 }
 0x7ea   : > { %6598 = vmatpush3.msra.mxu1 %v3504_v29  ;;  %v3876_v29 = vld [vmem:[#allocation8 + $0x1a0] sm:$0xff] }
 0x7eb   : > { %6599 = vmatprep.subr.mxu1 %v7018_v21 }
 0x7ec   : > { %6600 = vmatpush3.msra.mxu1 %v3503_v23  ;;  %v3875_v23 = vld [vmem:[#allocation8 + $0x198] sm:$0xff] }
 0x7ed   : > { %6601 = vmatprep.subr.mxu1 %v7018_v21 }
 0x7ee   : > { %6602 = vmatpush3.msra.mxu1 %v3502_v13  ;;  %v3874_v13 = vld [vmem:[#allocation8 + $0x190] sm:$0xff] }
 0x7ef   : > { %6603 = vmatprep.subr.mxu1 %v7018_v21 }
 0x7f0   : > { %6604 = vmatpush3.msra.mxu1 %v3501_v32  ;;  %v3873_v32 = vld [vmem:[#allocation8 + $0x188] sm:$0xff] }
 0x7f1   : > { %6606 = vmatmul.mubr.msk.f32.vlgmr.msra.gmra.mxu1 %vm3515_vm9, %v3468_v55  ;;  %v3872_v55 = vld [vmem:[#allocation8 + $0x180] sm:$0xff] }
 0x7f2   : > { %6610 = vmatprep.mubr.msk.f32.mxu1 %vm3670_vm10, %v3662_v28  ;;  %v3871_v28 = vld [vmem:[#allocation8 + $0x178] sm:$0xff] }
 0x895   : > { %v6550_v44 = vpop.f32.mrf.mxu1 }
 0x897   : > { %v6551_v19 = vpop.f32.mrf.mxu1 }
 0x898   : > { %v6552_v0 = vadd.f32 %v6551_v19, %v6550_v44  ;;  %v3870_v44 = vld [vmem:[#allocation8 + $0x170] sm:$0xff]  ;;  %v3869_v19 = vld [vmem:[#allocation8 + $0x168] sm:$0xff] }
 0x8b1   : > { %v3658_v36 = vpop.f32.mrf.mxu1 }
 0x8b2   : > { %v3659_v20 = vadd.f32 %v6552_v0, %v3658_v36  ;;  %v3868_v0 = vld [vmem:[#allocation8 + $0x160] sm:$0xff]  ;;  %v3867_v36 = vld [vmem:[#allocation8 + $0x158] sm:$0xff] }
 0x8b3   : > { %v6607_v9 = vpop.f32.mrf.mxu1 }
 0x8b4   : > { %6608 = vmatprep.subr.msk.mxu1 %vm919_vm8, %v3659_v20  ;;  %v3865_v9 = vld [vmem:[#allocation8 + $0x148] sm:$0xff] }
 0x8b5   : > { %6609 = vmatpush3.msk.msra.mxu1 %vm919_vm8, %v3659_v20  ;;  %v3866_v20 = vld [vmem:[#allocation8 + $0x150] sm:$0xff]  ;;  %vm3819_vm8 = vcmask 523264  }
 0x8b6   : > { %6611 = vmatmul.mubr.msk.f32.vlgmr.msra.gmra.mxu1 %vm3670_vm10, %v3663_v1  ;;  %v3864_v1 = vld [vmem:[#allocation8 + $0x140] sm:$0xff] }
 0x8b7   : > { %6613 = vmatprep.mubr.msk.f32.mxu1 %vm3670_vm10, %v3664_v16  ;;  %v3863_v16 = vld [vmem:[#allocation8 + $0x138] sm:$0xff] }
 0x8ba   : > { %6614 = vmatmul.mubr.msk.f32.gmra.mxu1 %vm3670_vm10, %v3665_v34  ;;  %v3862_v34 = vld [vmem:[#allocation8 + $0x130] sm:$0xff] }
 0x8bb   : > { %6616 = vmatprep.mubr.msk.f32.mxu1 %vm3670_vm10, %v3666_v6 }
 0x8be   : > { %6617 = vmatmul.mubr.msk.f32.gmra.mxu1 %vm3670_vm10, %v3667_v46  ;;  %v3861_v46 = vld [vmem:[#allocation8 + $0x128] sm:$0xff] }
 0x8bf   : > { %6619 = vmatprep.mubr.msk.f32.mxu1 %vm3670_vm10, %v3668_v62 }
 0x8c2   : > { %6620 = vmatmul.mubr.msk.f32.gmra.mxu1 %vm3670_vm10, %v3669_v51  ;;  %v3860_v51 = vld [vmem:[#allocation8 + $0x120] sm:$0xff] }
 0x8c3   : > { %4049 = vmatprep.mubr.f32.mxu1 %v7018_v21  ;;  %v3844_v21 = vld [vmem:[#allocation8 + $0xa0] sm:$0xff] }
 0x8c4   : > { %3911 = vmatpush1.msra.mxu0 %v3844_v21 }
 0x8c5   : > { %3912 = vmatprep.subr.mxu0 %v3843_v50  ;;  %v3888_v50 = vld [vmem:[%s8686_s6] sm:$0xff] }
 0x8c6   : > { %3913 = vmatpush1.msra.mxu0 %v3842_v52  ;;  %v3889_v52 = vld [vmem:[%s8686_s6 + $0x8] sm:$0xff] }
 0x8c7   : > { %3914 = vmatprep.subr.mxu0 %v3841_v58  ;;  %v5094_v58 = vld [vmem:[#allocation2] sm:$0x1] }
 0x8c8   : > { %3915 = vmatpush1.msra.mxu0 %v3840_v59 }
 0x8c9   : > { %3916 = vmatprep.subr.mxu0 %v3839_v27 }
 0x8ca   : > { %3917 = vmatpush1.msra.mxu0 %v3838_v17 }
 0x8cb   : > { %3918 = vmatprep.subr.mxu0 %v3837_v18 }
 0x8cc   : > { %3919 = vmatpush1.msra.mxu0 %v3836_v42 }
 0x8cd   : > { %3920 = vmatprep.subr.mxu0 %v3835_v45 }
 0x8ce   : > { %3921 = vmatpush1.msra.mxu0 %v3834_v11 }
 0x8cf   : > { %3922 = vmatprep.subr.mxu0 %v3833_v41 }
 0x8d0   : > { %3923 = vmatpush1.msra.mxu0 %v3832_v38 }
 0x8d1   : > { %3924 = vmatprep.subr.mxu0 %v3831_v10 }
 0x8d2   : > { %3925 = vmatpush1.msra.mxu0 %v3830_v37  ;;  %v4447_v37 = vld [vmem:[#allocation10 + $0xbc8] sm:$0xff] }
 0x8d3   : > { %3926 = vmatprep.subr.mxu0 %v3829_v3  ;;  %v4446_v3 = vld [vmem:[#allocation10 + $0xbc0] sm:$0xff] }
 0x8d4   : > { %3927 = vmatpush1.msra.mxu0 %v3828_v14  ;;  %v4439_v14 = vld [vmem:[#allocation10 + $0xb88] sm:$0xff] }
 0x8d5   : > { %3928 = vmatprep.subr.mxu0 %v3827_v30  ;;  %v4438_v30 = vld [vmem:[#allocation10 + $0xb80] sm:$0xff] }
 0x8d6   : > { %3929 = vmatpush1.msra.mxu0 %v3826_v63  ;;  %v4431_v63 = vld [vmem:[#allocation10 + $0xb48] sm:$0xff] }
 0x8d7   : > { %3930 = vmatprep.subr.mxu0 %v3825_v33  ;;  %v4430_v33 = vld [vmem:[#allocation10 + $0xb40] sm:$0xff] }
 0x8d8   : > { %3931 = vmatpush1.msra.mxu0 %v3824_v61  ;;  %v4423_v61 = vld [vmem:[#allocation10 + $0xb08] sm:$0xff] }
 0x8d9   : > { %3932 = vmatprep.subr.mxu0 %v3887_v53  ;;  %v4422_v53 = vld [vmem:[#allocation10 + $0xb00] sm:$0xff] }
 0x8da   : > { %3933 = vmatpush2.msra.mxu0 %v3886_v8  ;;  %v4415_v8 = vld [vmem:[#allocation10 + $0xac8] sm:$0xff] }
 0x8db   : > { %3934 = vmatprep.subr.mxu0 %v3885_v12  ;;  %v4414_v12 = vld [vmem:[#allocation10 + $0xac0] sm:$0xff] }
 0x8dc   : > { %3935 = vmatpush2.msra.mxu0 %v3884_v7  ;;  %v4407_v7 = vld [vmem:[#allocation10 + $0xa88] sm:$0xff] }
 0x8dd   : > { %3936 = vmatprep.subr.mxu0 %v3883_v15  ;;  %v4406_v15 = vld [vmem:[#allocation10 + $0xa80] sm:$0xff] }
 0x8de   : > { %3937 = vmatpush2.msra.mxu0 %v3882_v5  ;;  %v4399_v5 = vld [vmem:[#allocation10 + $0xa48] sm:$0xff] }
 0x8df   : > { %3938 = vmatprep.subr.mxu0 %v3881_v54  ;;  %v4398_v54 = vld [vmem:[#allocation10 + $0xa40] sm:$0xff] }
 0x8e0   : > { %3939 = vmatpush2.msra.mxu0 %v3880_v47  ;;  %v4391_v47 = vld [vmem:[#allocation10 + $0xa08] sm:$0xff] }
 0x8e1   : > { %3940 = vmatprep.subr.mxu0 %v3879_v57  ;;  %v4390_v57 = vld [vmem:[#allocation10 + $0xa00] sm:$0xff] }
 0x8e2   : > { %3941 = vmatpush2.msra.mxu0 %v3878_v25  ;;  %v4383_v25 = vld [vmem:[#allocation10 + $0x9c8] sm:$0xff] }
 0x8e3   : > { %3942 = vmatprep.subr.mxu0 %v3877_v22  ;;  %v4382_v22 = vld [vmem:[#allocation10 + $0x9c0] sm:$0xff] }
 0x8e4   : > { %3943 = vmatpush2.msra.mxu0 %v3876_v29  ;;  %v4375_v29 = vld [vmem:[#allocation10 + $0x988] sm:$0xff] }
 0x8e5   : > { %3944 = vmatprep.subr.mxu0 %v3875_v23  ;;  %v4374_v23 = vld [vmem:[#allocation10 + $0x980] sm:$0xff] }
 0x8e6   : > { %3945 = vmatpush2.msra.mxu0 %v3874_v13  ;;  %v4367_v13 = vld [vmem:[#allocation10 + $0x948] sm:$0xff] }
 0x8e7   : > { %3946 = vmatprep.subr.mxu0 %v3873_v32  ;;  %v4366_v32 = vld [vmem:[#allocation10 + $0x940] sm:$0xff] }
 0x8e8   : > { %3947 = vmatpush2.msra.mxu0 %v3872_v55  ;;  %v4359_v55 = vld [vmem:[#allocation10 + $0x908] sm:$0xff] }
 0x8e9   : > { %3948 = vmatprep.subr.mxu0 %v3871_v28  ;;  %v4358_v28 = vld [vmem:[#allocation10 + $0x900] sm:$0xff] }
 0x8ea   : > { %3949 = vmatpush2.msra.mxu0 %v3870_v44  ;;  %v4351_v44 = vld [vmem:[#allocation10 + $0x8c8] sm:$0xff] }
 0x8eb   : > { %3950 = vmatprep.subr.mxu0 %v3869_v19  ;;  %v4350_v19 = vld [vmem:[#allocation10 + $0x8c0] sm:$0xff] }
 0x8ec   : > { %3951 = vmatpush2.msra.mxu0 %v3868_v0  ;;  %v4343_v0 = vld [vmem:[#allocation10 + $0x888] sm:$0xff] }
 0x8ed   : > { %3952 = vmatprep.subr.mxu0 %v3867_v36  ;;  %v4342_v36 = vld [vmem:[#allocation10 + $0x880] sm:$0xff] }
 0x8ee   : > { %3953 = vmatpush2.msra.mxu0 %v3866_v20  ;;  %v4335_v20 = vld [vmem:[#allocation10 + $0x848] sm:$0xff] }
 0x8ef   : > { %3954 = vmatprep.subr.mxu0 %v3865_v9  ;;  %v4334_v9 = vld [vmem:[#allocation10 + $0x840] sm:$0xff] }
 0x8f0   : > { %3955 = vmatpush2.msra.mxu0 %v3864_v1  ;;  %v4327_v1 = vld [vmem:[#allocation10 + $0x808] sm:$0xff] }
 0x8f1   : > { %3956 = vmatprep.subr.mxu0 %v3863_v16  ;;  %v4326_v16 = vld [vmem:[#allocation10 + $0x800] sm:$0xff] }
 0x8f2   : > { %3957 = vmatpush2.msra.mxu0 %v3862_v34  ;;  %v4575_v34 = vld [vmem:[#allocation10 + $0xfc8] sm:$0xff] }
 0x8f3   : > { %3958 = vmatprep.subr.mxu0 %v3861_v46  ;;  %v4567_v46 = vld [vmem:[#allocation10 + $0xf88] sm:$0xff] }
 0x8f4   : > { %3959 = vmatpush2.msra.mxu0 %v3860_v51  ;;  %v4559_v51 = vld [vmem:[#allocation10 + $0xf48] sm:$0xff] }
 0x8f5   : > { %3960 = vmatprep.subr.mxu0 %v3859_v26  ;;  %v4558_v26 = vld [vmem:[#allocation10 + $0xf40] sm:$0xff] }
 0x8f6   : > { %3961 = vmatpush2.msra.mxu0 %v3858_v56  ;;  %v4550_v56 = vld [vmem:[#allocation10 + $0xf00] sm:$0xff] }
 0x8f7   : > { %3962 = vmatprep.subr.mxu0 %v3857_v43  ;;  %v4543_v43 = vld [vmem:[#allocation10 + $0xec8] sm:$0xff] }
 0x8f8   : > { %3963 = vmatpush2.msra.mxu0 %v3856_v24  ;;  %v4542_v24 = vld [vmem:[#allocation10 + $0xec0] sm:$0xff] }
 0x8f9   : > { %5175 = vmatprep.subr.mxu0 %v4447_v37 }
 0x976   : > { %v6612_v6 = vpop.f32.mrf.mxu1 }
 0x978   : > { %v3764_v62 = vpop.f32.mrf.mxu1 }
 0x97a   : > { %v6615_v48 = vpop.f32.mrf.mxu1 }
 0x97c   : > { %v3774_v60 = vpop.f32.mrf.mxu1 }
 0x97e   : > { %v6618_v40 = vpop.f32.mrf.mxu1 }
 0x980   : > { %v3784_v49 = vpop.f32.mrf.mxu1 }
 0x982   : > { %v6621_v39 = vpop.f32.mrf.mxu1 }
 0x983   : > { %v6809_v35 = vpack.i.bf16 %v6615_v48, %v6621_v39  ;;  %v4551_v48 = vld [vmem:[#allocation10 + $0xf08] sm:$0xff]  ;;  %v4526_v39 = vld [vmem:[#allocation10 + $0xe40] sm:$0xff] }
 0x984   : > { %v3794_v31 = vpop.f32.mrf.mxu1 }
 0x985   : > { %v6804_v21 = vpack.i.bf16 %v3774_v60, %v3794_v31  ;;  %6810 = vrot.lane.b32.xlu0 %v6809_v35, %s7026_s15  ;;  %v4535_v60 = vld [vmem:[#allocation10 + $0xe88] sm:$0xff]  ;;  %v4518_v31 = vld [vmem:[#allocation10 + $0xe00] sm:$0xff] }
 0x986   : > { %v4519_v35 = vld [vmem:[#allocation10 + $0xe08] sm:$0xff] }
 0x987   : > { %6805 = vrot.lane.b32.xlu1 %v6804_v21, %s7026_s15  ;;  %v4511_v21 = vld [vmem:[#allocation10 + $0xdc8] sm:$0xff] }
 0x989   : > { %3892 = vperm.xlu0 %6713, %v3888_v50   ;;  %v4510_v50 = vld [vmem:[#allocation10 + $0xdc0] sm:$0xff] }
 0x98b   : > { %3897 = vperm.xlu1 %6712, %v3889_v52   ;;  %v4503_v52 = vld [vmem:[#allocation10 + $0xd88] sm:$0xff] }
 0x98f   : > { %5097 = vperm.xlu1 %6712, %v5094_v58   ;;  %v4502_v58 = vld [vmem:[#allocation10 + $0xd80] sm:$0xff] }
 0x9f7   : > { %v6811_v59 = vpop.permute.xlu0 %6810 }
 0x9f8   : > { %v6812_v17 = vunpack.i.l.bf16 %v6811_v59  ;;  %v6813_v41 = vunpack.i.h.bf16 %v6811_v59  ;;  %v4495_v59 = vld [vmem:[#allocation10 + $0xd48] sm:$0xff] }
 0x9f9   : > { %v6806_v27 = vpop.permute.xlu1 %6805 }
 0x9fa   : > { %v6808_v18 = vunpack.i.h.bf16 %v6806_v27  ;;  %v6807_v42 = vunpack.i.l.bf16 %v6806_v27  ;;  %v3823_v38 = vsel %vm3819_vm8, %v6618_v40, %v6812_v17  ;;  %v3821_v10 = vsel %vm3819_vm8, %v6612_v6, %v6813_v41  ;;  %v4574_v6 = vld [vmem:[#allocation10 + $0xfc0] sm:$0xff]  ;;  %v4487_v17 = vld [vmem:[#allocation10 + $0xd08] sm:$0xff] }
 0x9fb   : > { %v4534_v40 = vld [vmem:[#allocation10 + $0xe80] sm:$0xff] }
 0x9fc   : > { %v3822_v45 = vsel %vm3819_vm8, %v3784_v49, %v6807_v42  ;;  %v3820_v11 = vsel %vm3819_vm8, %v3764_v62, %v6808_v18  ;;  %v4566_v62 = vld [vmem:[#allocation10 + $0xf80] sm:$0xff]  ;;  %v4527_v49 = vld [vmem:[#allocation10 + $0xe48] sm:$0xff] }
 0x9fd   : > { %3964 = vmatprep.mubr.f32.mxu0 %v3822_v45  ;;  %v4494_v27 = vld [vmem:[#allocation10 + $0xd40] sm:$0xff]  ;;  %v4479_v42 = vld [vmem:[#allocation10 + $0xcc8] sm:$0xff] }
 0x9fe   : > { %3965 = vmatmul.mubr.f32.vlgmr.msra.gmra.mxu0 %v3820_v11  ;;  %v4486_v18 = vld [vmem:[#allocation10 + $0xd00] sm:$0xff]  ;;  %v4471_v11 = vld [vmem:[#allocation10 + $0xc88] sm:$0xff] }
 0x9ff   : > { %3970 = vmatprep.mubr.f32.mxu0 %v3823_v38  ;;  %5176 = vmatpush1.msra.mxu0 %v4446_v3  ;;  %v4478_v45 = vld [vmem:[#allocation10 + $0xcc0] sm:$0xff] }
 0xa00   : > { %5177 = vmatprep.subr.mxu0 %v4439_v14 }
 0xa01   : > { %5178 = vmatpush1.msra.mxu0 %v4438_v30 }
 0xa02   : > { %3971 = vmatmul.mubr.f32.gmra.mxu0 %v3821_v10  ;;  %5179 = vmatprep.subr.mxu0 %v4431_v63 }
 0xa03   : > { %5180 = vmatpush1.msra.mxu0 %v4430_v33 }
 0xa04   : > { %5181 = vmatprep.subr.mxu0 %v4423_v61  ;;  %v3893_v3 = vpop.permute.xlu0 %3892 }
 0xa05   : > { %5182 = vmatpush1.msra.mxu0 %v4422_v53 }
 0xa06   : > { %5183 = vmatprep.subr.mxu0 %v4415_v8  ;;  %v3898_v37 = vpop.permute.xlu1 %3897 }
 0xa07   : > { %5184 = vmatpush1.msra.mxu0 %v4414_v12 }
 0xa08   : > { %5185 = vmatprep.subr.mxu0 %v4407_v7 }
 0xa09   : > { %5186 = vmatpush1.msra.mxu0 %v4406_v15  ;;  %v3981_v15 = vld [vmem:[#allocation3] sm:$0xf] }
 0xa0a   : > { %5187 = vmatprep.subr.mxu0 %v4399_v5  ;;  %v4191_v5 = vld [vmem:[#allocation10 + $0x3c8] sm:$0xff] }
 0xa0b   : > { %5188 = vmatpush1.msra.mxu0 %v4398_v54  ;;  %v4190_v54 = vld [vmem:[#allocation10 + $0x3c0] sm:$0xff] }
 0xa0c   : > { %5189 = vmatprep.subr.mxu0 %v4391_v47  ;;  %v4183_v47 = vld [vmem:[#allocation10 + $0x388] sm:$0xff] }
 0xa0d   : > { %5190 = vmatpush1.msra.mxu0 %v4390_v57  ;;  %v4182_v57 = vld [vmem:[#allocation10 + $0x380] sm:$0xff] }
 0xa0e   : > { %5191 = vmatprep.subr.mxu0 %v4383_v25  ;;  %v4175_v25 = vld [vmem:[#allocation10 + $0x348] sm:$0xff] }
 0xa0f   : > { %5192 = vmatpush1.msra.mxu0 %v4382_v22  ;;  %v4174_v22 = vld [vmem:[#allocation10 + $0x340] sm:$0xff] }
 0xa10   : > { %5193 = vmatprep.subr.mxu0 %v4375_v29  ;;  %v4167_v29 = vld [vmem:[#allocation10 + $0x308] sm:$0xff] }
 0xa11   : > { %5194 = vmatpush1.msra.mxu0 %v4374_v23  ;;  %v4166_v23 = vld [vmem:[#allocation10 + $0x300] sm:$0xff] }
 0xa12   : > { %5195 = vmatprep.subr.mxu0 %v4367_v13  ;;  %v4159_v13 = vld [vmem:[#allocation10 + $0x2c8] sm:$0xff] }
 0xa13   : > { %5196 = vmatpush1.msra.mxu0 %v4366_v32  ;;  %v4158_v32 = vld [vmem:[#allocation10 + $0x2c0] sm:$0xff] }
 0xa14   : > { %5197 = vmatprep.subr.mxu0 %v4359_v55  ;;  %v4151_v55 = vld [vmem:[#allocation10 + $0x288] sm:$0xff] }
 0xa15   : > { %5198 = vmatpush1.msra.mxu0 %v4358_v28  ;;  %v4150_v28 = vld [vmem:[#allocation10 + $0x280] sm:$0xff] }
 0xa16   : > { %5199 = vmatprep.subr.mxu0 %v4351_v44  ;;  %v4143_v44 = vld [vmem:[#allocation10 + $0x248] sm:$0xff] }
 0xa17   : > { %5200 = vmatpush1.msra.mxu0 %v4350_v19  ;;  %v4142_v19 = vld [vmem:[#allocation10 + $0x240] sm:$0xff] }
 0xa18   : > { %5201 = vmatprep.subr.mxu0 %v4343_v0  ;;  %v4135_v0 = vld [vmem:[#allocation10 + $0x208] sm:$0xff] }
 0xa19   : > { %5202 = vmatpush1.msra.mxu0 %v4342_v36  ;;  %v4134_v36 = vld [vmem:[#allocation10 + $0x200] sm:$0xff] }
 0xa1a   : > { %5203 = vmatprep.subr.mxu0 %v4335_v20  ;;  %v4127_v20 = vld [vmem:[#allocation10 + $0x1c8] sm:$0xff] }
 0xa1b   : > { %5204 = vmatpush1.msra.mxu0 %v4334_v9  ;;  %v4126_v9 = vld [vmem:[#allocation10 + $0x1c0] sm:$0xff] }
 0xa1c   : > { %5205 = vmatprep.subr.mxu0 %v4327_v1  ;;  %v4119_v1 = vld [vmem:[#allocation10 + $0x188] sm:$0xff] }
 0xa1d   : > { %5206 = vmatpush1.msra.mxu0 %v4326_v16  ;;  %v4118_v16 = vld [vmem:[#allocation10 + $0x180] sm:$0xff] }
 0xa1e   : > { %5207 = vmatprep.subr.mxu0 %v4575_v34  ;;  %v4111_v34 = vld [vmem:[#allocation10 + $0x148] sm:$0xff] }
 0xa1f   : > { %5208 = vmatpush2.msra.mxu0 %v4574_v6  ;;  %v4110_v6 = vld [vmem:[#allocation10 + $0x140] sm:$0xff] }
 0xa20   : > { %5209 = vmatprep.subr.mxu0 %v4567_v46  ;;  %v4103_v46 = vld [vmem:[#allocation10 + $0x108] sm:$0xff] }
 0xa21   : > { %5210 = vmatpush2.msra.mxu0 %v4566_v62  ;;  %v4102_v62 = vld [vmem:[#allocation10 + $0x100] sm:$0xff] }
 0xa22   : > { %5211 = vmatprep.subr.mxu0 %v4559_v51  ;;  %v4095_v51 = vld [vmem:[#allocation10 + $0xc8] sm:$0xff] }
 0xa23   : > { %5212 = vmatpush2.msra.mxu0 %v4558_v26  ;;  %v4094_v26 = vld [vmem:[#allocation10 + $0xc0] sm:$0xff] }
 0xa24   : > { %5213 = vmatprep.subr.mxu0 %v4551_v48  ;;  %v4087_v48 = vld [vmem:[#allocation10 + $0x88] sm:$0xff] }
 0xa25   : > { %5214 = vmatpush2.msra.mxu0 %v4550_v56  ;;  %v4086_v56 = vld [vmem:[#allocation10 + $0x80] sm:$0xff] }
 0xa26   : > { %5215 = vmatprep.subr.mxu0 %v4543_v43  ;;  %v4079_v43 = vld [vmem:[#allocation10 + $0x48] sm:$0xff] }
 0xa27   : > { %5216 = vmatpush2.msra.mxu0 %v4542_v24  ;;  %v4078_v24 = vld [vmem:[#allocation10 + $0x40] sm:$0xff] }
 0xa28   : > { %5217 = vmatprep.subr.mxu0 %v4535_v60  ;;  %v4071_v60 = vld [vmem:[#allocation10 + $0x8] sm:$0xff] }
 0xa29   : > { %5218 = vmatpush2.msra.mxu0 %v4534_v40  ;;  %v4070_v40 = vld [vmem:[#allocation10] sm:$0xff] }
 0xa2a   : > { %5219 = vmatprep.subr.mxu0 %v4527_v49  ;;  %v4319_v49 = vld [vmem:[#allocation10 + $0x7c8] sm:$0xff] }
 0xa2b   : > { %5220 = vmatpush2.msra.mxu0 %v4526_v39  ;;  %v4318_v39 = vld [vmem:[#allocation10 + $0x7c0] sm:$0xff] }
 0xa2c   : > { %5221 = vmatprep.subr.mxu0 %v4519_v35  ;;  %v4311_v35 = vld [vmem:[#allocation10 + $0x788] sm:$0xff] }
 0xa2d   : > { %5222 = vmatpush2.msra.mxu0 %v4518_v31  ;;  %v4310_v31 = vld [vmem:[#allocation10 + $0x780] sm:$0xff] }
 0xa2e   : > { %5223 = vmatprep.subr.mxu0 %v4511_v21  ;;  %v4303_v21 = vld [vmem:[#allocation10 + $0x748] sm:$0xff] }
 0xa2f   : > { %5224 = vmatpush2.msra.mxu0 %v4510_v50  ;;  %v4302_v50 = vld [vmem:[#allocation10 + $0x740] sm:$0xff] }
 0xa30   : > { %5225 = vmatprep.subr.mxu0 %v4503_v52  ;;  %v4295_v52 = vld [vmem:[#allocation10 + $0x708] sm:$0xff] }
 0xa31   : > { %5226 = vmatpush2.msra.mxu0 %v4502_v58  ;;  %v4294_v58 = vld [vmem:[#allocation10 + $0x700] sm:$0xff] }
 0xa32   : > { %5227 = vmatprep.subr.mxu0 %v4495_v59  ;;  %v4287_v59 = vld [vmem:[#allocation10 + $0x6c8] sm:$0xff] }
 0xa33   : > { %5228 = vmatpush2.msra.mxu0 %v4494_v27  ;;  %v4286_v27 = vld [vmem:[#allocation10 + $0x6c0] sm:$0xff] }
 0xa34   : > { %5229 = vmatprep.subr.mxu0 %v4487_v17  ;;  %v4279_v17 = vld [vmem:[#allocation10 + $0x688] sm:$0xff] }
 0xa35   : > { %5230 = vmatpush2.msra.mxu0 %v4486_v18  ;;  %v4278_v18 = vld [vmem:[#allocation10 + $0x680] sm:$0xff] }
 0xa36   : > { %5231 = vmatprep.subr.mxu0 %v4479_v42  ;;  %v4271_v42 = vld [vmem:[#allocation10 + $0x648] sm:$0xff] }
 0xa37   : > { %5232 = vmatpush2.msra.mxu0 %v4478_v45  ;;  %v4270_v45 = vld [vmem:[#allocation10 + $0x640] sm:$0xff] }
 0xa38   : > { %5233 = vmatprep.subr.mxu0 %v4471_v11  ;;  %v4263_v11 = vld [vmem:[#allocation10 + $0x608] sm:$0xff] }
 0xabe   : > { %v3966_v41 = vpop.f32.mrf.mxu0 }
 0xabf   : > { %v3967_v61 = vadd.f32 %v3966_v41, %v3893_v3  ;;  %v4262_v41 = vld [vmem:[#allocation10 + $0x600] sm:$0xff] }
 0xac0   : > { %v3968_v38 = vpop.f32.mrf.mxu0 }
 0xac1   : > { %v3969_v63 = vadd.f32 %v3968_v38, %v3893_v3  ;;  %v3977_v7 = vmax.f32 %v3967_v61, 0.0  ;;  %v4255_v38 = vld [vmem:[#allocation10 + $0x5c8] sm:$0xff]  ;;  %v4246_v3 = vld [vmem:[#allocation10 + $0x580] sm:$0xff] }
 0xac2   : > { %v3972_v10 = vpop.f32.mrf.mxu0  ;;  %v4223_v61 = vld [vmem:[#allocation10 + $0x4c8] sm:$0xff] }
 0xac3   : > { %v3973_v14 = vadd.f32 %v3972_v10, %v3898_v37  ;;  %v3978_v12 = vmax.f32 %v3969_v63, 0.0  ;;  %v4254_v10 = vld [vmem:[#allocation10 + $0x5c0] sm:$0xff]  ;;  %v4231_v63 = vld [vmem:[#allocation10 + $0x508] sm:$0xff] }
 0xac4   : > { %v3974_v30 = vpop.f32.mrf.mxu0 }
 0xac5   : > { %v3975_v33 = vadd.f32 %v3974_v30, %v3898_v37  ;;  %v3979_v8 = vmax.f32 %v3973_v14, 0.0  ;;  %v4247_v37 = vld [vmem:[#allocation10 + $0x588] sm:$0xff]  ;;  %v4238_v30 = vld [vmem:[#allocation10 + $0x540] sm:$0xff] }
 0xac6   : > { %v4239_v14 = vld [vmem:[#allocation10 + $0x548] sm:$0xff] }
 0xac7   : > { %v3980_v53 = vmax.f32 %v3975_v33, 0.0  ;;  %v4230_v33 = vld [vmem:[#allocation10 + $0x500] sm:$0xff] }
 0xac9   : > { %4013 = vmatprep.subr.mxu1 %v3980_v53  ;;  %v4222_v53 = vld [vmem:[#allocation10 + $0x4c0] sm:$0xff] }
 0xaca   : > { %4014 = vmatpush1.msra.mxu1 %v3979_v8  ;;  %v4215_v8 = vld [vmem:[#allocation10 + $0x488] sm:$0xff] }
 0xacb   : > { %4015 = vmatprep.subr.mxu1 %v3978_v12  ;;  %v4214_v12 = vld [vmem:[#allocation10 + $0x480] sm:$0xff] }
 0xacc   : > { %4016 = vmatpush1.msra.mxu1 %v3977_v7  ;;  %v4207_v7 = vld [vmem:[#allocation10 + $0x448] sm:$0xff] }
 0xacd   : > { %6507 = vmatmul.mubr.msk.f32.vlgmr.msra.gmra.mxu1 %vm3288_vm2, %v3981_v15  ;;  %5104 = vmatprep.subr.mxu1 %v4191_v5  ;;  %v4206_v15 = vld [vmem:[#allocation10 + $0x440] sm:$0xff] }
 0xace   : > { %5105 = vmatpush1.msra.mxu1 %v4190_v54  ;;  %v4470_v5 = vld [vmem:[#allocation10 + $0xc80] sm:$0xff]  ;;  %v4199_v54 = vld [vmem:[#allocation10 + $0x408] sm:$0xff] }
 0xacf   : > { %5106 = vmatprep.subr.mxu1 %v4183_v47  ;;  %5234 = vmatpush2.msra.mxu0 %v4470_v5  ;;  %v4463_v47 = vld [vmem:[#allocation10 + $0xc48] sm:$0xff]  ;;  %v4870_v5 = vld [vmem:[#allocation10 + $0x1900] sm:$0xff] }
 0xad0   : > { %5107 = vmatpush1.msra.mxu1 %v4182_v57  ;;  %5235 = vmatprep.subr.mxu0 %v4463_v47  ;;  %v4198_v57 = vld [vmem:[#allocation10 + $0x400] sm:$0xff]  ;;  %v4863_v47 = vld [vmem:[#allocation10 + $0x18c8] sm:$0xff] }
 0xad1   : > { %5108 = vmatprep.subr.mxu1 %v4175_v25  ;;  %v4462_v25 = vld [vmem:[#allocation10 + $0xc40] sm:$0xff] }
 0xad2   : > { %5109 = vmatpush1.msra.mxu1 %v4174_v22  ;;  %5236 = vmatpush2.msra.mxu0 %v4462_v25  ;;  %v4455_v22 = vld [vmem:[#allocation10 + $0xc08] sm:$0xff]  ;;  %v4862_v25 = vld [vmem:[#allocation10 + $0x18c0] sm:$0xff] }
 0xad3   : > { %5110 = vmatprep.subr.mxu1 %v4167_v29  ;;  %v4703_v29 = vld [vmem:[#allocation10 + $0x13c8] sm:$0xff]  ;;  %5237 = vmatprep.subr.mxu0 %v4455_v22 }
 0xad4   : > { %5111 = vmatpush1.msra.mxu1 %v4166_v23  ;;  %v4454_v23 = vld [vmem:[#allocation10 + $0xc00] sm:$0xff]  ;;  %v4591_v22 = vld [vmem:[#allocation10 + $0x1048] sm:$0xff] }
 0xad5   : > { %5112 = vmatprep.subr.mxu1 %v4159_v13  ;;  %5238 = vmatpush2.msra.mxu0 %v4454_v23  ;;  %v4959_v13 = vld [vmem:[#allocation10 + $0x1bc8] sm:$0xff]  ;;  %v4590_v23 = vld [vmem:[#allocation10 + $0x1040] sm:$0xff] }
 0xad6   : > { %5113 = vmatpush1.msra.mxu1 %v4158_v32  ;;  %5317 = vmatprep.subr.mxu0 %v4959_v13  ;;  %v4854_v13 = vld [vmem:[#allocation10 + $0x1880] sm:$0xff] }
 0xad7   : > { %5114 = vmatprep.subr.mxu1 %v4151_v55 }
 0xad8   : > { %5115 = vmatpush1.msra.mxu1 %v4150_v28  ;;  %v4702_v28 = vld [vmem:[#allocation10 + $0x13c0] sm:$0xff] }
 0xad9   : > { %5116 = vmatprep.subr.mxu1 %v4143_v44 }
 0xada   : > { %5117 = vmatpush1.msra.mxu1 %v4142_v19  ;;  %v4695_v19 = vld [vmem:[#allocation10 + $0x1388] sm:$0xff] }
 0xadb   : > { %5118 = vmatprep.subr.mxu1 %v4135_v0 }
 0xadc   : > { %5119 = vmatpush1.msra.mxu1 %v4134_v36  ;;  %v4694_v36 = vld [vmem:[#allocation10 + $0x1380] sm:$0xff] }
 0xadd   : > { %5120 = vmatprep.subr.mxu1 %v4127_v20  ;;  %v4958_v20 = vld [vmem:[#allocation10 + $0x1bc0] sm:$0xff] }
 0xade   : > { %5121 = vmatpush1.msra.mxu1 %v4126_v9  ;;  %v4687_v9 = vld [vmem:[#allocation10 + $0x1348] sm:$0xff] }
 0xadf   : > { %5122 = vmatprep.subr.mxu1 %v4119_v1  ;;  %v4951_v1 = vld [vmem:[#allocation10 + $0x1b88] sm:$0xff] }
 0xae0   : > { %5123 = vmatpush1.msra.mxu1 %v4118_v16  ;;  %v4686_v16 = vld [vmem:[#allocation10 + $0x1340] sm:$0xff] }
 0xae1   : > { %5124 = vmatprep.subr.mxu1 %v4111_v34  ;;  %v4950_v34 = vld [vmem:[#allocation10 + $0x1b80] sm:$0xff] }
 0xae2   : > { %5125 = vmatpush1.msra.mxu1 %v4110_v6  ;;  %v4679_v6 = vld [vmem:[#allocation10 + $0x1308] sm:$0xff] }
 0xae3   : > { %5126 = vmatprep.subr.mxu1 %v4103_v46  ;;  %v4943_v46 = vld [vmem:[#allocation10 + $0x1b48] sm:$0xff] }
 0xae4   : > { %5127 = vmatpush1.msra.mxu1 %v4102_v62  ;;  %v4678_v62 = vld [vmem:[#allocation10 + $0x1300] sm:$0xff] }
 0xae5   : > { %5128 = vmatprep.subr.mxu1 %v4095_v51  ;;  %v4942_v51 = vld [vmem:[#allocation10 + $0x1b40] sm:$0xff] }
 0xae6   : > { %5129 = vmatpush1.msra.mxu1 %v4094_v26  ;;  %v4671_v26 = vld [vmem:[#allocation10 + $0x12c8] sm:$0xff] }
 0xae7   : > { %5130 = vmatprep.subr.mxu1 %v4087_v48  ;;  %v4935_v48 = vld [vmem:[#allocation10 + $0x1b08] sm:$0xff] }
 0xae8   : > { %5131 = vmatpush1.msra.mxu1 %v4086_v56  ;;  %v4670_v56 = vld [vmem:[#allocation10 + $0x12c0] sm:$0xff] }
 0xae9   : > { %5132 = vmatprep.subr.mxu1 %v4079_v43  ;;  %v4934_v43 = vld [vmem:[#allocation10 + $0x1b00] sm:$0xff] }
 0xaea   : > { %5133 = vmatpush1.msra.mxu1 %v4078_v24  ;;  %v4663_v24 = vld [vmem:[#allocation10 + $0x1288] sm:$0xff] }
 0xaeb   : > { %5134 = vmatprep.subr.mxu1 %v4071_v60  ;;  %v4927_v60 = vld [vmem:[#allocation10 + $0x1ac8] sm:$0xff] }
 0xaec   : > { %5135 = vmatpush1.msra.mxu1 %v4070_v40  ;;  %v4662_v40 = vld [vmem:[#allocation10 + $0x1280] sm:$0xff] }
 0xaed   : > { %5136 = vmatprep.subr.mxu1 %v4319_v49  ;;  %v4926_v49 = vld [vmem:[#allocation10 + $0x1ac0] sm:$0xff] }
 0xaee   : > { %5137 = vmatpush2.msra.mxu1 %v4318_v39  ;;  %v4655_v39 = vld [vmem:[#allocation10 + $0x1248] sm:$0xff] }
 0xaef   : > { %5138 = vmatprep.subr.mxu1 %v4311_v35  ;;  %v4919_v35 = vld [vmem:[#allocation10 + $0x1a88] sm:$0xff] }
 0xaf0   : > { %5139 = vmatpush2.msra.mxu1 %v4310_v31 }
 0xaf1   : > { %5140 = vmatprep.subr.mxu1 %v4303_v21  ;;  %v4654_v21 = vld [vmem:[#allocation10 + $0x1240] sm:$0xff] }
 0xaf2   : > { %5141 = vmatpush2.msra.mxu1 %v4302_v50  ;;  %v4918_v50 = vld [vmem:[#allocation10 + $0x1a80] sm:$0xff] }
 0xaf3   : > { %5142 = vmatprep.subr.mxu1 %v4295_v52 }
 0xaf4   : > { %5143 = vmatpush2.msra.mxu1 %v4294_v58  ;;  %v4647_v58 = vld [vmem:[#allocation10 + $0x1208] sm:$0xff] }
 0xaf5   : > { %5144 = vmatprep.subr.mxu1 %v4287_v59  ;;  %v4911_v59 = vld [vmem:[#allocation10 + $0x1a48] sm:$0xff] }
 0xaf6   : > { %5145 = vmatpush2.msra.mxu1 %v4286_v27  ;;  %v4646_v27 = vld [vmem:[#allocation10 + $0x1200] sm:$0xff] }
 0xaf7   : > { %5146 = vmatprep.subr.mxu1 %v4279_v17  ;;  %v4910_v17 = vld [vmem:[#allocation10 + $0x1a40] sm:$0xff] }
 0xaf8   : > { %5147 = vmatpush2.msra.mxu1 %v4278_v18  ;;  %v4639_v18 = vld [vmem:[#allocation10 + $0x11c8] sm:$0xff] }
 0xaf9   : > { %5148 = vmatprep.subr.mxu1 %v4271_v42  ;;  %v4903_v42 = vld [vmem:[#allocation10 + $0x1a08] sm:$0xff] }
 0xafa   : > { %5149 = vmatpush2.msra.mxu1 %v4270_v45  ;;  %v4638_v45 = vld [vmem:[#allocation10 + $0x11c0] sm:$0xff] }
 0xafb   : > { %5150 = vmatprep.subr.mxu1 %v4263_v11  ;;  %v4902_v11 = vld [vmem:[#allocation10 + $0x1a00] sm:$0xff] }
 0xafc   : > { %5151 = vmatpush2.msra.mxu1 %v4262_v41  ;;  %v4631_v41 = vld [vmem:[#allocation10 + $0x1188] sm:$0xff] }
 0xafd   : > { %5152 = vmatprep.subr.mxu1 %v4255_v38  ;;  %v4895_v38 = vld [vmem:[#allocation10 + $0x19c8] sm:$0xff] }
 0xafe   : > { %5153 = vmatpush2.msra.mxu1 %v4254_v10  ;;  %v4630_v10 = vld [vmem:[#allocation10 + $0x1180] sm:$0xff] }
 0xaff   : > { %5154 = vmatprep.subr.mxu1 %v4247_v37  ;;  %v4894_v37 = vld [vmem:[#allocation10 + $0x19c0] sm:$0xff] }
 0xb00   : > { %5155 = vmatpush2.msra.mxu1 %v4246_v3  ;;  %v4623_v3 = vld [vmem:[#allocation10 + $0x1148] sm:$0xff] }
 0xb01   : > { %5156 = vmatprep.subr.mxu1 %v4239_v14  ;;  %v4887_v14 = vld [vmem:[#allocation10 + $0x1988] sm:$0xff] }
 0xb02   : > { %5157 = vmatpush2.msra.mxu1 %v4238_v30  ;;  %v4622_v30 = vld [vmem:[#allocation10 + $0x1140] sm:$0xff] }
 0xb03   : > { %5158 = vmatprep.subr.mxu1 %v4231_v63  ;;  %v4886_v63 = vld [vmem:[#allocation10 + $0x1980] sm:$0xff] }
 0xb04   : > { %5159 = vmatpush2.msra.mxu1 %v4230_v33  ;;  %v4615_v33 = vld [vmem:[#allocation10 + $0x1108] sm:$0xff] }
 0xb05   : > { %5160 = vmatprep.subr.mxu1 %v4223_v61  ;;  %v4879_v61 = vld [vmem:[#allocation10 + $0x1948] sm:$0xff] }
 0xb06   : > { %5161 = vmatpush2.msra.mxu1 %v4222_v53  ;;  %v4614_v53 = vld [vmem:[#allocation10 + $0x1100] sm:$0xff] }
 0xb07   : > { %5162 = vmatprep.subr.mxu1 %v4215_v8  ;;  %v4878_v8 = vld [vmem:[#allocation10 + $0x1940] sm:$0xff] }
 0xb08   : > { %5163 = vmatpush2.msra.mxu1 %v4214_v12  ;;  %v4607_v12 = vld [vmem:[#allocation10 + $0x10c8] sm:$0xff] }
 0xb09   : > { %5164 = vmatprep.subr.mxu1 %v4207_v7  ;;  %v4871_v7 = vld [vmem:[#allocation10 + $0x1908] sm:$0xff] }
 0xb0a   : > { %5165 = vmatpush2.msra.mxu1 %v4206_v15  ;;  %v4606_v15 = vld [vmem:[#allocation10 + $0x10c0] sm:$0xff] }
 0xb0b   : > { %5166 = vmatprep.subr.mxu1 %v4199_v54  ;;  %v4599_v54 = vld [vmem:[#allocation10 + $0x1088] sm:$0xff] }
 0xb0c   : > { %5167 = vmatpush2.msra.mxu1 %v4198_v57  ;;  %v4598_v57 = vld [vmem:[#allocation10 + $0x1080] sm:$0xff] }
 0xb0d   : > { %5246 = vmatprep.subr.mxu1 %v4703_v29  ;;  %v4855_v29 = vld [vmem:[#allocation10 + $0x1888] sm:$0xff] }
 0xb8d   : > { %v8617_v32 = vpop.f32.mrf.mxu1 }
 0xb8e   : > { %v8627_v0 = vrot.slane %v8617_v32, 1 }
 0xb8f   : > { %v8619_v55 = vpop.f32.mrf.mxu1 }
 0xb90   : > { %5168 = vmatprep.mubr.f32.mxu1 %v8619_v55  ;;  %v8623_v44 = vrot.slane %v8619_v55, 1  ;;  %v8632_v31 = vrot.slane %v8619_v55, 2  ;;  %v8635_v52 = vrot.slane %v8619_v55, 3 }
 0xb91   : > { %5169 = vmatmul.mubr.f32.vlgmr.msra.gmra.mxu1 %v8617_v32 }
 0xb92   : > { %5247 = vmatpush1.msra.mxu1 %v4702_v28  ;;  %5239 = vmatprep.mubr.f32.mxu0 %v8623_v44  ;;  %v4583_v28 = vld [vmem:[#allocation10 + $0x1008] sm:$0xff] }
 0xb93   : > { %5248 = vmatprep.subr.mxu1 %v4695_v19  ;;  %5240 = vmatmul.mubr.f32.vlgmr.msra.gmra.mxu0 %v8627_v0  ;;  %v4847_v19 = vld [vmem:[#allocation10 + $0x1848] sm:$0xff] }
 0xb94   : > { %5249 = vmatpush1.msra.mxu1 %v4694_v36  ;;  %5318 = vmatpush1.msra.mxu0 %v4958_v20  ;;  %v4582_v36 = vld [vmem:[#allocation10 + $0x1000] sm:$0xff] }
 0xb95   : > { %5250 = vmatprep.subr.mxu1 %v4687_v9  ;;  %5319 = vmatprep.subr.mxu0 %v4951_v1  ;;  %v4846_v20 = vld [vmem:[#allocation10 + $0x1840] sm:$0xff]  ;;  %v4831_v9 = vld [vmem:[#allocation10 + $0x17c8] sm:$0xff] }
 0xb96   : > { %5251 = vmatpush1.msra.mxu1 %v4686_v16  ;;  %5320 = vmatpush1.msra.mxu0 %v4950_v34  ;;  %v4839_v1 = vld [vmem:[#allocation10 + $0x1808] sm:$0xff]  ;;  %v4830_v16 = vld [vmem:[#allocation10 + $0x17c0] sm:$0xff] }
 0xb97   : > { %5252 = vmatprep.subr.mxu1 %v4679_v6  ;;  %5321 = vmatprep.subr.mxu0 %v4943_v46  ;;  %v4838_v34 = vld [vmem:[#allocation10 + $0x1800] sm:$0xff]  ;;  %v4823_v6 = vld [vmem:[#allocation10 + $0x1788] sm:$0xff] }
 0xb98   : > { %5253 = vmatpush1.msra.mxu1 %v4678_v62  ;;  %5322 = vmatpush1.msra.mxu0 %v4942_v51  ;;  %v5087_v46 = vld [vmem:[#allocation10 + $0x1fc8] sm:$0xff]  ;;  %v4822_v62 = vld [vmem:[#allocation10 + $0x1780] sm:$0xff] }
 0xb99   : > { %5254 = vmatprep.subr.mxu1 %v4671_v26  ;;  %5323 = vmatprep.subr.mxu0 %v4935_v48  ;;  %v5086_v51 = vld [vmem:[#allocation10 + $0x1fc0] sm:$0xff]  ;;  %v4815_v26 = vld [vmem:[#allocation10 + $0x1748] sm:$0xff] }
 0xb9a   : > { %5255 = vmatpush1.msra.mxu1 %v4670_v56  ;;  %5324 = vmatpush1.msra.mxu0 %v4934_v43  ;;  %v5079_v48 = vld [vmem:[#allocation10 + $0x1f88] sm:$0xff]  ;;  %v4814_v56 = vld [vmem:[#allocation10 + $0x1740] sm:$0xff] }
 0xb9b   : > { %5256 = vmatprep.subr.mxu1 %v4663_v24  ;;  %5325 = vmatprep.subr.mxu0 %v4927_v60  ;;  %v5078_v43 = vld [vmem:[#allocation10 + $0x1f80] sm:$0xff]  ;;  %v4807_v24 = vld [vmem:[#allocation10 + $0x1708] sm:$0xff] }
 0xb9c   : > { %5257 = vmatpush1.msra.mxu1 %v4662_v40  ;;  %5326 = vmatpush1.msra.mxu0 %v4926_v49  ;;  %v5071_v60 = vld [vmem:[#allocation10 + $0x1f48] sm:$0xff]  ;;  %v4806_v40 = vld [vmem:[#allocation10 + $0x1700] sm:$0xff] }
 0xb9d   : > { %5258 = vmatprep.subr.mxu1 %v4655_v39  ;;  %5327 = vmatprep.subr.mxu0 %v4919_v35  ;;  %v5070_v49 = vld [vmem:[#allocation10 + $0x1f40] sm:$0xff]  ;;  %v4799_v39 = vld [vmem:[#allocation10 + $0x16c8] sm:$0xff] }
 0xb9e   : > { %5259 = vmatpush1.msra.mxu1 %v4654_v21  ;;  %5310 = vmatprep.mubr.f32.mxu1 %v8632_v31  ;;  %v5063_v35 = vld [vmem:[#allocation10 + $0x1f08] sm:$0xff]  ;;  %v4798_v21 = vld [vmem:[#allocation10 + $0x16c0] sm:$0xff] }
 0xb9f   : > { %5328 = vmatpush1.msra.mxu0 %v4918_v50  ;;  %5381 = vmatprep.mubr.f32.mxu0 %v8635_v52  ;;  %v5062_v50 = vld [vmem:[#allocation10 + $0x1f00] sm:$0xff] }
 0xba0   : > { %5260 = vmatprep.subr.mxu1 %v4647_v58  ;;  %5329 = vmatprep.subr.mxu0 %v4911_v59  ;;  %v4791_v58 = vld [vmem:[#allocation10 + $0x1688] sm:$0xff] }
 0xba1   : > { %5261 = vmatpush1.msra.mxu1 %v4646_v27  ;;  %5330 = vmatpush1.msra.mxu0 %v4910_v17  ;;  %v5055_v59 = vld [vmem:[#allocation10 + $0x1ec8] sm:$0xff]  ;;  %v4790_v27 = vld [vmem:[#allocation10 + $0x1680] sm:$0xff] }
 0xba2   : > { %5262 = vmatprep.subr.mxu1 %v4639_v18  ;;  %5331 = vmatprep.subr.mxu0 %v4903_v42  ;;  %v5054_v17 = vld [vmem:[#allocation10 + $0x1ec0] sm:$0xff]  ;;  %v4783_v18 = vld [vmem:[#allocation10 + $0x1648] sm:$0xff] }
 0xba3   : > { %5263 = vmatpush1.msra.mxu1 %v4638_v45  ;;  %5332 = vmatpush1.msra.mxu0 %v4902_v11  ;;  %v5047_v42 = vld [vmem:[#allocation10 + $0x1e88] sm:$0xff]  ;;  %v4782_v45 = vld [vmem:[#allocation10 + $0x1640] sm:$0xff] }
 0xba4   : > { %5264 = vmatprep.subr.mxu1 %v4631_v41  ;;  %5333 = vmatprep.subr.mxu0 %v4895_v38  ;;  %v5046_v11 = vld [vmem:[#allocation10 + $0x1e80] sm:$0xff]  ;;  %v4775_v41 = vld [vmem:[#allocation10 + $0x1608] sm:$0xff] }
 0xba5   : > { %5265 = vmatpush1.msra.mxu1 %v4630_v10  ;;  %5334 = vmatpush1.msra.mxu0 %v4894_v37  ;;  %v5039_v38 = vld [vmem:[#allocation10 + $0x1e48] sm:$0xff]  ;;  %v4774_v10 = vld [vmem:[#allocation10 + $0x1600] sm:$0xff] }
 0xba6   : > { %5266 = vmatprep.subr.mxu1 %v4623_v3  ;;  %5335 = vmatprep.subr.mxu0 %v4887_v14  ;;  %v5038_v37 = vld [vmem:[#allocation10 + $0x1e40] sm:$0xff]  ;;  %v4767_v3 = vld [vmem:[#allocation10 + $0x15c8] sm:$0xff] }
 0xba7   : > { %5267 = vmatpush1.msra.mxu1 %v4622_v30  ;;  %5336 = vmatpush1.msra.mxu0 %v4886_v63  ;;  %v5031_v14 = vld [vmem:[#allocation10 + $0x1e08] sm:$0xff]  ;;  %v4766_v30 = vld [vmem:[#allocation10 + $0x15c0] sm:$0xff] }
 0xba8   : > { %5268 = vmatprep.subr.mxu1 %v4615_v33  ;;  %5337 = vmatprep.subr.mxu0 %v4879_v61  ;;  %v5030_v63 = vld [vmem:[#allocation10 + $0x1e00] sm:$0xff]  ;;  %v4759_v33 = vld [vmem:[#allocation10 + $0x1588] sm:$0xff] }
 0xba9   : > { %5269 = vmatpush1.msra.mxu1 %v4614_v53  ;;  %5338 = vmatpush1.msra.mxu0 %v4878_v8  ;;  %v5023_v61 = vld [vmem:[#allocation10 + $0x1dc8] sm:$0xff]  ;;  %v4758_v53 = vld [vmem:[#allocation10 + $0x1580] sm:$0xff] }
 0xbaa   : > { %5270 = vmatprep.subr.mxu1 %v4607_v12  ;;  %5339 = vmatprep.subr.mxu0 %v4871_v7  ;;  %v5022_v8 = vld [vmem:[#allocation10 + $0x1dc0] sm:$0xff]  ;;  %v4751_v12 = vld [vmem:[#allocation10 + $0x1548] sm:$0xff] }
 0xbab   : > { %5271 = vmatpush1.msra.mxu1 %v4606_v15  ;;  %5340 = vmatpush1.msra.mxu0 %v4870_v5  ;;  %v5015_v7 = vld [vmem:[#allocation10 + $0x1d88] sm:$0xff]  ;;  %v4750_v15 = vld [vmem:[#allocation10 + $0x1540] sm:$0xff] }
 0xbac   : > { %5272 = vmatprep.subr.mxu1 %v4599_v54  ;;  %5341 = vmatprep.subr.mxu0 %v4863_v47  ;;  %v5014_v5 = vld [vmem:[#allocation10 + $0x1d80] sm:$0xff]  ;;  %v4743_v54 = vld [vmem:[#allocation10 + $0x1508] sm:$0xff] }
 0xbad   : > { %5273 = vmatpush1.msra.mxu1 %v4598_v57  ;;  %5342 = vmatpush1.msra.mxu0 %v4862_v25  ;;  %v5007_v47 = vld [vmem:[#allocation10 + $0x1d48] sm:$0xff]  ;;  %v4742_v57 = vld [vmem:[#allocation10 + $0x1500] sm:$0xff] }
 0xbae   : > { %5274 = vmatprep.subr.mxu1 %v4591_v22  ;;  %5343 = vmatprep.subr.mxu0 %v4855_v29  ;;  %v5006_v25 = vld [vmem:[#allocation10 + $0x1d40] sm:$0xff]  ;;  %v4735_v22 = vld [vmem:[#allocation10 + $0x14c8] sm:$0xff] }
 0xbaf   : > { %5275 = vmatpush1.msra.mxu1 %v4590_v23  ;;  %5344 = vmatpush1.msra.mxu0 %v4854_v13  ;;  %v4999_v29 = vld [vmem:[#allocation10 + $0x1d08] sm:$0xff]  ;;  %v4734_v23 = vld [vmem:[#allocation10 + $0x14c0] sm:$0xff] }
 0xbb0   : > { %5276 = vmatprep.subr.mxu1 %v4583_v28  ;;  %5345 = vmatprep.subr.mxu0 %v4847_v19  ;;  %v4998_v13 = vld [vmem:[#allocation10 + $0x1d00] sm:$0xff]  ;;  %v4727_v28 = vld [vmem:[#allocation10 + $0x1488] sm:$0xff] }
 0xbb1   : > { %5277 = vmatpush1.msra.mxu1 %v4582_v36  ;;  %5346 = vmatpush1.msra.mxu0 %v4846_v20  ;;  %v4991_v19 = vld [vmem:[#allocation10 + $0x1cc8] sm:$0xff]  ;;  %v4726_v36 = vld [vmem:[#allocation10 + $0x1480] sm:$0xff] }
 0xbb2   : > { %5278 = vmatprep.subr.mxu1 %v4831_v9  ;;  %5347 = vmatprep.subr.mxu0 %v4839_v1  ;;  %v4990_v20 = vld [vmem:[#allocation10 + $0x1cc0] sm:$0xff]  ;;  %v4719_v9 = vld [vmem:[#allocation10 + $0x1448] sm:$0xff] }
 0xbb3   : > { %5279 = vmatpush2.msra.mxu1 %v4830_v16  ;;  %5348 = vmatpush1.msra.mxu0 %v4838_v34  ;;  %v4983_v1 = vld [vmem:[#allocation10 + $0x1c88] sm:$0xff]  ;;  %v4718_v16 = vld [vmem:[#allocation10 + $0x1440] sm:$0xff] }
 0xbb4   : > { %5280 = vmatprep.subr.mxu1 %v4823_v6  ;;  %5349 = vmatprep.subr.mxu0 %v5087_v46  ;;  %v4982_v34 = vld [vmem:[#allocation10 + $0x1c80] sm:$0xff]  ;;  %v4711_v6 = vld [vmem:[#allocation10 + $0x1408] sm:$0xff] }
 0xbb5   : > { %5281 = vmatpush2.msra.mxu1 %v4822_v62  ;;  %5350 = vmatpush2.msra.mxu0 %v5086_v51  ;;  %v4975_v46 = vld [vmem:[#allocation10 + $0x1c48] sm:$0xff]  ;;  %v4710_v62 = vld [vmem:[#allocation10 + $0x1400] sm:$0xff] }
 0xbb6   : > { %5282 = vmatprep.subr.mxu1 %v4815_v26  ;;  %5351 = vmatprep.subr.mxu0 %v5079_v48  ;;  %v4974_v51 = vld [vmem:[#allocation10 + $0x1c40] sm:$0xff]  ;;  %v4967_v26 = vld [vmem:[#allocation10 + $0x1c08] sm:$0xff]  ;;  %v8640_v48 = vrot.slane %v8617_v32, 2 }
 0xbb7   : > { %5283 = vmatpush2.msra.mxu1 %v4814_v56  ;;  %5352 = vmatpush2.msra.mxu0 %v5078_v43  ;;  %v4193_v56 = vld [vmem:[#allocation10 + $0x3d8] sm:$0xff]  ;;  %v4966_v43 = vld [vmem:[#allocation10 + $0x1c00] sm:$0xff] }
 0xbb8   : > { %5284 = vmatprep.subr.mxu1 %v4807_v24  ;;  %5353 = vmatprep.subr.mxu0 %v5071_v60  ;;  %v4192_v24 = vld [vmem:[#allocation10 + $0x3d0] sm:$0xff]  ;;  %v4185_v60 = vld [vmem:[#allocation10 + $0x398] sm:$0xff] }
 0xbb9   : > { %5285 = vmatpush2.msra.mxu1 %v4806_v40  ;;  %5354 = vmatpush2.msra.mxu0 %v5070_v49  ;;  %v8644_v40 = vrot.slane %v8617_v32, 3  ;;  %v4449_v49 = vld [vmem:[#allocation10 + $0xbd8] sm:$0xff] }
 0xbba   : > { %5286 = vmatprep.subr.mxu1 %v4799_v39  ;;  %5355 = vmatprep.subr.mxu0 %v5063_v35  ;;  %v4184_v39 = vld [vmem:[#allocation10 + $0x390] sm:$0xff] }
 0xbbb   : > { %5287 = vmatpush2.msra.mxu1 %v4798_v21  ;;  %5356 = vmatpush2.msra.mxu0 %v5062_v50  ;;  %v4448_v35 = vld [vmem:[#allocation10 + $0xbd0] sm:$0xff]  ;;  %v4177_v21 = vld [vmem:[#allocation10 + $0x358] sm:$0xff] }
 0xbbc   : > { %5288 = vmatprep.subr.mxu1 %v4791_v58  ;;  %5357 = vmatprep.subr.mxu0 %v5055_v59  ;;  %v4441_v50 = vld [vmem:[#allocation10 + $0xb98] sm:$0xff]  ;;  %v4176_v58 = vld [vmem:[#allocation10 + $0x350] sm:$0xff] }
 0xbbd   : > { %5289 = vmatpush2.msra.mxu1 %v4790_v27  ;;  %5358 = vmatpush2.msra.mxu0 %v5054_v17  ;;  %v4440_v59 = vld [vmem:[#allocation10 + $0xb90] sm:$0xff]  ;;  %v4169_v27 = vld [vmem:[#allocation10 + $0x318] sm:$0xff] }
 0xbbe   : > { %5290 = vmatprep.subr.mxu1 %v4783_v18  ;;  %5359 = vmatprep.subr.mxu0 %v5047_v42  ;;  %v4433_v17 = vld [vmem:[#allocation10 + $0xb58] sm:$0xff]  ;;  %v4168_v18 = vld [vmem:[#allocation10 + $0x310] sm:$0xff] }
 0xbbf   : > { %5291 = vmatpush2.msra.mxu1 %v4782_v45  ;;  %5360 = vmatpush2.msra.mxu0 %v5046_v11  ;;  %v4432_v42 = vld [vmem:[#allocation10 + $0xb50] sm:$0xff]  ;;  %v4161_v45 = vld [vmem:[#allocation10 + $0x2d8] sm:$0xff] }
 0xbc0   : > { %5292 = vmatprep.subr.mxu1 %v4775_v41  ;;  %5361 = vmatprep.subr.mxu0 %v5039_v38  ;;  %v4425_v11 = vld [vmem:[#allocation10 + $0xb18] sm:$0xff]  ;;  %v4160_v41 = vld [vmem:[#allocation10 + $0x2d0] sm:$0xff] }
 0xbc1   : > { %5293 = vmatpush2.msra.mxu1 %v4774_v10  ;;  %5362 = vmatpush2.msra.mxu0 %v5038_v37  ;;  %v4424_v38 = vld [vmem:[#allocation10 + $0xb10] sm:$0xff]  ;;  %v4153_v10 = vld [vmem:[#allocation10 + $0x298] sm:$0xff] }
 0xbc2   : > { %5294 = vmatprep.subr.mxu1 %v4767_v3  ;;  %5363 = vmatprep.subr.mxu0 %v5031_v14  ;;  %v4417_v37 = vld [vmem:[#allocation10 + $0xad8] sm:$0xff]  ;;  %v4152_v3 = vld [vmem:[#allocation10 + $0x290] sm:$0xff] }
 0xbc3   : > { %5295 = vmatpush2.msra.mxu1 %v4766_v30  ;;  %5364 = vmatpush2.msra.mxu0 %v5030_v63  ;;  %v4416_v14 = vld [vmem:[#allocation10 + $0xad0] sm:$0xff]  ;;  %v4145_v30 = vld [vmem:[#allocation10 + $0x258] sm:$0xff] }
 0xbc4   : > { %5296 = vmatprep.subr.mxu1 %v4759_v33  ;;  %5365 = vmatprep.subr.mxu0 %v5023_v61  ;;  %v4409_v63 = vld [vmem:[#allocation10 + $0xa98] sm:$0xff]  ;;  %v4144_v33 = vld [vmem:[#allocation10 + $0x250] sm:$0xff] }
 0xbc5   : > { %5297 = vmatpush2.msra.mxu1 %v4758_v53  ;;  %5366 = vmatpush2.msra.mxu0 %v5022_v8  ;;  %v4408_v61 = vld [vmem:[#allocation10 + $0xa90] sm:$0xff]  ;;  %v4137_v53 = vld [vmem:[#allocation10 + $0x218] sm:$0xff] }
 0xbc6   : > { %5298 = vmatprep.subr.mxu1 %v4751_v12  ;;  %5367 = vmatprep.subr.mxu0 %v5015_v7  ;;  %v4401_v8 = vld [vmem:[#allocation10 + $0xa58] sm:$0xff]  ;;  %v4136_v12 = vld [vmem:[#allocation10 + $0x210] sm:$0xff] }
 0xbc7   : > { %5299 = vmatpush2.msra.mxu1 %v4750_v15  ;;  %5368 = vmatpush2.msra.mxu0 %v5014_v5  ;;  %v4400_v7 = vld [vmem:[#allocation10 + $0xa50] sm:$0xff]  ;;  %v4129_v15 = vld [vmem:[#allocation10 + $0x1d8] sm:$0xff] }
 0xbc8   : > { %5300 = vmatprep.subr.mxu1 %v4743_v54  ;;  %5369 = vmatprep.subr.mxu0 %v5007_v47  ;;  %v4393_v5 = vld [vmem:[#allocation10 + $0xa18] sm:$0xff]  ;;  %v4128_v54 = vld [vmem:[#allocation10 + $0x1d0] sm:$0xff] }
 0xbc9   : > { %5301 = vmatpush2.msra.mxu1 %v4742_v57  ;;  %5370 = vmatpush2.msra.mxu0 %v5006_v25  ;;  %v4392_v47 = vld [vmem:[#allocation10 + $0xa10] sm:$0xff]  ;;  %v4121_v57 = vld [vmem:[#allocation10 + $0x198] sm:$0xff] }
 0xbca   : > { %5302 = vmatprep.subr.mxu1 %v4735_v22  ;;  %5371 = vmatprep.subr.mxu0 %v4999_v29  ;;  %v4385_v25 = vld [vmem:[#allocation10 + $0x9d8] sm:$0xff]  ;;  %v4120_v22 = vld [vmem:[#allocation10 + $0x190] sm:$0xff] }
 0xbcb   : > { %5303 = vmatpush2.msra.mxu1 %v4734_v23  ;;  %5372 = vmatpush2.msra.mxu0 %v4998_v13  ;;  %v4384_v29 = vld [vmem:[#allocation10 + $0x9d0] sm:$0xff]  ;;  %v4113_v23 = vld [vmem:[#allocation10 + $0x158] sm:$0xff] }
 0xbcc   : > { %5304 = vmatprep.subr.mxu1 %v4727_v28  ;;  %5373 = vmatprep.subr.mxu0 %v4991_v19  ;;  %v4377_v13 = vld [vmem:[#allocation10 + $0x998] sm:$0xff]  ;;  %v4112_v28 = vld [vmem:[#allocation10 + $0x150] sm:$0xff] }
 0xbcd   : > { %5305 = vmatpush2.msra.mxu1 %v4726_v36  ;;  %5374 = vmatpush2.msra.mxu0 %v4990_v20  ;;  %v4376_v19 = vld [vmem:[#allocation10 + $0x990] sm:$0xff]  ;;  %v4105_v36 = vld [vmem:[#allocation10 + $0x118] sm:$0xff] }
 0xbce   : > { %5306 = vmatprep.subr.mxu1 %v4719_v9  ;;  %5375 = vmatprep.subr.mxu0 %v4983_v1  ;;  %v4369_v20 = vld [vmem:[#allocation10 + $0x958] sm:$0xff]  ;;  %v4104_v9 = vld [vmem:[#allocation10 + $0x110] sm:$0xff] }
 0xbcf   : > { %5307 = vmatpush2.msra.mxu1 %v4718_v16  ;;  %5376 = vmatpush2.msra.mxu0 %v4982_v34  ;;  %v4368_v1 = vld [vmem:[#allocation10 + $0x950] sm:$0xff]  ;;  %v4097_v16 = vld [vmem:[#allocation10 + $0xd8] sm:$0xff] }
 0xbd0   : > { %5308 = vmatprep.subr.mxu1 %v4711_v6  ;;  %5377 = vmatprep.subr.mxu0 %v4975_v46  ;;  %v4361_v34 = vld [vmem:[#allocation10 + $0x918] sm:$0xff]  ;;  %v4096_v6 = vld [vmem:[#allocation10 + $0xd0] sm:$0xff] }
 0xbd1   : > { %5309 = vmatpush2.msra.mxu1 %v4710_v62  ;;  %5378 = vmatpush2.msra.mxu0 %v4974_v51  ;;  %v4360_v46 = vld [vmem:[#allocation10 + $0x910] sm:$0xff]  ;;  %v4089_v62 = vld [vmem:[#allocation10 + $0x98] sm:$0xff] }
 0xbd2   : > { %5311 = vmatmul.mubr.f32.vlgmr.msra.gmra.mxu1 %v8640_v48  ;;  %5379 = vmatprep.subr.mxu0 %v4967_v26  ;;  %v4353_v51 = vld [vmem:[#allocation10 + $0x8d8] sm:$0xff]  ;;  %v4088_v26 = vld [vmem:[#allocation10 + $0x90] sm:$0xff] }
 0xbd3   : > { %5388 = vmatprep.subr.mxu1 %v4193_v56  ;;  %5380 = vmatpush2.msra.mxu0 %v4966_v43  ;;  %v4352_v56 = vld [vmem:[#allocation10 + $0x8d0] sm:$0xff]  ;;  %v4081_v43 = vld [vmem:[#allocation10 + $0x58] sm:$0xff] }
 0xbd4   : > { %5389 = vmatpush1.msra.mxu1 %v4192_v24  ;;  %5452 = vmatprep.mubr.f32.mxu1 %v8619_v55  ;;  %v4345_v24 = vld [vmem:[#allocation10 + $0x898] sm:$0xff] }
 0xbd5   : > { %5382 = vmatmul.mubr.f32.vlgmr.msra.gmra.mxu0 %v8644_v40  ;;  %5390 = vmatprep.subr.mxu1 %v4185_v60  ;;  %v4080_v60 = vld [vmem:[#allocation10 + $0x50] sm:$0xff] }
 0xbd6   : > { %5459 = vmatprep.subr.mxu0 %v4449_v49  ;;  %5391 = vmatpush1.msra.mxu1 %v4184_v39  ;;  %v4344_v49 = vld [vmem:[#allocation10 + $0x890] sm:$0xff]  ;;  %v4073_v39 = vld [vmem:[#allocation10 + $0x18] sm:$0xff] }
 0xbd7   : > { %5460 = vmatpush1.msra.mxu0 %v4448_v35  ;;  %5523 = vmatprep.mubr.f32.mxu0 %v8623_v44  ;;  %v4337_v35 = vld [vmem:[#allocation10 + $0x858] sm:$0xff] }
 0xbd8   : > { %5392 = vmatprep.subr.mxu1 %v4177_v21  ;;  %5461 = vmatprep.subr.mxu0 %v4441_v50  ;;  %v4072_v21 = vld [vmem:[#allocation10 + $0x10] sm:$0xff] }
 0xbd9   : > { %5393 = vmatpush1.msra.mxu1 %v4176_v58  ;;  %5462 = vmatpush1.msra.mxu0 %v4440_v59  ;;  %v4336_v50 = vld [vmem:[#allocation10 + $0x850] sm:$0xff]  ;;  %v4321_v58 = vld [vmem:[#allocation10 + $0x7d8] sm:$0xff] }
 0xbda   : > { %5394 = vmatprep.subr.mxu1 %v4169_v27  ;;  %5463 = vmatprep.subr.mxu0 %v4433_v17  ;;  %v4329_v59 = vld [vmem:[#allocation10 + $0x818] sm:$0xff]  ;;  %v4320_v27 = vld [vmem:[#allocation10 + $0x7d0] sm:$0xff] }
 0xbdb   : > { %5395 = vmatpush1.msra.mxu1 %v4168_v18  ;;  %5464 = vmatpush1.msra.mxu0 %v4432_v42  ;;  %v4328_v17 = vld [vmem:[#allocation10 + $0x810] sm:$0xff]  ;;  %v4313_v18 = vld [vmem:[#allocation10 + $0x798] sm:$0xff] }
 0xbdc   : > { %5396 = vmatprep.subr.mxu1 %v4161_v45  ;;  %5465 = vmatprep.subr.mxu0 %v4425_v11  ;;  %v4577_v42 = vld [vmem:[#allocation10 + $0xfd8] sm:$0xff]  ;;  %v4312_v45 = vld [vmem:[#allocation10 + $0x790] sm:$0xff] }
 0xbdd   : > { %5397 = vmatpush1.msra.mxu1 %v4160_v41  ;;  %5466 = vmatpush1.msra.mxu0 %v4424_v38  ;;  %v4576_v11 = vld [vmem:[#allocation10 + $0xfd0] sm:$0xff]  ;;  %v4305_v41 = vld [vmem:[#allocation10 + $0x758] sm:$0xff] }
 0xbde   : > { %5398 = vmatprep.subr.mxu1 %v4153_v10  ;;  %5467 = vmatprep.subr.mxu0 %v4417_v37  ;;  %v4569_v38 = vld [vmem:[#allocation10 + $0xf98] sm:$0xff]  ;;  %v4304_v10 = vld [vmem:[#allocation10 + $0x750] sm:$0xff] }
 0xbdf   : > { %5399 = vmatpush1.msra.mxu1 %v4152_v3  ;;  %5468 = vmatpush1.msra.mxu0 %v4416_v14  ;;  %v4568_v37 = vld [vmem:[#allocation10 + $0xf90] sm:$0xff]  ;;  %v4297_v3 = vld [vmem:[#allocation10 + $0x718] sm:$0xff] }
 0xbe0   : > { %5400 = vmatprep.subr.mxu1 %v4145_v30  ;;  %5469 = vmatprep.subr.mxu0 %v4409_v63  ;;  %v4561_v14 = vld [vmem:[#allocation10 + $0xf58] sm:$0xff]  ;;  %v4296_v30 = vld [vmem:[#allocation10 + $0x710] sm:$0xff] }
 0xbe1   : > { %5401 = vmatpush1.msra.mxu1 %v4144_v33  ;;  %5470 = vmatpush1.msra.mxu0 %v4408_v61  ;;  %v4560_v63 = vld [vmem:[#allocation10 + $0xf50] sm:$0xff]  ;;  %v4289_v33 = vld [vmem:[#allocation10 + $0x6d8] sm:$0xff] }
 0xbe2   : > { %5402 = vmatprep.subr.mxu1 %v4137_v53  ;;  %5471 = vmatprep.subr.mxu0 %v4401_v8  ;;  %v4553_v61 = vld [vmem:[#allocation10 + $0xf18] sm:$0xff]  ;;  %v4288_v53 = vld [vmem:[#allocation10 + $0x6d0] sm:$0xff] }
 0xbe3   : > { %5403 = vmatpush1.msra.mxu1 %v4136_v12  ;;  %5472 = vmatpush1.msra.mxu0 %v4400_v7  ;;  %v4552_v8 = vld [vmem:[#allocation10 + $0xf10] sm:$0xff]  ;;  %v4281_v12 = vld [vmem:[#allocation10 + $0x698] sm:$0xff] }
 0xbe4   : > { %5404 = vmatprep.subr.mxu1 %v4129_v15  ;;  %5473 = vmatprep.subr.mxu0 %v4393_v5  ;;  %v4545_v7 = vld [vmem:[#allocation10 + $0xed8] sm:$0xff]  ;;  %v4280_v15 = vld [vmem:[#allocation10 + $0x690] sm:$0xff] }
 0xbe5   : > { %5405 = vmatpush1.msra.mxu1 %v4128_v54  ;;  %5474 = vmatpush1.msra.mxu0 %v4392_v47  ;;  %v4544_v5 = vld [vmem:[#allocation10 + $0xed0] sm:$0xff]  ;;  %v4273_v54 = vld [vmem:[#allocation10 + $0x658] sm:$0xff] }
 0xbe6   : > { %5406 = vmatprep.subr.mxu1 %v4121_v57  ;;  %5475 = vmatprep.subr.mxu0 %v4385_v25  ;;  %v4537_v47 = vld [vmem:[#allocation10 + $0xe98] sm:$0xff]  ;;  %v4272_v57 = vld [vmem:[#allocation10 + $0x650] sm:$0xff] }
 0xbe7   : > { %5407 = vmatpush1.msra.mxu1 %v4120_v22  ;;  %5476 = vmatpush1.msra.mxu0 %v4384_v29  ;;  %v4536_v25 = vld [vmem:[#allocation10 + $0xe90] sm:$0xff]  ;;  %v4265_v22 = vld [vmem:[#allocation10 + $0x618] sm:$0xff] }
 0xbe8   : > { %5408 = vmatprep.subr.mxu1 %v4113_v23  ;;  %5477 = vmatprep.subr.mxu0 %v4377_v13  ;;  %v4529_v29 = vld [vmem:[#allocation10 + $0xe58] sm:$0xff]  ;;  %v4264_v23 = vld [vmem:[#allocation10 + $0x610] sm:$0xff] }
 0xbe9   : > { %5409 = vmatpush1.msra.mxu1 %v4112_v28  ;;  %5478 = vmatpush1.msra.mxu0 %v4376_v19  ;;  %v4528_v13 = vld [vmem:[#allocation10 + $0xe50] sm:$0xff]  ;;  %v4257_v28 = vld [vmem:[#allocation10 + $0x5d8] sm:$0xff] }
 0xbea   : > { %5410 = vmatprep.subr.mxu1 %v4105_v36  ;;  %5479 = vmatprep.subr.mxu0 %v4369_v20  ;;  %v4521_v19 = vld [vmem:[#allocation10 + $0xe18] sm:$0xff]  ;;  %v4256_v36 = vld [vmem:[#allocation10 + $0x5d0] sm:$0xff] }
 0xbeb   : > { %5411 = vmatpush1.msra.mxu1 %v4104_v9  ;;  %5480 = vmatpush1.msra.mxu0 %v4368_v1  ;;  %v4520_v20 = vld [vmem:[#allocation10 + $0xe10] sm:$0xff]  ;;  %v4249_v9 = vld [vmem:[#allocation10 + $0x598] sm:$0xff] }
 0xbec   : > { %5412 = vmatprep.subr.mxu1 %v4097_v16  ;;  %5481 = vmatprep.subr.mxu0 %v4361_v34  ;;  %v4513_v1 = vld [vmem:[#allocation10 + $0xdd8] sm:$0xff]  ;;  %v4248_v16 = vld [vmem:[#allocation10 + $0x590] sm:$0xff] }
 0xbed   : > { %5413 = vmatpush1.msra.mxu1 %v4096_v6  ;;  %5482 = vmatpush1.msra.mxu0 %v4360_v46  ;;  %v4512_v34 = vld [vmem:[#allocation10 + $0xdd0] sm:$0xff]  ;;  %v4241_v6 = vld [vmem:[#allocation10 + $0x558] sm:$0xff] }
 0xbee   : > { %5414 = vmatprep.subr.mxu1 %v4089_v62  ;;  %5483 = vmatprep.subr.mxu0 %v4353_v51  ;;  %v4505_v46 = vld [vmem:[#allocation10 + $0xd98] sm:$0xff]  ;;  %v4240_v62 = vld [vmem:[#allocation10 + $0x550] sm:$0xff] }
 0xbef   : > { %5415 = vmatpush1.msra.mxu1 %v4088_v26  ;;  %5484 = vmatpush1.msra.mxu0 %v4352_v56  ;;  %v4504_v51 = vld [vmem:[#allocation10 + $0xd90] sm:$0xff]  ;;  %v4233_v26 = vld [vmem:[#allocation10 + $0x518] sm:$0xff] }
 0xbf0   : > { %5416 = vmatprep.subr.mxu1 %v4081_v43  ;;  %5485 = vmatprep.subr.mxu0 %v4345_v24  ;;  %v4497_v56 = vld [vmem:[#allocation10 + $0xd58] sm:$0xff]  ;;  %v4232_v43 = vld [vmem:[#allocation10 + $0x510] sm:$0xff] }
 0xbf1   : > { %5417 = vmatpush1.msra.mxu1 %v4080_v60  ;;  %5486 = vmatpush1.msra.mxu0 %v4344_v49  ;;  %v4496_v24 = vld [vmem:[#allocation10 + $0xd50] sm:$0xff]  ;;  %v4225_v60 = vld [vmem:[#allocation10 + $0x4d8] sm:$0xff] }
 0xbf2   : > { %5418 = vmatprep.subr.mxu1 %v4073_v39  ;;  %5487 = vmatprep.subr.mxu0 %v4337_v35  ;;  %v4489_v49 = vld [vmem:[#allocation10 + $0xd18] sm:$0xff]  ;;  %v4224_v39 = vld [vmem:[#allocation10 + $0x4d0] sm:$0xff] }
 0xbf3   : > { %5419 = vmatpush1.msra.mxu1 %v4072_v21  ;;  %5488 = vmatpush1.msra.mxu0 %v4336_v50  ;;  %v4488_v35 = vld [vmem:[#allocation10 + $0xd10] sm:$0xff]  ;;  %v4217_v21 = vld [vmem:[#allocation10 + $0x498] sm:$0xff] }
 0xbf4   : > { %5420 = vmatprep.subr.mxu1 %v4321_v58  ;;  %5489 = vmatprep.subr.mxu0 %v4329_v59  ;;  %v4481_v50 = vld [vmem:[#allocation10 + $0xcd8] sm:$0xff]  ;;  %v4216_v58 = vld [vmem:[#allocation10 + $0x490] sm:$0xff] }
 0xbf5   : > { %5421 = vmatpush2.msra.mxu1 %v4320_v27  ;;  %5490 = vmatpush1.msra.mxu0 %v4328_v17  ;;  %v4480_v59 = vld [vmem:[#allocation10 + $0xcd0] sm:$0xff]  ;;  %v4209_v27 = vld [vmem:[#allocation10 + $0x458] sm:$0xff] }
 0xbf6   : > { %5422 = vmatprep.subr.mxu1 %v4313_v18  ;;  %5491 = vmatprep.subr.mxu0 %v4577_v42  ;;  %v4473_v17 = vld [vmem:[#allocation10 + $0xc98] sm:$0xff]  ;;  %v4208_v18 = vld [vmem:[#allocation10 + $0x450] sm:$0xff] }
 0xbf7   : > { %5423 = vmatpush2.msra.mxu1 %v4312_v45  ;;  %5492 = vmatpush2.msra.mxu0 %v4576_v11  ;;  %v4472_v42 = vld [vmem:[#allocation10 + $0xc90] sm:$0xff]  ;;  %v4201_v45 = vld [vmem:[#allocation10 + $0x418] sm:$0xff] }
 0xbf8   : > { %5424 = vmatprep.subr.mxu1 %v4305_v41  ;;  %5493 = vmatprep.subr.mxu0 %v4569_v38  ;;  %v4465_v11 = vld [vmem:[#allocation10 + $0xc58] sm:$0xff]  ;;  %v4200_v41 = vld [vmem:[#allocation10 + $0x410] sm:$0xff] }
 0xbf9   : > { %5425 = vmatpush2.msra.mxu1 %v4304_v10  ;;  %5494 = vmatpush2.msra.mxu0 %v4568_v37  ;;  %v4464_v38 = vld [vmem:[#allocation10 + $0xc50] sm:$0xff]  ;;  %v4457_v10 = vld [vmem:[#allocation10 + $0xc18] sm:$0xff] }
 0xbfa   : > { %5426 = vmatprep.subr.mxu1 %v4297_v3  ;;  %5495 = vmatprep.subr.mxu0 %v4561_v14  ;;  %v4705_v37 = vld [vmem:[#allocation10 + $0x13d8] sm:$0xff]  ;;  %v4456_v3 = vld [vmem:[#allocation10 + $0xc10] sm:$0xff] }
 0xbfb   : > { %5427 = vmatpush2.msra.mxu1 %v4296_v30  ;;  %5496 = vmatpush2.msra.mxu0 %v4560_v63  ;;  %v4704_v14 = vld [vmem:[#allocation10 + $0x13d0] sm:$0xff]  ;;  %v4697_v30 = vld [vmem:[#allocation10 + $0x1398] sm:$0xff] }
 0xbfc   : > { %5428 = vmatprep.subr.mxu1 %v4289_v33  ;;  %5497 = vmatprep.subr.mxu0 %v4553_v61  ;;  %v4961_v63 = vld [vmem:[#allocation10 + $0x1bd8] sm:$0xff]  ;;  %v4696_v33 = vld [vmem:[#allocation10 + $0x1390] sm:$0xff] }
 0xbfd   : > { %5429 = vmatpush2.msra.mxu1 %v4288_v53  ;;  %5498 = vmatpush2.msra.mxu0 %v4552_v8  ;;  %v4960_v61 = vld [vmem:[#allocation10 + $0x1bd0] sm:$0xff]  ;;  %v4689_v53 = vld [vmem:[#allocation10 + $0x1358] sm:$0xff] }
 0xbfe   : > { %5430 = vmatprep.subr.mxu1 %v4281_v12  ;;  %5499 = vmatprep.subr.mxu0 %v4545_v7  ;;  %v4953_v8 = vld [vmem:[#allocation10 + $0x1b98] sm:$0xff]  ;;  %v4688_v12 = vld [vmem:[#allocation10 + $0x1350] sm:$0xff] }
 0xbff   : > { %5431 = vmatpush2.msra.mxu1 %v4280_v15  ;;  %5500 = vmatpush2.msra.mxu0 %v4544_v5  ;;  %v4952_v7 = vld [vmem:[#allocation10 + $0x1b90] sm:$0xff]  ;;  %v4681_v15 = vld [vmem:[#allocation10 + $0x1318] sm:$0xff] }
 0xc00   : > { %5432 = vmatprep.subr.mxu1 %v4273_v54  ;;  %5501 = vmatprep.subr.mxu0 %v4537_v47  ;;  %v4945_v5 = vld [vmem:[#allocation10 + $0x1b58] sm:$0xff]  ;;  %v4680_v54 = vld [vmem:[#allocation10 + $0x1310] sm:$0xff] }
 0xc01   : > { %5433 = vmatpush2.msra.mxu1 %v4272_v57  ;;  %5502 = vmatpush2.msra.mxu0 %v4536_v25  ;;  %v4944_v47 = vld [vmem:[#allocation10 + $0x1b50] sm:$0xff]  ;;  %v4673_v57 = vld [vmem:[#allocation10 + $0x12d8] sm:$0xff] }
 0xc02   : > { %5434 = vmatprep.subr.mxu1 %v4265_v22  ;;  %5503 = vmatprep.subr.mxu0 %v4529_v29  ;;  %v4937_v25 = vld [vmem:[#allocation10 + $0x1b18] sm:$0xff]  ;;  %v4672_v22 = vld [vmem:[#allocation10 + $0x12d0] sm:$0xff] }
 0xc03   : > { %5435 = vmatpush2.msra.mxu1 %v4264_v23  ;;  %5504 = vmatpush2.msra.mxu0 %v4528_v13  ;;  %v4936_v29 = vld [vmem:[#allocation10 + $0x1b10] sm:$0xff]  ;;  %v4665_v23 = vld [vmem:[#allocation10 + $0x1298] sm:$0xff] }
 0xc04   : > { %5436 = vmatprep.subr.mxu1 %v4257_v28  ;;  %5505 = vmatprep.subr.mxu0 %v4521_v19  ;;  %v4929_v13 = vld [vmem:[#allocation10 + $0x1ad8] sm:$0xff]  ;;  %v4664_v28 = vld [vmem:[#allocation10 + $0x1290] sm:$0xff] }
 0xc05   : > { %5437 = vmatpush2.msra.mxu1 %v4256_v36  ;;  %5506 = vmatpush2.msra.mxu0 %v4520_v20  ;;  %v4928_v19 = vld [vmem:[#allocation10 + $0x1ad0] sm:$0xff]  ;;  %v4657_v36 = vld [vmem:[#allocation10 + $0x1258] sm:$0xff] }
 0xc06   : > { %5438 = vmatprep.subr.mxu1 %v4249_v9  ;;  %5507 = vmatprep.subr.mxu0 %v4513_v1  ;;  %v4921_v20 = vld [vmem:[#allocation10 + $0x1a98] sm:$0xff]  ;;  %v4656_v9 = vld [vmem:[#allocation10 + $0x1250] sm:$0xff] }
 0xc07   : > { %5439 = vmatpush2.msra.mxu1 %v4248_v16  ;;  %5508 = vmatpush2.msra.mxu0 %v4512_v34  ;;  %v4920_v1 = vld [vmem:[#allocation10 + $0x1a90] sm:$0xff]  ;;  %v4649_v16 = vld [vmem:[#allocation10 + $0x1218] sm:$0xff] }
 0xc08   : > { %5440 = vmatprep.subr.mxu1 %v4241_v6  ;;  %5509 = vmatprep.subr.mxu0 %v4505_v46  ;;  %v4913_v34 = vld [vmem:[#allocation10 + $0x1a58] sm:$0xff]  ;;  %v4648_v6 = vld [vmem:[#allocation10 + $0x1210] sm:$0xff] }
 0xc09   : > { %5441 = vmatpush2.msra.mxu1 %v4240_v62  ;;  %5510 = vmatpush2.msra.mxu0 %v4504_v51  ;;  %v4912_v46 = vld [vmem:[#allocation10 + $0x1a50] sm:$0xff]  ;;  %v4641_v62 = vld [vmem:[#allocation10 + $0x11d8] sm:$0xff] }
 0xc0a   : > { %5442 = vmatprep.subr.mxu1 %v4233_v26  ;;  %5511 = vmatprep.subr.mxu0 %v4497_v56  ;;  %v4905_v51 = vld [vmem:[#allocation10 + $0x1a18] sm:$0xff]  ;;  %v4640_v26 = vld [vmem:[#allocation10 + $0x11d0] sm:$0xff] }
 0xc0b   : > { %5443 = vmatpush2.msra.mxu1 %v4232_v43  ;;  %5512 = vmatpush2.msra.mxu0 %v4496_v24  ;;  %v4904_v56 = vld [vmem:[#allocation10 + $0x1a10] sm:$0xff]  ;;  %v4633_v43 = vld [vmem:[#allocation10 + $0x1198] sm:$0xff] }
 0xc0c   : > { %5444 = vmatprep.subr.mxu1 %v4225_v60  ;;  %5513 = vmatprep.subr.mxu0 %v4489_v49  ;;  %v4897_v24 = vld [vmem:[#allocation10 + $0x19d8] sm:$0xff]  ;;  %v4632_v60 = vld [vmem:[#allocation10 + $0x1190] sm:$0xff] }
 0xc0d   : > { %5445 = vmatpush2.msra.mxu1 %v4224_v39  ;;  %5514 = vmatpush2.msra.mxu0 %v4488_v35  ;;  %v4896_v49 = vld [vmem:[#allocation10 + $0x19d0] sm:$0xff]  ;;  %v4625_v39 = vld [vmem:[#allocation10 + $0x1158] sm:$0xff] }
 0xc0e   : > { %5446 = vmatprep.subr.mxu1 %v4217_v21  ;;  %5515 = vmatprep.subr.mxu0 %v4481_v50  ;;  %v4889_v35 = vld [vmem:[#allocation10 + $0x1998] sm:$0xff]  ;;  %v4624_v21 = vld [vmem:[#allocation10 + $0x1150] sm:$0xff] }
 0xc0f   : > { %5447 = vmatpush2.msra.mxu1 %v4216_v58  ;;  %5516 = vmatpush2.msra.mxu0 %v4480_v59  ;;  %v4888_v50 = vld [vmem:[#allocation10 + $0x1990] sm:$0xff]  ;;  %v4617_v58 = vld [vmem:[#allocation10 + $0x1118] sm:$0xff] }
 0xc10   : > { %5448 = vmatprep.subr.mxu1 %v4209_v27  ;;  %5517 = vmatprep.subr.mxu0 %v4473_v17  ;;  %v4881_v59 = vld [vmem:[#allocation10 + $0x1958] sm:$0xff]  ;;  %v4616_v27 = vld [vmem:[#allocation10 + $0x1110] sm:$0xff] }
 0xc11   : > { %5449 = vmatpush2.msra.mxu1 %v4208_v18  ;;  %5518 = vmatpush2.msra.mxu0 %v4472_v42  ;;  %v4880_v17 = vld [vmem:[#allocation10 + $0x1950] sm:$0xff]  ;;  %v4609_v18 = vld [vmem:[#allocation10 + $0x10d8] sm:$0xff] }
 0xc12   : > { %5450 = vmatprep.subr.mxu1 %v4201_v45  ;;  %5519 = vmatprep.subr.mxu0 %v4465_v11  ;;  %v4873_v42 = vld [vmem:[#allocation10 + $0x1918] sm:$0xff]  ;;  %v4608_v45 = vld [vmem:[#allocation10 + $0x10d0] sm:$0xff] }
 0xc13   : > { %5451 = vmatpush2.msra.mxu1 %v4200_v41  ;;  %5520 = vmatpush2.msra.mxu0 %v4464_v38  ;;  %v4872_v11 = vld [vmem:[#allocation10 + $0x1910] sm:$0xff]  ;;  %v4601_v41 = vld [vmem:[#allocation10 + $0x1098] sm:$0xff] }
 0xc14   : > { %5453 = vmatmul.mubr.f32.vlgmr.msra.gmra.mxu1 %v8617_v32  ;;  %5521 = vmatprep.subr.mxu0 %v4457_v10  ;;  %v4865_v38 = vld [vmem:[#allocation10 + $0x18d8] sm:$0xff]  ;;  %v4600_v10 = vld [vmem:[#allocation10 + $0x1090] sm:$0xff] }
 0xc15   : > { %5530 = vmatprep.subr.mxu1 %v4705_v37  ;;  %5522 = vmatpush2.msra.mxu0 %v4456_v3  ;;  %v4864_v37 = vld [vmem:[#allocation10 + $0x18d0] sm:$0xff]  ;;  %v4593_v3 = vld [vmem:[#allocation10 + $0x1058] sm:$0xff] }
 0xc16   : > { %5531 = vmatpush1.msra.mxu1 %v4704_v14  ;;  %5594 = vmatprep.mubr.f32.mxu1 %v8632_v31  ;;  %v4857_v14 = vld [vmem:[#allocation10 + $0x1898] sm:$0xff] }
 0xc17   : > { %5524 = vmatmul.mubr.f32.vlgmr.msra.gmra.mxu0 %v8627_v0  ;;  %5532 = vmatprep.subr.mxu1 %v4697_v30  ;;  %v4592_v30 = vld [vmem:[#allocation10 + $0x1050] sm:$0xff] }
 0xc18   : > { %5601 = vmatprep.subr.mxu0 %v4961_v63  ;;  %5533 = vmatpush1.msra.mxu1 %v4696_v33  ;;  %v4856_v63 = vld [vmem:[#allocation10 + $0x1890] sm:$0xff]  ;;  %v4585_v33 = vld [vmem:[#allocation10 + $0x1018] sm:$0xff] }
 0xc19   : > { %5602 = vmatpush1.msra.mxu0 %v4960_v61  ;;  %5665 = vmatprep.mubr.f32.mxu0 %v8635_v52  ;;  %v4849_v61 = vld [vmem:[#allocation10 + $0x1858] sm:$0xff] }
 0xc1a   : > { %5534 = vmatprep.subr.mxu1 %v4689_v53  ;;  %5603 = vmatprep.subr.mxu0 %v4953_v8  ;;  %v4584_v53 = vld [vmem:[#allocation10 + $0x1010] sm:$0xff] }
 0xc1b   : > { %5535 = vmatpush1.msra.mxu1 %v4688_v12  ;;  %5604 = vmatpush1.msra.mxu0 %v4952_v7  ;;  %v4848_v8 = vld [vmem:[#allocation10 + $0x1850] sm:$0xff]  ;;  %v4833_v12 = vld [vmem:[#allocation10 + $0x17d8] sm:$0xff] }
 0xc1c   : > { %5536 = vmatprep.subr.mxu1 %v4681_v15  ;;  %5605 = vmatprep.subr.mxu0 %v4945_v5  ;;  %v4841_v7 = vld [vmem:[#allocation10 + $0x1818] sm:$0xff]  ;;  %v4832_v15 = vld [vmem:[#allocation10 + $0x17d0] sm:$0xff] }
 0xc1d   : > { %5537 = vmatpush1.msra.mxu1 %v4680_v54  ;;  %5606 = vmatpush1.msra.mxu0 %v4944_v47  ;;  %v4840_v5 = vld [vmem:[#allocation10 + $0x1810] sm:$0xff]  ;;  %v4825_v54 = vld [vmem:[#allocation10 + $0x1798] sm:$0xff] }
 0xc1e   : > { %5538 = vmatprep.subr.mxu1 %v4673_v57  ;;  %5607 = vmatprep.subr.mxu0 %v4937_v25  ;;  %v5089_v47 = vld [vmem:[#allocation10 + $0x1fd8] sm:$0xff]  ;;  %v4824_v57 = vld [vmem:[#allocation10 + $0x1790] sm:$0xff] }
 0xc1f   : > { %5539 = vmatpush1.msra.mxu1 %v4672_v22  ;;  %5608 = vmatpush1.msra.mxu0 %v4936_v29  ;;  %v5088_v25 = vld [vmem:[#allocation10 + $0x1fd0] sm:$0xff]  ;;  %v4817_v22 = vld [vmem:[#allocation10 + $0x1758] sm:$0xff] }
 0xc20   : > { %5540 = vmatprep.subr.mxu1 %v4665_v23  ;;  %5609 = vmatprep.subr.mxu0 %v4929_v13  ;;  %v5081_v29 = vld [vmem:[#allocation10 + $0x1f98] sm:$0xff]  ;;  %v4816_v23 = vld [vmem:[#allocation10 + $0x1750] sm:$0xff] }
 0xc21   : > { %5541 = vmatpush1.msra.mxu1 %v4664_v28  ;;  %5610 = vmatpush1.msra.mxu0 %v4928_v19  ;;  %v5080_v13 = vld [vmem:[#allocation10 + $0x1f90] sm:$0xff]  ;;  %v4809_v28 = vld [vmem:[#allocation10 + $0x1718] sm:$0xff] }
 0xc22   : > { %5542 = vmatprep.subr.mxu1 %v4657_v36  ;;  %5611 = vmatprep.subr.mxu0 %v4921_v20  ;;  %v5073_v19 = vld [vmem:[#allocation10 + $0x1f58] sm:$0xff]  ;;  %v4808_v36 = vld [vmem:[#allocation10 + $0x1710] sm:$0xff] }
 0xc23   : > { %5543 = vmatpush1.msra.mxu1 %v4656_v9  ;;  %5612 = vmatpush1.msra.mxu0 %v4920_v1  ;;  %v5072_v20 = vld [vmem:[#allocation10 + $0x1f50] sm:$0xff]  ;;  %v4801_v9 = vld [vmem:[#allocation10 + $0x16d8] sm:$0xff] }
 0xc24   : > { %5544 = vmatprep.subr.mxu1 %v4649_v16  ;;  %5613 = vmatprep.subr.mxu0 %v4913_v34  ;;  %v5065_v1 = vld [vmem:[#allocation10 + $0x1f18] sm:$0xff]  ;;  %v4800_v16 = vld [vmem:[#allocation10 + $0x16d0] sm:$0xff] }
 0xc25   : > { %5545 = vmatpush1.msra.mxu1 %v4648_v6  ;;  %5614 = vmatpush1.msra.mxu0 %v4912_v46  ;;  %v5064_v34 = vld [vmem:[#allocation10 + $0x1f10] sm:$0xff]  ;;  %v4793_v6 = vld [vmem:[#allocation10 + $0x1698] sm:$0xff] }
 0xc26   : > { %5546 = vmatprep.subr.mxu1 %v4641_v62  ;;  %5615 = vmatprep.subr.mxu0 %v4905_v51  ;;  %v5057_v46 = vld [vmem:[#allocation10 + $0x1ed8] sm:$0xff]  ;;  %v4792_v62 = vld [vmem:[#allocation10 + $0x1690] sm:$0xff] }
 0xc27   : > { %5547 = vmatpush1.msra.mxu1 %v4640_v26  ;;  %5616 = vmatpush1.msra.mxu0 %v4904_v56  ;;  %v5056_v51 = vld [vmem:[#allocation10 + $0x1ed0] sm:$0xff]  ;;  %v4785_v26 = vld [vmem:[#allocation10 + $0x1658] sm:$0xff] }
 0xc28   : > { %5548 = vmatprep.subr.mxu1 %v4633_v43  ;;  %5617 = vmatprep.subr.mxu0 %v4897_v24  ;;  %v5049_v56 = vld [vmem:[#allocation10 + $0x1e98] sm:$0xff]  ;;  %v4784_v43 = vld [vmem:[#allocation10 + $0x1650] sm:$0xff] }
 0xc29   : > { %5549 = vmatpush1.msra.mxu1 %v4632_v60  ;;  %5618 = vmatpush1.msra.mxu0 %v4896_v49  ;;  %v5048_v24 = vld [vmem:[#allocation10 + $0x1e90] sm:$0xff]  ;;  %v4777_v60 = vld [vmem:[#allocation10 + $0x1618] sm:$0xff] }
 0xc2a   : > { %5550 = vmatprep.subr.mxu1 %v4625_v39  ;;  %5619 = vmatprep.subr.mxu0 %v4889_v35  ;;  %v5041_v49 = vld [vmem:[#allocation10 + $0x1e58] sm:$0xff]  ;;  %v4776_v39 = vld [vmem:[#allocation10 + $0x1610] sm:$0xff] }
 0xc2b   : > { %5551 = vmatpush1.msra.mxu1 %v4624_v21  ;;  %5620 = vmatpush1.msra.mxu0 %v4888_v50  ;;  %v5040_v35 = vld [vmem:[#allocation10 + $0x1e50] sm:$0xff]  ;;  %v4769_v21 = vld [vmem:[#allocation10 + $0x15d8] sm:$0xff] }
 0xc2c   : > { %5552 = vmatprep.subr.mxu1 %v4617_v58  ;;  %5621 = vmatprep.subr.mxu0 %v4881_v59  ;;  %v5033_v50 = vld [vmem:[#allocation10 + $0x1e18] sm:$0xff]  ;;  %v4768_v58 = vld [vmem:[#allocation10 + $0x15d0] sm:$0xff] }
 0xc2d   : > { %5553 = vmatpush1.msra.mxu1 %v4616_v27  ;;  %5622 = vmatpush1.msra.mxu0 %v4880_v17  ;;  %v5032_v59 = vld [vmem:[#allocation10 + $0x1e10] sm:$0xff]  ;;  %v4761_v27 = vld [vmem:[#allocation10 + $0x1598] sm:$0xff] }
 0xc2e   : > { %5554 = vmatprep.subr.mxu1 %v4609_v18  ;;  %5623 = vmatprep.subr.mxu0 %v4873_v42  ;;  %v5025_v17 = vld [vmem:[#allocation10 + $0x1dd8] sm:$0xff]  ;;  %v4760_v18 = vld [vmem:[#allocation10 + $0x1590] sm:$0xff] }
 0xc2f   : > { %5555 = vmatpush1.msra.mxu1 %v4608_v45  ;;  %5624 = vmatpush1.msra.mxu0 %v4872_v11  ;;  %v5024_v42 = vld [vmem:[#allocation10 + $0x1dd0] sm:$0xff]  ;;  %v4753_v45 = vld [vmem:[#allocation10 + $0x1558] sm:$0xff] }
 0xc30   : > { %5556 = vmatprep.subr.mxu1 %v4601_v41  ;;  %5625 = vmatprep.subr.mxu0 %v4865_v38  ;;  %v5017_v11 = vld [vmem:[#allocation10 + $0x1d98] sm:$0xff]  ;;  %v4752_v41 = vld [vmem:[#allocation10 + $0x1550] sm:$0xff] }
 0xc31   : > { %5557 = vmatpush1.msra.mxu1 %v4600_v10  ;;  %5626 = vmatpush1.msra.mxu0 %v4864_v37  ;;  %v5016_v38 = vld [vmem:[#allocation10 + $0x1d90] sm:$0xff]  ;;  %v4745_v10 = vld [vmem:[#allocation10 + $0x1518] sm:$0xff] }
 0xc32   : > { %5558 = vmatprep.subr.mxu1 %v4593_v3  ;;  %5627 = vmatprep.subr.mxu0 %v4857_v14  ;;  %v5009_v37 = vld [vmem:[#allocation10 + $0x1d58] sm:$0xff]  ;;  %v4744_v3 = vld [vmem:[#allocation10 + $0x1510] sm:$0xff] }
 0xc33   : > { %5559 = vmatpush1.msra.mxu1 %v4592_v30  ;;  %5628 = vmatpush1.msra.mxu0 %v4856_v63  ;;  %v5008_v14 = vld [vmem:[#allocation10 + $0x1d50] sm:$0xff]  ;;  %v4737_v30 = vld [vmem:[#allocation10 + $0x14d8] sm:$0xff] }
 0xc34   : > { %5560 = vmatprep.subr.mxu1 %v4585_v33  ;;  %5629 = vmatprep.subr.mxu0 %v4849_v61  ;;  %v5001_v63 = vld [vmem:[#allocation10 + $0x1d18] sm:$0xff]  ;;  %v4736_v33 = vld [vmem:[#allocation10 + $0x14d0] sm:$0xff] }
 0xc35   : > { %5561 = vmatpush1.msra.mxu1 %v4584_v53  ;;  %5630 = vmatpush1.msra.mxu0 %v4848_v8  ;;  %v5000_v61 = vld [vmem:[#allocation10 + $0x1d10] sm:$0xff]  ;;  %v4729_v53 = vld [vmem:[#allocation10 + $0x1498] sm:$0xff] }
 0xc36   : > { %5562 = vmatprep.subr.mxu1 %v4833_v12  ;;  %5631 = vmatprep.subr.mxu0 %v4841_v7  ;;  %v4993_v8 = vld [vmem:[#allocation10 + $0x1cd8] sm:$0xff]  ;;  %v4728_v12 = vld [vmem:[#allocation10 + $0x1490] sm:$0xff] }
 0xc37   : > { %5563 = vmatpush2.msra.mxu1 %v4832_v15  ;;  %5632 = vmatpush1.msra.mxu0 %v4840_v5  ;;  %v4992_v7 = vld [vmem:[#allocation10 + $0x1cd0] sm:$0xff]  ;;  %v4721_v15 = vld [vmem:[#allocation10 + $0x1458] sm:$0xff] }
 0xc38   : > { %5564 = vmatprep.subr.mxu1 %v4825_v54  ;;  %5633 = vmatprep.subr.mxu0 %v5089_v47  ;;  %v4985_v5 = vld [vmem:[#allocation10 + $0x1c98] sm:$0xff]  ;;  %v4720_v54 = vld [vmem:[#allocation10 + $0x1450] sm:$0xff] }
 0xc39   : > { %5565 = vmatpush2.msra.mxu1 %v4824_v57  ;;  %5634 = vmatpush2.msra.mxu0 %v5088_v25  ;;  %v4984_v47 = vld [vmem:[#allocation10 + $0x1c90] sm:$0xff]  ;;  %v4713_v57 = vld [vmem:[#allocation10 + $0x1418] sm:$0xff] }
 0xc3a   : > { %5566 = vmatprep.subr.mxu1 %v4817_v22  ;;  %5635 = vmatprep.subr.mxu0 %v5081_v29  ;;  %v4977_v25 = vld [vmem:[#allocation10 + $0x1c58] sm:$0xff]  ;;  %v4712_v22 = vld [vmem:[#allocation10 + $0x1410] sm:$0xff] }
 0xc3b   : > { %5567 = vmatpush2.msra.mxu1 %v4816_v23  ;;  %5636 = vmatpush2.msra.mxu0 %v5080_v13  ;;  %v4976_v29 = vld [vmem:[#allocation10 + $0x1c50] sm:$0xff]  ;;  %v4969_v23 = vld [vmem:[#allocation10 + $0x1c18] sm:$0xff]  ;;  %v4195_v13 = vld [vmem:[#allocation10 + $0x3e8] sm:$0xff] }
 0xc3c   : > { %5568 = vmatprep.subr.mxu1 %v4809_v28  ;;  %5637 = vmatprep.subr.mxu0 %v5073_v19  ;;  %v4968_v28 = vld [vmem:[#allocation10 + $0x1c10] sm:$0xff]  ;;  %v4194_v19 = vld [vmem:[#allocation10 + $0x3e0] sm:$0xff] }
 0xc3d   : > { %5569 = vmatpush2.msra.mxu1 %v4808_v36  ;;  %5638 = vmatpush2.msra.mxu0 %v5072_v20  ;;  %v4187_v36 = vld [vmem:[#allocation10 + $0x3a8] sm:$0xff] }
 0xc3e   : > { %5570 = vmatprep.subr.mxu1 %v4801_v9  ;;  %5639 = vmatprep.subr.mxu0 %v5065_v1  ;;  %v4451_v20 = vld [vmem:[#allocation10 + $0xbe8] sm:$0xff]  ;;  %v4186_v9 = vld [vmem:[#allocation10 + $0x3a0] sm:$0xff] }
 0xc3f   : > { %5571 = vmatpush2.msra.mxu1 %v4800_v16  ;;  %5640 = vmatpush2.msra.mxu0 %v5064_v34  ;;  %v4450_v1 = vld [vmem:[#allocation10 + $0xbe0] sm:$0xff]  ;;  %v4179_v16 = vld [vmem:[#allocation10 + $0x368] sm:$0xff] }
 0xc40   : > { %5572 = vmatprep.subr.mxu1 %v4793_v6  ;;  %5641 = vmatprep.subr.mxu0 %v5057_v46  ;;  %v4443_v34 = vld [vmem:[#allocation10 + $0xba8] sm:$0xff]  ;;  %v4178_v6 = vld [vmem:[#allocation10 + $0x360] sm:$0xff] }
 0xc41   : > { %5573 = vmatpush2.msra.mxu1 %v4792_v62  ;;  %5642 = vmatpush2.msra.mxu0 %v5056_v51  ;;  %v4442_v46 = vld [vmem:[#allocation10 + $0xba0] sm:$0xff]  ;;  %v4171_v62 = vld [vmem:[#allocation10 + $0x328] sm:$0xff] }
 0xc42   : > { %5574 = vmatprep.subr.mxu1 %v4785_v26  ;;  %5643 = vmatprep.subr.mxu0 %v5049_v56  ;;  %v4435_v51 = vld [vmem:[#allocation10 + $0xb68] sm:$0xff]  ;;  %v4170_v26 = vld [vmem:[#allocation10 + $0x320] sm:$0xff] }
 0xc43   : > { %5575 = vmatpush2.msra.mxu1 %v4784_v43  ;;  %5644 = vmatpush2.msra.mxu0 %v5048_v24  ;;  %v4434_v56 = vld [vmem:[#allocation10 + $0xb60] sm:$0xff]  ;;  %v4163_v43 = vld [vmem:[#allocation10 + $0x2e8] sm:$0xff] }
 0xc44   : > { %5576 = vmatprep.subr.mxu1 %v4777_v60  ;;  %5645 = vmatprep.subr.mxu0 %v5041_v49  ;;  %v4427_v24 = vld [vmem:[#allocation10 + $0xb28] sm:$0xff]  ;;  %v4162_v60 = vld [vmem:[#allocation10 + $0x2e0] sm:$0xff] }
 0xc45   : > { %5577 = vmatpush2.msra.mxu1 %v4776_v39  ;;  %5646 = vmatpush2.msra.mxu0 %v5040_v35  ;;  %v4426_v49 = vld [vmem:[#allocation10 + $0xb20] sm:$0xff]  ;;  %v4155_v39 = vld [vmem:[#allocation10 + $0x2a8] sm:$0xff] }
 0xc46   : > { %5578 = vmatprep.subr.mxu1 %v4769_v21  ;;  %5647 = vmatprep.subr.mxu0 %v5033_v50  ;;  %v4419_v35 = vld [vmem:[#allocation10 + $0xae8] sm:$0xff]  ;;  %v4154_v21 = vld [vmem:[#allocation10 + $0x2a0] sm:$0xff] }
 0xc47   : > { %5579 = vmatpush2.msra.mxu1 %v4768_v58  ;;  %5648 = vmatpush2.msra.mxu0 %v5032_v59  ;;  %v4418_v50 = vld [vmem:[#allocation10 + $0xae0] sm:$0xff]  ;;  %v4147_v58 = vld [vmem:[#allocation10 + $0x268] sm:$0xff] }
 0xc48   : > { %5580 = vmatprep.subr.mxu1 %v4761_v27  ;;  %5649 = vmatprep.subr.mxu0 %v5025_v17  ;;  %v4411_v59 = vld [vmem:[#allocation10 + $0xaa8] sm:$0xff]  ;;  %v4146_v27 = vld [vmem:[#allocation10 + $0x260] sm:$0xff] }
 0xc49   : > { %5581 = vmatpush2.msra.mxu1 %v4760_v18  ;;  %5650 = vmatpush2.msra.mxu0 %v5024_v42  ;;  %v4410_v17 = vld [vmem:[#allocation10 + $0xaa0] sm:$0xff]  ;;  %v4139_v18 = vld [vmem:[#allocation10 + $0x228] sm:$0xff] }
 0xc4a   : > { %5582 = vmatprep.subr.mxu1 %v4753_v45  ;;  %5651 = vmatprep.subr.mxu0 %v5017_v11  ;;  %v4403_v42 = vld [vmem:[#allocation10 + $0xa68] sm:$0xff]  ;;  %v4138_v45 = vld [vmem:[#allocation10 + $0x220] sm:$0xff] }
 0xc4b   : > { %5583 = vmatpush2.msra.mxu1 %v4752_v41  ;;  %5652 = vmatpush2.msra.mxu0 %v5016_v38  ;;  %v4402_v11 = vld [vmem:[#allocation10 + $0xa60] sm:$0xff]  ;;  %v4131_v41 = vld [vmem:[#allocation10 + $0x1e8] sm:$0xff] }
 0xc4c   : > { %5584 = vmatprep.subr.mxu1 %v4745_v10  ;;  %5653 = vmatprep.subr.mxu0 %v5009_v37  ;;  %v4395_v38 = vld [vmem:[#allocation10 + $0xa28] sm:$0xff]  ;;  %v4130_v10 = vld [vmem:[#allocation10 + $0x1e0] sm:$0xff] }
 0xc4d   : > { %5585 = vmatpush2.msra.mxu1 %v4744_v3  ;;  %5654 = vmatpush2.msra.mxu0 %v5008_v14  ;;  %v4394_v37 = vld [vmem:[#allocation10 + $0xa20] sm:$0xff]  ;;  %v4123_v3 = vld [vmem:[#allocation10 + $0x1a8] sm:$0xff] }
 0xc4e   : > { %5586 = vmatprep.subr.mxu1 %v4737_v30  ;;  %5655 = vmatprep.subr.mxu0 %v5001_v63  ;;  %v4387_v14 = vld [vmem:[#allocation10 + $0x9e8] sm:$0xff]  ;;  %v4122_v30 = vld [vmem:[#allocation10 + $0x1a0] sm:$0xff] }
 0xc4f   : > { %5587 = vmatpush2.msra.mxu1 %v4736_v33  ;;  %5656 = vmatpush2.msra.mxu0 %v5000_v61  ;;  %v4386_v63 = vld [vmem:[#allocation10 + $0x9e0] sm:$0xff]  ;;  %v4115_v33 = vld [vmem:[#allocation10 + $0x168] sm:$0xff] }
 0xc50   : > { %5588 = vmatprep.subr.mxu1 %v4729_v53  ;;  %5657 = vmatprep.subr.mxu0 %v4993_v8  ;;  %v4379_v61 = vld [vmem:[#allocation10 + $0x9a8] sm:$0xff]  ;;  %v4114_v53 = vld [vmem:[#allocation10 + $0x160] sm:$0xff] }
 0xc51   : > { %5589 = vmatpush2.msra.mxu1 %v4728_v12  ;;  %5658 = vmatpush2.msra.mxu0 %v4992_v7  ;;  %v4378_v8 = vld [vmem:[#allocation10 + $0x9a0] sm:$0xff]  ;;  %v4107_v12 = vld [vmem:[#allocation10 + $0x128] sm:$0xff] }
 0xc52   : > { %5590 = vmatprep.subr.mxu1 %v4721_v15  ;;  %5659 = vmatprep.subr.mxu0 %v4985_v5  ;;  %v4371_v7 = vld [vmem:[#allocation10 + $0x968] sm:$0xff]  ;;  %v4106_v15 = vld [vmem:[#allocation10 + $0x120] sm:$0xff] }
 0xc53   : > { %5591 = vmatpush2.msra.mxu1 %v4720_v54  ;;  %5660 = vmatpush2.msra.mxu0 %v4984_v47  ;;  %v4370_v5 = vld [vmem:[#allocation10 + $0x960] sm:$0xff]  ;;  %v4099_v54 = vld [vmem:[#allocation10 + $0xe8] sm:$0xff] }
 0xc54   : > { %5592 = vmatprep.subr.mxu1 %v4713_v57  ;;  %5661 = vmatprep.subr.mxu0 %v4977_v25  ;;  %v4363_v47 = vld [vmem:[#allocation10 + $0x928] sm:$0xff]  ;;  %v4098_v57 = vld [vmem:[#allocation10 + $0xe0] sm:$0xff] }
 0xc55   : > { %5593 = vmatpush2.msra.mxu1 %v4712_v22  ;;  %5662 = vmatpush2.msra.mxu0 %v4976_v29  ;;  %v4362_v25 = vld [vmem:[#allocation10 + $0x920] sm:$0xff]  ;;  %v4091_v22 = vld [vmem:[#allocation10 + $0xa8] sm:$0xff] }
 0xc56   : > { %5595 = vmatmul.mubr.f32.vlgmr.msra.gmra.mxu1 %v8640_v48  ;;  %5663 = vmatprep.subr.mxu0 %v4969_v23  ;;  %v4355_v29 = vld [vmem:[#allocation10 + $0x8e8] sm:$0xff]  ;;  %v4090_v23 = vld [vmem:[#allocation10 + $0xa0] sm:$0xff] }
 0xc57   : > { %5672 = vmatprep.subr.mxu1 %v4195_v13  ;;  %5664 = vmatpush2.msra.mxu0 %v4968_v28  ;;  %v4354_v13 = vld [vmem:[#allocation10 + $0x8e0] sm:$0xff]  ;;  %v4083_v28 = vld [vmem:[#allocation10 + $0x68] sm:$0xff] }
 0xc58   : > { %5673 = vmatpush1.msra.mxu1 %v4194_v19  ;;  %5736 = vmatprep.mubr.f32.mxu1 %v8619_v55  ;;  %v4347_v19 = vld [vmem:[#allocation10 + $0x8a8] sm:$0xff] }
 0xc59   : > { %5666 = vmatmul.mubr.f32.vlgmr.msra.gmra.mxu0 %v8644_v40  ;;  %5674 = vmatprep.subr.mxu1 %v4187_v36  ;;  %v4082_v36 = vld [vmem:[#allocation10 + $0x60] sm:$0xff] }
 0xc5a   : > { %5743 = vmatprep.subr.mxu0 %v4451_v20  ;;  %5675 = vmatpush1.msra.mxu1 %v4186_v9  ;;  %v4346_v20 = vld [vmem:[#allocation10 + $0x8a0] sm:$0xff]  ;;  %v4075_v9 = vld [vmem:[#allocation10 + $0x28] sm:$0xff] }
 0xc5b   : > { %5744 = vmatpush1.msra.mxu0 %v4450_v1  ;;  %5807 = vmatprep.mubr.f32.mxu0 %v8623_v44  ;;  %v4339_v1 = vld [vmem:[#allocation10 + $0x868] sm:$0xff] }
 0xc5c   : > { %5676 = vmatprep.subr.mxu1 %v4179_v16  ;;  %5745 = vmatprep.subr.mxu0 %v4443_v34  ;;  %v4074_v16 = vld [vmem:[#allocation10 + $0x20] sm:$0xff] }
 0xc5d   : > { %5677 = vmatpush1.msra.mxu1 %v4178_v6  ;;  %5746 = vmatpush1.msra.mxu0 %v4442_v46  ;;  %v4338_v34 = vld [vmem:[#allocation10 + $0x860] sm:$0xff]  ;;  %v4323_v6 = vld [vmem:[#allocation10 + $0x7e8] sm:$0xff] }
 0xc5e   : > { %5678 = vmatprep.subr.mxu1 %v4171_v62  ;;  %5747 = vmatprep.subr.mxu0 %v4435_v51  ;;  %v4331_v46 = vld [vmem:[#allocation10 + $0x828] sm:$0xff]  ;;  %v4322_v62 = vld [vmem:[#allocation10 + $0x7e0] sm:$0xff] }
 0xc5f   : > { %5679 = vmatpush1.msra.mxu1 %v4170_v26  ;;  %5748 = vmatpush1.msra.mxu0 %v4434_v56  ;;  %v4330_v51 = vld [vmem:[#allocation10 + $0x820] sm:$0xff]  ;;  %v4315_v26 = vld [vmem:[#allocation10 + $0x7a8] sm:$0xff] }
 0xc60   : > { %5680 = vmatprep.subr.mxu1 %v4163_v43  ;;  %5749 = vmatprep.subr.mxu0 %v4427_v24  ;;  %v4579_v56 = vld [vmem:[#allocation10 + $0xfe8] sm:$0xff]  ;;  %v4314_v43 = vld [vmem:[#allocation10 + $0x7a0] sm:$0xff] }
 0xc61   : > { %5681 = vmatpush1.msra.mxu1 %v4162_v60  ;;  %5750 = vmatpush1.msra.mxu0 %v4426_v49  ;;  %v4578_v24 = vld [vmem:[#allocation10 + $0xfe0] sm:$0xff]  ;;  %v4307_v60 = vld [vmem:[#allocation10 + $0x768] sm:$0xff] }
 0xc62   : > { %5682 = vmatprep.subr.mxu1 %v4155_v39  ;;  %5751 = vmatprep.subr.mxu0 %v4419_v35  ;;  %v4571_v49 = vld [vmem:[#allocation10 + $0xfa8] sm:$0xff]  ;;  %v4306_v39 = vld [vmem:[#allocation10 + $0x760] sm:$0xff] }
 0xc63   : > { %5683 = vmatpush1.msra.mxu1 %v4154_v21  ;;  %5752 = vmatpush1.msra.mxu0 %v4418_v50  ;;  %v4570_v35 = vld [vmem:[#allocation10 + $0xfa0] sm:$0xff]  ;;  %v4299_v21 = vld [vmem:[#allocation10 + $0x728] sm:$0xff] }
 0xc64   : > { %5684 = vmatprep.subr.mxu1 %v4147_v58  ;;  %5753 = vmatprep.subr.mxu0 %v4411_v59  ;;  %v4563_v50 = vld [vmem:[#allocation10 + $0xf68] sm:$0xff]  ;;  %v4298_v58 = vld [vmem:[#allocation10 + $0x720] sm:$0xff] }
 0xc65   : > { %5685 = vmatpush1.msra.mxu1 %v4146_v27  ;;  %5754 = vmatpush1.msra.mxu0 %v4410_v17  ;;  %v4562_v59 = vld [vmem:[#allocation10 + $0xf60] sm:$0xff]  ;;  %v4291_v27 = vld [vmem:[#allocation10 + $0x6e8] sm:$0xff] }
 0xc66   : > { %5686 = vmatprep.subr.mxu1 %v4139_v18  ;;  %5755 = vmatprep.subr.mxu0 %v4403_v42  ;;  %v4555_v17 = vld [vmem:[#allocation10 + $0xf28] sm:$0xff]  ;;  %v4290_v18 = vld [vmem:[#allocation10 + $0x6e0] sm:$0xff] }
 0xc67   : > { %5687 = vmatpush1.msra.mxu1 %v4138_v45  ;;  %5756 = vmatpush1.msra.mxu0 %v4402_v11  ;;  %v4554_v42 = vld [vmem:[#allocation10 + $0xf20] sm:$0xff]  ;;  %v4283_v45 = vld [vmem:[#allocation10 + $0x6a8] sm:$0xff] }
 0xc68   : > { %5688 = vmatprep.subr.mxu1 %v4131_v41  ;;  %5757 = vmatprep.subr.mxu0 %v4395_v38  ;;  %v4547_v11 = vld [vmem:[#allocation10 + $0xee8] sm:$0xff]  ;;  %v4282_v41 = vld [vmem:[#allocation10 + $0x6a0] sm:$0xff] }
 0xc69   : > { %5689 = vmatpush1.msra.mxu1 %v4130_v10  ;;  %5758 = vmatpush1.msra.mxu0 %v4394_v37  ;;  %v4546_v38 = vld [vmem:[#allocation10 + $0xee0] sm:$0xff]  ;;  %v4275_v10 = vld [vmem:[#allocation10 + $0x668] sm:$0xff] }
 0xc6a   : > { %5690 = vmatprep.subr.mxu1 %v4123_v3  ;;  %5759 = vmatprep.subr.mxu0 %v4387_v14  ;;  %v4539_v37 = vld [vmem:[#allocation10 + $0xea8] sm:$0xff]  ;;  %v4274_v3 = vld [vmem:[#allocation10 + $0x660] sm:$0xff] }
 0xc6b   : > { %5691 = vmatpush1.msra.mxu1 %v4122_v30  ;;  %5760 = vmatpush1.msra.mxu0 %v4386_v63  ;;  %v4538_v14 = vld [vmem:[#allocation10 + $0xea0] sm:$0xff]  ;;  %v4267_v30 = vld [vmem:[#allocation10 + $0x628] sm:$0xff] }
 0xc6c   : > { %5692 = vmatprep.subr.mxu1 %v4115_v33  ;;  %5761 = vmatprep.subr.mxu0 %v4379_v61  ;;  %v4531_v63 = vld [vmem:[#allocation10 + $0xe68] sm:$0xff]  ;;  %v4266_v33 = vld [vmem:[#allocation10 + $0x620] sm:$0xff] }
 0xc6d   : > { %5693 = vmatpush1.msra.mxu1 %v4114_v53  ;;  %5762 = vmatpush1.msra.mxu0 %v4378_v8  ;;  %v4530_v61 = vld [vmem:[#allocation10 + $0xe60] sm:$0xff]  ;;  %v4259_v53 = vld [vmem:[#allocation10 + $0x5e8] sm:$0xff] }
 0xc6e   : > { %5694 = vmatprep.subr.mxu1 %v4107_v12  ;;  %5763 = vmatprep.subr.mxu0 %v4371_v7  ;;  %v4523_v8 = vld [vmem:[#allocation10 + $0xe28] sm:$0xff]  ;;  %v4258_v12 = vld [vmem:[#allocation10 + $0x5e0] sm:$0xff] }
 0xc6f   : > { %5695 = vmatpush1.msra.mxu1 %v4106_v15  ;;  %5764 = vmatpush1.msra.mxu0 %v4370_v5  ;;  %v4522_v7 = vld [vmem:[#allocation10 + $0xe20] sm:$0xff]  ;;  %v4251_v15 = vld [vmem:[#allocation10 + $0x5a8] sm:$0xff] }
 0xc70   : > { %5696 = vmatprep.subr.mxu1 %v4099_v54  ;;  %5765 = vmatprep.subr.mxu0 %v4363_v47  ;;  %v4515_v5 = vld [vmem:[#allocation10 + $0xde8] sm:$0xff]  ;;  %v4250_v54 = vld [vmem:[#allocation10 + $0x5a0] sm:$0xff] }
 0xc71   : > { %5697 = vmatpush1.msra.mxu1 %v4098_v57  ;;  %5766 = vmatpush1.msra.mxu0 %v4362_v25  ;;  %v4514_v47 = vld [vmem:[#allocation10 + $0xde0] sm:$0xff]  ;;  %v4243_v57 = vld [vmem:[#allocation10 + $0x568] sm:$0xff] }
 0xc72   : > { %5698 = vmatprep.subr.mxu1 %v4091_v22  ;;  %5767 = vmatprep.subr.mxu0 %v4355_v29  ;;  %v4507_v25 = vld [vmem:[#allocation10 + $0xda8] sm:$0xff]  ;;  %v4242_v22 = vld [vmem:[#allocation10 + $0x560] sm:$0xff] }
 0xc73   : > { %5699 = vmatpush1.msra.mxu1 %v4090_v23  ;;  %5768 = vmatpush1.msra.mxu0 %v4354_v13  ;;  %v4506_v29 = vld [vmem:[#allocation10 + $0xda0] sm:$0xff]  ;;  %v4235_v23 = vld [vmem:[#allocation10 + $0x528] sm:$0xff] }
 0xc74   : > { %5700 = vmatprep.subr.mxu1 %v4083_v28  ;;  %5769 = vmatprep.subr.mxu0 %v4347_v19  ;;  %v4499_v13 = vld [vmem:[#allocation10 + $0xd68] sm:$0xff]  ;;  %v4234_v28 = vld [vmem:[#allocation10 + $0x520] sm:$0xff] }
 0xc75   : > { %5701 = vmatpush1.msra.mxu1 %v4082_v36  ;;  %5770 = vmatpush1.msra.mxu0 %v4346_v20  ;;  %v4498_v19 = vld [vmem:[#allocation10 + $0xd60] sm:$0xff]  ;;  %v4227_v36 = vld [vmem:[#allocation10 + $0x4e8] sm:$0xff] }
 0xc76   : > { %5702 = vmatprep.subr.mxu1 %v4075_v9  ;;  %5771 = vmatprep.subr.mxu0 %v4339_v1  ;;  %v4491_v20 = vld [vmem:[#allocation10 + $0xd28] sm:$0xff]  ;;  %v4226_v9 = vld [vmem:[#allocation10 + $0x4e0] sm:$0xff] }
 0xc77   : > { %5703 = vmatpush1.msra.mxu1 %v4074_v16  ;;  %5772 = vmatpush1.msra.mxu0 %v4338_v34  ;;  %v4490_v1 = vld [vmem:[#allocation10 + $0xd20] sm:$0xff]  ;;  %v4219_v16 = vld [vmem:[#allocation10 + $0x4a8] sm:$0xff] }
 0xc78   : > { %5704 = vmatprep.subr.mxu1 %v4323_v6  ;;  %5773 = vmatprep.subr.mxu0 %v4331_v46  ;;  %v4483_v34 = vld [vmem:[#allocation10 + $0xce8] sm:$0xff]  ;;  %v4218_v6 = vld [vmem:[#allocation10 + $0x4a0] sm:$0xff] }
 0xc79   : > { %5705 = vmatpush2.msra.mxu1 %v4322_v62  ;;  %5774 = vmatpush1.msra.mxu0 %v4330_v51  ;;  %v4482_v46 = vld [vmem:[#allocation10 + $0xce0] sm:$0xff]  ;;  %v4211_v62 = vld [vmem:[#allocation10 + $0x468] sm:$0xff] }
 0xc7a   : > { %5706 = vmatprep.subr.mxu1 %v4315_v26  ;;  %5775 = vmatprep.subr.mxu0 %v4579_v56  ;;  %v4475_v51 = vld [vmem:[#allocation10 + $0xca8] sm:$0xff]  ;;  %v4210_v26 = vld [vmem:[#allocation10 + $0x460] sm:$0xff] }
 0xc7b   : > { %5707 = vmatpush2.msra.mxu1 %v4314_v43  ;;  %5776 = vmatpush2.msra.mxu0 %v4578_v24  ;;  %v4474_v56 = vld [vmem:[#allocation10 + $0xca0] sm:$0xff]  ;;  %v4203_v43 = vld [vmem:[#allocation10 + $0x428] sm:$0xff] }
 0xc7c   : > { %5708 = vmatprep.subr.mxu1 %v4307_v60  ;;  %5777 = vmatprep.subr.mxu0 %v4571_v49  ;;  %v4467_v24 = vld [vmem:[#allocation10 + $0xc68] sm:$0xff]  ;;  %v4202_v60 = vld [vmem:[#allocation10 + $0x420] sm:$0xff] }
 0xc7d   : > { %5709 = vmatpush2.msra.mxu1 %v4306_v39  ;;  %5778 = vmatpush2.msra.mxu0 %v4570_v35  ;;  %v4466_v49 = vld [vmem:[#allocation10 + $0xc60] sm:$0xff]  ;;  %v4459_v39 = vld [vmem:[#allocation10 + $0xc28] sm:$0xff] }
 0xc7e   : > { %5710 = vmatprep.subr.mxu1 %v4299_v21  ;;  %5779 = vmatprep.subr.mxu0 %v4563_v50  ;;  %v4707_v35 = vld [vmem:[#allocation10 + $0x13e8] sm:$0xff]  ;;  %v4458_v21 = vld [vmem:[#allocation10 + $0xc20] sm:$0xff] }
 0xc7f   : > { %5711 = vmatpush2.msra.mxu1 %v4298_v58  ;;  %5780 = vmatpush2.msra.mxu0 %v4562_v59  ;;  %v4706_v50 = vld [vmem:[#allocation10 + $0x13e0] sm:$0xff]  ;;  %v4699_v58 = vld [vmem:[#allocation10 + $0x13a8] sm:$0xff] }
 0xc80   : > { %5712 = vmatprep.subr.mxu1 %v4291_v27  ;;  %5781 = vmatprep.subr.mxu0 %v4555_v17  ;;  %v4963_v59 = vld [vmem:[#allocation10 + $0x1be8] sm:$0xff]  ;;  %v4698_v27 = vld [vmem:[#allocation10 + $0x13a0] sm:$0xff] }
 0xc81   : > { %5713 = vmatpush2.msra.mxu1 %v4290_v18  ;;  %5782 = vmatpush2.msra.mxu0 %v4554_v42  ;;  %v4962_v17 = vld [vmem:[#allocation10 + $0x1be0] sm:$0xff]  ;;  %v4691_v18 = vld [vmem:[#allocation10 + $0x1368] sm:$0xff] }
 0xc82   : > { %5714 = vmatprep.subr.mxu1 %v4283_v45  ;;  %5783 = vmatprep.subr.mxu0 %v4547_v11  ;;  %v4955_v42 = vld [vmem:[#allocation10 + $0x1ba8] sm:$0xff]  ;;  %v4690_v45 = vld [vmem:[#allocation10 + $0x1360] sm:$0xff] }
 0xc83   : > { %5715 = vmatpush2.msra.mxu1 %v4282_v41  ;;  %5784 = vmatpush2.msra.mxu0 %v4546_v38  ;;  %v4954_v11 = vld [vmem:[#allocation10 + $0x1ba0] sm:$0xff]  ;;  %v4683_v41 = vld [vmem:[#allocation10 + $0x1328] sm:$0xff] }
 0xc84   : > { %5716 = vmatprep.subr.mxu1 %v4275_v10  ;;  %5785 = vmatprep.subr.mxu0 %v4539_v37  ;;  %v4947_v38 = vld [vmem:[#allocation10 + $0x1b68] sm:$0xff]  ;;  %v4682_v10 = vld [vmem:[#allocation10 + $0x1320] sm:$0xff] }
 0xc85   : > { %5717 = vmatpush2.msra.mxu1 %v4274_v3  ;;  %5786 = vmatpush2.msra.mxu0 %v4538_v14  ;;  %v4946_v37 = vld [vmem:[#allocation10 + $0x1b60] sm:$0xff]  ;;  %v4675_v3 = vld [vmem:[#allocation10 + $0x12e8] sm:$0xff] }
 0xc86   : > { %5718 = vmatprep.subr.mxu1 %v4267_v30  ;;  %5787 = vmatprep.subr.mxu0 %v4531_v63  ;;  %v4939_v14 = vld [vmem:[#allocation10 + $0x1b28] sm:$0xff]  ;;  %v4674_v30 = vld [vmem:[#allocation10 + $0x12e0] sm:$0xff] }
 0xc87   : > { %5719 = vmatpush2.msra.mxu1 %v4266_v33  ;;  %5788 = vmatpush2.msra.mxu0 %v4530_v61  ;;  %v4938_v63 = vld [vmem:[#allocation10 + $0x1b20] sm:$0xff]  ;;  %v4667_v33 = vld [vmem:[#allocation10 + $0x12a8] sm:$0xff] }
 0xc88   : > { %5720 = vmatprep.subr.mxu1 %v4259_v53  ;;  %5789 = vmatprep.subr.mxu0 %v4523_v8  ;;  %v4931_v61 = vld [vmem:[#allocation10 + $0x1ae8] sm:$0xff]  ;;  %v4666_v53 = vld [vmem:[#allocation10 + $0x12a0] sm:$0xff] }
 0xc89   : > { %5721 = vmatpush2.msra.mxu1 %v4258_v12  ;;  %5790 = vmatpush2.msra.mxu0 %v4522_v7  ;;  %v4930_v8 = vld [vmem:[#allocation10 + $0x1ae0] sm:$0xff]  ;;  %v4659_v12 = vld [vmem:[#allocation10 + $0x1268] sm:$0xff] }
 0xc8a   : > { %5722 = vmatprep.subr.mxu1 %v4251_v15  ;;  %5791 = vmatprep.subr.mxu0 %v4515_v5  ;;  %v4923_v7 = vld [vmem:[#allocation10 + $0x1aa8] sm:$0xff]  ;;  %v4658_v15 = vld [vmem:[#allocation10 + $0x1260] sm:$0xff] }
 0xc8b   : > { %5723 = vmatpush2.msra.mxu1 %v4250_v54  ;;  %5792 = vmatpush2.msra.mxu0 %v4514_v47  ;;  %v4922_v5 = vld [vmem:[#allocation10 + $0x1aa0] sm:$0xff]  ;;  %v4651_v54 = vld [vmem:[#allocation10 + $0x1228] sm:$0xff] }
 0xc8c   : > { %5724 = vmatprep.subr.mxu1 %v4243_v57  ;;  %5793 = vmatprep.subr.mxu0 %v4507_v25  ;;  %v4915_v47 = vld [vmem:[#allocation10 + $0x1a68] sm:$0xff]  ;;  %v4650_v57 = vld [vmem:[#allocation10 + $0x1220] sm:$0xff] }
 0xc8d   : > { %5725 = vmatpush2.msra.mxu1 %v4242_v22  ;;  %5794 = vmatpush2.msra.mxu0 %v4506_v29  ;;  %v4914_v25 = vld [vmem:[#allocation10 + $0x1a60] sm:$0xff]  ;;  %v4643_v22 = vld [vmem:[#allocation10 + $0x11e8] sm:$0xff] }
 0xc8e   : > { %5726 = vmatprep.subr.mxu1 %v4235_v23  ;;  %5795 = vmatprep.subr.mxu0 %v4499_v13  ;;  %v4907_v29 = vld [vmem:[#allocation10 + $0x1a28] sm:$0xff]  ;;  %v4642_v23 = vld [vmem:[#allocation10 + $0x11e0] sm:$0xff] }
 0xc8f   : > { %5727 = vmatpush2.msra.mxu1 %v4234_v28  ;;  %5796 = vmatpush2.msra.mxu0 %v4498_v19  ;;  %v4906_v13 = vld [vmem:[#allocation10 + $0x1a20] sm:$0xff]  ;;  %v4635_v28 = vld [vmem:[#allocation10 + $0x11a8] sm:$0xff] }
 0xc90   : > { %5728 = vmatprep.subr.mxu1 %v4227_v36  ;;  %5797 = vmatprep.subr.mxu0 %v4491_v20  ;;  %v4899_v19 = vld [vmem:[#allocation10 + $0x19e8] sm:$0xff]  ;;  %v4634_v36 = vld [vmem:[#allocation10 + $0x11a0] sm:$0xff] }
 0xc91   : > { %5729 = vmatpush2.msra.mxu1 %v4226_v9  ;;  %5798 = vmatpush2.msra.mxu0 %v4490_v1  ;;  %v4898_v20 = vld [vmem:[#allocation10 + $0x19e0] sm:$0xff]  ;;  %v4627_v9 = vld [vmem:[#allocation10 + $0x1168] sm:$0xff] }
 0xc92   : > { %5730 = vmatprep.subr.mxu1 %v4219_v16  ;;  %5799 = vmatprep.subr.mxu0 %v4483_v34  ;;  %v4891_v1 = vld [vmem:[#allocation10 + $0x19a8] sm:$0xff]  ;;  %v4626_v16 = vld [vmem:[#allocation10 + $0x1160] sm:$0xff] }
 0xc93   : > { %5731 = vmatpush2.msra.mxu1 %v4218_v6  ;;  %5800 = vmatpush2.msra.mxu0 %v4482_v46  ;;  %v4890_v34 = vld [vmem:[#allocation10 + $0x19a0] sm:$0xff]  ;;  %v4619_v6 = vld [vmem:[#allocation10 + $0x1128] sm:$0xff] }
 0xc94   : > { %5732 = vmatprep.subr.mxu1 %v4211_v62  ;;  %5801 = vmatprep.subr.mxu0 %v4475_v51  ;;  %v4883_v46 = vld [vmem:[#allocation10 + $0x1968] sm:$0xff]  ;;  %v4618_v62 = vld [vmem:[#allocation10 + $0x1120] sm:$0xff] }
 0xc95   : > { %5733 = vmatpush2.msra.mxu1 %v4210_v26  ;;  %5802 = vmatpush2.msra.mxu0 %v4474_v56  ;;  %v4882_v51 = vld [vmem:[#allocation10 + $0x1960] sm:$0xff]  ;;  %v4611_v26 = vld [vmem:[#allocation10 + $0x10e8] sm:$0xff] }
 0xc96   : > { %5734 = vmatprep.subr.mxu1 %v4203_v43  ;;  %5803 = vmatprep.subr.mxu0 %v4467_v24  ;;  %v4875_v56 = vld [vmem:[#allocation10 + $0x1928] sm:$0xff]  ;;  %v4610_v43 = vld [vmem:[#allocation10 + $0x10e0] sm:$0xff] }
 0xc97   : > { %5735 = vmatpush2.msra.mxu1 %v4202_v60  ;;  %5804 = vmatpush2.msra.mxu0 %v4466_v49  ;;  %v4874_v24 = vld [vmem:[#allocation10 + $0x1920] sm:$0xff]  ;;  %v4603_v60 = vld [vmem:[#allocation10 + $0x10a8] sm:$0xff] }
 0xc98   : > { %5737 = vmatmul.mubr.f32.vlgmr.msra.gmra.mxu1 %v8617_v32  ;;  %5805 = vmatprep.subr.mxu0 %v4459_v39  ;;  %v4867_v49 = vld [vmem:[#allocation10 + $0x18e8] sm:$0xff]  ;;  %v4602_v39 = vld [vmem:[#allocation10 + $0x10a0] sm:$0xff] }
 0xc99   : > { %5814 = vmatprep.subr.mxu1 %v4707_v35  ;;  %5806 = vmatpush2.msra.mxu0 %v4458_v21  ;;  %v4866_v35 = vld [vmem:[#allocation10 + $0x18e0] sm:$0xff]  ;;  %v4595_v21 = vld [vmem:[#allocation10 + $0x1068] sm:$0xff] }
 0xc9a   : > { %5815 = vmatpush1.msra.mxu1 %v4706_v50  ;;  %5878 = vmatprep.mubr.f32.mxu1 %v8632_v31  ;;  %v4859_v50 = vld [vmem:[#allocation10 + $0x18a8] sm:$0xff] }
 0xc9b   : > { %5808 = vmatmul.mubr.f32.vlgmr.msra.gmra.mxu0 %v8627_v0  ;;  %5816 = vmatprep.subr.mxu1 %v4699_v58  ;;  %v4594_v58 = vld [vmem:[#allocation10 + $0x1060] sm:$0xff] }
 0xc9c   : > { %5885 = vmatprep.subr.mxu0 %v4963_v59  ;;  %5817 = vmatpush1.msra.mxu1 %v4698_v27  ;;  %v4858_v59 = vld [vmem:[#allocation10 + $0x18a0] sm:$0xff]  ;;  %v4587_v27 = vld [vmem:[#allocation10 + $0x1028] sm:$0xff] }
 0xc9d   : > { %5886 = vmatpush1.msra.mxu0 %v4962_v17  ;;  %5949 = vmatprep.mubr.f32.mxu0 %v8635_v52  ;;  %v4851_v17 = vld [vmem:[#allocation10 + $0x1868] sm:$0xff] }
 0xc9e   : > { %5818 = vmatprep.subr.mxu1 %v4691_v18  ;;  %5887 = vmatprep.subr.mxu0 %v4955_v42  ;;  %v4586_v18 = vld [vmem:[#allocation10 + $0x1020] sm:$0xff] }
 0xc9f   : > { %5819 = vmatpush1.msra.mxu1 %v4690_v45  ;;  %5888 = vmatpush1.msra.mxu0 %v4954_v11  ;;  %v4850_v42 = vld [vmem:[#allocation10 + $0x1860] sm:$0xff]  ;;  %v4835_v45 = vld [vmem:[#allocation10 + $0x17e8] sm:$0xff] }
 0xca0   : > { %5820 = vmatprep.subr.mxu1 %v4683_v41  ;;  %5889 = vmatprep.subr.mxu0 %v4947_v38  ;;  %v4843_v11 = vld [vmem:[#allocation10 + $0x1828] sm:$0xff]  ;;  %v4834_v41 = vld [vmem:[#allocation10 + $0x17e0] sm:$0xff] }
 0xca1   : > { %5821 = vmatpush1.msra.mxu1 %v4682_v10  ;;  %5890 = vmatpush1.msra.mxu0 %v4946_v37  ;;  %v4842_v38 = vld [vmem:[#allocation10 + $0x1820] sm:$0xff]  ;;  %v4827_v10 = vld [vmem:[#allocation10 + $0x17a8] sm:$0xff] }
 0xca2   : > { %5822 = vmatprep.subr.mxu1 %v4675_v3  ;;  %5891 = vmatprep.subr.mxu0 %v4939_v14  ;;  %v5091_v37 = vld [vmem:[#allocation10 + $0x1fe8] sm:$0xff]  ;;  %v4826_v3 = vld [vmem:[#allocation10 + $0x17a0] sm:$0xff] }
 0xca3   : > { %5823 = vmatpush1.msra.mxu1 %v4674_v30  ;;  %5892 = vmatpush1.msra.mxu0 %v4938_v63  ;;  %v5090_v14 = vld [vmem:[#allocation10 + $0x1fe0] sm:$0xff]  ;;  %v4819_v30 = vld [vmem:[#allocation10 + $0x1768] sm:$0xff] }
 0xca4   : > { %5824 = vmatprep.subr.mxu1 %v4667_v33  ;;  %5893 = vmatprep.subr.mxu0 %v4931_v61  ;;  %v5083_v63 = vld [vmem:[#allocation10 + $0x1fa8] sm:$0xff]  ;;  %v4818_v33 = vld [vmem:[#allocation10 + $0x1760] sm:$0xff] }
 0xca5   : > { %5825 = vmatpush1.msra.mxu1 %v4666_v53  ;;  %5894 = vmatpush1.msra.mxu0 %v4930_v8  ;;  %v5082_v61 = vld [vmem:[#allocation10 + $0x1fa0] sm:$0xff]  ;;  %v4811_v53 = vld [vmem:[#allocation10 + $0x1728] sm:$0xff] }
 0xca6   : > { %5826 = vmatprep.subr.mxu1 %v4659_v12  ;;  %5895 = vmatprep.subr.mxu0 %v4923_v7  ;;  %v5075_v8 = vld [vmem:[#allocation10 + $0x1f68] sm:$0xff]  ;;  %v4810_v12 = vld [vmem:[#allocation10 + $0x1720] sm:$0xff] }
 0xca7   : > { %5827 = vmatpush1.msra.mxu1 %v4658_v15  ;;  %5896 = vmatpush1.msra.mxu0 %v4922_v5  ;;  %v5074_v7 = vld [vmem:[#allocation10 + $0x1f60] sm:$0xff]  ;;  %v4803_v15 = vld [vmem:[#allocation10 + $0x16e8] sm:$0xff] }
 0xca8   : > { %5828 = vmatprep.subr.mxu1 %v4651_v54  ;;  %5897 = vmatprep.subr.mxu0 %v4915_v47  ;;  %v5067_v5 = vld [vmem:[#allocation10 + $0x1f28] sm:$0xff]  ;;  %v4802_v54 = vld [vmem:[#allocation10 + $0x16e0] sm:$0xff] }
 0xca9   : > { %5829 = vmatpush1.msra.mxu1 %v4650_v57  ;;  %5898 = vmatpush1.msra.mxu0 %v4914_v25  ;;  %v5066_v47 = vld [vmem:[#allocation10 + $0x1f20] sm:$0xff]  ;;  %v4795_v57 = vld [vmem:[#allocation10 + $0x16a8] sm:$0xff] }
 0xcaa   : > { %5830 = vmatprep.subr.mxu1 %v4643_v22  ;;  %5899 = vmatprep.subr.mxu0 %v4907_v29  ;;  %v5059_v25 = vld [vmem:[#allocation10 + $0x1ee8] sm:$0xff]  ;;  %v4794_v22 = vld [vmem:[#allocation10 + $0x16a0] sm:$0xff] }
 0xcab   : > { %5831 = vmatpush1.msra.mxu1 %v4642_v23  ;;  %5900 = vmatpush1.msra.mxu0 %v4906_v13  ;;  %v5058_v29 = vld [vmem:[#allocation10 + $0x1ee0] sm:$0xff]  ;;  %v4787_v23 = vld [vmem:[#allocation10 + $0x1668] sm:$0xff] }
 0xcac   : > { %5832 = vmatprep.subr.mxu1 %v4635_v28  ;;  %5901 = vmatprep.subr.mxu0 %v4899_v19  ;;  %v5051_v13 = vld [vmem:[#allocation10 + $0x1ea8] sm:$0xff]  ;;  %v4786_v28 = vld [vmem:[#allocation10 + $0x1660] sm:$0xff] }
 0xcad   : > { %5833 = vmatpush1.msra.mxu1 %v4634_v36  ;;  %5902 = vmatpush1.msra.mxu0 %v4898_v20  ;;  %v5050_v19 = vld [vmem:[#allocation10 + $0x1ea0] sm:$0xff]  ;;  %v4779_v36 = vld [vmem:[#allocation10 + $0x1628] sm:$0xff] }
 0xcae   : > { %5834 = vmatprep.subr.mxu1 %v4627_v9  ;;  %5903 = vmatprep.subr.mxu0 %v4891_v1  ;;  %v5043_v20 = vld [vmem:[#allocation10 + $0x1e68] sm:$0xff]  ;;  %v4778_v9 = vld [vmem:[#allocation10 + $0x1620] sm:$0xff] }
 0xcaf   : > { %5835 = vmatpush1.msra.mxu1 %v4626_v16  ;;  %5904 = vmatpush1.msra.mxu0 %v4890_v34  ;;  %v5042_v1 = vld [vmem:[#allocation10 + $0x1e60] sm:$0xff]  ;;  %v4771_v16 = vld [vmem:[#allocation10 + $0x15e8] sm:$0xff] }
 0xcb0   : > { %5836 = vmatprep.subr.mxu1 %v4619_v6  ;;  %5905 = vmatprep.subr.mxu0 %v4883_v46  ;;  %v5035_v34 = vld [vmem:[#allocation10 + $0x1e28] sm:$0xff]  ;;  %v4770_v6 = vld [vmem:[#allocation10 + $0x15e0] sm:$0xff] }
 0xcb1   : > { %5837 = vmatpush1.msra.mxu1 %v4618_v62  ;;  %5906 = vmatpush1.msra.mxu0 %v4882_v51  ;;  %v5034_v46 = vld [vmem:[#allocation10 + $0x1e20] sm:$0xff]  ;;  %v4763_v62 = vld [vmem:[#allocation10 + $0x15a8] sm:$0xff] }
 0xcb2   : > { %5838 = vmatprep.subr.mxu1 %v4611_v26  ;;  %5907 = vmatprep.subr.mxu0 %v4875_v56  ;;  %v5027_v51 = vld [vmem:[#allocation10 + $0x1de8] sm:$0xff]  ;;  %v4762_v26 = vld [vmem:[#allocation10 + $0x15a0] sm:$0xff] }
 0xcb3   : > { %5839 = vmatpush1.msra.mxu1 %v4610_v43  ;;  %5908 = vmatpush1.msra.mxu0 %v4874_v24  ;;  %v5026_v56 = vld [vmem:[#allocation10 + $0x1de0] sm:$0xff]  ;;  %v4755_v43 = vld [vmem:[#allocation10 + $0x1568] sm:$0xff] }
 0xcb4   : > { %5840 = vmatprep.subr.mxu1 %v4603_v60  ;;  %5909 = vmatprep.subr.mxu0 %v4867_v49  ;;  %v5019_v24 = vld [vmem:[#allocation10 + $0x1da8] sm:$0xff]  ;;  %v4754_v60 = vld [vmem:[#allocation10 + $0x1560] sm:$0xff] }
 0xcb5   : > { %5841 = vmatpush1.msra.mxu1 %v4602_v39  ;;  %5910 = vmatpush1.msra.mxu0 %v4866_v35  ;;  %v5018_v49 = vld [vmem:[#allocation10 + $0x1da0] sm:$0xff]  ;;  %v4747_v39 = vld [vmem:[#allocation10 + $0x1528] sm:$0xff] }
 0xcb6   : > { %5842 = vmatprep.subr.mxu1 %v4595_v21  ;;  %5911 = vmatprep.subr.mxu0 %v4859_v50  ;;  %v5011_v35 = vld [vmem:[#allocation10 + $0x1d68] sm:$0xff]  ;;  %v4746_v21 = vld [vmem:[#allocation10 + $0x1520] sm:$0xff] }
 0xcb7   : > { %5843 = vmatpush1.msra.mxu1 %v4594_v58  ;;  %5912 = vmatpush1.msra.mxu0 %v4858_v59  ;;  %v5010_v50 = vld [vmem:[#allocation10 + $0x1d60] sm:$0xff]  ;;  %v4739_v58 = vld [vmem:[#allocation10 + $0x14e8] sm:$0xff] }
 0xcb8   : > { %5844 = vmatprep.subr.mxu1 %v4587_v27  ;;  %5913 = vmatprep.subr.mxu0 %v4851_v17  ;;  %v5003_v59 = vld [vmem:[#allocation10 + $0x1d28] sm:$0xff]  ;;  %v4738_v27 = vld [vmem:[#allocation10 + $0x14e0] sm:$0xff] }
 0xcb9   : > { %5845 = vmatpush1.msra.mxu1 %v4586_v18  ;;  %5914 = vmatpush1.msra.mxu0 %v4850_v42  ;;  %v5002_v17 = vld [vmem:[#allocation10 + $0x1d20] sm:$0xff]  ;;  %v4731_v18 = vld [vmem:[#allocation10 + $0x14a8] sm:$0xff] }
 0xcba   : > { %5846 = vmatprep.subr.mxu1 %v4835_v45  ;;  %5915 = vmatprep.subr.mxu0 %v4843_v11  ;;  %v4995_v42 = vld [vmem:[#allocation10 + $0x1ce8] sm:$0xff]  ;;  %v4730_v45 = vld [vmem:[#allocation10 + $0x14a0] sm:$0xff] }
 0xcbb   : > { %5847 = vmatpush2.msra.mxu1 %v4834_v41  ;;  %5916 = vmatpush1.msra.mxu0 %v4842_v38  ;;  %v4994_v11 = vld [vmem:[#allocation10 + $0x1ce0] sm:$0xff]  ;;  %v4723_v41 = vld [vmem:[#allocation10 + $0x1468] sm:$0xff] }
 0xcbc   : > { %5848 = vmatprep.subr.mxu1 %v4827_v10  ;;  %5917 = vmatprep.subr.mxu0 %v5091_v37  ;;  %v4987_v38 = vld [vmem:[#allocation10 + $0x1ca8] sm:$0xff]  ;;  %v4722_v10 = vld [vmem:[#allocation10 + $0x1460] sm:$0xff] }
 0xcbd   : > { %5849 = vmatpush2.msra.mxu1 %v4826_v3  ;;  %5918 = vmatpush2.msra.mxu0 %v5090_v14  ;;  %v4986_v37 = vld [vmem:[#allocation10 + $0x1ca0] sm:$0xff]  ;;  %v4715_v3 = vld [vmem:[#allocation10 + $0x1428] sm:$0xff] }
 0xcbe   : > { %5850 = vmatprep.subr.mxu1 %v4819_v30  ;;  %5919 = vmatprep.subr.mxu0 %v5083_v63  ;;  %v4979_v14 = vld [vmem:[#allocation10 + $0x1c68] sm:$0xff]  ;;  %v4714_v30 = vld [vmem:[#allocation10 + $0x1420] sm:$0xff] }
 0xcbf   : > { %5851 = vmatpush2.msra.mxu1 %v4818_v33  ;;  %5920 = vmatpush2.msra.mxu0 %v5082_v61  ;;  %v4978_v63 = vld [vmem:[#allocation10 + $0x1c60] sm:$0xff]  ;;  %v4971_v33 = vld [vmem:[#allocation10 + $0x1c28] sm:$0xff]  ;;  %v4197_v61 = vld [vmem:[#allocation10 + $0x3f8] sm:$0xff] }
 0xcc0   : > { %5852 = vmatprep.subr.mxu1 %v4811_v53  ;;  %5921 = vmatprep.subr.mxu0 %v5075_v8  ;;  %v4970_v53 = vld [vmem:[#allocation10 + $0x1c20] sm:$0xff]  ;;  %v4196_v8 = vld [vmem:[#allocation10 + $0x3f0] sm:$0xff] }
 0xcc1   : > { %5853 = vmatpush2.msra.mxu1 %v4810_v12  ;;  %5922 = vmatpush2.msra.mxu0 %v5074_v7  ;;  %v4189_v12 = vld [vmem:[#allocation10 + $0x3b8] sm:$0xff] }
 0xcc2   : > { %5854 = vmatprep.subr.mxu1 %v4803_v15  ;;  %5923 = vmatprep.subr.mxu0 %v5067_v5  ;;  %v4453_v7 = vld [vmem:[#allocation10 + $0xbf8] sm:$0xff]  ;;  %v4188_v15 = vld [vmem:[#allocation10 + $0x3b0] sm:$0xff] }
 0xcc3   : > { %5855 = vmatpush2.msra.mxu1 %v4802_v54  ;;  %5924 = vmatpush2.msra.mxu0 %v5066_v47  ;;  %v4452_v5 = vld [vmem:[#allocation10 + $0xbf0] sm:$0xff]  ;;  %v4181_v54 = vld [vmem:[#allocation10 + $0x378] sm:$0xff] }
 0xcc4   : > { %5856 = vmatprep.subr.mxu1 %v4795_v57  ;;  %5925 = vmatprep.subr.mxu0 %v5059_v25  ;;  %v4445_v47 = vld [vmem:[#allocation10 + $0xbb8] sm:$0xff]  ;;  %v4180_v57 = vld [vmem:[#allocation10 + $0x370] sm:$0xff] }
 0xcc5   : > { %5857 = vmatpush2.msra.mxu1 %v4794_v22  ;;  %5926 = vmatpush2.msra.mxu0 %v5058_v29  ;;  %v4444_v25 = vld [vmem:[#allocation10 + $0xbb0] sm:$0xff]  ;;  %v4173_v22 = vld [vmem:[#allocation10 + $0x338] sm:$0xff] }
 0xcc6   : > { %5858 = vmatprep.subr.mxu1 %v4787_v23  ;;  %5927 = vmatprep.subr.mxu0 %v5051_v13  ;;  %v4437_v29 = vld [vmem:[#allocation10 + $0xb78] sm:$0xff]  ;;  %v4172_v23 = vld [vmem:[#allocation10 + $0x330] sm:$0xff] }
 0xcc7   : > { %5859 = vmatpush2.msra.mxu1 %v4786_v28  ;;  %5928 = vmatpush2.msra.mxu0 %v5050_v19  ;;  %v4436_v13 = vld [vmem:[#allocation10 + $0xb70] sm:$0xff]  ;;  %v4429_v28 = vld [vmem:[#allocation10 + $0xb38] sm:$0xff] }
 0xcc8   : > { %5860 = vmatprep.subr.mxu1 %v4779_v36  ;;  %5929 = vmatprep.subr.mxu0 %v5043_v20  ;;  %v4164_v19 = vld [vmem:[#allocation10 + $0x2f0] sm:$0xff]  ;;  %v4157_v20 = vld [vmem:[#allocation10 + $0x2b8] sm:$0xff] }
 0xcc9   : > { %5861 = vmatpush2.msra.mxu1 %v4778_v9  ;;  %5930 = vmatpush2.msra.mxu0 %v5042_v1  ;;  %v4428_v36 = vld [vmem:[#allocation10 + $0xb30] sm:$0xff]  ;;  %v4421_v9 = vld [vmem:[#allocation10 + $0xaf8] sm:$0xff] }
 0xcca   : > { %5862 = vmatprep.subr.mxu1 %v4771_v16  ;;  %5931 = vmatprep.subr.mxu0 %v5035_v34  ;;  %v4420_v1 = vld [vmem:[#allocation10 + $0xaf0] sm:$0xff]  ;;  %v4149_v16 = vld [vmem:[#allocation10 + $0x278] sm:$0xff] }
 0xccb   : > { %5863 = vmatpush2.msra.mxu1 %v4770_v6  ;;  %5932 = vmatpush2.msra.mxu0 %v5034_v46  ;;  %v4413_v34 = vld [vmem:[#allocation10 + $0xab8] sm:$0xff]  ;;  %v4148_v6 = vld [vmem:[#allocation10 + $0x270] sm:$0xff] }
 0xccc   : > { %5864 = vmatprep.subr.mxu1 %v4763_v62  ;;  %5933 = vmatprep.subr.mxu0 %v5027_v51  ;;  %v4412_v46 = vld [vmem:[#allocation10 + $0xab0] sm:$0xff]  ;;  %v4141_v62 = vld [vmem:[#allocation10 + $0x238] sm:$0xff] }
 0xccd   : > { %5865 = vmatpush2.msra.mxu1 %v4762_v26  ;;  %5934 = vmatpush2.msra.mxu0 %v5026_v56  ;;  %v4405_v51 = vld [vmem:[#allocation10 + $0xa78] sm:$0xff]  ;;  %v4140_v26 = vld [vmem:[#allocation10 + $0x230] sm:$0xff] }
 0xcce   : > { %5866 = vmatprep.subr.mxu1 %v4755_v43  ;;  %5935 = vmatprep.subr.mxu0 %v5019_v24  ;;  %v4404_v56 = vld [vmem:[#allocation10 + $0xa70] sm:$0xff]  ;;  %v4133_v43 = vld [vmem:[#allocation10 + $0x1f8] sm:$0xff] }
 0xccf   : > { %5867 = vmatpush2.msra.mxu1 %v4754_v60  ;;  %5936 = vmatpush2.msra.mxu0 %v5018_v49  ;;  %v4397_v24 = vld [vmem:[#allocation10 + $0xa38] sm:$0xff]  ;;  %v4132_v60 = vld [vmem:[#allocation10 + $0x1f0] sm:$0xff] }
 0xcd0   : > { %5868 = vmatprep.subr.mxu1 %v4747_v39  ;;  %5937 = vmatprep.subr.mxu0 %v5011_v35  ;;  %v4396_v49 = vld [vmem:[#allocation10 + $0xa30] sm:$0xff]  ;;  %v4125_v39 = vld [vmem:[#allocation10 + $0x1b8] sm:$0xff] }
 0xcd1   : > { %5869 = vmatpush2.msra.mxu1 %v4746_v21  ;;  %5938 = vmatpush2.msra.mxu0 %v5010_v50  ;;  %v4389_v35 = vld [vmem:[#allocation10 + $0x9f8] sm:$0xff]  ;;  %v4124_v21 = vld [vmem:[#allocation10 + $0x1b0] sm:$0xff] }
 0xcd2   : > { %5870 = vmatprep.subr.mxu1 %v4739_v58  ;;  %5939 = vmatprep.subr.mxu0 %v5003_v59  ;;  %v4388_v50 = vld [vmem:[#allocation10 + $0x9f0] sm:$0xff]  ;;  %v4117_v58 = vld [vmem:[#allocation10 + $0x178] sm:$0xff] }
 0xcd3   : > { %5871 = vmatpush2.msra.mxu1 %v4738_v27  ;;  %5940 = vmatpush2.msra.mxu0 %v5002_v17  ;;  %v4381_v59 = vld [vmem:[#allocation10 + $0x9b8] sm:$0xff]  ;;  %v4116_v27 = vld [vmem:[#allocation10 + $0x170] sm:$0xff] }
 0xcd4   : > { %5872 = vmatprep.subr.mxu1 %v4731_v18  ;;  %5941 = vmatprep.subr.mxu0 %v4995_v42  ;;  %v4380_v17 = vld [vmem:[#allocation10 + $0x9b0] sm:$0xff]  ;;  %v4109_v18 = vld [vmem:[#allocation10 + $0x138] sm:$0xff] }
 0xcd5   : > { %5873 = vmatpush2.msra.mxu1 %v4730_v45  ;;  %5942 = vmatpush2.msra.mxu0 %v4994_v11  ;;  %v4373_v42 = vld [vmem:[#allocation10 + $0x978] sm:$0xff]  ;;  %v4108_v45 = vld [vmem:[#allocation10 + $0x130] sm:$0xff] }
 0xcd6   : > { %5874 = vmatprep.subr.mxu1 %v4723_v41  ;;  %5943 = vmatprep.subr.mxu0 %v4987_v38  ;;  %v4372_v11 = vld [vmem:[#allocation10 + $0x970] sm:$0xff]  ;;  %v4101_v41 = vld [vmem:[#allocation10 + $0xf8] sm:$0xff] }
 0xcd7   : > { %5875 = vmatpush2.msra.mxu1 %v4722_v10  ;;  %5944 = vmatpush2.msra.mxu0 %v4986_v37  ;;  %v4365_v38 = vld [vmem:[#allocation10 + $0x938] sm:$0xff]  ;;  %v4100_v10 = vld [vmem:[#allocation10 + $0xf0] sm:$0xff] }
 0xcd8   : > { %5876 = vmatprep.subr.mxu1 %v4715_v3  ;;  %5945 = vmatprep.subr.mxu0 %v4979_v14  ;;  %v4364_v37 = vld [vmem:[#allocation10 + $0x930] sm:$0xff]  ;;  %v4093_v3 = vld [vmem:[#allocation10 + $0xb8] sm:$0xff] }
 0xcd9   : > { %5877 = vmatpush2.msra.mxu1 %v4714_v30  ;;  %5946 = vmatpush2.msra.mxu0 %v4978_v63  ;;  %v4357_v14 = vld [vmem:[#allocation10 + $0x8f8] sm:$0xff]  ;;  %v4092_v30 = vld [vmem:[#allocation10 + $0xb0] sm:$0xff] }
 0xcda   : > { %5879 = vmatmul.mubr.f32.vlgmr.msra.gmra.mxu1 %v8640_v48  ;;  %5947 = vmatprep.subr.mxu0 %v4971_v33  ;;  %v4356_v63 = vld [vmem:[#allocation10 + $0x8f0] sm:$0xff]  ;;  %v4085_v33 = vld [vmem:[#allocation10 + $0x78] sm:$0xff] }
 0xcdb   : > { %5956 = vmatprep.subr.mxu1 %v4197_v61  ;;  %5948 = vmatpush2.msra.mxu0 %v4970_v53  ;;  %v4349_v61 = vld [vmem:[#allocation10 + $0x8b8] sm:$0xff]  ;;  %v4084_v53 = vld [vmem:[#allocation10 + $0x70] sm:$0xff] }
 0xcdc   : > { %5957 = vmatpush1.msra.mxu1 %v4196_v8  ;;  %6020 = vmatprep.mubr.f32.mxu1 %v8619_v55  ;;  %v4165_v55 = vld [vmem:[#allocation10 + $0x2f8] sm:$0xff]  ;;  %v4348_v8 = vld [vmem:[#allocation10 + $0x8b0] sm:$0xff] }
 0xcdd   : > { %5950 = vmatmul.mubr.f32.vlgmr.msra.gmra.mxu0 %v8644_v40  ;;  %5958 = vmatprep.subr.mxu1 %v4189_v12  ;;  %v4077_v12 = vld [vmem:[#allocation10 + $0x38] sm:$0xff] }
 0xcde   : > { %6027 = vmatprep.subr.mxu0 %v4453_v7  ;;  %5959 = vmatpush1.msra.mxu1 %v4188_v15  ;;  %v4341_v7 = vld [vmem:[#allocation10 + $0x878] sm:$0xff]  ;;  %v4076_v15 = vld [vmem:[#allocation10 + $0x30] sm:$0xff] }
 0xcdf   : > { %6028 = vmatpush1.msra.mxu0 %v4452_v5  ;;  %6091 = vmatprep.mubr.f32.mxu0 %v8623_v44  ;;  %v4156_v44 = vld [vmem:[#allocation10 + $0x2b0] sm:$0xff] }
 0xce0   : > { %5960 = vmatprep.subr.mxu1 %v4181_v54  ;;  %6029 = vmatprep.subr.mxu0 %v4445_v47  ;;  %v4340_v5 = vld [vmem:[#allocation10 + $0x870] sm:$0xff]  ;;  %v4325_v54 = vld [vmem:[#allocation10 + $0x7f8] sm:$0xff] }
 0xce1   : > { %5961 = vmatpush1.msra.mxu1 %v4180_v57  ;;  %6030 = vmatpush1.msra.mxu0 %v4444_v25  ;;  %v4333_v47 = vld [vmem:[#allocation10 + $0x838] sm:$0xff]  ;;  %v4324_v57 = vld [vmem:[#allocation10 + $0x7f0] sm:$0xff] }
 0xce2   : > { %5962 = vmatprep.subr.mxu1 %v4173_v22  ;;  %6031 = vmatprep.subr.mxu0 %v4437_v29  ;;  %v4332_v25 = vld [vmem:[#allocation10 + $0x830] sm:$0xff]  ;;  %v4317_v22 = vld [vmem:[#allocation10 + $0x7b8] sm:$0xff] }
 0xce3   : > { %5963 = vmatpush1.msra.mxu1 %v4172_v23  ;;  %6032 = vmatpush1.msra.mxu0 %v4436_v13  ;;  %v4581_v29 = vld [vmem:[#allocation10 + $0xff8] sm:$0xff]  ;;  %v4316_v23 = vld [vmem:[#allocation10 + $0x7b0] sm:$0xff] }
 0xce4   : > { %5964 = vmatprep.subr.mxu1 %v4165_v55  ;;  %6033 = vmatprep.subr.mxu0 %v4429_v28  ;;  %v4580_v13 = vld [vmem:[#allocation10 + $0xff0] sm:$0xff]  ;;  %v4309_v55 = vld [vmem:[#allocation10 + $0x778] sm:$0xff] }
 0xce5   : > { %5965 = vmatpush1.msra.mxu1 %v4164_v19  ;;  %6034 = vmatpush1.msra.mxu0 %v4428_v36  ;;  %v4573_v28 = vld [vmem:[#allocation10 + $0xfb8] sm:$0xff]  ;;  %v4308_v19 = vld [vmem:[#allocation10 + $0x770] sm:$0xff] }
 0xce6   : > { %5966 = vmatprep.subr.mxu1 %v4157_v20  ;;  %6035 = vmatprep.subr.mxu0 %v4421_v9  ;;  %v4572_v36 = vld [vmem:[#allocation10 + $0xfb0] sm:$0xff]  ;;  %v4301_v20 = vld [vmem:[#allocation10 + $0x738] sm:$0xff] }
 0xce7   : > { %5967 = vmatpush1.msra.mxu1 %v4156_v44  ;;  %6036 = vmatpush1.msra.mxu0 %v4420_v1  ;;  %v4565_v9 = vld [vmem:[#allocation10 + $0xf78] sm:$0xff]  ;;  %v4300_v44 = vld [vmem:[#allocation10 + $0x730] sm:$0xff] }
 0xce8   : > { %5968 = vmatprep.subr.mxu1 %v4149_v16  ;;  %6037 = vmatprep.subr.mxu0 %v4413_v34  ;;  %v4564_v1 = vld [vmem:[#allocation10 + $0xf70] sm:$0xff]  ;;  %v4293_v16 = vld [vmem:[#allocation10 + $0x6f8] sm:$0xff] }
 0xce9   : > { %5969 = vmatpush1.msra.mxu1 %v4148_v6  ;;  %6038 = vmatpush1.msra.mxu0 %v4412_v46  ;;  %v4557_v34 = vld [vmem:[#allocation10 + $0xf38] sm:$0xff]  ;;  %v4292_v6 = vld [vmem:[#allocation10 + $0x6f0] sm:$0xff] }
 0xcea   : > { %5970 = vmatprep.subr.mxu1 %v4141_v62  ;;  %6039 = vmatprep.subr.mxu0 %v4405_v51  ;;  %v4556_v46 = vld [vmem:[#allocation10 + $0xf30] sm:$0xff]  ;;  %v4285_v62 = vld [vmem:[#allocation10 + $0x6b8] sm:$0xff] }
 0xceb   : > { %5971 = vmatpush1.msra.mxu1 %v4140_v26  ;;  %6040 = vmatpush1.msra.mxu0 %v4404_v56  ;;  %v4549_v51 = vld [vmem:[#allocation10 + $0xef8] sm:$0xff]  ;;  %v4284_v26 = vld [vmem:[#allocation10 + $0x6b0] sm:$0xff] }
 0xcec   : > { %5972 = vmatprep.subr.mxu1 %v4133_v43  ;;  %6041 = vmatprep.subr.mxu0 %v4397_v24  ;;  %v4548_v56 = vld [vmem:[#allocation10 + $0xef0] sm:$0xff]  ;;  %v4277_v43 = vld [vmem:[#allocation10 + $0x678] sm:$0xff] }
 0xced   : > { %5973 = vmatpush1.msra.mxu1 %v4132_v60  ;;  %6042 = vmatpush1.msra.mxu0 %v4396_v49  ;;  %v4541_v24 = vld [vmem:[#allocation10 + $0xeb8] sm:$0xff]  ;;  %v4276_v60 = vld [vmem:[#allocation10 + $0x670] sm:$0xff] }
 0xcee   : > { %5974 = vmatprep.subr.mxu1 %v4125_v39  ;;  %6043 = vmatprep.subr.mxu0 %v4389_v35  ;;  %v4540_v49 = vld [vmem:[#allocation10 + $0xeb0] sm:$0xff]  ;;  %v4269_v39 = vld [vmem:[#allocation10 + $0x638] sm:$0xff] }
 0xcef   : > { %5975 = vmatpush1.msra.mxu1 %v4124_v21  ;;  %6044 = vmatpush1.msra.mxu0 %v4388_v50  ;;  %v4533_v35 = vld [vmem:[#allocation10 + $0xe78] sm:$0xff]  ;;  %v4268_v21 = vld [vmem:[#allocation10 + $0x630] sm:$0xff] }
 0xcf0   : > { %5976 = vmatprep.subr.mxu1 %v4117_v58  ;;  %6045 = vmatprep.subr.mxu0 %v4381_v59  ;;  %v4532_v50 = vld [vmem:[#allocation10 + $0xe70] sm:$0xff]  ;;  %v4261_v58 = vld [vmem:[#allocation10 + $0x5f8] sm:$0xff] }
 0xcf1   : > { %5977 = vmatpush1.msra.mxu1 %v4116_v27  ;;  %6046 = vmatpush1.msra.mxu0 %v4380_v17  ;;  %v4525_v59 = vld [vmem:[#allocation10 + $0xe38] sm:$0xff]  ;;  %v4260_v27 = vld [vmem:[#allocation10 + $0x5f0] sm:$0xff] }
 0xcf2   : > { %5978 = vmatprep.subr.mxu1 %v4109_v18  ;;  %6047 = vmatprep.subr.mxu0 %v4373_v42  ;;  %v4524_v17 = vld [vmem:[#allocation10 + $0xe30] sm:$0xff]  ;;  %v4253_v18 = vld [vmem:[#allocation10 + $0x5b8] sm:$0xff] }
 0xcf3   : > { %5979 = vmatpush1.msra.mxu1 %v4108_v45  ;;  %6048 = vmatpush1.msra.mxu0 %v4372_v11  ;;  %v4517_v42 = vld [vmem:[#allocation10 + $0xdf8] sm:$0xff]  ;;  %v4252_v45 = vld [vmem:[#allocation10 + $0x5b0] sm:$0xff] }
 0xcf4   : > { %5980 = vmatprep.subr.mxu1 %v4101_v41  ;;  %6049 = vmatprep.subr.mxu0 %v4365_v38  ;;  %v4516_v11 = vld [vmem:[#allocation10 + $0xdf0] sm:$0xff]  ;;  %v4245_v41 = vld [vmem:[#allocation10 + $0x578] sm:$0xff] }
 0xcf5   : > { %5981 = vmatpush1.msra.mxu1 %v4100_v10  ;;  %6050 = vmatpush1.msra.mxu0 %v4364_v37  ;;  %v4509_v38 = vld [vmem:[#allocation10 + $0xdb8] sm:$0xff]  ;;  %v4244_v10 = vld [vmem:[#allocation10 + $0x570] sm:$0xff] }
 0xcf6   : > { %5982 = vmatprep.subr.mxu1 %v4093_v3  ;;  %6051 = vmatprep.subr.mxu0 %v4357_v14  ;;  %v4508_v37 = vld [vmem:[#allocation10 + $0xdb0] sm:$0xff]  ;;  %v4237_v3 = vld [vmem:[#allocation10 + $0x538] sm:$0xff] }
 0xcf7   : > { %5983 = vmatpush1.msra.mxu1 %v4092_v30  ;;  %6052 = vmatpush1.msra.mxu0 %v4356_v63  ;;  %v4501_v14 = vld [vmem:[#allocation10 + $0xd78] sm:$0xff]  ;;  %v4236_v30 = vld [vmem:[#allocation10 + $0x530] sm:$0xff] }
 0xcf8   : > { %5984 = vmatprep.subr.mxu1 %v4085_v33  ;;  %6053 = vmatprep.subr.mxu0 %v4349_v61  ;;  %v4500_v63 = vld [vmem:[#allocation10 + $0xd70] sm:$0xff]  ;;  %v4229_v33 = vld [vmem:[#allocation10 + $0x4f8] sm:$0xff] }
 0xcf9   : > { %5985 = vmatpush1.msra.mxu1 %v4084_v53  ;;  %6054 = vmatpush1.msra.mxu0 %v4348_v8  ;;  %v4493_v61 = vld [vmem:[#allocation10 + $0xd38] sm:$0xff]  ;;  %v4228_v53 = vld [vmem:[#allocation10 + $0x4f0] sm:$0xff] }
 0xcfa   : > { %5986 = vmatprep.subr.mxu1 %v4077_v12  ;;  %6055 = vmatprep.subr.mxu0 %v4341_v7  ;;  %v4492_v8 = vld [vmem:[#allocation10 + $0xd30] sm:$0xff]  ;;  %v4221_v12 = vld [vmem:[#allocation10 + $0x4b8] sm:$0xff] }
 0xcfb   : > { %5987 = vmatpush1.msra.mxu1 %v4076_v15  ;;  %6056 = vmatpush1.msra.mxu0 %v4340_v5  ;;  %v4485_v7 = vld [vmem:[#allocation10 + $0xcf8] sm:$0xff]  ;;  %v4220_v15 = vld [vmem:[#allocation10 + $0x4b0] sm:$0xff] }
 0xcfc   : > { %5988 = vmatprep.subr.mxu1 %v4325_v54  ;;  %6057 = vmatprep.subr.mxu0 %v4333_v47  ;;  %v4484_v5 = vld [vmem:[#allocation10 + $0xcf0] sm:$0xff]  ;;  %v4213_v54 = vld [vmem:[#allocation10 + $0x478] sm:$0xff] }
 0xcfd   : > { %5989 = vmatpush2.msra.mxu1 %v4324_v57  ;;  %6058 = vmatpush1.msra.mxu0 %v4332_v25  ;;  %v4477_v47 = vld [vmem:[#allocation10 + $0xcb8] sm:$0xff]  ;;  %v4212_v57 = vld [vmem:[#allocation10 + $0x470] sm:$0xff] }
 0xcfe   : > { %5990 = vmatprep.subr.mxu1 %v4317_v22  ;;  %6059 = vmatprep.subr.mxu0 %v4581_v29  ;;  %v4476_v25 = vld [vmem:[#allocation10 + $0xcb0] sm:$0xff]  ;;  %v4205_v22 = vld [vmem:[#allocation10 + $0x438] sm:$0xff] }
 0xcff   : > { %5991 = vmatpush2.msra.mxu1 %v4316_v23  ;;  %6060 = vmatpush2.msra.mxu0 %v4580_v13  ;;  %v4469_v29 = vld [vmem:[#allocation10 + $0xc78] sm:$0xff]  ;;  %v4204_v23 = vld [vmem:[#allocation10 + $0x430] sm:$0xff] }
 0xd00   : > { %5992 = vmatprep.subr.mxu1 %v4309_v55  ;;  %6061 = vmatprep.subr.mxu0 %v4573_v28  ;;  %v4468_v13 = vld [vmem:[#allocation10 + $0xc70] sm:$0xff]  ;;  %v4461_v55 = vld [vmem:[#allocation10 + $0xc38] sm:$0xff] }
 0xd01   : > { %5993 = vmatpush2.msra.mxu1 %v4308_v19  ;;  %6062 = vmatpush2.msra.mxu0 %v4572_v36  ;;  %v4709_v28 = vld [vmem:[#allocation10 + $0x13f8] sm:$0xff]  ;;  %v4460_v19 = vld [vmem:[#allocation10 + $0xc30] sm:$0xff] }
 0xd02   : > { %5994 = vmatprep.subr.mxu1 %v4301_v20  ;;  %6063 = vmatprep.subr.mxu0 %v4565_v9  ;;  %v4708_v36 = vld [vmem:[#allocation10 + $0x13f0] sm:$0xff]  ;;  %v4701_v20 = vld [vmem:[#allocation10 + $0x13b8] sm:$0xff] }
 0xd03   : > { %5995 = vmatpush2.msra.mxu1 %v4300_v44  ;;  %6064 = vmatpush2.msra.mxu0 %v4564_v1  ;;  %v4965_v9 = vld [vmem:[#allocation10 + $0x1bf8] sm:$0xff]  ;;  %v4700_v44 = vld [vmem:[#allocation10 + $0x13b0] sm:$0xff] }
 0xd04   : > { %5996 = vmatprep.subr.mxu1 %v4293_v16  ;;  %6065 = vmatprep.subr.mxu0 %v4557_v34  ;;  %v4964_v1 = vld [vmem:[#allocation10 + $0x1bf0] sm:$0xff]  ;;  %v4693_v16 = vld [vmem:[#allocation10 + $0x1378] sm:$0xff] }
 0xd05   : > { %5997 = vmatpush2.msra.mxu1 %v4292_v6  ;;  %6066 = vmatpush2.msra.mxu0 %v4556_v46  ;;  %v4957_v34 = vld [vmem:[#allocation10 + $0x1bb8] sm:$0xff]  ;;  %v4692_v6 = vld [vmem:[#allocation10 + $0x1370] sm:$0xff] }
 0xd06   : > { %5998 = vmatprep.subr.mxu1 %v4285_v62  ;;  %6067 = vmatprep.subr.mxu0 %v4549_v51  ;;  %v4956_v46 = vld [vmem:[#allocation10 + $0x1bb0] sm:$0xff]  ;;  %v4949_v62 = vld [vmem:[#allocation10 + $0x1b78] sm:$0xff] }
 0xd07   : > { %5999 = vmatpush2.msra.mxu1 %v4284_v26  ;;  %6068 = vmatpush2.msra.mxu0 %v4548_v56  ;;  %v4684_v51 = vld [vmem:[#allocation10 + $0x1330] sm:$0xff] }
 0xd08   : > { %6000 = vmatprep.subr.mxu1 %v4277_v43  ;;  %6069 = vmatprep.subr.mxu0 %v4541_v24  ;;  %v4948_v26 = vld [vmem:[#allocation10 + $0x1b70] sm:$0xff]  ;;  %v4669_v24 = vld [vmem:[#allocation10 + $0x12b8] sm:$0xff] }
 0xd09   : > { %6001 = vmatpush2.msra.mxu1 %v4276_v60  ;;  %6070 = vmatpush2.msra.mxu0 %v4540_v49  ;;  %v4676_v56 = vld [vmem:[#allocation10 + $0x12f0] sm:$0xff]  ;;  %v4933_v60 = vld [vmem:[#allocation10 + $0x1af8] sm:$0xff] }
 0xd0a   : > { %6002 = vmatprep.subr.mxu1 %v4269_v39  ;;  %6071 = vmatprep.subr.mxu0 %v4533_v35  ;;  %v4940_v43 = vld [vmem:[#allocation10 + $0x1b30] sm:$0xff]  ;;  %v4661_v39 = vld [vmem:[#allocation10 + $0x1278] sm:$0xff] }
 0xd0b   : > { %6003 = vmatpush2.msra.mxu1 %v4268_v21  ;;  %6072 = vmatpush2.msra.mxu0 %v4532_v50  ;;  %v4932_v49 = vld [vmem:[#allocation10 + $0x1af0] sm:$0xff]  ;;  %v4925_v35 = vld [vmem:[#allocation10 + $0x1ab8] sm:$0xff] }
 0xd0c   : > { %6004 = vmatprep.subr.mxu1 %v4261_v58  ;;  %6073 = vmatprep.subr.mxu0 %v4525_v59  ;;  %v4660_v21 = vld [vmem:[#allocation10 + $0x1270] sm:$0xff]  ;;  %v4653_v58 = vld [vmem:[#allocation10 + $0x1238] sm:$0xff] }
 0xd0d   : > { %6005 = vmatpush2.msra.mxu1 %v4260_v27  ;;  %6074 = vmatpush2.msra.mxu0 %v4524_v17  ;;  %v4924_v50 = vld [vmem:[#allocation10 + $0x1ab0] sm:$0xff]  ;;  %v4917_v59 = vld [vmem:[#allocation10 + $0x1a78] sm:$0xff] }
 0xd0e   : > { %6006 = vmatprep.subr.mxu1 %v4253_v18  ;;  %6075 = vmatprep.subr.mxu0 %v4517_v42  ;;  %v4652_v27 = vld [vmem:[#allocation10 + $0x1230] sm:$0xff]  ;;  %v4645_v18 = vld [vmem:[#allocation10 + $0x11f8] sm:$0xff] }
 0xd0f   : > { %6007 = vmatpush2.msra.mxu1 %v4252_v45  ;;  %6076 = vmatpush2.msra.mxu0 %v4516_v11  ;;  %v4916_v17 = vld [vmem:[#allocation10 + $0x1a70] sm:$0xff]  ;;  %v4909_v42 = vld [vmem:[#allocation10 + $0x1a38] sm:$0xff] }
 0xd10   : > { %6008 = vmatprep.subr.mxu1 %v4245_v41  ;;  %6077 = vmatprep.subr.mxu0 %v4509_v38  ;;  %v4644_v45 = vld [vmem:[#allocation10 + $0x11f0] sm:$0xff]  ;;  %v4637_v41 = vld [vmem:[#allocation10 + $0x11b8] sm:$0xff] }
 0xd11   : > { %6009 = vmatpush2.msra.mxu1 %v4244_v10  ;;  %6078 = vmatpush2.msra.mxu0 %v4508_v37  ;;  %v4908_v11 = vld [vmem:[#allocation10 + $0x1a30] sm:$0xff]  ;;  %v4901_v38 = vld [vmem:[#allocation10 + $0x19f8] sm:$0xff] }
 0xd12   : > { %6010 = vmatprep.subr.mxu1 %v4237_v3  ;;  %6079 = vmatprep.subr.mxu0 %v4501_v14  ;;  %v4636_v10 = vld [vmem:[#allocation10 + $0x11b0] sm:$0xff]  ;;  %v4629_v3 = vld [vmem:[#allocation10 + $0x1178] sm:$0xff] }
 0xd13   : > { %6011 = vmatpush2.msra.mxu1 %v4236_v30  ;;  %6080 = vmatpush2.msra.mxu0 %v4500_v63  ;;  %v4900_v37 = vld [vmem:[#allocation10 + $0x19f0] sm:$0xff]  ;;  %v4893_v14 = vld [vmem:[#allocation10 + $0x19b8] sm:$0xff] }
 0xd14   : > { %6012 = vmatprep.subr.mxu1 %v4229_v33  ;;  %6081 = vmatprep.subr.mxu0 %v4493_v61  ;;  %v4628_v30 = vld [vmem:[#allocation10 + $0x1170] sm:$0xff]  ;;  %v4621_v33 = vld [vmem:[#allocation10 + $0x1138] sm:$0xff] }
 0xd15   : > { %6013 = vmatpush2.msra.mxu1 %v4228_v53  ;;  %6082 = vmatpush2.msra.mxu0 %v4492_v8  ;;  %v4892_v63 = vld [vmem:[#allocation10 + $0x19b0] sm:$0xff]  ;;  %v4885_v61 = vld [vmem:[#allocation10 + $0x1978] sm:$0xff] }
 0xd16   : > { %6014 = vmatprep.subr.mxu1 %v4221_v12  ;;  %6083 = vmatprep.subr.mxu0 %v4485_v7  ;;  %v4620_v53 = vld [vmem:[#allocation10 + $0x1130] sm:$0xff]  ;;  %v4613_v12 = vld [vmem:[#allocation10 + $0x10f8] sm:$0xff] }
 0xd17   : > { %6015 = vmatpush2.msra.mxu1 %v4220_v15  ;;  %6084 = vmatpush2.msra.mxu0 %v4484_v5  ;;  %v4884_v8 = vld [vmem:[#allocation10 + $0x1970] sm:$0xff]  ;;  %v4877_v7 = vld [vmem:[#allocation10 + $0x1938] sm:$0xff] }
 0xd18   : > { %6016 = vmatprep.subr.mxu1 %v4213_v54  ;;  %6085 = vmatprep.subr.mxu0 %v4477_v47  ;;  %v4612_v15 = vld [vmem:[#allocation10 + $0x10f0] sm:$0xff]  ;;  %v4605_v54 = vld [vmem:[#allocation10 + $0x10b8] sm:$0xff] }
 0xd19   : > { %6017 = vmatpush2.msra.mxu1 %v4212_v57  ;;  %6086 = vmatpush2.msra.mxu0 %v4476_v25  ;;  %v4876_v5 = vld [vmem:[#allocation10 + $0x1930] sm:$0xff]  ;;  %v4869_v47 = vld [vmem:[#allocation10 + $0x18f8] sm:$0xff] }
 0xd1a   : > { %6018 = vmatprep.subr.mxu1 %v4205_v22  ;;  %6087 = vmatprep.subr.mxu0 %v4469_v29  ;;  %v4604_v57 = vld [vmem:[#allocation10 + $0x10b0] sm:$0xff]  ;;  %v4597_v22 = vld [vmem:[#allocation10 + $0x1078] sm:$0xff] }
 0xd1b   : > { %6019 = vmatpush2.msra.mxu1 %v4204_v23  ;;  %6088 = vmatpush2.msra.mxu0 %v4468_v13  ;;  %v4868_v25 = vld [vmem:[#allocation10 + $0x18f0] sm:$0xff]  ;;  %v4861_v29 = vld [vmem:[#allocation10 + $0x18b8] sm:$0xff] }
 0xd1c   : > { %6021 = vmatmul.mubr.f32.vlgmr.msra.gmra.mxu1 %v8617_v32  ;;  %6089 = vmatprep.subr.mxu0 %v4461_v55  ;;  %v4685_v32 = vld [vmem:[#allocation10 + $0x1338] sm:$0xff]  ;;  %v4596_v23 = vld [vmem:[#allocation10 + $0x1070] sm:$0xff] }
 0xd1d   : > { %6098 = vmatprep.subr.mxu1 %v4709_v28  ;;  %6090 = vmatpush2.msra.mxu0 %v4460_v19  ;;  %v4860_v13 = vld [vmem:[#allocation10 + $0x18b0] sm:$0xff]  ;;  %v4589_v55 = vld [vmem:[#allocation10 + $0x1038] sm:$0xff] }
 0xd1e   : > { %6099 = vmatpush1.msra.mxu1 %v4708_v36  ;;  %6162 = vmatprep.mubr.f32.mxu1 %v8632_v31  ;;  %v4677_v31 = vld [vmem:[#allocation10 + $0x12f8] sm:$0xff]  ;;  %v4588_v19 = vld [vmem:[#allocation10 + $0x1030] sm:$0xff] }
 0xd1f   : > { %6092 = vmatmul.mubr.f32.vlgmr.msra.gmra.mxu0 %v8627_v0  ;;  %6100 = vmatprep.subr.mxu1 %v4701_v20  ;;  %v4941_v0 = vld [vmem:[#allocation10 + $0x1b38] sm:$0xff]  ;;  %v4852_v36 = vld [vmem:[#allocation10 + $0x1870] sm:$0xff] }
 0xd20   : > { %6169 = vmatprep.subr.mxu0 %v4965_v9  ;;  %6101 = vmatpush1.msra.mxu1 %v4700_v44  ;;  %v4853_v28 = vld [vmem:[#allocation10 + $0x1878] sm:$0xff]  ;;  %v4836_v44 = vld [vmem:[#allocation10 + $0x17f0] sm:$0xff] }
 0xd21   : > { %6170 = vmatpush1.msra.mxu0 %v4964_v1  ;;  %6233 = vmatprep.mubr.f32.mxu0 %v8635_v52  ;;  %v4668_v52 = vld [vmem:[#allocation10 + $0x12b0] sm:$0xff]  ;;  %v4837_v20 = vld [vmem:[#allocation10 + $0x17f8] sm:$0xff] }
 0xd22   : > { %6102 = vmatprep.subr.mxu1 %v4693_v16  ;;  %6171 = vmatprep.subr.mxu0 %v4957_v34  ;;  %v4845_v9 = vld [vmem:[#allocation10 + $0x1838] sm:$0xff]  ;;  %v4844_v1 = vld [vmem:[#allocation10 + $0x1830] sm:$0xff] }
 0xd23   : > { %6103 = vmatpush1.msra.mxu1 %v4692_v6  ;;  %6172 = vmatpush1.msra.mxu0 %v4956_v46  ;;  %v4829_v16 = vld [vmem:[#allocation10 + $0x17b8] sm:$0xff]  ;;  %v4828_v6 = vld [vmem:[#allocation10 + $0x17b0] sm:$0xff] }
 0xd24   : > { %6104 = vmatprep.subr.mxu1 %v4685_v32  ;;  %6173 = vmatprep.subr.mxu0 %v4949_v62  ;;  %v5093_v34 = vld [vmem:[#allocation10 + $0x1ff8] sm:$0xff]  ;;  %v5092_v46 = vld [vmem:[#allocation10 + $0x1ff0] sm:$0xff] }
 0xd25   : > { %6105 = vmatpush1.msra.mxu1 %v4684_v51  ;;  %6174 = vmatpush1.msra.mxu0 %v4948_v26  ;;  %v4821_v32 = vld [vmem:[#allocation10 + $0x1778] sm:$0xff]  ;;  %v4820_v51 = vld [vmem:[#allocation10 + $0x1770] sm:$0xff] }
 0xd26   : > { %6106 = vmatprep.subr.mxu1 %v4677_v31  ;;  %6175 = vmatprep.subr.mxu0 %v4941_v0  ;;  %v5085_v62 = vld [vmem:[#allocation10 + $0x1fb8] sm:$0xff]  ;;  %v5084_v26 = vld [vmem:[#allocation10 + $0x1fb0] sm:$0xff] }
 0xd27   : > { %6107 = vmatpush1.msra.mxu1 %v4676_v56  ;;  %6176 = vmatpush1.msra.mxu0 %v4940_v43  ;;  %v4813_v31 = vld [vmem:[#allocation10 + $0x1738] sm:$0xff]  ;;  %v4812_v56 = vld [vmem:[#allocation10 + $0x1730] sm:$0xff] }
 0xd28   : > { %6108 = vmatprep.subr.mxu1 %v4669_v24  ;;  %6177 = vmatprep.subr.mxu0 %v4933_v60  ;;  %v5077_v0 = vld [vmem:[#allocation10 + $0x1f78] sm:$0xff]  ;;  %v5076_v43 = vld [vmem:[#allocation10 + $0x1f70] sm:$0xff] }
 0xd29   : > { %6109 = vmatpush1.msra.mxu1 %v4668_v52  ;;  %6178 = vmatpush1.msra.mxu0 %v4932_v49  ;;  %v4805_v24 = vld [vmem:[#allocation10 + $0x16f8] sm:$0xff]  ;;  %v4804_v52 = vld [vmem:[#allocation10 + $0x16f0] sm:$0xff] }
 0xd2a   : > { %6110 = vmatprep.subr.mxu1 %v4661_v39  ;;  %6179 = vmatprep.subr.mxu0 %v4925_v35  ;;  %v5069_v60 = vld [vmem:[#allocation10 + $0x1f38] sm:$0xff]  ;;  %v5068_v49 = vld [vmem:[#allocation10 + $0x1f30] sm:$0xff] }
 0xd2b   : > { %6111 = vmatpush1.msra.mxu1 %v4660_v21  ;;  %6180 = vmatpush1.msra.mxu0 %v4924_v50  ;;  %v4797_v39 = vld [vmem:[#allocation10 + $0x16b8] sm:$0xff]  ;;  %v4796_v21 = vld [vmem:[#allocation10 + $0x16b0] sm:$0xff] }
 0xd2c   : > { %6112 = vmatprep.subr.mxu1 %v4653_v58  ;;  %6181 = vmatprep.subr.mxu0 %v4917_v59  ;;  %v5061_v35 = vld [vmem:[#allocation10 + $0x1ef8] sm:$0xff]  ;;  %v5060_v50 = vld [vmem:[#allocation10 + $0x1ef0] sm:$0xff] }
 0xd2d   : > { %6113 = vmatpush1.msra.mxu1 %v4652_v27  ;;  %6182 = vmatpush1.msra.mxu0 %v4916_v17  ;;  %v4789_v58 = vld [vmem:[#allocation10 + $0x1678] sm:$0xff]  ;;  %v4788_v27 = vld [vmem:[#allocation10 + $0x1670] sm:$0xff] }
 0xd2e   : > { %6114 = vmatprep.subr.mxu1 %v4645_v18  ;;  %6183 = vmatprep.subr.mxu0 %v4909_v42  ;;  %v5053_v59 = vld [vmem:[#allocation10 + $0x1eb8] sm:$0xff]  ;;  %v5052_v17 = vld [vmem:[#allocation10 + $0x1eb0] sm:$0xff] }
 0xd2f   : > { %6115 = vmatpush1.msra.mxu1 %v4644_v45  ;;  %6184 = vmatpush1.msra.mxu0 %v4908_v11  ;;  %v4781_v18 = vld [vmem:[#allocation10 + $0x1638] sm:$0xff]  ;;  %v4780_v45 = vld [vmem:[#allocation10 + $0x1630] sm:$0xff] }
 0xd30   : > { %6116 = vmatprep.subr.mxu1 %v4637_v41  ;;  %6185 = vmatprep.subr.mxu0 %v4901_v38  ;;  %v5045_v42 = vld [vmem:[#allocation10 + $0x1e78] sm:$0xff]  ;;  %v5044_v11 = vld [vmem:[#allocation10 + $0x1e70] sm:$0xff] }
 0xd31   : > { %6117 = vmatpush1.msra.mxu1 %v4636_v10  ;;  %6186 = vmatpush1.msra.mxu0 %v4900_v37  ;;  %v4773_v41 = vld [vmem:[#allocation10 + $0x15f8] sm:$0xff]  ;;  %v4772_v10 = vld [vmem:[#allocation10 + $0x15f0] sm:$0xff] }
 0xd32   : > { %6118 = vmatprep.subr.mxu1 %v4629_v3  ;;  %6187 = vmatprep.subr.mxu0 %v4893_v14  ;;  %v5037_v38 = vld [vmem:[#allocation10 + $0x1e38] sm:$0xff]  ;;  %v5036_v37 = vld [vmem:[#allocation10 + $0x1e30] sm:$0xff] }
 0xd33   : > { %6119 = vmatpush1.msra.mxu1 %v4628_v30  ;;  %6188 = vmatpush1.msra.mxu0 %v4892_v63  ;;  %v4765_v3 = vld [vmem:[#allocation10 + $0x15b8] sm:$0xff]  ;;  %v4764_v30 = vld [vmem:[#allocation10 + $0x15b0] sm:$0xff] }
 0xd34   : > { %6120 = vmatprep.subr.mxu1 %v4621_v33  ;;  %6189 = vmatprep.subr.mxu0 %v4885_v61  ;;  %v5029_v14 = vld [vmem:[#allocation10 + $0x1df8] sm:$0xff]  ;;  %v5028_v63 = vld [vmem:[#allocation10 + $0x1df0] sm:$0xff] }
 0xd35   : > { %6121 = vmatpush1.msra.mxu1 %v4620_v53  ;;  %6190 = vmatpush1.msra.mxu0 %v4884_v8  ;;  %v4757_v33 = vld [vmem:[#allocation10 + $0x1578] sm:$0xff]  ;;  %v4756_v53 = vld [vmem:[#allocation10 + $0x1570] sm:$0xff] }
 0xd36   : > { %6122 = vmatprep.subr.mxu1 %v4613_v12  ;;  %6191 = vmatprep.subr.mxu0 %v4877_v7  ;;  %v5021_v61 = vld [vmem:[#allocation10 + $0x1db8] sm:$0xff]  ;;  %v5020_v8 = vld [vmem:[#allocation10 + $0x1db0] sm:$0xff] }
 0xd37   : > { %6123 = vmatpush1.msra.mxu1 %v4612_v15  ;;  %6192 = vmatpush1.msra.mxu0 %v4876_v5  ;;  %v4749_v12 = vld [vmem:[#allocation10 + $0x1538] sm:$0xff]  ;;  %v4748_v15 = vld [vmem:[#allocation10 + $0x1530] sm:$0xff] }
 0xd38   : > { %6124 = vmatprep.subr.mxu1 %v4605_v54  ;;  %6193 = vmatprep.subr.mxu0 %v4869_v47  ;;  %v5013_v7 = vld [vmem:[#allocation10 + $0x1d78] sm:$0xff]  ;;  %v5012_v5 = vld [vmem:[#allocation10 + $0x1d70] sm:$0xff] }
 0xd39   : > { %6125 = vmatpush1.msra.mxu1 %v4604_v57  ;;  %6194 = vmatpush1.msra.mxu0 %v4868_v25  ;;  %v4741_v54 = vld [vmem:[#allocation10 + $0x14f8] sm:$0xff]  ;;  %v4740_v57 = vld [vmem:[#allocation10 + $0x14f0] sm:$0xff] }
 0xd3a   : > { %6126 = vmatprep.subr.mxu1 %v4597_v22  ;;  %6195 = vmatprep.subr.mxu0 %v4861_v29  ;;  %v5005_v47 = vld [vmem:[#allocation10 + $0x1d38] sm:$0xff]  ;;  %v5004_v25 = vld [vmem:[#allocation10 + $0x1d30] sm:$0xff] }
 0xd3b   : > { %6127 = vmatpush1.msra.mxu1 %v4596_v23  ;;  %6196 = vmatpush1.msra.mxu0 %v4860_v13  ;;  %v4733_v22 = vld [vmem:[#allocation10 + $0x14b8] sm:$0xff]  ;;  %v4732_v23 = vld [vmem:[#allocation10 + $0x14b0] sm:$0xff] }
 0xd3c   : > { %6128 = vmatprep.subr.mxu1 %v4589_v55  ;;  %6197 = vmatprep.subr.mxu0 %v4853_v28  ;;  %v4997_v29 = vld [vmem:[#allocation10 + $0x1cf8] sm:$0xff]  ;;  %v4996_v13 = vld [vmem:[#allocation10 + $0x1cf0] sm:$0xff] }
 0xd3d   : > { %6129 = vmatpush1.msra.mxu1 %v4588_v19  ;;  %6198 = vmatpush1.msra.mxu0 %v4852_v36  ;;  %v4725_v55 = vld [vmem:[#allocation10 + $0x1478] sm:$0xff]  ;;  %v4724_v19 = vld [vmem:[#allocation10 + $0x1470] sm:$0xff] }
 0xd3e   : > { %6130 = vmatprep.subr.mxu1 %v4837_v20  ;;  %6199 = vmatprep.subr.mxu0 %v4845_v9  ;;  %v4989_v28 = vld [vmem:[#allocation10 + $0x1cb8] sm:$0xff]  ;;  %v4988_v36 = vld [vmem:[#allocation10 + $0x1cb0] sm:$0xff] }
 0xd3f   : > { %6131 = vmatpush2.msra.mxu1 %v4836_v44  ;;  %6200 = vmatpush1.msra.mxu0 %v4844_v1  ;;  %v4717_v20 = vld [vmem:[#allocation10 + $0x1438] sm:$0xff]  ;;  %v4716_v44 = vld [vmem:[#allocation10 + $0x1430] sm:$0xff] }
 0xd40   : > { %6132 = vmatprep.subr.mxu1 %v4829_v16  ;;  %6201 = vmatprep.subr.mxu0 %v5093_v34  ;;  %v4981_v9 = vld [vmem:[#allocation10 + $0x1c78] sm:$0xff]  ;;  %v4980_v1 = vld [vmem:[#allocation10 + $0x1c70] sm:$0xff] }
 0xd41   : > { %6133 = vmatpush2.msra.mxu1 %v4828_v6  ;;  %6202 = vmatpush2.msra.mxu0 %v5092_v46  ;;  %v4973_v16 = vld [vmem:[#allocation10 + $0x1c38] sm:$0xff]  ;;  %v4972_v34 = vld [vmem:[#allocation10 + $0x1c30] sm:$0xff]  ;;  %v5170_v6 = vpop.f32.mrf.mxu1 }
 0xd42   : > { %6134 = vmatprep.subr.mxu1 %v4821_v32  ;;  %6203 = vmatprep.subr.mxu0 %v5085_v62  ;;  %v5241_v32 = vpop.f32.mrf.mxu0 }
 0xd43   : > { %6135 = vmatpush2.msra.mxu1 %v4820_v51  ;;  %6204 = vmatpush2.msra.mxu0 %v5084_v26  ;;  %v5172_v46 = vpop.f32.mrf.mxu1 }
 0xd44   : > { %6136 = vmatprep.subr.mxu1 %v4813_v31  ;;  %6205 = vmatprep.subr.mxu0 %v5077_v0  ;;  %v5243_v51 = vpop.f32.mrf.mxu0 }
 0xd45   : > { %6137 = vmatpush2.msra.mxu1 %v4812_v56  ;;  %6206 = vmatpush2.msra.mxu0 %v5076_v43  ;;  %v5312_v62 = vpop.f32.mrf.mxu1 }
 0xd46   : > { %6138 = vmatprep.subr.mxu1 %v4805_v24  ;;  %6207 = vmatprep.subr.mxu0 %v5069_v60  ;;  %v5383_v31 = vpop.f32.mrf.mxu0 }
 0xd47   : > { %6139 = vmatpush2.msra.mxu1 %v4804_v52  ;;  %6208 = vmatpush2.msra.mxu0 %v5068_v49  ;;  %v5314_v26 = vpop.f32.mrf.mxu1  ;;  %v5098_v49 = vpop.permute.xlu1 %5097 }
 0xd48   : > { %6140 = vmatprep.subr.mxu1 %v4797_v39  ;;  %6209 = vmatprep.subr.mxu0 %v5061_v35  ;;  %v5385_v56 = vpop.f32.mrf.mxu0 }
 0xd49   : > { %6141 = vmatpush2.msra.mxu1 %v4796_v21  ;;  %6210 = vmatpush2.msra.mxu0 %v5060_v50  ;;  %v5454_v0 = vpop.f32.mrf.mxu1  ;;  %v5103_v21 = vrot.slane %v5098_v49, %v7198_v4 }
 0xd4a   : > { %6142 = vmatprep.subr.mxu1 %v4789_v58  ;;  %6211 = vmatprep.subr.mxu0 %v5053_v59  ;;  %v5525_v24 = vpop.f32.mrf.mxu0 }
 0xd4b   : > { %6143 = vmatpush2.msra.mxu1 %v4788_v27  ;;  %6212 = vmatpush2.msra.mxu0 %v5052_v17  ;;  %v5456_v43 = vpop.f32.mrf.mxu1  ;;  %v5173_v58 = vadd.f32 %v5172_v46, %v5103_v21  ;;  %v5455_v17 = vadd.f32 %v5454_v0, %v5103_v21 }
 0xd4c   : > { %6144 = vmatprep.subr.mxu1 %v4781_v18  ;;  %6213 = vmatprep.subr.mxu0 %v5045_v42  ;;  %v5527_v52 = vpop.f32.mrf.mxu0  ;;  %v5457_v50 = vadd.f32 %v5456_v43, %v5103_v21  ;;  %v5171_v18 = vadd.f32 %v5170_v6, %v5103_v21 }
 0xd4d   : > { %6145 = vmatpush2.msra.mxu1 %v4780_v45  ;;  %6214 = vmatpush2.msra.mxu0 %v5044_v11  ;;  %v5596_v60 = vpop.f32.mrf.mxu1 }
 0xd4e   : > { %6146 = vmatprep.subr.mxu1 %v4773_v41  ;;  %6215 = vmatprep.subr.mxu0 %v5037_v38  ;;  %v5528_v45 = vadd.f32 %v5527_v52, %v5457_v50  ;;  %v5244_v41 = vadd.f32 %v5243_v51, %v5173_v58 }
 0xd4f   : > { %6147 = vmatpush2.msra.mxu1 %v4772_v10  ;;  %6216 = vmatpush2.msra.mxu0 %v5036_v37  ;;  %v5598_v39 = vpop.f32.mrf.mxu1  ;;  %v5526_v10 = vadd.f32 %v5525_v24, %v5455_v17 }
 0xd50   : > { %6148 = vmatprep.subr.mxu1 %v4765_v3  ;;  %6217 = vmatprep.subr.mxu0 %v5029_v14  ;;  %v5599_v37 = vadd.f32 %v5598_v39, %v5528_v45  ;;  %v5242_v14 = vadd.f32 %v5241_v32, %v5171_v18 }
 0xd51   : > { %6149 = vmatpush2.msra.mxu1 %v4764_v30  ;;  %6218 = vmatpush2.msra.mxu0 %v5028_v63  ;;  %v5315_v30 = vadd.f32 %v5314_v26, %v5244_v41  ;;  %v5597_v4 = vadd.f32 %v5596_v60, %v5526_v10 }
 0xd52   : > { %6150 = vmatprep.subr.mxu1 %v4757_v33  ;;  %6219 = vmatprep.subr.mxu0 %v5021_v61 }
 0xd53   : > { %6151 = vmatpush2.msra.mxu1 %v4756_v53  ;;  %6220 = vmatpush2.msra.mxu0 %v5020_v8  ;;  %v5313_v53 = vadd.f32 %v5312_v62, %v5242_v14 }
 0xd54   : > { %6152 = vmatprep.subr.mxu1 %v4749_v12  ;;  %6221 = vmatprep.subr.mxu0 %v5013_v7 }
 0xd55   : > { %6153 = vmatpush2.msra.mxu1 %v4748_v15  ;;  %6222 = vmatpush2.msra.mxu0 %v5012_v5  ;;  %v5386_v15 = vadd.f32 %v5385_v56, %v5315_v30 }
 0xd56   : > { %6154 = vmatprep.subr.mxu1 %v4741_v54  ;;  %6223 = vmatprep.subr.mxu0 %v5005_v47 }
 0xd57   : > { %6155 = vmatpush2.msra.mxu1 %v4740_v57  ;;  %6224 = vmatpush2.msra.mxu0 %v5004_v25  ;;  %v5384_v25 = vadd.f32 %v5383_v31, %v5313_v53 }
 0xd58   : > { %6156 = vmatprep.subr.mxu1 %v4733_v22  ;;  %6225 = vmatprep.subr.mxu0 %v4997_v29  ;;  %v5738_v35 = vpop.f32.mrf.mxu1 }
 0xd59   : > { %6157 = vmatpush2.msra.mxu1 %v4732_v23  ;;  %6226 = vmatpush2.msra.mxu0 %v4996_v13  ;;  %v5739_v3 = vadd.f32 %v5738_v35, %v5103_v21  ;;  %v6509_v23 = vmul.f32 -1.442695, %v5386_v15 }
 0xd5a   : > { %6158 = vmatprep.subr.mxu1 %v4725_v55  ;;  %6227 = vmatprep.subr.mxu0 %v4989_v28  ;;  %v5740_v59 = vpop.f32.mrf.mxu1 }
 0xd5b   : > { %6159 = vmatpush2.msra.mxu1 %v4724_v19  ;;  %6228 = vmatpush2.msra.mxu0 %v4988_v36  ;;  %v5741_v11 = vadd.f32 %v5740_v59, %v5103_v21 }
 0xd5c   : > { %6160 = vmatprep.subr.mxu1 %v4717_v20  ;;  %6229 = vmatprep.subr.mxu0 %v4981_v9  ;;  %v6508_v20 = vmul.f32 -1.442695, %v5384_v25 }
 0xd5d   : > { %6161 = vmatpush2.msra.mxu1 %v4716_v44  ;;  %6230 = vmatpush2.msra.mxu0 %v4980_v1 }
 0xd5e   : > { %6163 = vmatmul.mubr.f32.vlgmr.msra.gmra.mxu1 %v8640_v48  ;;  %6231 = vmatprep.subr.mxu0 %v4973_v16  ;;  %v5667_v48 = vpop.f32.mrf.mxu0 }
 0xd5f   : > { %6232 = vmatpush2.msra.mxu0 %v4972_v34  ;;  %v5668_v47 = vadd.f32 %v5667_v48, %v5597_v4 }
 0xd60   : > { %6234 = vmatmul.mubr.f32.vlgmr.msra.gmra.mxu0 %v8644_v40  ;;  %v5669_v40 = vpop.f32.mrf.mxu0 }
 0xd61   : > { %v5670_v8 = vadd.f32 %v5669_v40, %v5599_v37  ;;  %v6510_v28 = vmul.f32 -1.442695, %v5668_v47 }
 0xd62   : > { %v5809_v27 = vpop.f32.mrf.mxu0 }
 0xd63   : > { %v5810_v12 = vadd.f32 %v5809_v27, %v5739_v3  ;;  %v6511_v22 = vmul.f32 -1.442695, %v5670_v8 }
 0xd64   : > { %v5811_v38 = vpop.f32.mrf.mxu0 }
 0xd65   : > { %v5812_v61 = vadd.f32 %v5811_v38, %v5741_v11  ;;  %6815 = vpow2.f32 %v6511_v22  ;;  %v7027_v11 = vmov 1966171168  }
 0xd66   : > { %6817 = vpow2.f32 %v6509_v23  ;;  %v6301_v41 = vunpack.c.l.s4 %v7027_v11 }
 0xd67   : > { %6819 = vpow2.f32 %v6510_v28 }
 0xd68   : > { %6821 = vpow2.f32 %v6508_v20  ;;  %v6302_v37 = vunpack.c.0.s8 %v6301_v41 }
 0xd6a   : > { %v6305_v4 = vsub.s32 %v6302_v37, %v7193_v2 }
 0xd72   : > { %v6816_v60 = vpop.eup %6815 }
 0xd73   : > { %v6818_v52 = vpop.eup %6817  ;;  %v6267_v48 = vadd.f32 1.0, %v6816_v60 }
 0xd74   : > { %v6820_v49 = vpop.eup %6819 }
 0xd75   : > { %v6822_v39 = vpop.eup %6821  ;;  %v6266_v40 = vadd.f32 1.0, %v6820_v49 }
 0xd76   : > { %v6264_v58 = vadd.f32 1.0, %v6822_v39 }
 0xd9a   : > { %v5880_v42 = vpop.f32.mrf.mxu1 }
 0xd9b   : > { %v5881_v57 = vadd.f32 %v5880_v42, %v5810_v12 }
 0xd9c   : > { %v5882_v63 = vpop.f32.mrf.mxu1 }
 0xd9d   : > { %v5951_v33 = vpop.f32.mrf.mxu0  ;;  %v5883_v7 = vadd.f32 %v5882_v63, %v5812_v61 }
 0xd9e   : > { %v5952_v19 = vadd.f32 %v5951_v33, %v5881_v57 }
 0xd9f   : > { %v5953_v5 = vpop.f32.mrf.mxu0 }
 0xda0   : > { %v5954_v29 = vadd.f32 %v5953_v5, %v5883_v7  ;;  %v6512_v16 = vmul.f32 -1.442695, %v5952_v19 }
 0xda2   : > { %v6513_v9 = vmul.f32 -1.442695, %v5954_v29 }
 0xda4   : > { %6823 = vpow2.f32 %v6513_v9 }
 0xda5   : > { %6825 = vpow2.f32 %v6512_v16 }
 0xdb1   : > { %v6824_v35 = vpop.eup %6823 }
 0xdb2   : > { %v6826_v50 = vpop.eup %6825  ;;  %v6269_v59 = vadd.f32 1.0, %v6824_v35 }
 0xdb3   : > { %v6268_v27 = vadd.f32 1.0, %v6826_v50 }
 0xddc   : > { %v6022_v54 = vpop.f32.mrf.mxu1 }
 0xddd   : > { %v6023_v36 = vadd.f32 %v6022_v54, %v5103_v21 }
 0xdde   : > { %v6024_v13 = vpop.f32.mrf.mxu1 }
 0xddf   : > { %v6093_v55 = vpop.f32.mrf.mxu0  ;;  %v6025_v44 = vadd.f32 %v6024_v13, %v5103_v21  ;;  %v6265_v21 = vadd.f32 1.0, %v6818_v52 }
 0xde0   : > { %v6094_v34 = vadd.f32 %v6093_v55, %v6023_v36 }
 0xde1   : > { %v6095_v1 = vpop.f32.mrf.mxu0 }
 0xde2   : > { %v6096_v46 = vadd.f32 %v6095_v1, %v6025_v44 }
 0xe1e   : > { %v6164_v6 = vpop.f32.mrf.mxu1 }
 0xe1f   : > { %v6165_v32 = vadd.f32 %v6164_v6, %v6094_v34 }
 0xe20   : > { %v6166_v62 = vpop.f32.mrf.mxu1  ;;  %v6235_v51 = vpop.f32.mrf.mxu0 }
 0xe21   : > { %v6167_v26 = vadd.f32 %v6166_v62, %v6096_v46  ;;  %v6236_v31 = vadd.f32 %v6235_v51, %v6165_v32 }
 0xe22   : > { %v6237_v0 = vpop.f32.mrf.mxu0 }
 0xe23   : > { %v6514_v56 = vmul.f32 -1.442695, %v6236_v31  ;;  %v6238_v43 = vadd.f32 %v6237_v0, %v6167_v26 }
 0xe25   : > { %6827 = vpow2.f32 %v6514_v56  ;;  %v6515_v24 = vmul.f32 -1.442695, %v6238_v43 }
 0xe27   : > { %6829 = vpow2.f32 %v6515_v24 }
 0xe28   : > { %6831 = vrcp.f32 %v6267_v48 }
 0xe29   : > { %6833 = vrcp.f32 %v6265_v21 }
 0xe2a   : > { %6835 = vrcp.f32 %v6266_v40 }
 0xe2b   : > { %6837 = vrcp.f32 %v6264_v58 }
 0xe2c   : > { %6839 = vrcp.f32 %v6269_v59 }
 0xe2d   : > { %6841 = vrcp.f32 %v6268_v27 }
 0xe32   : > { %v6828_v17 = vpop.eup %6827 }
 0xe33   : > { %v6270_v18 = vadd.f32 1.0, %v6828_v17 }
 0xe34   : > { %v6830_v42 = vpop.eup %6829 }
 0xe35   : > { %v6271_v45 = vadd.f32 1.0, %v6830_v42  ;;  %6843 = vrcp.f32 %v6270_v18  ;;  %v6832_v38 = vpop.eup %6831 }
 0xe36   : > { %v6834_v10 = vpop.eup %6833 }
 0xe37   : > { %6845 = vrcp.f32 %v6271_v45  ;;  %v6836_v3 = vpop.eup %6835 }
 0xe38   : > { %v6838_v14 = vpop.eup %6837  ;;  %v6297_v30 = vcombine.low %v6836_v3, %v6832_v38 }
 0xe39   : > { %v6840_v63 = vpop.eup %6839  ;;  %v6296_v33 = vcombine.low %v6838_v14, %v6834_v10 }
 0xe3a   : > { %v6842_v61 = vpop.eup %6841  ;;  %v6313_v8 = vrot.slane %v6297_v30, %v6305_v4 }
 0xe3b   : > { %v6298_v12 = vcombine.low %v6842_v61, %v6840_v63  ;;  %v6306_v15 = vrot.slane %v6296_v33, %v6305_v4 }
 0xe3d   : > { %v6328_v54 = vcombine.low %v6306_v15, %v6313_v8  ;;  %v6320_v47 = vrot.slane %v6298_v12, %v6305_v4 }
 0xe3f   : > { %v6336_v22 = vrot.slane %v6328_v54, %v6305_v4 }
 0xe42   : > { %v6844_v53 = vpop.eup %6843 }
 0xe44   : > { %v6846_v7 = vpop.eup %6845 }
 0xe45   : > { %v6299_v5 = vcombine.low %v6844_v53, %v6846_v7 }
 0xe47   : > { %v6327_v57 = vrot.slane %v6299_v5, %v6305_v4 }
 0xe49   : > { %v6329_v25 = vcombine.low %v6320_v47, %v6327_v57 }
 0xe4b   : > { %v6343_v29 = vrot.slane %v6329_v25, %v6305_v4 }
 0xe4d   : > { %v6344_v23 = vcombine.low %v6336_v22, %v6343_v29 }
 0xe4f   : > { %6346 = vst [vmem:[%s508_s26] sm:$0xff] %v6344_v23 }
 0xe50 PF: > { %s28_s27 = sadd.s32 1, %s6995_s27  }
 0xe51   : > { %p25_p0 = scmp.ge.s32.totalorder %s28_s27, 4  }
 0xe53   :  { %27 = sbr.rel (!%p25_p0) target bundleno = 6 (0x6), region = 123 }
 0xe58   :  { %6366 = vsyncpa [#allocation4], 1 }
 0xe59   :  { %6368 = vsyncpa [#allocation4 + $0x1], 1 }
 0xe5a   :  { %6369 = vsyncpa [#allocation6], 1 }
 0xe5b   :  { %6370 = vsyncpa [#allocation9], 1 }

</bundles_post_ra>
